<compile_context>
chip_gen: v7x
topology: tpu7x:2x2x1
jax: 0.10.0
libtpu: 0.0.40
codegen_flags: <defaults>
</compile_context>

<pallas_src>
import functools
import math

import jax
import jax.numpy as jnp
from jax.experimental import pallas as pl
from jax.experimental.pallas import tpu as pltpu

_VMEM_LIMIT = 32 * 1024 * 1024  # safe scoped-VMEM budget on v5e/v6e/v7x


def _round_up(x, m):
    return ((x + m - 1) // m) * m


def _cparams(*sems):
    return pltpu.CompilerParams(dimension_semantics=sems,
                                vmem_limit_bytes=_VMEM_LIMIT)


# ------------------------------------------------------------------
# Kernel 1: tiled matmul + per-channel scale/bias (+ReLU) (+fused residual)
#   used for: conv1 (im2col), grouped 1x1 convs (+BN), final FC
# ------------------------------------------------------------------
def _matmul_bn_kernel(x_ref, w_ref, s_ref, b_ref, o_ref, *, relu):
    acc = jnp.dot(x_ref[...], w_ref[...], preferred_element_type=jnp.float32)
    acc = acc * s_ref[...] + b_ref[...]
    if relu:
        acc = jnp.maximum(acc, 0.0)
    o_ref[...] = acc.astype(o_ref.dtype)


def _matmul_bn_res_kernel(x_ref, w_ref, s_ref, b_ref, r_ref, o_ref, *, relu):
    acc = jnp.dot(x_ref[...], w_ref[...], preferred_element_type=jnp.float32)
    acc = acc * s_ref[...] + b_ref[...] + r_ref[...].astype(jnp.float32)
    if relu:
        acc = jnp.maximum(acc, 0.0)
    o_ref[...] = acc.astype(o_ref.dtype)


def matmul_bn_act(x, w, scale, bias, *, relu, res=None,
                  out_dtype=jnp.bfloat16, tile_m=512):
    """out = act((x @ w) * scale + bias [+ res]); rows tiled + pipelined."""
    M, K = x.shape
    N = w.shape[1]
    TM = min(tile_m, _round_up(M, 8))
    Mp = _round_up(M, TM)

    x = x.astype(jnp.bfloat16)
    w = w.astype(jnp.bfloat16)
    if res is not None:
        res = res.astype(jnp.bfloat16)
    if Mp != M:
        x = jnp.pad(x, ((0, Mp - M), (0, 0)))
        if res is not None:
            res = jnp.pad(res, ((0, Mp - M), (0, 0)))

    s2 = scale.reshape(1, N).astype(jnp.float32)
    b2 = bias.reshape(1, N).astype(jnp.float32)

    in_specs = [pl.BlockSpec((TM, K), lambda i: (i, 0)),
                pl.BlockSpec((K, N), lambda i: (0, 0)),
                pl.BlockSpec((1, N), lambda i: (0, 0)),
                pl.BlockSpec((1, N), lambda i: (0, 0))]
    args = [x, w, s2, b2]
    if res is None:
        kernel = functools.partial(_matmul_bn_kernel, relu=relu)
    else:
        kernel = functools.partial(_matmul_bn_res_kernel, relu=relu)
        in_specs.append(pl.BlockSpec((TM, N), lambda i: (i, 0)))
        args.append(res)

    out = pl.pallas_call(
        kernel,
        out_shape=jax.ShapeDtypeStruct((Mp, N), out_dtype),
        grid=(Mp // TM,),
        in_specs=in_specs,
        out_specs=pl.BlockSpec((TM, N), lambda i: (i, 0)),
        compiler_params=_cparams("parallel"),
    )(*args)
    return out[:M] if Mp != M else out


# ------------------------------------------------------------------
# Kernel 2: depthwise 3x3 "valid" conv + fused BN (taps sliced in VMEM)
# ------------------------------------------------------------------
def _dwconv_bn_kernel(x_ref, w_ref, s_ref, b_ref, o_ref):
    Ho, Wo = o_ref.shape[1], o_ref.shape[2]
    w = w_ref[...].astype(jnp.float32)            # (9, 1, 1, C)
    acc = None
    k = 0
    for dh in range(3):
        for dw in range(3):
            tap = x_ref[0, dh:dh + Ho, dw:dw + Wo, :].astype(jnp.float32)
            term = tap * w[k]
            acc = term if acc is None else acc + term
            k += 1
    acc = acc * s_ref[...] + b_ref[...]
    o_ref[0] = acc.astype(o_ref.dtype)


def dwconv3x3_bn(x, w9, scale, bias, *, out_dtype=jnp.bfloat16):
    """x: (N, Hp, Wp, C) -> (N, Hp-2, Wp-2, C); grid over batch."""
    N, Hp, Wp, C = x.shape
    Ho, Wo = Hp - 2, Wp - 2
    w = w9.reshape(9, 1, 1, C).astype(jnp.float32)
    s = scale.reshape(1, 1, C).astype(jnp.float32)
    b = bias.reshape(1, 1, C).astype(jnp.float32)
    return pl.pallas_call(
        _dwconv_bn_kernel,
        out_shape=jax.ShapeDtypeStruct((N, Ho, Wo, C), out_dtype),
        grid=(N,),
        in_specs=[pl.BlockSpec((1, Hp, Wp, C), lambda n: (n, 0, 0, 0)),
                  pl.BlockSpec((9, 1, 1, C), lambda n: (0, 0, 0, 0)),
                  pl.BlockSpec((1, 1, C), lambda n: (0, 0, 0)),
                  pl.BlockSpec((1, 1, C), lambda n: (0, 0, 0))],
        out_specs=pl.BlockSpec((1, Ho, Wo, C), lambda n: (n, 0, 0, 0)),
        compiler_params=_cparams("parallel"),
    )(x.astype(jnp.bfloat16), w, s, b)


# ------------------------------------------------------------------
# Kernel 3: 3x3 pooling (max / avg, optional fused ReLU), taps sliced in VMEM
# ------------------------------------------------------------------
def _pool3x3_kernel(x_ref, o_ref, *, mode, relu):
    Ho, Wo = o_ref.shape[1], o_ref.shape[2]
    acc = None
    for dh in range(3):
        for dw in range(3):
            tap = x_ref[0, dh:dh + Ho, dw:dw + Wo, :].astype(jnp.float32)
            if acc is None:
                acc = tap
            elif mode == "max":
                acc = jnp.maximum(acc, tap)
            else:
                acc = acc + tap
    if mode == "avg":
        acc = acc * (1.0 / 9.0)      # count_include_pad=True semantics
    if relu:
        acc = jnp.maximum(acc, 0.0)
    o_ref[0] = acc.astype(o_ref.dtype)


def pool3x3(x, *, mode, stride, padding=0, relu=False, out_dtype=jnp.bfloat16):
    if padding:
        x = jnp.pad(x, ((0, 0), (padding, padding), (padding, padding), (0, 0)))
    N, Hp, Wp, C = x.shape
    Ho, Wo = Hp - 2, Wp - 2
    out = pl.pallas_call(
        functools.partial(_pool3x3_kernel, mode=mode, relu=relu),
        out_shape=jax.ShapeDtypeStruct((N, Ho, Wo, C), out_dtype),
        grid=(N,),
        in_specs=[pl.BlockSpec((1, Hp, Wp, C), lambda n: (n, 0, 0, 0))],
        out_specs=pl.BlockSpec((1, Ho, Wo, C), lambda n: (n, 0, 0, 0)),
        compiler_params=_cparams("parallel"),
    )(x)
    if stride == 2:
        out = out[:, ::2, ::2, :]     # stride-2 tap positions are 0, 2, 4, ...
    return out


# ------------------------------------------------------------------
# Kernel 4: global average pool (AdaptiveAvgPool2d(1) + flatten)
# ------------------------------------------------------------------
def _gap_kernel(x_ref, o_ref, *, inv_hw):
    acc = jnp.sum(x_ref[...].astype(jnp.float32), axis=(1, 2)) * inv_hw
    o_ref[...] = acc.astype(o_ref.dtype)


def global_avg_pool(x, *, out_dtype=jnp.bfloat16):
    N, H, W, C = x.shape
    return pl.pallas_call(
        functools.partial(_gap_kernel, inv_hw=1.0 / (H * W)),
        out_shape=jax.ShapeDtypeStruct((N, C), out_dtype),
        grid=(1,),
        in_specs=[pl.BlockSpec((N, H, W, C), lambda i: (0, 0, 0, 0))],
        out_specs=pl.BlockSpec((N, C), lambda i: (0, 0)),
        compiler_params=_cparams("arbitrary"),
    )(x)


# ------------------------------------------------------------------
# Parameters (deterministic, synthetic); BN folded; shuffle folded into W1
# ------------------------------------------------------------------
def _bn_params(key, c):
    k1, k2, k3, k4 = jax.random.split(key, 4)
    gamma = 1.0 + 0.1 * jax.random.normal(k1, (c,), jnp.float32)
    beta = 0.1 * jax.random.normal(k2, (c,), jnp.float32)
    mean = 0.1 * jax.random.normal(k3, (c,), jnp.float32)
    var = 1.0 + 0.1 * jax.random.uniform(k4, (c,), jnp.float32)
    return gamma, beta, mean, var


def _fuse_conv_bn(conv_bias, gamma, beta, mean, var, eps=1e-5):
    scale = gamma / jnp.sqrt(var + eps)
    bias = (conv_bias - mean) * scale + beta
    return scale, bias


def _group_pw_weight(key, c_in, c_out, groups):
    # block-diagonal [c_in, c_out] matrix == grouped 1x1 conv
    cin_g, cout_g = c_in // groups, c_out // groups
    k1, k2 = jax.random.split(key)
    blocks = jax.random.normal(k1, (groups, cin_g, cout_g), jnp.float32) * math.sqrt(2.0 / cin_g)
    W = jnp.zeros((c_in, c_out), jnp.float32)
    for gi in range(groups):
        W = W.at[gi * cin_g:(gi + 1) * cin_g, gi * cout_g:(gi + 1) * cout_g].set(blocks[gi])
    b = 0.01 * jax.random.normal(k2, (c_out,), jnp.float32)
    return W, b


def _shuffle_src(c, g):
    # shuffled[k] = orig[(k % g) * (c // g) + k // g]  (ChannelShuffle)
    n = c // g
    idx = jnp.arange(c)
    return (idx % g) * n + (idx // g)


def _make_unit_params(key, c_in, c_out, stride, groups):
    bneck = c_in if stride == 1 else c_out - c_in
    k = jax.random.split(key, 8)
    W1, b1c = _group_pw_weight(k[0], c_in, bneck, groups)
    s1, b1 = _fuse_conv_bn(b1c, *_bn_params(k[1], bneck))
    # fold the channel shuffle (fixed permutation of conv1+BN1+ReLU output
    # channels) into W1 / s1 / b1 -> zero runtime cost.
    src = _shuffle_src(bneck, groups)
    W1, s1, b1 = W1[:, src], s1[src], b1[src]
    dw_w = jax.random.normal(k[2], (9, bneck), jnp.float32) * math.sqrt(2.0 / 9.0)
    dw_b = 0.01 * jax.random.normal(k[3], (bneck,), jnp.float32)
    s2, b2 = _fuse_conv_bn(dw_b, *_bn_params(k[4], bneck))
    W2, b2c = _group_pw_weight(k[5], bneck, bneck, groups)
    s3, b3 = _fuse_conv_bn(b2c, *_bn_params(k[6], bneck))
    return dict(stride=stride, bneck=bneck,
                W1=W1.astype(jnp.bfloat16), s1=s1, b1=b1,
                dw_w=dw_w, s2=s2, b2=b2,
                W2=W2.astype(jnp.bfloat16), s3=s3, b3=b3)


def make_shufflenet_params(key, config, num_classes):
    g = config["model_groups"]
    s = config["model_scale_factor"]
    c = {1: 144, 2: 200, 3: 240, 4: 272, 5: 384}[g]
    c24, cs, c2s, c4s = int(24 * s), int(c * s), int(2 * c * s), int(4 * c * s)
    keys = jax.random.split(key, 8)

    # lane-dense FC: pad output logits to a multiple of 128 lanes, slice after
    nc_pad = _round_up(num_classes, 128)
    fc_W = jnp.zeros((c4s, nc_pad), jnp.float32).at[:, :num_classes].set(
        jax.random.normal(keys[5], (c4s, num_classes), jnp.float32) * math.sqrt(1.0 / c4s))
    fc_b = jnp.zeros((nc_pad,), jnp.float32).at[:num_classes].set(
        0.01 * jax.random.normal(keys[6], (num_classes,), jnp.float32))

    params = {
        "conv1_W": (jax.random.normal(keys[0], (27, c24), jnp.float32)
                    * math.sqrt(2.0 / 27.0)).astype(jnp.bfloat16),
        "conv1_b": 0.01 * jax.random.normal(keys[1], (c24,), jnp.float32),
        "fc_W": fc_W.astype(jnp.bfloat16),
        "fc_b": fc_b,
        "num_classes": num_classes,
    }

    def stage(key, n_units, c_in, c_out):
        ks = jax.random.split(key, n_units)
        units = [_make_unit_params(ks[0], c_in, c_out, 2, g)]
        for i in range(1, n_units):
            units.append(_make_unit_params(ks[i], c_out, c_out, 1, g))
        return units

    params["stage2"] = stage(keys[2], 4, c24, cs)
    params["stage3"] = stage(keys[3], 8, cs, c2s)
    params["stage4"] = stage(keys[4], 4, c2s, c4s)
    return params


# ------------------------------------------------------------------
# Forward pass (NHWC internally, bf16 activations)
# ------------------------------------------------------------------
def shuffle_unit_forward(x, p):
    N, H, W, C = x.shape
    stride, B = p["stride"], p["bneck"]

    # zero pad: this is the padding=1 of the grouped 1x1 conv in the module
    xp = jnp.pad(x, ((0, 0), (1, 1), (1, 1), (0, 0)))
    Hp, Wp = H + 2, W + 2

    if stride == 1:
        res = x.reshape(N * H * W, C)
    else:
        # residual branch: AvgPool2d(3, stride=2, padding=1), final ReLU fused
        res = pool3x3(xp, mode="avg", stride=2, relu=True)

    # grouped 1x1 conv over the zero-padded input (+BN1+ReLU, shuffle folded)
    y = matmul_bn_act(xp.reshape(N * Hp * Wp, C), p["W1"], p["s1"], p["b1"], relu=True)
    y = y.reshape(N, Hp, Wp, B)

    # depthwise 3x3 conv + BN2 ("valid"); stride-2 = slice of stride-1 output
    y = dwconv3x3_bn(y, p["dw_w"], p["s2"], p["b2"])
    if stride == 2:
        y = y[:, ::2, ::2, :]
    Ny, Hy, Wy, _ = y.shape

    if stride == 1:
        # second grouped 1x1 conv + BN3 with residual add + ReLU fused in epilogue
        out = matmul_bn_act(y.reshape(Ny * Hy * Wy, B), p["W2"], p["s3"], p["b3"],
                            relu=True, res=res)
        return out.reshape(Ny, Hy, Wy, B)

    # stride 2: ReLU fused into both branches; channel concat in XLA
    out = matmul_bn_act(y.reshape(Ny * Hy * Wy, B), p["W2"], p["s3"], p["b3"], relu=True)
    return jnp.concatenate([out.reshape(Ny, Hy, Wy, B), res], axis=-1)


def _conv1_im2col(x, stride=2):
    # 3x3 / stride-2 "valid" conv as im2col: concat the 9 taps on channels
    N, H, W, C = x.shape
    Ho = (H - 3) // stride + 1
    Wo = (W - 3) // stride + 1
    cols = []
    for dh in range(3):
        for dw in range(3):
            cols.append(x[:, dh:dh + stride * (Ho - 1) + 1:stride,
                          dw:dw + stride * (Wo - 1) + 1:stride, :])
    patches = jnp.concatenate(cols, axis=-1)           # (N, Ho, Wo, 9*C)
    return patches.reshape(N * Ho * Wo, 9 * C), (N, Ho, Wo)


def shufflenet_forward(params, x_nchw):
    # accept NCHW like the PyTorch module, run NHWC / bf16 internally
    x = jnp.transpose(x_nchw, (0, 2, 3, 1)).astype(jnp.bfloat16)

    # conv1: 3x3 stride 2, no padding -> im2col + tiled matmul
    patches, (N, Ho, Wo) = _conv1_im2col(x, stride=2)
    c1 = params["conv1_W"].shape[1]
    x = matmul_bn_act(patches, params["conv1_W"],
                      jnp.ones((c1,), jnp.float32), params["conv1_b"], relu=False)
    x = x.reshape(N, Ho, Wo, c1)

    # maxpool 3x3 stride 2, no padding
    x = pool3x3(x, mode="max", stride=2)

    for unit in params["stage2"]:
        x = shuffle_unit_forward(x, unit)
    for unit in params["stage3"]:
        x = shuffle_unit_forward(x, unit)
    for unit in params["stage4"]:
        x = shuffle_unit_forward(x, unit)

    # global average pool + flatten + fc (lane-padded logits, sliced after)
    x = global_avg_pool(x)                              # (N, 4*c*s)
    ncp = params["fc_W"].shape[1]
    logits = matmul_bn_act(x, params["fc_W"], jnp.ones((ncp,), jnp.float32),
                           params["fc_b"], relu=False, out_dtype=jnp.float32)
    return logits[:, :params["num_classes"]]


if __name__ == "__main__":
    key = jax.random.PRNGKey(0)
    kp, kx = jax.random.split(key)
    config = {"model_groups": 2, "model_scale_factor": 0.5}
    num_classes = 10
    params = make_shufflenet_params(kp, config, num_classes)

    # small input consistent with the module: NCHW, 3 input channels
    x = jax.random.normal(kx, (2, 3, 32, 32), jnp.float32)

    fwd = jax.jit(lambda inp: shufflenet_forward(params, inp))
    out = fwd(x)
    jax.block_until_ready(out)
    assert out.shape == (2, num_classes), out.shape
    assert bool(jnp.all(jnp.isfinite(out)))
    print("KERNEL_OK")
</pallas_src>

<mosaic_0001>
module attributes {stable_mosaic.version = 11 : i64} {
  func.func @_matmul_bn_kernel(%arg0: i32, %arg1: memref<456x27xbf16, #tpu.memory_space<vmem>>, %arg2: memref<27x12xbf16, #tpu.memory_space<vmem>>, %arg3: memref<1x12xf32, #tpu.memory_space<vmem>>, %arg4: memref<1x12xf32, #tpu.memory_space<vmem>>, %arg5: memref<456x12xbf16, #tpu.memory_space<vmem>>) attributes {dimension_semantics = [#tpu.dimension_semantics<parallel>], iteration_bounds = array<i64: 1>, scalar_prefetch = 0 : i64, scratch_operands = 0 : i64, tpu.core_type = #tpu.core_type<tc>, window_params = [{transform_indices = @transform_0, window_bounds = array<i64: 456, 27>}, {pipeline_mode = #tpu.pipeline_mode<synchronous>, transform_indices = @transform_1, window_bounds = array<i64: 27, 12>}, {pipeline_mode = #tpu.pipeline_mode<synchronous>, transform_indices = @transform_2, window_bounds = array<i64: 1, 12>}, {pipeline_mode = #tpu.pipeline_mode<synchronous>, transform_indices = @transform_3, window_bounds = array<i64: 1, 12>}, {transform_indices = @transform_4, window_bounds = array<i64: 456, 12>}]} {
    %c0 = arith.constant 0 : index
    %c0_0 = arith.constant 0 : index
    %0 = vector.load %arg1[%c0, %c0_0] : memref<456x27xbf16, #tpu.memory_space<vmem>>, vector<456x27xbf16>
    %c0_1 = arith.constant 0 : index
    %c0_2 = arith.constant 0 : index
    %1 = vector.load %arg2[%c0_1, %c0_2] : memref<27x12xbf16, #tpu.memory_space<vmem>>, vector<27x12xbf16>
    %cst = arith.constant dense<0.000000e+00> : vector<456x12xf32>
    %2 = tpu.matmul %0, %1, %cst {dimension_numbers = #tpu.dot_dimension_numbers<[1], [0], [0], [1], [0, 0, 1, 1], [], []>} : vector<456x27xbf16>, vector<27x12xbf16>, vector<456x12xf32> -> vector<456x12xf32>
    %c0_3 = arith.constant 0 : index
    %c0_4 = arith.constant 0 : index
    %3 = vector.load %arg3[%c0_3, %c0_4] : memref<1x12xf32, #tpu.memory_space<vmem>>, vector<1x12xf32>
    %4 = vector.broadcast %3 : vector<1x12xf32> to vector<456x12xf32>
    %5 = arith.mulf %2, %4 : vector<456x12xf32>
    %c0_5 = arith.constant 0 : index
    %c0_6 = arith.constant 0 : index
    %6 = vector.load %arg4[%c0_5, %c0_6] : memref<1x12xf32, #tpu.memory_space<vmem>>, vector<1x12xf32>
    %7 = vector.broadcast %6 : vector<1x12xf32> to vector<456x12xf32>
    %8 = arith.addf %5, %7 : vector<456x12xf32>
    %9 = arith.truncf %8 : vector<456x12xf32> to vector<456x12xbf16>
    %c0_7 = arith.constant 0 : index
    %c0_8 = arith.constant 0 : index
    %10 = vector.load %arg5[%c0_7, %c0_8] : memref<456x12xbf16, #tpu.memory_space<vmem>>, vector<456x12xbf16>
    tpu.vector_store %arg5[%c0_7, %c0_8], %9 {strides = array<i32>} : memref<456x12xbf16, #tpu.memory_space<vmem>>, vector<456x12xbf16>,
    return
  }
  func.func @transform_0(%arg0: i32) -> (i32, i32) {
    %c0_i32 = arith.constant 0 : i32
    %c0_i32_0 = arith.constant 0 : i32
    return %arg0, %c0_i32 : i32, i32
  }
  func.func @transform_1(%arg0: i32) -> (i32, i32) {
    %c0_i32 = arith.constant 0 : i32
    %c0_i32_0 = arith.constant 0 : i32
    %c0_i32_1 = arith.constant 0 : i32
    return %c0_i32, %c0_i32_0 : i32, i32
  }
  func.func @transform_2(%arg0: i32) -> (i32, i32) {
    %c0_i32 = arith.constant 0 : i32
    %c0_i32_0 = arith.constant 0 : i32
    %c0_i32_1 = arith.constant 0 : i32
    return %c0_i32, %c0_i32_0 : i32, i32
  }
  func.func @transform_3(%arg0: i32) -> (i32, i32) {
    %c0_i32 = arith.constant 0 : i32
    %c0_i32_0 = arith.constant 0 : i32
    %c0_i32_1 = arith.constant 0 : i32
    return %c0_i32, %c0_i32_0 : i32, i32
  }
  func.func @transform_4(%arg0: i32) -> (i32, i32) {
    %c0_i32 = arith.constant 0 : i32
    %c0_i32_0 = arith.constant 0 : i32
    return %arg0, %c0_i32 : i32, i32
  }
}

module attributes {stable_mosaic.version = 11 : i64} {
  func.func @_pool3x3_kernel(%arg0: i32, %arg1: memref<1x15x15x12xbf16, #tpu.memory_space<vmem>>, %arg2: memref<1x13x13x12xbf16, #tpu.memory_space<vmem>>) attributes {dimension_semantics = [#tpu.dimension_semantics<parallel>], iteration_bounds = array<i64: 2>, scalar_prefetch = 0 : i64, scratch_operands = 0 : i64, tpu.core_type = #tpu.core_type<tc>, window_params = [{transform_indices = @transform_0, window_bounds = array<i64: 1, 15, 15, 12>}, {transform_indices = @transform_1, window_bounds = array<i64: 1, 13, 13, 12>}]} {
    %c0 = arith.constant 0 : index
    %c0_0 = arith.constant 0 : index
    %c0_1 = arith.constant 0 : index
    %c0_2 = arith.constant 0 : index
    %0 = vector.load %arg1[%c0, %c0_0, %c0_1, %c0_2] : memref<1x15x15x12xbf16, #tpu.memory_space<vmem>>, vector<1x13x13x12xbf16>
    %1 = vector.shape_cast %0 : vector<1x13x13x12xbf16> to vector<13x13x12xbf16>
    %2 = arith.extf %1 : vector<13x13x12xbf16> to vector<13x13x12xf32>
    %c0_3 = arith.constant 0 : index
    %c0_4 = arith.constant 0 : index
    %c1 = arith.constant 1 : index
    %c0_5 = arith.constant 0 : index
    %3 = vector.load %arg1[%c0_3, %c0_4, %c1, %c0_5] : memref<1x15x15x12xbf16, #tpu.memory_space<vmem>>, vector<1x13x13x12xbf16>
    %4 = vector.shape_cast %3 : vector<1x13x13x12xbf16> to vector<13x13x12xbf16>
    %5 = arith.extf %4 : vector<13x13x12xbf16> to vector<13x13x12xf32>
    %6 = arith.maximumf %2, %5 : vector<13x13x12xf32>
    %c0_6 = arith.constant 0 : index
    %c0_7 = arith.constant 0 : index
    %c2 = arith.constant 2 : index
    %c0_8 = arith.constant 0 : index
    %7 = vector.load %arg1[%c0_6, %c0_7, %c2, %c0_8] : memref<1x15x15x12xbf16, #tpu.memory_space<vmem>>, vector<1x13x13x12xbf16>
    %8 = vector.shape_cast %7 : vector<1x13x13x12xbf16> to vector<13x13x12xbf16>
    %9 = arith.extf %8 : vector<13x13x12xbf16> to vector<13x13x12xf32>
    %10 = arith.maximumf %6, %9 : vector<13x13x12xf32>
    %c0_9 = arith.constant 0 : index
    %c1_10 = arith.constant 1 : index
    %c0_11 = arith.constant 0 : index
    %c0_12 = arith.constant 0 : index
    %11 = vector.load %arg1[%c0_9, %c1_10, %c0_11, %c0_12] : memref<1x15x15x12xbf16, #tpu.memory_space<vmem>>, vector<1x13x13x12xbf16>
    %12 = vector.shape_cast %11 : vector<1x13x13x12xbf16> to vector<13x13x12xbf16>
    %13 = arith.extf %12 : vector<13x13x12xbf16> to vector<13x13x12xf32>
    %14 = arith.maximumf %10, %13 : vector<13x13x12xf32>
    %c0_13 = arith.constant 0 : index
    %c1_14 = arith.constant 1 : index
    %c1_15 = arith.constant 1 : index
    %c0_16 = arith.constant 0 : index
    %15 = vector.load %arg1[%c0_13, %c1_14, %c1_15, %c0_16] : memref<1x15x15x12xbf16, #tpu.memory_space<vmem>>, vector<1x13x13x12xbf16>
    %16 = vector.shape_cast %15 : vector<1x13x13x12xbf16> to vector<13x13x12xbf16>
    %17 = arith.extf %16 : vector<13x13x12xbf16> to vector<13x13x12xf32>
    %18 = arith.maximumf %14, %17 : vector<13x13x12xf32>
    %c0_17 = arith.constant 0 : index
    %c1_18 = arith.constant 1 : index
    %c2_19 = arith.constant 2 : index
    %c0_20 = arith.constant 0 : index
    %19 = vector.load %arg1[%c0_17, %c1_18, %c2_19, %c0_20] : memref<1x15x15x12xbf16, #tpu.memory_space<vmem>>, vector<1x13x13x12xbf16>
    %20 = vector.shape_cast %19 : vector<1x13x13x12xbf16> to vector<13x13x12xbf16>
    %21 = arith.extf %20 : vector<13x13x12xbf16> to vector<13x13x12xf32>
    %22 = arith.maximumf %18, %21 : vector<13x13x12xf32>
    %c0_21 = arith.constant 0 : index
    %c2_22 = arith.constant 2 : index
    %c0_23 = arith.constant 0 : index
    %c0_24 = arith.constant 0 : index
    %23 = vector.load %arg1[%c0_21, %c2_22, %c0_23, %c0_24] : memref<1x15x15x12xbf16, #tpu.memory_space<vmem>>, vector<1x13x13x12xbf16>
    %24 = vector.shape_cast %23 : vector<1x13x13x12xbf16> to vector<13x13x12xbf16>
    %25 = arith.extf %24 : vector<13x13x12xbf16> to vector<13x13x12xf32>
    %26 = arith.maximumf %22, %25 : vector<13x13x12xf32>
    %c0_25 = arith.constant 0 : index
    %c2_26 = arith.constant 2 : index
    %c1_27 = arith.constant 1 : index
    %c0_28 = arith.constant 0 : index
    %27 = vector.load %arg1[%c0_25, %c2_26, %c1_27, %c0_28] : memref<1x15x15x12xbf16, #tpu.memory_space<vmem>>, vector<1x13x13x12xbf16>
    %28 = vector.shape_cast %27 : vector<1x13x13x12xbf16> to vector<13x13x12xbf16>
    %29 = arith.extf %28 : vector<13x13x12xbf16> to vector<13x13x12xf32>
    %30 = arith.maximumf %26, %29 : vector<13x13x12xf32>
    %c0_29 = arith.constant 0 : index
    %c2_30 = arith.constant 2 : index
    %c2_31 = arith.constant 2 : index
    %c0_32 = arith.constant 0 : index
    %31 = vector.load %arg1[%c0_29, %c2_30, %c2_31, %c0_32] : memref<1x15x15x12xbf16, #tpu.memory_space<vmem>>, vector<1x13x13x12xbf16>
    %32 = vector.shape_cast %31 : vector<1x13x13x12xbf16> to vector<13x13x12xbf16>
    %33 = arith.extf %32 : vector<13x13x12xbf16> to vector<13x13x12xf32>
    %34 = arith.maximumf %30, %33 : vector<13x13x12xf32>
    %35 = arith.truncf %34 : vector<13x13x12xf32> to vector<13x13x12xbf16>
    %c0_33 = arith.constant 0 : index
    %c0_34 = arith.constant 0 : index
    %c0_35 = arith.constant 0 : index
    %c0_36 = arith.constant 0 : index
    %36 = vector.load %arg2[%c0_33, %c0_34, %c0_35, %c0_36] : memref<1x13x13x12xbf16, #tpu.memory_space<vmem>>, vector<1x13x13x12xbf16>
    %37 = vector.shape_cast %36 : vector<1x13x13x12xbf16> to vector<13x13x12xbf16>
    %38 = vector.shape_cast %35 : vector<13x13x12xbf16> to vector<1x13x13x12xbf16>
    tpu.vector_store %arg2[%c0_33, %c0_34, %c0_35, %c0_36], %38 {strides = array<i32>} : memref<1x13x13x12xbf16, #tpu.memory_space<vmem>>, vector<1x13x13x12xbf16>,
    return
  }
  func.func @transform_0(%arg0: i32) -> (i32, i32, i32, i32) {
    %c0_i32 = arith.constant 0 : i32
    %c0_i32_0 = arith.constant 0 : i32
    %c0_i32_1 = arith.constant 0 : i32
    %c0_i32_2 = arith.constant 0 : i32
    return %arg0, %c0_i32, %c0_i32_0, %c0_i32_1 : i32, i32, i32, i32
  }
  func.func @transform_1(%arg0: i32) -> (i32, i32, i32, i32) {
    %c0_i32 = arith.constant 0 : i32
    %c0_i32_0 = arith.constant 0 : i32
    %c0_i32_1 = arith.constant 0 : i32
    %c0_i32_2 = arith.constant 0 : i32
    return %arg0, %c0_i32, %c0_i32_0, %c0_i32_1 : i32, i32, i32, i32
  }
}

module attributes {stable_mosaic.version = 11 : i64} {
  func.func @_matmul_bn_kernel(%arg0: i32, %arg1: memref<168x12xbf16, #tpu.memory_space<vmem>>, %arg2: memref<12x88xbf16, #tpu.memory_space<vmem>>, %arg3: memref<1x88xf32, #tpu.memory_space<vmem>>, %arg4: memref<1x88xf32, #tpu.memory_space<vmem>>, %arg5: memref<168x88xbf16, #tpu.memory_space<vmem>>) attributes {dimension_semantics = [#tpu.dimension_semantics<parallel>], iteration_bounds = array<i64: 1>, scalar_prefetch = 0 : i64, scratch_operands = 0 : i64, tpu.core_type = #tpu.core_type<tc>, window_params = [{transform_indices = @transform_0, window_bounds = array<i64: 168, 12>}, {pipeline_mode = #tpu.pipeline_mode<synchronous>, transform_indices = @transform_1, window_bounds = array<i64: 12, 88>}, {pipeline_mode = #tpu.pipeline_mode<synchronous>, transform_indices = @transform_2, window_bounds = array<i64: 1, 88>}, {pipeline_mode = #tpu.pipeline_mode<synchronous>, transform_indices = @transform_3, window_bounds = array<i64: 1, 88>}, {transform_indices = @transform_4, window_bounds = array<i64: 168, 88>}]} {
    %c0 = arith.constant 0 : index
    %c0_0 = arith.constant 0 : index
    %0 = vector.load %arg1[%c0, %c0_0] : memref<168x12xbf16, #tpu.memory_space<vmem>>, vector<168x12xbf16>
    %c0_1 = arith.constant 0 : index
    %c0_2 = arith.constant 0 : index
    %1 = vector.load %arg2[%c0_1, %c0_2] : memref<12x88xbf16, #tpu.memory_space<vmem>>, vector<12x88xbf16>
    %cst = arith.constant dense<0.000000e+00> : vector<168x88xf32>
    %2 = tpu.matmul %0, %1, %cst {dimension_numbers = #tpu.dot_dimension_numbers<[1], [0], [0], [1], [0, 0, 1, 1], [], []>} : vector<168x12xbf16>, vector<12x88xbf16>, vector<168x88xf32> -> vector<168x88xf32>
    %c0_3 = arith.constant 0 : index
    %c0_4 = arith.constant 0 : index
    %3 = vector.load %arg3[%c0_3, %c0_4] : memref<1x88xf32, #tpu.memory_space<vmem>>, vector<1x88xf32>
    %4 = vector.broadcast %3 : vector<1x88xf32> to vector<168x88xf32>
    %5 = arith.mulf %2, %4 : vector<168x88xf32>
    %c0_5 = arith.constant 0 : index
    %c0_6 = arith.constant 0 : index
    %6 = vector.load %arg4[%c0_5, %c0_6] : memref<1x88xf32, #tpu.memory_space<vmem>>, vector<1x88xf32>
    %7 = vector.broadcast %6 : vector<1x88xf32> to vector<168x88xf32>
    %8 = arith.addf %5, %7 : vector<168x88xf32>
    %cst_7 = arith.constant 0.000000e+00 : f32
    %9 = vector.broadcast %cst_7 : f32 to vector<168x88xf32>
    %10 = arith.maximumf %8, %9 : vector<168x88xf32>
    %11 = arith.truncf %10 : vector<168x88xf32> to vector<168x88xbf16>
    %c0_8 = arith.constant 0 : index
    %c0_9 = arith.constant 0 : index
    %12 = vector.load %arg5[%c0_8, %c0_9] : memref<168x88xbf16, #tpu.memory_space<vmem>>, vector<168x88xbf16>
    tpu.vector_store %arg5[%c0_8, %c0_9], %11 {strides = array<i32>} : memref<168x88xbf16, #tpu.memory_space<vmem>>, vector<168x88xbf16>,
    return
  }
  func.func @transform_0(%arg0: i32) -> (i32, i32) {
    %c0_i32 = arith.constant 0 : i32
    %c0_i32_0 = arith.constant 0 : i32
    return %arg0, %c0_i32 : i32, i32
  }
  func.func @transform_1(%arg0: i32) -> (i32, i32) {
    %c0_i32 = arith.constant 0 : i32
    %c0_i32_0 = arith.constant 0 : i32
    %c0_i32_1 = arith.constant 0 : i32
    return %c0_i32, %c0_i32_0 : i32, i32
  }
  func.func @transform_2(%arg0: i32) -> (i32, i32) {
    %c0_i32 = arith.constant 0 : i32
    %c0_i32_0 = arith.constant 0 : i32
    %c0_i32_1 = arith.constant 0 : i32
    return %c0_i32, %c0_i32_0 : i32, i32
  }
  func.func @transform_3(%arg0: i32) -> (i32, i32) {
    %c0_i32 = arith.constant 0 : i32
    %c0_i32_0 = arith.constant 0 : i32
    %c0_i32_1 = arith.constant 0 : i32
    return %c0_i32, %c0_i32_0 : i32, i32
  }
  func.func @transform_4(%arg0: i32) -> (i32, i32) {
    %c0_i32 = arith.constant 0 : i32
    %c0_i32_0 = arith.constant 0 : i32
    return %arg0, %c0_i32 : i32, i32
  }
}

module attributes {stable_mosaic.version = 11 : i64} {
  func.func @_dwconv_bn_kernel(%arg0: i32, %arg1: memref<1x9x9x88xbf16, #tpu.memory_space<vmem>>, %arg2: memref<9x1x1x88xf32, #tpu.memory_space<vmem>>, %arg3: memref<1x1x88xf32, #tpu.memory_space<vmem>>, %arg4: memref<1x1x88xf32, #tpu.memory_space<vmem>>, %arg5: memref<1x7x7x88xbf16, #tpu.memory_space<vmem>>) attributes {dimension_semantics = [#tpu.dimension_semantics<parallel>], iteration_bounds = array<i64: 2>, scalar_prefetch = 0 : i64, scratch_operands = 0 : i64, tpu.core_type = #tpu.core_type<tc>, window_params = [{transform_indices = @transform_0, window_bounds = array<i64: 1, 9, 9, 88>}, {pipeline_mode = #tpu.pipeline_mode<synchronous>, transform_indices = @transform_1, window_bounds = array<i64: 9, 1, 1, 88>}, {pipeline_mode = #tpu.pipeline_mode<synchronous>, transform_indices = @transform_2, window_bounds = array<i64: 1, 1, 88>}, {pipeline_mode = #tpu.pipeline_mode<synchronous>, transform_indices = @transform_3, window_bounds = array<i64: 1, 1, 88>}, {transform_indices = @transform_4, window_bounds = array<i64: 1, 7, 7, 88>}]} {
    %c0 = arith.constant 0 : index
    %c0_0 = arith.constant 0 : index
    %c0_1 = arith.constant 0 : index
    %c0_2 = arith.constant 0 : index
    %0 = vector.load %arg2[%c0, %c0_0, %c0_1, %c0_2] : memref<9x1x1x88xf32, #tpu.memory_space<vmem>>, vector<9x1x1x88xf32>
    %c0_3 = arith.constant 0 : index
    %c0_4 = arith.constant 0 : index
    %c0_5 = arith.constant 0 : index
    %c0_6 = arith.constant 0 : index
    %1 = vector.load %arg1[%c0_3, %c0_4, %c0_5, %c0_6] : memref<1x9x9x88xbf16, #tpu.memory_space<vmem>>, vector<1x7x7x88xbf16>
    %2 = vector.shape_cast %1 : vector<1x7x7x88xbf16> to vector<7x7x88xbf16>
    %3 = arith.extf %2 : vector<7x7x88xbf16> to vector<7x7x88xf32>
    %4 = vector.extract_strided_slice %0 {offsets = [0, 0, 0, 0], sizes = [1, 1, 1, 88], strides = [1, 1, 1, 1]} : vector<9x1x1x88xf32> to vector<1x1x1x88xf32>
    %5 = vector.shape_cast %4 : vector<1x1x1x88xf32> to vector<1x1x88xf32>
    %6 = vector.broadcast %5 : vector<1x1x88xf32> to vector<7x7x88xf32>
    %7 = arith.mulf %3, %6 : vector<7x7x88xf32>
    %c0_7 = arith.constant 0 : index
    %c0_8 = arith.constant 0 : index
    %c1 = arith.constant 1 : index
    %c0_9 = arith.constant 0 : index
    %8 = vector.load %arg1[%c0_7, %c0_8, %c1, %c0_9] : memref<1x9x9x88xbf16, #tpu.memory_space<vmem>>, vector<1x7x7x88xbf16>
    %9 = vector.shape_cast %8 : vector<1x7x7x88xbf16> to vector<7x7x88xbf16>
    %10 = arith.extf %9 : vector<7x7x88xbf16> to vector<7x7x88xf32>
    %11 = vector.extract_strided_slice %0 {offsets = [1, 0, 0, 0], sizes = [1, 1, 1, 88], strides = [1, 1, 1, 1]} : vector<9x1x1x88xf32> to vector<1x1x1x88xf32>
    %12 = vector.shape_cast %11 : vector<1x1x1x88xf32> to vector<1x1x88xf32>
    %13 = vector.broadcast %12 : vector<1x1x88xf32> to vector<7x7x88xf32>
    %14 = arith.mulf %10, %13 : vector<7x7x88xf32>
    %15 = arith.addf %7, %14 : vector<7x7x88xf32>
    %c0_10 = arith.constant 0 : index
    %c0_11 = arith.constant 0 : index
    %c2 = arith.constant 2 : index
    %c0_12 = arith.constant 0 : index
    %16 = vector.load %arg1[%c0_10, %c0_11, %c2, %c0_12] : memref<1x9x9x88xbf16, #tpu.memory_space<vmem>>, vector<1x7x7x88xbf16>
    %17 = vector.shape_cast %16 : vector<1x7x7x88xbf16> to vector<7x7x88xbf16>
    %18 = arith.extf %17 : vector<7x7x88xbf16> to vector<7x7x88xf32>
    %19 = vector.extract_strided_slice %0 {offsets = [2, 0, 0, 0], sizes = [1, 1, 1, 88], strides = [1, 1, 1, 1]} : vector<9x1x1x88xf32> to vector<1x1x1x88xf32>
    %20 = vector.shape_cast %19 : vector<1x1x1x88xf32> to vector<1x1x88xf32>
    %21 = vector.broadcast %20 : vector<1x1x88xf32> to vector<7x7x88xf32>
    %22 = arith.mulf %18, %21 : vector<7x7x88xf32>
    %23 = arith.addf %15, %22 : vector<7x7x88xf32>
    %c0_13 = arith.constant 0 : index
    %c1_14 = arith.constant 1 : index
    %c0_15 = arith.constant 0 : index
    %c0_16 = arith.constant 0 : index
    %24 = vector.load %arg1[%c0_13, %c1_14, %c0_15, %c0_16] : memref<1x9x9x88xbf16, #tpu.memory_space<vmem>>, vector<1x7x7x88xbf16>
    %25 = vector.shape_cast %24 : vector<1x7x7x88xbf16> to vector<7x7x88xbf16>
    %26 = arith.extf %25 : vector<7x7x88xbf16> to vector<7x7x88xf32>
    %27 = vector.extract_strided_slice %0 {offsets = [3, 0, 0, 0], sizes = [1, 1, 1, 88], strides = [1, 1, 1, 1]} : vector<9x1x1x88xf32> to vector<1x1x1x88xf32>
    %28 = vector.shape_cast %27 : vector<1x1x1x88xf32> to vector<1x1x88xf32>
    %29 = vector.broadcast %28 : vector<1x1x88xf32> to vector<7x7x88xf32>
    %30 = arith.mulf %26, %29 : vector<7x7x88xf32>
    %31 = arith.addf %23, %30 : vector<7x7x88xf32>
    %c0_17 = arith.constant 0 : index
    %c1_18 = arith.constant 1 : index
    %c1_19 = arith.constant 1 : index
    %c0_20 = arith.constant 0 : index
    %32 = vector.load %arg1[%c0_17, %c1_18, %c1_19, %c0_20] : memref<1x9x9x88xbf16, #tpu.memory_space<vmem>>, vector<1x7x7x88xbf16>
    %33 = vector.shape_cast %32 : vector<1x7x7x88xbf16> to vector<7x7x88xbf16>
    %34 = arith.extf %33 : vector<7x7x88xbf16> to vector<7x7x88xf32>
    %35 = vector.extract_strided_slice %0 {offsets = [4, 0, 0, 0], sizes = [1, 1, 1, 88], strides = [1, 1, 1, 1]} : vector<9x1x1x88xf32> to vector<1x1x1x88xf32>
    %36 = vector.shape_cast %35 : vector<1x1x1x88xf32> to vector<1x1x88xf32>
    %37 = vector.broadcast %36 : vector<1x1x88xf32> to vector<7x7x88xf32>
    %38 = arith.mulf %34, %37 : vector<7x7x88xf32>
    %39 = arith.addf %31, %38 : vector<7x7x88xf32>
    %c0_21 = arith.constant 0 : index
    %c1_22 = arith.constant 1 : index
    %c2_23 = arith.constant 2 : index
    %c0_24 = arith.constant 0 : index
    %40 = vector.load %arg1[%c0_21, %c1_22, %c2_23, %c0_24] : memref<1x9x9x88xbf16, #tpu.memory_space<vmem>>, vector<1x7x7x88xbf16>
    %41 = vector.shape_cast %40 : vector<1x7x7x88xbf16> to vector<7x7x88xbf16>
    %42 = arith.extf %41 : vector<7x7x88xbf16> to vector<7x7x88xf32>
    %43 = vector.extract_strided_slice %0 {offsets = [5, 0, 0, 0], sizes = [1, 1, 1, 88], strides = [1, 1, 1, 1]} : vector<9x1x1x88xf32> to vector<1x1x1x88xf32>
    %44 = vector.shape_cast %43 : vector<1x1x1x88xf32> to vector<1x1x88xf32>
    %45 = vector.broadcast %44 : vector<1x1x88xf32> to vector<7x7x88xf32>
    %46 = arith.mulf %42, %45 : vector<7x7x88xf32>
    %47 = arith.addf %39, %46 : vector<7x7x88xf32>
    %c0_25 = arith.constant 0 : index
    %c2_26 = arith.constant 2 : index
    %c0_27 = arith.constant 0 : index
    %c0_28 = arith.constant 0 : index
    %48 = vector.load %arg1[%c0_25, %c2_26, %c0_27, %c0_28] : memref<1x9x9x88xbf16, #tpu.memory_space<vmem>>, vector<1x7x7x88xbf16>
    %49 = vector.shape_cast %48 : vector<1x7x7x88xbf16> to vector<7x7x88xbf16>
    %50 = arith.extf %49 : vector<7x7x88xbf16> to vector<7x7x88xf32>
    %51 = vector.extract_strided_slice %0 {offsets = [6, 0, 0, 0], sizes = [1, 1, 1, 88], strides = [1, 1, 1, 1]} : vector<9x1x1x88xf32> to vector<1x1x1x88xf32>
    %52 = vector.shape_cast %51 : vector<1x1x1x88xf32> to vector<1x1x88xf32>
    %53 = vector.broadcast %52 : vector<1x1x88xf32> to vector<7x7x88xf32>
    %54 = arith.mulf %50, %53 : vector<7x7x88xf32>
    %55 = arith.addf %47, %54 : vector<7x7x88xf32>
    %c0_29 = arith.constant 0 : index
    %c2_30 = arith.constant 2 : index
    %c1_31 = arith.constant 1 : index
    %c0_32 = arith.constant 0 : index
    %56 = vector.load %arg1[%c0_29, %c2_30, %c1_31, %c0_32] : memref<1x9x9x88xbf16, #tpu.memory_space<vmem>>, vector<1x7x7x88xbf16>
    %57 = vector.shape_cast %56 : vector<1x7x7x88xbf16> to vector<7x7x88xbf16>
    %58 = arith.extf %57 : vector<7x7x88xbf16> to vector<7x7x88xf32>
    %59 = vector.extract_strided_slice %0 {offsets = [7, 0, 0, 0], sizes = [1, 1, 1, 88], strides = [1, 1, 1, 1]} : vector<9x1x1x88xf32> to vector<1x1x1x88xf32>
    %60 = vector.shape_cast %59 : vector<1x1x1x88xf32> to vector<1x1x88xf32>
    %61 = vector.broadcast %60 : vector<1x1x88xf32> to vector<7x7x88xf32>
    %62 = arith.mulf %58, %61 : vector<7x7x88xf32>
    %63 = arith.addf %55, %62 : vector<7x7x88xf32>
    %c0_33 = arith.constant 0 : index
    %c2_34 = arith.constant 2 : index
    %c2_35 = arith.constant 2 : index
    %c0_36 = arith.constant 0 : index
    %64 = vector.load %arg1[%c0_33, %c2_34, %c2_35, %c0_36] : memref<1x9x9x88xbf16, #tpu.memory_space<vmem>>, vector<1x7x7x88xbf16>
    %65 = vector.shape_cast %64 : vector<1x7x7x88xbf16> to vector<7x7x88xbf16>
    %66 = arith.extf %65 : vector<7x7x88xbf16> to vector<7x7x88xf32>
    %67 = vector.extract_strided_slice %0 {offsets = [8, 0, 0, 0], sizes = [1, 1, 1, 88], strides = [1, 1, 1, 1]} : vector<9x1x1x88xf32> to vector<1x1x1x88xf32>
    %68 = vector.shape_cast %67 : vector<1x1x1x88xf32> to vector<1x1x88xf32>
    %69 = vector.broadcast %68 : vector<1x1x88xf32> to vector<7x7x88xf32>
    %70 = arith.mulf %66, %69 : vector<7x7x88xf32>
    %71 = arith.addf %63, %70 : vector<7x7x88xf32>
    %c0_37 = arith.constant 0 : index
    %c0_38 = arith.constant 0 : index
    %c0_39 = arith.constant 0 : index
    %72 = vector.load %arg3[%c0_37, %c0_38, %c0_39] : memref<1x1x88xf32, #tpu.memory_space<vmem>>, vector<1x1x88xf32>
    %73 = vector.broadcast %72 : vector<1x1x88xf32> to vector<7x7x88xf32>
    %74 = arith.mulf %71, %73 : vector<7x7x88xf32>
    %c0_40 = arith.constant 0 : index
    %c0_41 = arith.constant 0 : index
    %c0_42 = arith.constant 0 : index
    %75 = vector.load %arg4[%c0_40, %c0_41, %c0_42] : memref<1x1x88xf32, #tpu.memory_space<vmem>>, vector<1x1x88xf32>
    %76 = vector.broadcast %75 : vector<1x1x88xf32> to vector<7x7x88xf32>
    %77 = arith.addf %74, %76 : vector<7x7x88xf32>
    %78 = arith.truncf %77 : vector<7x7x88xf32> to vector<7x7x88xbf16>
    %c0_43 = arith.constant 0 : index
    %c0_44 = arith.constant 0 : index
    %c0_45 = arith.constant 0 : index
    %c0_46 = arith.constant 0 : index
    %79 = vector.load %arg5[%c0_43, %c0_44, %c0_45, %c0_46] : memref<1x7x7x88xbf16, #tpu.memory_space<vmem>>, vector<1x7x7x88xbf16>
    %80 = vector.shape_cast %79 : vector<1x7x7x88xbf16> to vector<7x7x88xbf16>
    %81 = vector.shape_cast %78 : vector<7x7x88xbf16> to vector<1x7x7x88xbf16>
    tpu.vector_store %arg5[%c0_43, %c0_44, %c0_45, %c0_46], %81 {strides = array<i32>} : memref<1x7x7x88xbf16, #tpu.memory_space<vmem>>, vector<1x7x7x88xbf16>,
    return
  }
  func.func @transform_0(%arg0: i32) -> (i32, i32, i32, i32) {
    %c0_i32 = arith.constant 0 : i32
    %c0_i32_0 = arith.constant 0 : i32
    %c0_i32_1 = arith.constant 0 : i32
    %c0_i32_2 = arith.constant 0 : i32
    return %arg0, %c0_i32, %c0_i32_0, %c0_i32_1 : i32, i32, i32, i32
  }
  func.func @transform_1(%arg0: i32) -> (i32, i32, i32, i32) {
    %c0_i32 = arith.constant 0 : i32
    %c0_i32_0 = arith.constant 0 : i32
    %c0_i32_1 = arith.constant 0 : i32
    %c0_i32_2 = arith.constant 0 : i32
    %c0_i32_3 = arith.constant 0 : i32
    return %c0_i32, %c0_i32_0, %c0_i32_1, %c0_i32_2 : i32, i32, i32, i32
  }
  func.func @transform_2(%arg0: i32) -> (i32, i32, i32) {
    %c0_i32 = arith.constant 0 : i32
    %c0_i32_0 = arith.constant 0 : i32
    %c0_i32_1 = arith.constant 0 : i32
    %c0_i32_2 = arith.constant 0 : i32
    return %c0_i32, %c0_i32_0, %c0_i32_1 : i32, i32, i32
  }
  func.func @transform_3(%arg0: i32) -> (i32, i32, i32) {
    %c0_i32 = arith.constant 0 : i32
    %c0_i32_0 = arith.constant 0 : i32
    %c0_i32_1 = arith.constant 0 : i32
    %c0_i32_2 = arith.constant 0 : i32
    return %c0_i32, %c0_i32_0, %c0_i32_1 : i32, i32, i32
  }
  func.func @transform_4(%arg0: i32) -> (i32, i32, i32, i32) {
    %c0_i32 = arith.constant 0 : i32
    %c0_i32_0 = arith.constant 0 : i32
    %c0_i32_1 = arith.constant 0 : i32
    %c0_i32_2 = arith.constant 0 : i32
    return %arg0, %c0_i32, %c0_i32_0, %c0_i32_1 : i32, i32, i32, i32
  }
}

module attributes {stable_mosaic.version = 11 : i64} {
  func.func @_pool3x3_kernel(%arg0: i32, %arg1: memref<1x9x9x12xbf16, #tpu.memory_space<vmem>>, %arg2: memref<1x7x7x12xbf16, #tpu.memory_space<vmem>>) attributes {dimension_semantics = [#tpu.dimension_semantics<parallel>], iteration_bounds = array<i64: 2>, scalar_prefetch = 0 : i64, scratch_operands = 0 : i64, tpu.core_type = #tpu.core_type<tc>, window_params = [{transform_indices = @transform_0, window_bounds = array<i64: 1, 9, 9, 12>}, {transform_indices = @transform_1, window_bounds = array<i64: 1, 7, 7, 12>}]} {
    %c0 = arith.constant 0 : index
    %c0_0 = arith.constant 0 : index
    %c0_1 = arith.constant 0 : index
    %c0_2 = arith.constant 0 : index
    %0 = vector.load %arg1[%c0, %c0_0, %c0_1, %c0_2] : memref<1x9x9x12xbf16, #tpu.memory_space<vmem>>, vector<1x7x7x12xbf16>
    %1 = vector.shape_cast %0 : vector<1x7x7x12xbf16> to vector<7x7x12xbf16>
    %2 = arith.extf %1 : vector<7x7x12xbf16> to vector<7x7x12xf32>
    %c0_3 = arith.constant 0 : index
    %c0_4 = arith.constant 0 : index
    %c1 = arith.constant 1 : index
    %c0_5 = arith.constant 0 : index
    %3 = vector.load %arg1[%c0_3, %c0_4, %c1, %c0_5] : memref<1x9x9x12xbf16, #tpu.memory_space<vmem>>, vector<1x7x7x12xbf16>
    %4 = vector.shape_cast %3 : vector<1x7x7x12xbf16> to vector<7x7x12xbf16>
    %5 = arith.extf %4 : vector<7x7x12xbf16> to vector<7x7x12xf32>
    %6 = arith.addf %2, %5 : vector<7x7x12xf32>
    %c0_6 = arith.constant 0 : index
    %c0_7 = arith.constant 0 : index
    %c2 = arith.constant 2 : index
    %c0_8 = arith.constant 0 : index
    %7 = vector.load %arg1[%c0_6, %c0_7, %c2, %c0_8] : memref<1x9x9x12xbf16, #tpu.memory_space<vmem>>, vector<1x7x7x12xbf16>
    %8 = vector.shape_cast %7 : vector<1x7x7x12xbf16> to vector<7x7x12xbf16>
    %9 = arith.extf %8 : vector<7x7x12xbf16> to vector<7x7x12xf32>
    %10 = arith.addf %6, %9 : vector<7x7x12xf32>
    %c0_9 = arith.constant 0 : index
    %c1_10 = arith.constant 1 : index
    %c0_11 = arith.constant 0 : index
    %c0_12 = arith.constant 0 : index
    %11 = vector.load %arg1[%c0_9, %c1_10, %c0_11, %c0_12] : memref<1x9x9x12xbf16, #tpu.memory_space<vmem>>, vector<1x7x7x12xbf16>
    %12 = vector.shape_cast %11 : vector<1x7x7x12xbf16> to vector<7x7x12xbf16>
    %13 = arith.extf %12 : vector<7x7x12xbf16> to vector<7x7x12xf32>
    %14 = arith.addf %10, %13 : vector<7x7x12xf32>
    %c0_13 = arith.constant 0 : index
    %c1_14 = arith.constant 1 : index
    %c1_15 = arith.constant 1 : index
    %c0_16 = arith.constant 0 : index
    %15 = vector.load %arg1[%c0_13, %c1_14, %c1_15, %c0_16] : memref<1x9x9x12xbf16, #tpu.memory_space<vmem>>, vector<1x7x7x12xbf16>
    %16 = vector.shape_cast %15 : vector<1x7x7x12xbf16> to vector<7x7x12xbf16>
    %17 = arith.extf %16 : vector<7x7x12xbf16> to vector<7x7x12xf32>
    %18 = arith.addf %14, %17 : vector<7x7x12xf32>
    %c0_17 = arith.constant 0 : index
    %c1_18 = arith.constant 1 : index
    %c2_19 = arith.constant 2 : index
    %c0_20 = arith.constant 0 : index
    %19 = vector.load %arg1[%c0_17, %c1_18, %c2_19, %c0_20] : memref<1x9x9x12xbf16, #tpu.memory_space<vmem>>, vector<1x7x7x12xbf16>
    %20 = vector.shape_cast %19 : vector<1x7x7x12xbf16> to vector<7x7x12xbf16>
    %21 = arith.extf %20 : vector<7x7x12xbf16> to vector<7x7x12xf32>
    %22 = arith.addf %18, %21 : vector<7x7x12xf32>
    %c0_21 = arith.constant 0 : index
    %c2_22 = arith.constant 2 : index
    %c0_23 = arith.constant 0 : index
    %c0_24 = arith.constant 0 : index
    %23 = vector.load %arg1[%c0_21, %c2_22, %c0_23, %c0_24] : memref<1x9x9x12xbf16, #tpu.memory_space<vmem>>, vector<1x7x7x12xbf16>
    %24 = vector.shape_cast %23 : vector<1x7x7x12xbf16> to vector<7x7x12xbf16>
    %25 = arith.extf %24 : vector<7x7x12xbf16> to vector<7x7x12xf32>
    %26 = arith.addf %22, %25 : vector<7x7x12xf32>
    %c0_25 = arith.constant 0 : index
    %c2_26 = arith.constant 2 : index
    %c1_27 = arith.constant 1 : index
    %c0_28 = arith.constant 0 : index
    %27 = vector.load %arg1[%c0_25, %c2_26, %c1_27, %c0_28] : memref<1x9x9x12xbf16, #tpu.memory_space<vmem>>, vector<1x7x7x12xbf16>
    %28 = vector.shape_cast %27 : vector<1x7x7x12xbf16> to vector<7x7x12xbf16>
    %29 = arith.extf %28 : vector<7x7x12xbf16> to vector<7x7x12xf32>
    %30 = arith.addf %26, %29 : vector<7x7x12xf32>
    %c0_29 = arith.constant 0 : index
    %c2_30 = arith.constant 2 : index
    %c2_31 = arith.constant 2 : index
    %c0_32 = arith.constant 0 : index
    %31 = vector.load %arg1[%c0_29, %c2_30, %c2_31, %c0_32] : memref<1x9x9x12xbf16, #tpu.memory_space<vmem>>, vector<1x7x7x12xbf16>
    %32 = vector.shape_cast %31 : vector<1x7x7x12xbf16> to vector<7x7x12xbf16>
    %33 = arith.extf %32 : vector<7x7x12xbf16> to vector<7x7x12xf32>
    %34 = arith.addf %30, %33 : vector<7x7x12xf32>
    %cst = arith.constant 0.111111112 : f32
    %35 = vector.broadcast %cst : f32 to vector<7x7x12xf32>
    %36 = arith.mulf %34, %35 : vector<7x7x12xf32>
    %cst_33 = arith.constant 0.000000e+00 : f32
    %37 = vector.broadcast %cst_33 : f32 to vector<7x7x12xf32>
    %38 = arith.maximumf %36, %37 : vector<7x7x12xf32>
    %39 = arith.truncf %38 : vector<7x7x12xf32> to vector<7x7x12xbf16>
    %c0_34 = arith.constant 0 : index
    %c0_35 = arith.constant 0 : index
    %c0_36 = arith.constant 0 : index
    %c0_37 = arith.constant 0 : index
    %40 = vector.load %arg2[%c0_34, %c0_35, %c0_36, %c0_37] : memref<1x7x7x12xbf16, #tpu.memory_space<vmem>>, vector<1x7x7x12xbf16>
    %41 = vector.shape_cast %40 : vector<1x7x7x12xbf16> to vector<7x7x12xbf16>
    %42 = vector.shape_cast %39 : vector<7x7x12xbf16> to vector<1x7x7x12xbf16>
    tpu.vector_store %arg2[%c0_34, %c0_35, %c0_36, %c0_37], %42 {strides = array<i32>} : memref<1x7x7x12xbf16, #tpu.memory_space<vmem>>, vector<1x7x7x12xbf16>,
    return
  }
  func.func @transform_0(%arg0: i32) -> (i32, i32, i32, i32) {
    %c0_i32 = arith.constant 0 : i32
    %c0_i32_0 = arith.constant 0 : i32
    %c0_i32_1 = arith.constant 0 : i32
    %c0_i32_2 = arith.constant 0 : i32
    return %arg0, %c0_i32, %c0_i32_0, %c0_i32_1 : i32, i32, i32, i32
  }
  func.func @transform_1(%arg0: i32) -> (i32, i32, i32, i32) {
    %c0_i32 = arith.constant 0 : i32
    %c0_i32_0 = arith.constant 0 : i32
    %c0_i32_1 = arith.constant 0 : i32
    %c0_i32_2 = arith.constant 0 : i32
    return %arg0, %c0_i32, %c0_i32_0, %c0_i32_1 : i32, i32, i32, i32
  }
}

module attributes {stable_mosaic.version = 11 : i64} {
  func.func @_matmul_bn_kernel(%arg0: i32, %arg1: memref<72x100xbf16, #tpu.memory_space<vmem>>, %arg2: memref<100x100xbf16, #tpu.memory_space<vmem>>, %arg3: memref<1x100xf32, #tpu.memory_space<vmem>>, %arg4: memref<1x100xf32, #tpu.memory_space<vmem>>, %arg5: memref<72x100xbf16, #tpu.memory_space<vmem>>) attributes {dimension_semantics = [#tpu.dimension_semantics<parallel>], iteration_bounds = array<i64: 1>, scalar_prefetch = 0 : i64, scratch_operands = 0 : i64, tpu.core_type = #tpu.core_type<tc>, window_params = [{transform_indices = @transform_0, window_bounds = array<i64: 72, 100>}, {pipeline_mode = #tpu.pipeline_mode<synchronous>, transform_indices = @transform_1, window_bounds = array<i64: 100, 100>}, {pipeline_mode = #tpu.pipeline_mode<synchronous>, transform_indices = @transform_2, window_bounds = array<i64: 1, 100>}, {pipeline_mode = #tpu.pipeline_mode<synchronous>, transform_indices = @transform_3, window_bounds = array<i64: 1, 100>}, {transform_indices = @transform_4, window_bounds = array<i64: 72, 100>}]} {
    %c0 = arith.constant 0 : index
    %c0_0 = arith.constant 0 : index
    %0 = vector.load %arg1[%c0, %c0_0] : memref<72x100xbf16, #tpu.memory_space<vmem>>, vector<72x100xbf16>
    %c0_1 = arith.constant 0 : index
    %c0_2 = arith.constant 0 : index
    %1 = vector.load %arg2[%c0_1, %c0_2] : memref<100x100xbf16, #tpu.memory_space<vmem>>, vector<100x100xbf16>
    %cst = arith.constant dense<0.000000e+00> : vector<72x100xf32>
    %2 = tpu.matmul %0, %1, %cst {dimension_numbers = #tpu.dot_dimension_numbers<[1], [0], [0], [1], [0, 0, 1, 1], [], []>} : vector<72x100xbf16>, vector<100x100xbf16>, vector<72x100xf32> -> vector<72x100xf32>
    %c0_3 = arith.constant 0 : index
    %c0_4 = arith.constant 0 : index
    %3 = vector.load %arg3[%c0_3, %c0_4] : memref<1x100xf32, #tpu.memory_space<vmem>>, vector<1x100xf32>
    %4 = vector.broadcast %3 : vector<1x100xf32> to vector<72x100xf32>
    %5 = arith.mulf %2, %4 : vector<72x100xf32>
    %c0_5 = arith.constant 0 : index
    %c0_6 = arith.constant 0 : index
    %6 = vector.load %arg4[%c0_5, %c0_6] : memref<1x100xf32, #tpu.memory_space<vmem>>, vector<1x100xf32>
    %7 = vector.broadcast %6 : vector<1x100xf32> to vector<72x100xf32>
    %8 = arith.addf %5, %7 : vector<72x100xf32>
    %cst_7 = arith.constant 0.000000e+00 : f32
    %9 = vector.broadcast %cst_7 : f32 to vector<72x100xf32>
    %10 = arith.maximumf %8, %9 : vector<72x100xf32>
    %11 = arith.truncf %10 : vector<72x100xf32> to vector<72x100xbf16>
    %c0_8 = arith.constant 0 : index
    %c0_9 = arith.constant 0 : index
    %12 = vector.load %arg5[%c0_8, %c0_9] : memref<72x100xbf16, #tpu.memory_space<vmem>>, vector<72x100xbf16>
    tpu.vector_store %arg5[%c0_8, %c0_9], %11 {strides = array<i32>} : memref<72x100xbf16, #tpu.memory_space<vmem>>, vector<72x100xbf16>,
    return
  }
  func.func @transform_0(%arg0: i32) -> (i32, i32) {
    %c0_i32 = arith.constant 0 : i32
    %c0_i32_0 = arith.constant 0 : i32
    return %arg0, %c0_i32 : i32, i32
  }
  func.func @transform_1(%arg0: i32) -> (i32, i32) {
    %c0_i32 = arith.constant 0 : i32
    %c0_i32_0 = arith.constant 0 : i32
    %c0_i32_1 = arith.constant 0 : i32
    return %c0_i32, %c0_i32_0 : i32, i32
  }
  func.func @transform_2(%arg0: i32) -> (i32, i32) {
    %c0_i32 = arith.constant 0 : i32
    %c0_i32_0 = arith.constant 0 : i32
    %c0_i32_1 = arith.constant 0 : i32
    return %c0_i32, %c0_i32_0 : i32, i32
  }
  func.func @transform_3(%arg0: i32) -> (i32, i32) {
    %c0_i32 = arith.constant 0 : i32
    %c0_i32_0 = arith.constant 0 : i32
    %c0_i32_1 = arith.constant 0 : i32
    return %c0_i32, %c0_i32_0 : i32, i32
  }
  func.func @transform_4(%arg0: i32) -> (i32, i32) {
    %c0_i32 = arith.constant 0 : i32
    %c0_i32_0 = arith.constant 0 : i32
    return %arg0, %c0_i32 : i32, i32
  }
}

module attributes {stable_mosaic.version = 11 : i64} {
  func.func @_dwconv_bn_kernel(%arg0: i32, %arg1: memref<1x6x6x100xbf16, #tpu.memory_space<vmem>>, %arg2: memref<9x1x1x100xf32, #tpu.memory_space<vmem>>, %arg3: memref<1x1x100xf32, #tpu.memory_space<vmem>>, %arg4: memref<1x1x100xf32, #tpu.memory_space<vmem>>, %arg5: memref<1x4x4x100xbf16, #tpu.memory_space<vmem>>) attributes {dimension_semantics = [#tpu.dimension_semantics<parallel>], iteration_bounds = array<i64: 2>, scalar_prefetch = 0 : i64, scratch_operands = 0 : i64, tpu.core_type = #tpu.core_type<tc>, window_params = [{transform_indices = @transform_0, window_bounds = array<i64: 1, 6, 6, 100>}, {pipeline_mode = #tpu.pipeline_mode<synchronous>, transform_indices = @transform_1, window_bounds = array<i64: 9, 1, 1, 100>}, {pipeline_mode = #tpu.pipeline_mode<synchronous>, transform_indices = @transform_2, window_bounds = array<i64: 1, 1, 100>}, {pipeline_mode = #tpu.pipeline_mode<synchronous>, transform_indices = @transform_3, window_bounds = array<i64: 1, 1, 100>}, {transform_indices = @transform_4, window_bounds = array<i64: 1, 4, 4, 100>}]} {
    %c0 = arith.constant 0 : index
    %c0_0 = arith.constant 0 : index
    %c0_1 = arith.constant 0 : index
    %c0_2 = arith.constant 0 : index
    %0 = vector.load %arg2[%c0, %c0_0, %c0_1, %c0_2] : memref<9x1x1x100xf32, #tpu.memory_space<vmem>>, vector<9x1x1x100xf32>
    %c0_3 = arith.constant 0 : index
    %c0_4 = arith.constant 0 : index
    %c0_5 = arith.constant 0 : index
    %c0_6 = arith.constant 0 : index
    %1 = vector.load %arg1[%c0_3, %c0_4, %c0_5, %c0_6] : memref<1x6x6x100xbf16, #tpu.memory_space<vmem>>, vector<1x4x4x100xbf16>
    %2 = vector.shape_cast %1 : vector<1x4x4x100xbf16> to vector<4x4x100xbf16>
    %3 = arith.extf %2 : vector<4x4x100xbf16> to vector<4x4x100xf32>
    %4 = vector.extract_strided_slice %0 {offsets = [0, 0, 0, 0], sizes = [1, 1, 1, 100], strides = [1, 1, 1, 1]} : vector<9x1x1x100xf32> to vector<1x1x1x100xf32>
    %5 = vector.shape_cast %4 : vector<1x1x1x100xf32> to vector<1x1x100xf32>
    %6 = vector.broadcast %5 : vector<1x1x100xf32> to vector<4x4x100xf32>
    %7 = arith.mulf %3, %6 : vector<4x4x100xf32>
    %c0_7 = arith.constant 0 : index
    %c0_8 = arith.constant 0 : index
    %c1 = arith.constant 1 : index
    %c0_9 = arith.constant 0 : index
    %8 = vector.load %arg1[%c0_7, %c0_8, %c1, %c0_9] : memref<1x6x6x100xbf16, #tpu.memory_space<vmem>>, vector<1x4x4x100xbf16>
    %9 = vector.shape_cast %8 : vector<1x4x4x100xbf16> to vector<4x4x100xbf16>
    %10 = arith.extf %9 : vector<4x4x100xbf16> to vector<4x4x100xf32>
    %11 = vector.extract_strided_slice %0 {offsets = [1, 0, 0, 0], sizes = [1, 1, 1, 100], strides = [1, 1, 1, 1]} : vector<9x1x1x100xf32> to vector<1x1x1x100xf32>
    %12 = vector.shape_cast %11 : vector<1x1x1x100xf32> to vector<1x1x100xf32>
    %13 = vector.broadcast %12 : vector<1x1x100xf32> to vector<4x4x100xf32>
    %14 = arith.mulf %10, %13 : vector<4x4x100xf32>
    %15 = arith.addf %7, %14 : vector<4x4x100xf32>
    %c0_10 = arith.constant 0 : index
    %c0_11 = arith.constant 0 : index
    %c2 = arith.constant 2 : index
    %c0_12 = arith.constant 0 : index
    %16 = vector.load %arg1[%c0_10, %c0_11, %c2, %c0_12] : memref<1x6x6x100xbf16, #tpu.memory_space<vmem>>, vector<1x4x4x100xbf16>
    %17 = vector.shape_cast %16 : vector<1x4x4x100xbf16> to vector<4x4x100xbf16>
    %18 = arith.extf %17 : vector<4x4x100xbf16> to vector<4x4x100xf32>
    %19 = vector.extract_strided_slice %0 {offsets = [2, 0, 0, 0], sizes = [1, 1, 1, 100], strides = [1, 1, 1, 1]} : vector<9x1x1x100xf32> to vector<1x1x1x100xf32>
    %20 = vector.shape_cast %19 : vector<1x1x1x100xf32> to vector<1x1x100xf32>
    %21 = vector.broadcast %20 : vector<1x1x100xf32> to vector<4x4x100xf32>
    %22 = arith.mulf %18, %21 : vector<4x4x100xf32>
    %23 = arith.addf %15, %22 : vector<4x4x100xf32>
    %c0_13 = arith.constant 0 : index
    %c1_14 = arith.constant 1 : index
    %c0_15 = arith.constant 0 : index
    %c0_16 = arith.constant 0 : index
    %24 = vector.load %arg1[%c0_13, %c1_14, %c0_15, %c0_16] : memref<1x6x6x100xbf16, #tpu.memory_space<vmem>>, vector<1x4x4x100xbf16>
    %25 = vector.shape_cast %24 : vector<1x4x4x100xbf16> to vector<4x4x100xbf16>
    %26 = arith.extf %25 : vector<4x4x100xbf16> to vector<4x4x100xf32>
    %27 = vector.extract_strided_slice %0 {offsets = [3, 0, 0, 0], sizes = [1, 1, 1, 100], strides = [1, 1, 1, 1]} : vector<9x1x1x100xf32> to vector<1x1x1x100xf32>
    %28 = vector.shape_cast %27 : vector<1x1x1x100xf32> to vector<1x1x100xf32>
    %29 = vector.broadcast %28 : vector<1x1x100xf32> to vector<4x4x100xf32>
    %30 = arith.mulf %26, %29 : vector<4x4x100xf32>
    %31 = arith.addf %23, %30 : vector<4x4x100xf32>
    %c0_17 = arith.constant 0 : index
    %c1_18 = arith.constant 1 : index
    %c1_19 = arith.constant 1 : index
    %c0_20 = arith.constant 0 : index
    %32 = vector.load %arg1[%c0_17, %c1_18, %c1_19, %c0_20] : memref<1x6x6x100xbf16, #tpu.memory_space<vmem>>, vector<1x4x4x100xbf16>
    %33 = vector.shape_cast %32 : vector<1x4x4x100xbf16> to vector<4x4x100xbf16>
    %34 = arith.extf %33 : vector<4x4x100xbf16> to vector<4x4x100xf32>
    %35 = vector.extract_strided_slice %0 {offsets = [4, 0, 0, 0], sizes = [1, 1, 1, 100], strides = [1, 1, 1, 1]} : vector<9x1x1x100xf32> to vector<1x1x1x100xf32>
    %36 = vector.shape_cast %35 : vector<1x1x1x100xf32> to vector<1x1x100xf32>
    %37 = vector.broadcast %36 : vector<1x1x100xf32> to vector<4x4x100xf32>
    %38 = arith.mulf %34, %37 : vector<4x4x100xf32>
    %39 = arith.addf %31, %38 : vector<4x4x100xf32>
    %c0_21 = arith.constant 0 : index
    %c1_22 = arith.constant 1 : index
    %c2_23 = arith.constant 2 : index
    %c0_24 = arith.constant 0 : index
    %40 = vector.load %arg1[%c0_21, %c1_22, %c2_23, %c0_24] : memref<1x6x6x100xbf16, #tpu.memory_space<vmem>>, vector<1x4x4x100xbf16>
    %41 = vector.shape_cast %40 : vector<1x4x4x100xbf16> to vector<4x4x100xbf16>
    %42 = arith.extf %41 : vector<4x4x100xbf16> to vector<4x4x100xf32>
    %43 = vector.extract_strided_slice %0 {offsets = [5, 0, 0, 0], sizes = [1, 1, 1, 100], strides = [1, 1, 1, 1]} : vector<9x1x1x100xf32> to vector<1x1x1x100xf32>
    %44 = vector.shape_cast %43 : vector<1x1x1x100xf32> to vector<1x1x100xf32>
    %45 = vector.broadcast %44 : vector<1x1x100xf32> to vector<4x4x100xf32>
    %46 = arith.mulf %42, %45 : vector<4x4x100xf32>
    %47 = arith.addf %39, %46 : vector<4x4x100xf32>
    %c0_25 = arith.constant 0 : index
    %c2_26 = arith.constant 2 : index
    %c0_27 = arith.constant 0 : index
    %c0_28 = arith.constant 0 : index
    %48 = vector.load %arg1[%c0_25, %c2_26, %c0_27, %c0_28] : memref<1x6x6x100xbf16, #tpu.memory_space<vmem>>, vector<1x4x4x100xbf16>
    %49 = vector.shape_cast %48 : vector<1x4x4x100xbf16> to vector<4x4x100xbf16>
    %50 = arith.extf %49 : vector<4x4x100xbf16> to vector<4x4x100xf32>
    %51 = vector.extract_strided_slice %0 {offsets = [6, 0, 0, 0], sizes = [1, 1, 1, 100], strides = [1, 1, 1, 1]} : vector<9x1x1x100xf32> to vector<1x1x1x100xf32>
    %52 = vector.shape_cast %51 : vector<1x1x1x100xf32> to vector<1x1x100xf32>
    %53 = vector.broadcast %52 : vector<1x1x100xf32> to vector<4x4x100xf32>
    %54 = arith.mulf %50, %53 : vector<4x4x100xf32>
    %55 = arith.addf %47, %54 : vector<4x4x100xf32>
    %c0_29 = arith.constant 0 : index
    %c2_30 = arith.constant 2 : index
    %c1_31 = arith.constant 1 : index
    %c0_32 = arith.constant 0 : index
    %56 = vector.load %arg1[%c0_29, %c2_30, %c1_31, %c0_32] : memref<1x6x6x100xbf16, #tpu.memory_space<vmem>>, vector<1x4x4x100xbf16>
    %57 = vector.shape_cast %56 : vector<1x4x4x100xbf16> to vector<4x4x100xbf16>
    %58 = arith.extf %57 : vector<4x4x100xbf16> to vector<4x4x100xf32>
    %59 = vector.extract_strided_slice %0 {offsets = [7, 0, 0, 0], sizes = [1, 1, 1, 100], strides = [1, 1, 1, 1]} : vector<9x1x1x100xf32> to vector<1x1x1x100xf32>
    %60 = vector.shape_cast %59 : vector<1x1x1x100xf32> to vector<1x1x100xf32>
    %61 = vector.broadcast %60 : vector<1x1x100xf32> to vector<4x4x100xf32>
    %62 = arith.mulf %58, %61 : vector<4x4x100xf32>
    %63 = arith.addf %55, %62 : vector<4x4x100xf32>
    %c0_33 = arith.constant 0 : index
    %c2_34 = arith.constant 2 : index
    %c2_35 = arith.constant 2 : index
    %c0_36 = arith.constant 0 : index
    %64 = vector.load %arg1[%c0_33, %c2_34, %c2_35, %c0_36] : memref<1x6x6x100xbf16, #tpu.memory_space<vmem>>, vector<1x4x4x100xbf16>
    %65 = vector.shape_cast %64 : vector<1x4x4x100xbf16> to vector<4x4x100xbf16>
    %66 = arith.extf %65 : vector<4x4x100xbf16> to vector<4x4x100xf32>
    %67 = vector.extract_strided_slice %0 {offsets = [8, 0, 0, 0], sizes = [1, 1, 1, 100], strides = [1, 1, 1, 1]} : vector<9x1x1x100xf32> to vector<1x1x1x100xf32>
    %68 = vector.shape_cast %67 : vector<1x1x1x100xf32> to vector<1x1x100xf32>
    %69 = vector.broadcast %68 : vector<1x1x100xf32> to vector<4x4x100xf32>
    %70 = arith.mulf %66, %69 : vector<4x4x100xf32>
    %71 = arith.addf %63, %70 : vector<4x4x100xf32>
    %c0_37 = arith.constant 0 : index
    %c0_38 = arith.constant 0 : index
    %c0_39 = arith.constant 0 : index
    %72 = vector.load %arg3[%c0_37, %c0_38, %c0_39] : memref<1x1x100xf32, #tpu.memory_space<vmem>>, vector<1x1x100xf32>
    %73 = vector.broadcast %72 : vector<1x1x100xf32> to vector<4x4x100xf32>
    %74 = arith.mulf %71, %73 : vector<4x4x100xf32>
    %c0_40 = arith.constant 0 : index
    %c0_41 = arith.constant 0 : index
    %c0_42 = arith.constant 0 : index
    %75 = vector.load %arg4[%c0_40, %c0_41, %c0_42] : memref<1x1x100xf32, #tpu.memory_space<vmem>>, vector<1x1x100xf32>
    %76 = vector.broadcast %75 : vector<1x1x100xf32> to vector<4x4x100xf32>
    %77 = arith.addf %74, %76 : vector<4x4x100xf32>
    %78 = arith.truncf %77 : vector<4x4x100xf32> to vector<4x4x100xbf16>
    %c0_43 = arith.constant 0 : index
    %c0_44 = arith.constant 0 : index
    %c0_45 = arith.constant 0 : index
    %c0_46 = arith.constant 0 : index
    %79 = vector.load %arg5[%c0_43, %c0_44, %c0_45, %c0_46] : memref<1x4x4x100xbf16, #tpu.memory_space<vmem>>, vector<1x4x4x100xbf16>
    %80 = vector.shape_cast %79 : vector<1x4x4x100xbf16> to vector<4x4x100xbf16>
    %81 = vector.shape_cast %78 : vector<4x4x100xbf16> to vector<1x4x4x100xbf16>
    tpu.vector_store %arg5[%c0_43, %c0_44, %c0_45, %c0_46], %81 {strides = array<i32>} : memref<1x4x4x100xbf16, #tpu.memory_space<vmem>>, vector<1x4x4x100xbf16>,
    return
  }
  func.func @transform_0(%arg0: i32) -> (i32, i32, i32, i32) {
    %c0_i32 = arith.constant 0 : i32
    %c0_i32_0 = arith.constant 0 : i32
    %c0_i32_1 = arith.constant 0 : i32
    %c0_i32_2 = arith.constant 0 : i32
    return %arg0, %c0_i32, %c0_i32_0, %c0_i32_1 : i32, i32, i32, i32
  }
  func.func @transform_1(%arg0: i32) -> (i32, i32, i32, i32) {
    %c0_i32 = arith.constant 0 : i32
    %c0_i32_0 = arith.constant 0 : i32
    %c0_i32_1 = arith.constant 0 : i32
    %c0_i32_2 = arith.constant 0 : i32
    %c0_i32_3 = arith.constant 0 : i32
    return %c0_i32, %c0_i32_0, %c0_i32_1, %c0_i32_2 : i32, i32, i32, i32
  }
  func.func @transform_2(%arg0: i32) -> (i32, i32, i32) {
    %c0_i32 = arith.constant 0 : i32
    %c0_i32_0 = arith.constant 0 : i32
    %c0_i32_1 = arith.constant 0 : i32
    %c0_i32_2 = arith.constant 0 : i32
    return %c0_i32, %c0_i32_0, %c0_i32_1 : i32, i32, i32
  }
  func.func @transform_3(%arg0: i32) -> (i32, i32, i32) {
    %c0_i32 = arith.constant 0 : i32
    %c0_i32_0 = arith.constant 0 : i32
    %c0_i32_1 = arith.constant 0 : i32
    %c0_i32_2 = arith.constant 0 : i32
    return %c0_i32, %c0_i32_0, %c0_i32_1 : i32, i32, i32
  }
  func.func @transform_4(%arg0: i32) -> (i32, i32, i32, i32) {
    %c0_i32 = arith.constant 0 : i32
    %c0_i32_0 = arith.constant 0 : i32
    %c0_i32_1 = arith.constant 0 : i32
    %c0_i32_2 = arith.constant 0 : i32
    return %arg0, %c0_i32, %c0_i32_0, %c0_i32_1 : i32, i32, i32, i32
  }
}

module attributes {stable_mosaic.version = 11 : i64} {
  func.func @_matmul_bn_kernel(%arg0: i32, %arg1: memref<32x88xbf16, #tpu.memory_space<vmem>>, %arg2: memref<88x88xbf16, #tpu.memory_space<vmem>>, %arg3: memref<1x88xf32, #tpu.memory_space<vmem>>, %arg4: memref<1x88xf32, #tpu.memory_space<vmem>>, %arg5: memref<32x88xbf16, #tpu.memory_space<vmem>>) attributes {dimension_semantics = [#tpu.dimension_semantics<parallel>], iteration_bounds = array<i64: 1>, scalar_prefetch = 0 : i64, scratch_operands = 0 : i64, tpu.core_type = #tpu.core_type<tc>, window_params = [{transform_indices = @transform_0, window_bounds = array<i64: 32, 88>}, {pipeline_mode = #tpu.pipeline_mode<synchronous>, transform_indices = @transform_1, window_bounds = array<i64: 88, 88>}, {pipeline_mode = #tpu.pipeline_mode<synchronous>, transform_indices = @transform_2, window_bounds = array<i64: 1, 88>}, {pipeline_mode = #tpu.pipeline_mode<synchronous>, transform_indices = @transform_3, window_bounds = array<i64: 1, 88>}, {transform_indices = @transform_4, window_bounds = array<i64: 32, 88>}]} {
    %c0 = arith.constant 0 : index
    %c0_0 = arith.constant 0 : index
    %0 = vector.load %arg1[%c0, %c0_0] : memref<32x88xbf16, #tpu.memory_space<vmem>>, vector<32x88xbf16>
    %c0_1 = arith.constant 0 : index
    %c0_2 = arith.constant 0 : index
    %1 = vector.load %arg2[%c0_1, %c0_2] : memref<88x88xbf16, #tpu.memory_space<vmem>>, vector<88x88xbf16>
    %cst = arith.constant dense<0.000000e+00> : vector<32x88xf32>
    %2 = tpu.matmul %0, %1, %cst {dimension_numbers = #tpu.dot_dimension_numbers<[1], [0], [0], [1], [0, 0, 1, 1], [], []>} : vector<32x88xbf16>, vector<88x88xbf16>, vector<32x88xf32> -> vector<32x88xf32>
    %c0_3 = arith.constant 0 : index
    %c0_4 = arith.constant 0 : index
    %3 = vector.load %arg3[%c0_3, %c0_4] : memref<1x88xf32, #tpu.memory_space<vmem>>, vector<1x88xf32>
    %4 = vector.broadcast %3 : vector<1x88xf32> to vector<32x88xf32>
    %5 = arith.mulf %2, %4 : vector<32x88xf32>
    %c0_5 = arith.constant 0 : index
    %c0_6 = arith.constant 0 : index
    %6 = vector.load %arg4[%c0_5, %c0_6] : memref<1x88xf32, #tpu.memory_space<vmem>>, vector<1x88xf32>
    %7 = vector.broadcast %6 : vector<1x88xf32> to vector<32x88xf32>
    %8 = arith.addf %5, %7 : vector<32x88xf32>
    %cst_7 = arith.constant 0.000000e+00 : f32
    %9 = vector.broadcast %cst_7 : f32 to vector<32x88xf32>
    %10 = arith.maximumf %8, %9 : vector<32x88xf32>
    %11 = arith.truncf %10 : vector<32x88xf32> to vector<32x88xbf16>
    %c0_8 = arith.constant 0 : index
    %c0_9 = arith.constant 0 : index
    %12 = vector.load %arg5[%c0_8, %c0_9] : memref<32x88xbf16, #tpu.memory_space<vmem>>, vector<32x88xbf16>
    tpu.vector_store %arg5[%c0_8, %c0_9], %11 {strides = array<i32>} : memref<32x88xbf16, #tpu.memory_space<vmem>>, vector<32x88xbf16>,
    return
  }
  func.func @transform_0(%arg0: i32) -> (i32, i32) {
    %c0_i32 = arith.constant 0 : i32
    %c0_i32_0 = arith.constant 0 : i32
    return %arg0, %c0_i32 : i32, i32
  }
  func.func @transform_1(%arg0: i32) -> (i32, i32) {
    %c0_i32 = arith.constant 0 : i32
    %c0_i32_0 = arith.constant 0 : i32
    %c0_i32_1 = arith.constant 0 : i32
    return %c0_i32, %c0_i32_0 : i32, i32
  }
  func.func @transform_2(%arg0: i32) -> (i32, i32) {
    %c0_i32 = arith.constant 0 : i32
    %c0_i32_0 = arith.constant 0 : i32
    %c0_i32_1 = arith.constant 0 : i32
    return %c0_i32, %c0_i32_0 : i32, i32
  }
  func.func @transform_3(%arg0: i32) -> (i32, i32) {
    %c0_i32 = arith.constant 0 : i32
    %c0_i32_0 = arith.constant 0 : i32
    %c0_i32_1 = arith.constant 0 : i32
    return %c0_i32, %c0_i32_0 : i32, i32
  }
  func.func @transform_4(%arg0: i32) -> (i32, i32) {
    %c0_i32 = arith.constant 0 : i32
    %c0_i32_0 = arith.constant 0 : i32
    return %arg0, %c0_i32 : i32, i32
  }
}

module attributes {stable_mosaic.version = 11 : i64} {
  func.func @_matmul_bn_res_kernel(%arg0: i32, %arg1: memref<32x100xbf16, #tpu.memory_space<vmem>>, %arg2: memref<100x100xbf16, #tpu.memory_space<vmem>>, %arg3: memref<1x100xf32, #tpu.memory_space<vmem>>, %arg4: memref<1x100xf32, #tpu.memory_space<vmem>>, %arg5: memref<32x100xbf16, #tpu.memory_space<vmem>>, %arg6: memref<32x100xbf16, #tpu.memory_space<vmem>>) attributes {dimension_semantics = [#tpu.dimension_semantics<parallel>], iteration_bounds = array<i64: 1>, scalar_prefetch = 0 : i64, scratch_operands = 0 : i64, tpu.core_type = #tpu.core_type<tc>, window_params = [{transform_indices = @transform_0, window_bounds = array<i64: 32, 100>}, {pipeline_mode = #tpu.pipeline_mode<synchronous>, transform_indices = @transform_1, window_bounds = array<i64: 100, 100>}, {pipeline_mode = #tpu.pipeline_mode<synchronous>, transform_indices = @transform_2, window_bounds = array<i64: 1, 100>}, {pipeline_mode = #tpu.pipeline_mode<synchronous>, transform_indices = @transform_3, window_bounds = array<i64: 1, 100>}, {transform_indices = @transform_4, window_bounds = array<i64: 32, 100>}, {transform_indices = @transform_5, window_bounds = array<i64: 32, 100>}]} {
    %c0 = arith.constant 0 : index
    %c0_0 = arith.constant 0 : index
    %0 = vector.load %arg1[%c0, %c0_0] : memref<32x100xbf16, #tpu.memory_space<vmem>>, vector<32x100xbf16>
    %c0_1 = arith.constant 0 : index
    %c0_2 = arith.constant 0 : index
    %1 = vector.load %arg2[%c0_1, %c0_2] : memref<100x100xbf16, #tpu.memory_space<vmem>>, vector<100x100xbf16>
    %cst = arith.constant dense<0.000000e+00> : vector<32x100xf32>
    %2 = tpu.matmul %0, %1, %cst {dimension_numbers = #tpu.dot_dimension_numbers<[1], [0], [0], [1], [0, 0, 1, 1], [], []>} : vector<32x100xbf16>, vector<100x100xbf16>, vector<32x100xf32> -> vector<32x100xf32>
    %c0_3 = arith.constant 0 : index
    %c0_4 = arith.constant 0 : index
    %3 = vector.load %arg3[%c0_3, %c0_4] : memref<1x100xf32, #tpu.memory_space<vmem>>, vector<1x100xf32>
    %4 = vector.broadcast %3 : vector<1x100xf32> to vector<32x100xf32>
    %5 = arith.mulf %2, %4 : vector<32x100xf32>
    %c0_5 = arith.constant 0 : index
    %c0_6 = arith.constant 0 : index
    %6 = vector.load %arg4[%c0_5, %c0_6] : memref<1x100xf32, #tpu.memory_space<vmem>>, vector<1x100xf32>
    %7 = vector.broadcast %6 : vector<1x100xf32> to vector<32x100xf32>
    %8 = arith.addf %5, %7 : vector<32x100xf32>
    %c0_7 = arith.constant 0 : index
    %c0_8 = arith.constant 0 : index
    %9 = vector.load %arg5[%c0_7, %c0_8] : memref<32x100xbf16, #tpu.memory_space<vmem>>, vector<32x100xbf16>
    %10 = arith.extf %9 : vector<32x100xbf16> to vector<32x100xf32>
    %11 = arith.addf %8, %10 : vector<32x100xf32>
    %cst_9 = arith.constant 0.000000e+00 : f32
    %12 = vector.broadcast %cst_9 : f32 to vector<32x100xf32>
    %13 = arith.maximumf %11, %12 : vector<32x100xf32>
    %14 = arith.truncf %13 : vector<32x100xf32> to vector<32x100xbf16>
    %c0_10 = arith.constant 0 : index
    %c0_11 = arith.constant 0 : index
    %15 = vector.load %arg6[%c0_10, %c0_11] : memref<32x100xbf16, #tpu.memory_space<vmem>>, vector<32x100xbf16>
    tpu.vector_store %arg6[%c0_10, %c0_11], %14 {strides = array<i32>} : memref<32x100xbf16, #tpu.memory_space<vmem>>, vector<32x100xbf16>,
    return
  }
  func.func @transform_0(%arg0: i32) -> (i32, i32) {
    %c0_i32 = arith.constant 0 : i32
    %c0_i32_0 = arith.constant 0 : i32
    return %arg0, %c0_i32 : i32, i32
  }
  func.func @transform_1(%arg0: i32) -> (i32, i32) {
    %c0_i32 = arith.constant 0 : i32
    %c0_i32_0 = arith.constant 0 : i32
    %c0_i32_1 = arith.constant 0 : i32
    return %c0_i32, %c0_i32_0 : i32, i32
  }
  func.func @transform_2(%arg0: i32) -> (i32, i32) {
    %c0_i32 = arith.constant 0 : i32
    %c0_i32_0 = arith.constant 0 : i32
    %c0_i32_1 = arith.constant 0 : i32
    return %c0_i32, %c0_i32_0 : i32, i32
  }
  func.func @transform_3(%arg0: i32) -> (i32, i32) {
    %c0_i32 = arith.constant 0 : i32
    %c0_i32_0 = arith.constant 0 : i32
    %c0_i32_1 = arith.constant 0 : i32
    return %c0_i32, %c0_i32_0 : i32, i32
  }
  func.func @transform_4(%arg0: i32) -> (i32, i32) {
    %c0_i32 = arith.constant 0 : i32
    %c0_i32_0 = arith.constant 0 : i32
    return %arg0, %c0_i32 : i32, i32
  }
  func.func @transform_5(%arg0: i32) -> (i32, i32) {
    %c0_i32 = arith.constant 0 : i32
    %c0_i32_0 = arith.constant 0 : i32
    return %arg0, %c0_i32 : i32, i32
  }
}

module attributes {stable_mosaic.version = 11 : i64} {
  func.func @_pool3x3_kernel(%arg0: i32, %arg1: memref<1x6x6x100xbf16, #tpu.memory_space<vmem>>, %arg2: memref<1x4x4x100xbf16, #tpu.memory_space<vmem>>) attributes {dimension_semantics = [#tpu.dimension_semantics<parallel>], iteration_bounds = array<i64: 2>, scalar_prefetch = 0 : i64, scratch_operands = 0 : i64, tpu.core_type = #tpu.core_type<tc>, window_params = [{transform_indices = @transform_0, window_bounds = array<i64: 1, 6, 6, 100>}, {transform_indices = @transform_1, window_bounds = array<i64: 1, 4, 4, 100>}]} {
    %c0 = arith.constant 0 : index
    %c0_0 = arith.constant 0 : index
    %c0_1 = arith.constant 0 : index
    %c0_2 = arith.constant 0 : index
    %0 = vector.load %arg1[%c0, %c0_0, %c0_1, %c0_2] : memref<1x6x6x100xbf16, #tpu.memory_space<vmem>>, vector<1x4x4x100xbf16>
    %1 = vector.shape_cast %0 : vector<1x4x4x100xbf16> to vector<4x4x100xbf16>
    %2 = arith.extf %1 : vector<4x4x100xbf16> to vector<4x4x100xf32>
    %c0_3 = arith.constant 0 : index
    %c0_4 = arith.constant 0 : index
    %c1 = arith.constant 1 : index
    %c0_5 = arith.constant 0 : index
    %3 = vector.load %arg1[%c0_3, %c0_4, %c1, %c0_5] : memref<1x6x6x100xbf16, #tpu.memory_space<vmem>>, vector<1x4x4x100xbf16>
    %4 = vector.shape_cast %3 : vector<1x4x4x100xbf16> to vector<4x4x100xbf16>
    %5 = arith.extf %4 : vector<4x4x100xbf16> to vector<4x4x100xf32>
    %6 = arith.addf %2, %5 : vector<4x4x100xf32>
    %c0_6 = arith.constant 0 : index
    %c0_7 = arith.constant 0 : index
    %c2 = arith.constant 2 : index
    %c0_8 = arith.constant 0 : index
    %7 = vector.load %arg1[%c0_6, %c0_7, %c2, %c0_8] : memref<1x6x6x100xbf16, #tpu.memory_space<vmem>>, vector<1x4x4x100xbf16>
    %8 = vector.shape_cast %7 : vector<1x4x4x100xbf16> to vector<4x4x100xbf16>
    %9 = arith.extf %8 : vector<4x4x100xbf16> to vector<4x4x100xf32>
    %10 = arith.addf %6, %9 : vector<4x4x100xf32>
    %c0_9 = arith.constant 0 : index
    %c1_10 = arith.constant 1 : index
    %c0_11 = arith.constant 0 : index
    %c0_12 = arith.constant 0 : index
    %11 = vector.load %arg1[%c0_9, %c1_10, %c0_11, %c0_12] : memref<1x6x6x100xbf16, #tpu.memory_space<vmem>>, vector<1x4x4x100xbf16>
    %12 = vector.shape_cast %11 : vector<1x4x4x100xbf16> to vector<4x4x100xbf16>
    %13 = arith.extf %12 : vector<4x4x100xbf16> to vector<4x4x100xf32>
    %14 = arith.addf %10, %13 : vector<4x4x100xf32>
    %c0_13 = arith.constant 0 : index
    %c1_14 = arith.constant 1 : index
    %c1_15 = arith.constant 1 : index
    %c0_16 = arith.constant 0 : index
    %15 = vector.load %arg1[%c0_13, %c1_14, %c1_15, %c0_16] : memref<1x6x6x100xbf16, #tpu.memory_space<vmem>>, vector<1x4x4x100xbf16>
    %16 = vector.shape_cast %15 : vector<1x4x4x100xbf16> to vector<4x4x100xbf16>
    %17 = arith.extf %16 : vector<4x4x100xbf16> to vector<4x4x100xf32>
    %18 = arith.addf %14, %17 : vector<4x4x100xf32>
    %c0_17 = arith.constant 0 : index
    %c1_18 = arith.constant 1 : index
    %c2_19 = arith.constant 2 : index
    %c0_20 = arith.constant 0 : index
    %19 = vector.load %arg1[%c0_17, %c1_18, %c2_19, %c0_20] : memref<1x6x6x100xbf16, #tpu.memory_space<vmem>>, vector<1x4x4x100xbf16>
    %20 = vector.shape_cast %19 : vector<1x4x4x100xbf16> to vector<4x4x100xbf16>
    %21 = arith.extf %20 : vector<4x4x100xbf16> to vector<4x4x100xf32>
    %22 = arith.addf %18, %21 : vector<4x4x100xf32>
    %c0_21 = arith.constant 0 : index
    %c2_22 = arith.constant 2 : index
    %c0_23 = arith.constant 0 : index
    %c0_24 = arith.constant 0 : index
    %23 = vector.load %arg1[%c0_21, %c2_22, %c0_23, %c0_24] : memref<1x6x6x100xbf16, #tpu.memory_space<vmem>>, vector<1x4x4x100xbf16>
    %24 = vector.shape_cast %23 : vector<1x4x4x100xbf16> to vector<4x4x100xbf16>
    %25 = arith.extf %24 : vector<4x4x100xbf16> to vector<4x4x100xf32>
    %26 = arith.addf %22, %25 : vector<4x4x100xf32>
    %c0_25 = arith.constant 0 : index
    %c2_26 = arith.constant 2 : index
    %c1_27 = arith.constant 1 : index
    %c0_28 = arith.constant 0 : index
    %27 = vector.load %arg1[%c0_25, %c2_26, %c1_27, %c0_28] : memref<1x6x6x100xbf16, #tpu.memory_space<vmem>>, vector<1x4x4x100xbf16>
    %28 = vector.shape_cast %27 : vector<1x4x4x100xbf16> to vector<4x4x100xbf16>
    %29 = arith.extf %28 : vector<4x4x100xbf16> to vector<4x4x100xf32>
    %30 = arith.addf %26, %29 : vector<4x4x100xf32>
    %c0_29 = arith.constant 0 : index
    %c2_30 = arith.constant 2 : index
    %c2_31 = arith.constant 2 : index
    %c0_32 = arith.constant 0 : index
    %31 = vector.load %arg1[%c0_29, %c2_30, %c2_31, %c0_32] : memref<1x6x6x100xbf16, #tpu.memory_space<vmem>>, vector<1x4x4x100xbf16>
    %32 = vector.shape_cast %31 : vector<1x4x4x100xbf16> to vector<4x4x100xbf16>
    %33 = arith.extf %32 : vector<4x4x100xbf16> to vector<4x4x100xf32>
    %34 = arith.addf %30, %33 : vector<4x4x100xf32>
    %cst = arith.constant 0.111111112 : f32
    %35 = vector.broadcast %cst : f32 to vector<4x4x100xf32>
    %36 = arith.mulf %34, %35 : vector<4x4x100xf32>
    %cst_33 = arith.constant 0.000000e+00 : f32
    %37 = vector.broadcast %cst_33 : f32 to vector<4x4x100xf32>
    %38 = arith.maximumf %36, %37 : vector<4x4x100xf32>
    %39 = arith.truncf %38 : vector<4x4x100xf32> to vector<4x4x100xbf16>
    %c0_34 = arith.constant 0 : index
    %c0_35 = arith.constant 0 : index
    %c0_36 = arith.constant 0 : index
    %c0_37 = arith.constant 0 : index
    %40 = vector.load %arg2[%c0_34, %c0_35, %c0_36, %c0_37] : memref<1x4x4x100xbf16, #tpu.memory_space<vmem>>, vector<1x4x4x100xbf16>
    %41 = vector.shape_cast %40 : vector<1x4x4x100xbf16> to vector<4x4x100xbf16>
    %42 = vector.shape_cast %39 : vector<4x4x100xbf16> to vector<1x4x4x100xbf16>
    tpu.vector_store %arg2[%c0_34, %c0_35, %c0_36, %c0_37], %42 {strides = array<i32>} : memref<1x4x4x100xbf16, #tpu.memory_space<vmem>>, vector<1x4x4x100xbf16>,
    return
  }
  func.func @transform_0(%arg0: i32) -> (i32, i32, i32, i32) {
    %c0_i32 = arith.constant 0 : i32
    %c0_i32_0 = arith.constant 0 : i32
    %c0_i32_1 = arith.constant 0 : i32
    %c0_i32_2 = arith.constant 0 : i32
    return %arg0, %c0_i32, %c0_i32_0, %c0_i32_1 : i32, i32, i32, i32
  }
  func.func @transform_1(%arg0: i32) -> (i32, i32, i32, i32) {
    %c0_i32 = arith.constant 0 : i32
    %c0_i32_0 = arith.constant 0 : i32
    %c0_i32_1 = arith.constant 0 : i32
    %c0_i32_2 = arith.constant 0 : i32
    return %arg0, %c0_i32, %c0_i32_0, %c0_i32_1 : i32, i32, i32, i32
  }
}

module attributes {stable_mosaic.version = 11 : i64} {
  func.func @_matmul_bn_kernel(%arg0: i32, %arg1: memref<8x100xbf16, #tpu.memory_space<vmem>>, %arg2: memref<100x100xbf16, #tpu.memory_space<vmem>>, %arg3: memref<1x100xf32, #tpu.memory_space<vmem>>, %arg4: memref<1x100xf32, #tpu.memory_space<vmem>>, %arg5: memref<8x100xbf16, #tpu.memory_space<vmem>>) attributes {dimension_semantics = [#tpu.dimension_semantics<parallel>], iteration_bounds = array<i64: 1>, scalar_prefetch = 0 : i64, scratch_operands = 0 : i64, tpu.core_type = #tpu.core_type<tc>, window_params = [{transform_indices = @transform_0, window_bounds = array<i64: 8, 100>}, {pipeline_mode = #tpu.pipeline_mode<synchronous>, transform_indices = @transform_1, window_bounds = array<i64: 100, 100>}, {pipeline_mode = #tpu.pipeline_mode<synchronous>, transform_indices = @transform_2, window_bounds = array<i64: 1, 100>}, {pipeline_mode = #tpu.pipeline_mode<synchronous>, transform_indices = @transform_3, window_bounds = array<i64: 1, 100>}, {transform_indices = @transform_4, window_bounds = array<i64: 8, 100>}]} {
    %c0 = arith.constant 0 : index
    %c0_0 = arith.constant 0 : index
    %0 = vector.load %arg1[%c0, %c0_0] : memref<8x100xbf16, #tpu.memory_space<vmem>>, vector<8x100xbf16>
    %c0_1 = arith.constant 0 : index
    %c0_2 = arith.constant 0 : index
    %1 = vector.load %arg2[%c0_1, %c0_2] : memref<100x100xbf16, #tpu.memory_space<vmem>>, vector<100x100xbf16>
    %cst = arith.constant dense<0.000000e+00> : vector<8x100xf32>
    %2 = tpu.matmul %0, %1, %cst {dimension_numbers = #tpu.dot_dimension_numbers<[1], [0], [0], [1], [0, 0, 1, 1], [], []>} : vector<8x100xbf16>, vector<100x100xbf16>, vector<8x100xf32> -> vector<8x100xf32>
    %c0_3 = arith.constant 0 : index
    %c0_4 = arith.constant 0 : index
    %3 = vector.load %arg3[%c0_3, %c0_4] : memref<1x100xf32, #tpu.memory_space<vmem>>, vector<1x100xf32>
    %4 = vector.broadcast %3 : vector<1x100xf32> to vector<8x100xf32>
    %5 = arith.mulf %2, %4 : vector<8x100xf32>
    %c0_5 = arith.constant 0 : index
    %c0_6 = arith.constant 0 : index
    %6 = vector.load %arg4[%c0_5, %c0_6] : memref<1x100xf32, #tpu.memory_space<vmem>>, vector<1x100xf32>
    %7 = vector.broadcast %6 : vector<1x100xf32> to vector<8x100xf32>
    %8 = arith.addf %5, %7 : vector<8x100xf32>
    %cst_7 = arith.constant 0.000000e+00 : f32
    %9 = vector.broadcast %cst_7 : f32 to vector<8x100xf32>
    %10 = arith.maximumf %8, %9 : vector<8x100xf32>
    %11 = arith.truncf %10 : vector<8x100xf32> to vector<8x100xbf16>
    %c0_8 = arith.constant 0 : index
    %c0_9 = arith.constant 0 : index
    %12 = vector.load %arg5[%c0_8, %c0_9] : memref<8x100xbf16, #tpu.memory_space<vmem>>, vector<8x100xbf16>
    tpu.vector_store %arg5[%c0_8, %c0_9], %11 {strides = array<i32>} : memref<8x100xbf16, #tpu.memory_space<vmem>>, vector<8x100xbf16>,
    return
  }
  func.func @transform_0(%arg0: i32) -> (i32, i32) {
    %c0_i32 = arith.constant 0 : i32
    %c0_i32_0 = arith.constant 0 : i32
    return %arg0, %c0_i32 : i32, i32
  }
  func.func @transform_1(%arg0: i32) -> (i32, i32) {
    %c0_i32 = arith.constant 0 : i32
    %c0_i32_0 = arith.constant 0 : i32
    %c0_i32_1 = arith.constant 0 : i32
    return %c0_i32, %c0_i32_0 : i32, i32
  }
  func.func @transform_2(%arg0: i32) -> (i32, i32) {
    %c0_i32 = arith.constant 0 : i32
    %c0_i32_0 = arith.constant 0 : i32
    %c0_i32_1 = arith.constant 0 : i32
    return %c0_i32, %c0_i32_0 : i32, i32
  }
  func.func @transform_3(%arg0: i32) -> (i32, i32) {
    %c0_i32 = arith.constant 0 : i32
    %c0_i32_0 = arith.constant 0 : i32
    %c0_i32_1 = arith.constant 0 : i32
    return %c0_i32, %c0_i32_0 : i32, i32
  }
  func.func @transform_4(%arg0: i32) -> (i32, i32) {
    %c0_i32 = arith.constant 0 : i32
    %c0_i32_0 = arith.constant 0 : i32
    return %arg0, %c0_i32 : i32, i32
  }
}

module attributes {stable_mosaic.version = 11 : i64} {
  func.func @_matmul_bn_kernel(%arg0: i32, %arg1: memref<32x200xbf16, #tpu.memory_space<vmem>>, %arg2: memref<200x200xbf16, #tpu.memory_space<vmem>>, %arg3: memref<1x200xf32, #tpu.memory_space<vmem>>, %arg4: memref<1x200xf32, #tpu.memory_space<vmem>>, %arg5: memref<32x200xbf16, #tpu.memory_space<vmem>>) attributes {dimension_semantics = [#tpu.dimension_semantics<parallel>], iteration_bounds = array<i64: 1>, scalar_prefetch = 0 : i64, scratch_operands = 0 : i64, tpu.core_type = #tpu.core_type<tc>, window_params = [{transform_indices = @transform_0, window_bounds = array<i64: 32, 200>}, {pipeline_mode = #tpu.pipeline_mode<synchronous>, transform_indices = @transform_1, window_bounds = array<i64: 200, 200>}, {pipeline_mode = #tpu.pipeline_mode<synchronous>, transform_indices = @transform_2, window_bounds = array<i64: 1, 200>}, {pipeline_mode = #tpu.pipeline_mode<synchronous>, transform_indices = @transform_3, window_bounds = array<i64: 1, 200>}, {transform_indices = @transform_4, window_bounds = array<i64: 32, 200>}]} {
    %c0 = arith.constant 0 : index
    %c0_0 = arith.constant 0 : index
    %0 = vector.load %arg1[%c0, %c0_0] : memref<32x200xbf16, #tpu.memory_space<vmem>>, vector<32x200xbf16>
    %c0_1 = arith.constant 0 : index
    %c0_2 = arith.constant 0 : index
    %1 = vector.load %arg2[%c0_1, %c0_2] : memref<200x200xbf16, #tpu.memory_space<vmem>>, vector<200x200xbf16>
    %cst = arith.constant dense<0.000000e+00> : vector<32x200xf32>
    %2 = tpu.matmul %0, %1, %cst {dimension_numbers = #tpu.dot_dimension_numbers<[1], [0], [0], [1], [0, 0, 1, 1], [], []>} : vector<32x200xbf16>, vector<200x200xbf16>, vector<32x200xf32> -> vector<32x200xf32>
    %c0_3 = arith.constant 0 : index
    %c0_4 = arith.constant 0 : index
    %3 = vector.load %arg3[%c0_3, %c0_4] : memref<1x200xf32, #tpu.memory_space<vmem>>, vector<1x200xf32>
    %4 = vector.broadcast %3 : vector<1x200xf32> to vector<32x200xf32>
    %5 = arith.mulf %2, %4 : vector<32x200xf32>
    %c0_5 = arith.constant 0 : index
    %c0_6 = arith.constant 0 : index
    %6 = vector.load %arg4[%c0_5, %c0_6] : memref<1x200xf32, #tpu.memory_space<vmem>>, vector<1x200xf32>
    %7 = vector.broadcast %6 : vector<1x200xf32> to vector<32x200xf32>
    %8 = arith.addf %5, %7 : vector<32x200xf32>
    %cst_7 = arith.constant 0.000000e+00 : f32
    %9 = vector.broadcast %cst_7 : f32 to vector<32x200xf32>
    %10 = arith.maximumf %8, %9 : vector<32x200xf32>
    %11 = arith.truncf %10 : vector<32x200xf32> to vector<32x200xbf16>
    %c0_8 = arith.constant 0 : index
    %c0_9 = arith.constant 0 : index
    %12 = vector.load %arg5[%c0_8, %c0_9] : memref<32x200xbf16, #tpu.memory_space<vmem>>, vector<32x200xbf16>
    tpu.vector_store %arg5[%c0_8, %c0_9], %11 {strides = array<i32>} : memref<32x200xbf16, #tpu.memory_space<vmem>>, vector<32x200xbf16>,
    return
  }
  func.func @transform_0(%arg0: i32) -> (i32, i32) {
    %c0_i32 = arith.constant 0 : i32
    %c0_i32_0 = arith.constant 0 : i32
    return %arg0, %c0_i32 : i32, i32
  }
  func.func @transform_1(%arg0: i32) -> (i32, i32) {
    %c0_i32 = arith.constant 0 : i32
    %c0_i32_0 = arith.constant 0 : i32
    %c0_i32_1 = arith.constant 0 : i32
    return %c0_i32, %c0_i32_0 : i32, i32
  }
  func.func @transform_2(%arg0: i32) -> (i32, i32) {
    %c0_i32 = arith.constant 0 : i32
    %c0_i32_0 = arith.constant 0 : i32
    %c0_i32_1 = arith.constant 0 : i32
    return %c0_i32, %c0_i32_0 : i32, i32
  }
  func.func @transform_3(%arg0: i32) -> (i32, i32) {
    %c0_i32 = arith.constant 0 : i32
    %c0_i32_0 = arith.constant 0 : i32
    %c0_i32_1 = arith.constant 0 : i32
    return %c0_i32, %c0_i32_0 : i32, i32
  }
  func.func @transform_4(%arg0: i32) -> (i32, i32) {
    %c0_i32 = arith.constant 0 : i32
    %c0_i32_0 = arith.constant 0 : i32
    return %arg0, %c0_i32 : i32, i32
  }
}

module attributes {stable_mosaic.version = 11 : i64} {
  func.func @_dwconv_bn_kernel(%arg0: i32, %arg1: memref<1x4x4x200xbf16, #tpu.memory_space<vmem>>, %arg2: memref<9x1x1x200xf32, #tpu.memory_space<vmem>>, %arg3: memref<1x1x200xf32, #tpu.memory_space<vmem>>, %arg4: memref<1x1x200xf32, #tpu.memory_space<vmem>>, %arg5: memref<1x2x2x200xbf16, #tpu.memory_space<vmem>>) attributes {dimension_semantics = [#tpu.dimension_semantics<parallel>], iteration_bounds = array<i64: 2>, scalar_prefetch = 0 : i64, scratch_operands = 0 : i64, tpu.core_type = #tpu.core_type<tc>, window_params = [{transform_indices = @transform_0, window_bounds = array<i64: 1, 4, 4, 200>}, {pipeline_mode = #tpu.pipeline_mode<synchronous>, transform_indices = @transform_1, window_bounds = array<i64: 9, 1, 1, 200>}, {pipeline_mode = #tpu.pipeline_mode<synchronous>, transform_indices = @transform_2, window_bounds = array<i64: 1, 1, 200>}, {pipeline_mode = #tpu.pipeline_mode<synchronous>, transform_indices = @transform_3, window_bounds = array<i64: 1, 1, 200>}, {transform_indices = @transform_4, window_bounds = array<i64: 1, 2, 2, 200>}]} {
    %c0 = arith.constant 0 : index
    %c0_0 = arith.constant 0 : index
    %c0_1 = arith.constant 0 : index
    %c0_2 = arith.constant 0 : index
    %0 = vector.load %arg2[%c0, %c0_0, %c0_1, %c0_2] : memref<9x1x1x200xf32, #tpu.memory_space<vmem>>, vector<9x1x1x200xf32>
    %c0_3 = arith.constant 0 : index
    %c0_4 = arith.constant 0 : index
    %c0_5 = arith.constant 0 : index
    %c0_6 = arith.constant 0 : index
    %1 = vector.load %arg1[%c0_3, %c0_4, %c0_5, %c0_6] : memref<1x4x4x200xbf16, #tpu.memory_space<vmem>>, vector<1x2x2x200xbf16>
    %2 = vector.shape_cast %1 : vector<1x2x2x200xbf16> to vector<2x2x200xbf16>
    %3 = arith.extf %2 : vector<2x2x200xbf16> to vector<2x2x200xf32>
    %4 = vector.extract_strided_slice %0 {offsets = [0, 0, 0, 0], sizes = [1, 1, 1, 200], strides = [1, 1, 1, 1]} : vector<9x1x1x200xf32> to vector<1x1x1x200xf32>
    %5 = vector.shape_cast %4 : vector<1x1x1x200xf32> to vector<1x1x200xf32>
    %6 = vector.broadcast %5 : vector<1x1x200xf32> to vector<2x2x200xf32>
    %7 = arith.mulf %3, %6 : vector<2x2x200xf32>
    %c0_7 = arith.constant 0 : index
    %c0_8 = arith.constant 0 : index
    %c1 = arith.constant 1 : index
    %c0_9 = arith.constant 0 : index
    %8 = vector.load %arg1[%c0_7, %c0_8, %c1, %c0_9] : memref<1x4x4x200xbf16, #tpu.memory_space<vmem>>, vector<1x2x2x200xbf16>
    %9 = vector.shape_cast %8 : vector<1x2x2x200xbf16> to vector<2x2x200xbf16>
    %10 = arith.extf %9 : vector<2x2x200xbf16> to vector<2x2x200xf32>
    %11 = vector.extract_strided_slice %0 {offsets = [1, 0, 0, 0], sizes = [1, 1, 1, 200], strides = [1, 1, 1, 1]} : vector<9x1x1x200xf32> to vector<1x1x1x200xf32>
    %12 = vector.shape_cast %11 : vector<1x1x1x200xf32> to vector<1x1x200xf32>
    %13 = vector.broadcast %12 : vector<1x1x200xf32> to vector<2x2x200xf32>
    %14 = arith.mulf %10, %13 : vector<2x2x200xf32>
    %15 = arith.addf %7, %14 : vector<2x2x200xf32>
    %c0_10 = arith.constant 0 : index
    %c0_11 = arith.constant 0 : index
    %c2 = arith.constant 2 : index
    %c0_12 = arith.constant 0 : index
    %16 = vector.load %arg1[%c0_10, %c0_11, %c2, %c0_12] : memref<1x4x4x200xbf16, #tpu.memory_space<vmem>>, vector<1x2x2x200xbf16>
    %17 = vector.shape_cast %16 : vector<1x2x2x200xbf16> to vector<2x2x200xbf16>
    %18 = arith.extf %17 : vector<2x2x200xbf16> to vector<2x2x200xf32>
    %19 = vector.extract_strided_slice %0 {offsets = [2, 0, 0, 0], sizes = [1, 1, 1, 200], strides = [1, 1, 1, 1]} : vector<9x1x1x200xf32> to vector<1x1x1x200xf32>
    %20 = vector.shape_cast %19 : vector<1x1x1x200xf32> to vector<1x1x200xf32>
    %21 = vector.broadcast %20 : vector<1x1x200xf32> to vector<2x2x200xf32>
    %22 = arith.mulf %18, %21 : vector<2x2x200xf32>
    %23 = arith.addf %15, %22 : vector<2x2x200xf32>
    %c0_13 = arith.constant 0 : index
    %c1_14 = arith.constant 1 : index
    %c0_15 = arith.constant 0 : index
    %c0_16 = arith.constant 0 : index
    %24 = vector.load %arg1[%c0_13, %c1_14, %c0_15, %c0_16] : memref<1x4x4x200xbf16, #tpu.memory_space<vmem>>, vector<1x2x2x200xbf16>
    %25 = vector.shape_cast %24 : vector<1x2x2x200xbf16> to vector<2x2x200xbf16>
    %26 = arith.extf %25 : vector<2x2x200xbf16> to vector<2x2x200xf32>
    %27 = vector.extract_strided_slice %0 {offsets = [3, 0, 0, 0], sizes = [1, 1, 1, 200], strides = [1, 1, 1, 1]} : vector<9x1x1x200xf32> to vector<1x1x1x200xf32>
    %28 = vector.shape_cast %27 : vector<1x1x1x200xf32> to vector<1x1x200xf32>
    %29 = vector.broadcast %28 : vector<1x1x200xf32> to vector<2x2x200xf32>
    %30 = arith.mulf %26, %29 : vector<2x2x200xf32>
    %31 = arith.addf %23, %30 : vector<2x2x200xf32>
    %c0_17 = arith.constant 0 : index
    %c1_18 = arith.constant 1 : index
    %c1_19 = arith.constant 1 : index
    %c0_20 = arith.constant 0 : index
    %32 = vector.load %arg1[%c0_17, %c1_18, %c1_19, %c0_20] : memref<1x4x4x200xbf16, #tpu.memory_space<vmem>>, vector<1x2x2x200xbf16>
    %33 = vector.shape_cast %32 : vector<1x2x2x200xbf16> to vector<2x2x200xbf16>
    %34 = arith.extf %33 : vector<2x2x200xbf16> to vector<2x2x200xf32>
    %35 = vector.extract_strided_slice %0 {offsets = [4, 0, 0, 0], sizes = [1, 1, 1, 200], strides = [1, 1, 1, 1]} : vector<9x1x1x200xf32> to vector<1x1x1x200xf32>
    %36 = vector.shape_cast %35 : vector<1x1x1x200xf32> to vector<1x1x200xf32>
    %37 = vector.broadcast %36 : vector<1x1x200xf32> to vector<2x2x200xf32>
    %38 = arith.mulf %34, %37 : vector<2x2x200xf32>
    %39 = arith.addf %31, %38 : vector<2x2x200xf32>
    %c0_21 = arith.constant 0 : index
    %c1_22 = arith.constant 1 : index
    %c2_23 = arith.constant 2 : index
    %c0_24 = arith.constant 0 : index
    %40 = vector.load %arg1[%c0_21, %c1_22, %c2_23, %c0_24] : memref<1x4x4x200xbf16, #tpu.memory_space<vmem>>, vector<1x2x2x200xbf16>
    %41 = vector.shape_cast %40 : vector<1x2x2x200xbf16> to vector<2x2x200xbf16>
    %42 = arith.extf %41 : vector<2x2x200xbf16> to vector<2x2x200xf32>
    %43 = vector.extract_strided_slice %0 {offsets = [5, 0, 0, 0], sizes = [1, 1, 1, 200], strides = [1, 1, 1, 1]} : vector<9x1x1x200xf32> to vector<1x1x1x200xf32>
    %44 = vector.shape_cast %43 : vector<1x1x1x200xf32> to vector<1x1x200xf32>
    %45 = vector.broadcast %44 : vector<1x1x200xf32> to vector<2x2x200xf32>
    %46 = arith.mulf %42, %45 : vector<2x2x200xf32>
    %47 = arith.addf %39, %46 : vector<2x2x200xf32>
    %c0_25 = arith.constant 0 : index
    %c2_26 = arith.constant 2 : index
    %c0_27 = arith.constant 0 : index
    %c0_28 = arith.constant 0 : index
    %48 = vector.load %arg1[%c0_25, %c2_26, %c0_27, %c0_28] : memref<1x4x4x200xbf16, #tpu.memory_space<vmem>>, vector<1x2x2x200xbf16>
    %49 = vector.shape_cast %48 : vector<1x2x2x200xbf16> to vector<2x2x200xbf16>
    %50 = arith.extf %49 : vector<2x2x200xbf16> to vector<2x2x200xf32>
    %51 = vector.extract_strided_slice %0 {offsets = [6, 0, 0, 0], sizes = [1, 1, 1, 200], strides = [1, 1, 1, 1]} : vector<9x1x1x200xf32> to vector<1x1x1x200xf32>
    %52 = vector.shape_cast %51 : vector<1x1x1x200xf32> to vector<1x1x200xf32>
    %53 = vector.broadcast %52 : vector<1x1x200xf32> to vector<2x2x200xf32>
    %54 = arith.mulf %50, %53 : vector<2x2x200xf32>
    %55 = arith.addf %47, %54 : vector<2x2x200xf32>
    %c0_29 = arith.constant 0 : index
    %c2_30 = arith.constant 2 : index
    %c1_31 = arith.constant 1 : index
    %c0_32 = arith.constant 0 : index
    %56 = vector.load %arg1[%c0_29, %c2_30, %c1_31, %c0_32] : memref<1x4x4x200xbf16, #tpu.memory_space<vmem>>, vector<1x2x2x200xbf16>
    %57 = vector.shape_cast %56 : vector<1x2x2x200xbf16> to vector<2x2x200xbf16>
    %58 = arith.extf %57 : vector<2x2x200xbf16> to vector<2x2x200xf32>
    %59 = vector.extract_strided_slice %0 {offsets = [7, 0, 0, 0], sizes = [1, 1, 1, 200], strides = [1, 1, 1, 1]} : vector<9x1x1x200xf32> to vector<1x1x1x200xf32>
    %60 = vector.shape_cast %59 : vector<1x1x1x200xf32> to vector<1x1x200xf32>
    %61 = vector.broadcast %60 : vector<1x1x200xf32> to vector<2x2x200xf32>
    %62 = arith.mulf %58, %61 : vector<2x2x200xf32>
    %63 = arith.addf %55, %62 : vector<2x2x200xf32>
    %c0_33 = arith.constant 0 : index
    %c2_34 = arith.constant 2 : index
    %c2_35 = arith.constant 2 : index
    %c0_36 = arith.constant 0 : index
    %64 = vector.load %arg1[%c0_33, %c2_34, %c2_35, %c0_36] : memref<1x4x4x200xbf16, #tpu.memory_space<vmem>>, vector<1x2x2x200xbf16>
    %65 = vector.shape_cast %64 : vector<1x2x2x200xbf16> to vector<2x2x200xbf16>
    %66 = arith.extf %65 : vector<2x2x200xbf16> to vector<2x2x200xf32>
    %67 = vector.extract_strided_slice %0 {offsets = [8, 0, 0, 0], sizes = [1, 1, 1, 200], strides = [1, 1, 1, 1]} : vector<9x1x1x200xf32> to vector<1x1x1x200xf32>
    %68 = vector.shape_cast %67 : vector<1x1x1x200xf32> to vector<1x1x200xf32>
    %69 = vector.broadcast %68 : vector<1x1x200xf32> to vector<2x2x200xf32>
    %70 = arith.mulf %66, %69 : vector<2x2x200xf32>
    %71 = arith.addf %63, %70 : vector<2x2x200xf32>
    %c0_37 = arith.constant 0 : index
    %c0_38 = arith.constant 0 : index
    %c0_39 = arith.constant 0 : index
    %72 = vector.load %arg3[%c0_37, %c0_38, %c0_39] : memref<1x1x200xf32, #tpu.memory_space<vmem>>, vector<1x1x200xf32>
    %73 = vector.broadcast %72 : vector<1x1x200xf32> to vector<2x2x200xf32>
    %74 = arith.mulf %71, %73 : vector<2x2x200xf32>
    %c0_40 = arith.constant 0 : index
    %c0_41 = arith.constant 0 : index
    %c0_42 = arith.constant 0 : index
    %75 = vector.load %arg4[%c0_40, %c0_41, %c0_42] : memref<1x1x200xf32, #tpu.memory_space<vmem>>, vector<1x1x200xf32>
    %76 = vector.broadcast %75 : vector<1x1x200xf32> to vector<2x2x200xf32>
    %77 = arith.addf %74, %76 : vector<2x2x200xf32>
    %78 = arith.truncf %77 : vector<2x2x200xf32> to vector<2x2x200xbf16>
    %c0_43 = arith.constant 0 : index
    %c0_44 = arith.constant 0 : index
    %c0_45 = arith.constant 0 : index
    %c0_46 = arith.constant 0 : index
    %79 = vector.load %arg5[%c0_43, %c0_44, %c0_45, %c0_46] : memref<1x2x2x200xbf16, #tpu.memory_space<vmem>>, vector<1x2x2x200xbf16>
    %80 = vector.shape_cast %79 : vector<1x2x2x200xbf16> to vector<2x2x200xbf16>
    %81 = vector.shape_cast %78 : vector<2x2x200xbf16> to vector<1x2x2x200xbf16>
    tpu.vector_store %arg5[%c0_43, %c0_44, %c0_45, %c0_46], %81 {strides = array<i32>} : memref<1x2x2x200xbf16, #tpu.memory_space<vmem>>, vector<1x2x2x200xbf16>,
    return
  }
  func.func @transform_0(%arg0: i32) -> (i32, i32, i32, i32) {
    %c0_i32 = arith.constant 0 : i32
    %c0_i32_0 = arith.constant 0 : i32
    %c0_i32_1 = arith.constant 0 : i32
    %c0_i32_2 = arith.constant 0 : i32
    return %arg0, %c0_i32, %c0_i32_0, %c0_i32_1 : i32, i32, i32, i32
  }
  func.func @transform_1(%arg0: i32) -> (i32, i32, i32, i32) {
    %c0_i32 = arith.constant 0 : i32
    %c0_i32_0 = arith.constant 0 : i32
    %c0_i32_1 = arith.constant 0 : i32
    %c0_i32_2 = arith.constant 0 : i32
    %c0_i32_3 = arith.constant 0 : i32
    return %c0_i32, %c0_i32_0, %c0_i32_1, %c0_i32_2 : i32, i32, i32, i32
  }
  func.func @transform_2(%arg0: i32) -> (i32, i32, i32) {
    %c0_i32 = arith.constant 0 : i32
    %c0_i32_0 = arith.constant 0 : i32
    %c0_i32_1 = arith.constant 0 : i32
    %c0_i32_2 = arith.constant 0 : i32
    return %c0_i32, %c0_i32_0, %c0_i32_1 : i32, i32, i32
  }
  func.func @transform_3(%arg0: i32) -> (i32, i32, i32) {
    %c0_i32 = arith.constant 0 : i32
    %c0_i32_0 = arith.constant 0 : i32
    %c0_i32_1 = arith.constant 0 : i32
    %c0_i32_2 = arith.constant 0 : i32
    return %c0_i32, %c0_i32_0, %c0_i32_1 : i32, i32, i32
  }
  func.func @transform_4(%arg0: i32) -> (i32, i32, i32, i32) {
    %c0_i32 = arith.constant 0 : i32
    %c0_i32_0 = arith.constant 0 : i32
    %c0_i32_1 = arith.constant 0 : i32
    %c0_i32_2 = arith.constant 0 : i32
    return %arg0, %c0_i32, %c0_i32_0, %c0_i32_1 : i32, i32, i32, i32
  }
}

module attributes {stable_mosaic.version = 11 : i64} {
  func.func @_matmul_bn_res_kernel(%arg0: i32, %arg1: memref<8x200xbf16, #tpu.memory_space<vmem>>, %arg2: memref<200x200xbf16, #tpu.memory_space<vmem>>, %arg3: memref<1x200xf32, #tpu.memory_space<vmem>>, %arg4: memref<1x200xf32, #tpu.memory_space<vmem>>, %arg5: memref<8x200xbf16, #tpu.memory_space<vmem>>, %arg6: memref<8x200xbf16, #tpu.memory_space<vmem>>) attributes {dimension_semantics = [#tpu.dimension_semantics<parallel>], iteration_bounds = array<i64: 1>, scalar_prefetch = 0 : i64, scratch_operands = 0 : i64, tpu.core_type = #tpu.core_type<tc>, window_params = [{transform_indices = @transform_0, window_bounds = array<i64: 8, 200>}, {pipeline_mode = #tpu.pipeline_mode<synchronous>, transform_indices = @transform_1, window_bounds = array<i64: 200, 200>}, {pipeline_mode = #tpu.pipeline_mode<synchronous>, transform_indices = @transform_2, window_bounds = array<i64: 1, 200>}, {pipeline_mode = #tpu.pipeline_mode<synchronous>, transform_indices = @transform_3, window_bounds = array<i64: 1, 200>}, {transform_indices = @transform_4, window_bounds = array<i64: 8, 200>}, {transform_indices = @transform_5, window_bounds = array<i64: 8, 200>}]} {
    %c0 = arith.constant 0 : index
    %c0_0 = arith.constant 0 : index
    %0 = vector.load %arg1[%c0, %c0_0] : memref<8x200xbf16, #tpu.memory_space<vmem>>, vector<8x200xbf16>
    %c0_1 = arith.constant 0 : index
    %c0_2 = arith.constant 0 : index
    %1 = vector.load %arg2[%c0_1, %c0_2] : memref<200x200xbf16, #tpu.memory_space<vmem>>, vector<200x200xbf16>
    %cst = arith.constant dense<0.000000e+00> : vector<8x200xf32>
    %2 = tpu.matmul %0, %1, %cst {dimension_numbers = #tpu.dot_dimension_numbers<[1], [0], [0], [1], [0, 0, 1, 1], [], []>} : vector<8x200xbf16>, vector<200x200xbf16>, vector<8x200xf32> -> vector<8x200xf32>
    %c0_3 = arith.constant 0 : index
    %c0_4 = arith.constant 0 : index
    %3 = vector.load %arg3[%c0_3, %c0_4] : memref<1x200xf32, #tpu.memory_space<vmem>>, vector<1x200xf32>
    %4 = vector.broadcast %3 : vector<1x200xf32> to vector<8x200xf32>
    %5 = arith.mulf %2, %4 : vector<8x200xf32>
    %c0_5 = arith.constant 0 : index
    %c0_6 = arith.constant 0 : index
    %6 = vector.load %arg4[%c0_5, %c0_6] : memref<1x200xf32, #tpu.memory_space<vmem>>, vector<1x200xf32>
    %7 = vector.broadcast %6 : vector<1x200xf32> to vector<8x200xf32>
    %8 = arith.addf %5, %7 : vector<8x200xf32>
    %c0_7 = arith.constant 0 : index
    %c0_8 = arith.constant 0 : index
    %9 = vector.load %arg5[%c0_7, %c0_8] : memref<8x200xbf16, #tpu.memory_space<vmem>>, vector<8x200xbf16>
    %10 = arith.extf %9 : vector<8x200xbf16> to vector<8x200xf32>
    %11 = arith.addf %8, %10 : vector<8x200xf32>
    %cst_9 = arith.constant 0.000000e+00 : f32
    %12 = vector.broadcast %cst_9 : f32 to vector<8x200xf32>
    %13 = arith.maximumf %11, %12 : vector<8x200xf32>
    %14 = arith.truncf %13 : vector<8x200xf32> to vector<8x200xbf16>
    %c0_10 = arith.constant 0 : index
    %c0_11 = arith.constant 0 : index
    %15 = vector.load %arg6[%c0_10, %c0_11] : memref<8x200xbf16, #tpu.memory_space<vmem>>, vector<8x200xbf16>
    tpu.vector_store %arg6[%c0_10, %c0_11], %14 {strides = array<i32>} : memref<8x200xbf16, #tpu.memory_space<vmem>>, vector<8x200xbf16>,
    return
  }
  func.func @transform_0(%arg0: i32) -> (i32, i32) {
    %c0_i32 = arith.constant 0 : i32
    %c0_i32_0 = arith.constant 0 : i32
    return %arg0, %c0_i32 : i32, i32
  }
  func.func @transform_1(%arg0: i32) -> (i32, i32) {
    %c0_i32 = arith.constant 0 : i32
    %c0_i32_0 = arith.constant 0 : i32
    %c0_i32_1 = arith.constant 0 : i32
    return %c0_i32, %c0_i32_0 : i32, i32
  }
  func.func @transform_2(%arg0: i32) -> (i32, i32) {
    %c0_i32 = arith.constant 0 : i32
    %c0_i32_0 = arith.constant 0 : i32
    %c0_i32_1 = arith.constant 0 : i32
    return %c0_i32, %c0_i32_0 : i32, i32
  }
  func.func @transform_3(%arg0: i32) -> (i32, i32) {
    %c0_i32 = arith.constant 0 : i32
    %c0_i32_0 = arith.constant 0 : i32
    %c0_i32_1 = arith.constant 0 : i32
    return %c0_i32, %c0_i32_0 : i32, i32
  }
  func.func @transform_4(%arg0: i32) -> (i32, i32) {
    %c0_i32 = arith.constant 0 : i32
    %c0_i32_0 = arith.constant 0 : i32
    return %arg0, %c0_i32 : i32, i32
  }
  func.func @transform_5(%arg0: i32) -> (i32, i32) {
    %c0_i32 = arith.constant 0 : i32
    %c0_i32_0 = arith.constant 0 : i32
    return %arg0, %c0_i32 : i32, i32
  }
}

module attributes {stable_mosaic.version = 11 : i64} {
  func.func @_matmul_bn_kernel(%arg0: i32, %arg1: memref<8x200xbf16, #tpu.memory_space<vmem>>, %arg2: memref<200x200xbf16, #tpu.memory_space<vmem>>, %arg3: memref<1x200xf32, #tpu.memory_space<vmem>>, %arg4: memref<1x200xf32, #tpu.memory_space<vmem>>, %arg5: memref<8x200xbf16, #tpu.memory_space<vmem>>) attributes {dimension_semantics = [#tpu.dimension_semantics<parallel>], iteration_bounds = array<i64: 1>, scalar_prefetch = 0 : i64, scratch_operands = 0 : i64, tpu.core_type = #tpu.core_type<tc>, window_params = [{transform_indices = @transform_0, window_bounds = array<i64: 8, 200>}, {pipeline_mode = #tpu.pipeline_mode<synchronous>, transform_indices = @transform_1, window_bounds = array<i64: 200, 200>}, {pipeline_mode = #tpu.pipeline_mode<synchronous>, transform_indices = @transform_2, window_bounds = array<i64: 1, 200>}, {pipeline_mode = #tpu.pipeline_mode<synchronous>, transform_indices = @transform_3, window_bounds = array<i64: 1, 200>}, {transform_indices = @transform_4, window_bounds = array<i64: 8, 200>}]} {
    %c0 = arith.constant 0 : index
    %c0_0 = arith.constant 0 : index
    %0 = vector.load %arg1[%c0, %c0_0] : memref<8x200xbf16, #tpu.memory_space<vmem>>, vector<8x200xbf16>
    %c0_1 = arith.constant 0 : index
    %c0_2 = arith.constant 0 : index
    %1 = vector.load %arg2[%c0_1, %c0_2] : memref<200x200xbf16, #tpu.memory_space<vmem>>, vector<200x200xbf16>
    %cst = arith.constant dense<0.000000e+00> : vector<8x200xf32>
    %2 = tpu.matmul %0, %1, %cst {dimension_numbers = #tpu.dot_dimension_numbers<[1], [0], [0], [1], [0, 0, 1, 1], [], []>} : vector<8x200xbf16>, vector<200x200xbf16>, vector<8x200xf32> -> vector<8x200xf32>
    %c0_3 = arith.constant 0 : index
    %c0_4 = arith.constant 0 : index
    %3 = vector.load %arg3[%c0_3, %c0_4] : memref<1x200xf32, #tpu.memory_space<vmem>>, vector<1x200xf32>
    %4 = vector.broadcast %3 : vector<1x200xf32> to vector<8x200xf32>
    %5 = arith.mulf %2, %4 : vector<8x200xf32>
    %c0_5 = arith.constant 0 : index
    %c0_6 = arith.constant 0 : index
    %6 = vector.load %arg4[%c0_5, %c0_6] : memref<1x200xf32, #tpu.memory_space<vmem>>, vector<1x200xf32>
    %7 = vector.broadcast %6 : vector<1x200xf32> to vector<8x200xf32>
    %8 = arith.addf %5, %7 : vector<8x200xf32>
    %cst_7 = arith.constant 0.000000e+00 : f32
    %9 = vector.broadcast %cst_7 : f32 to vector<8x200xf32>
    %10 = arith.maximumf %8, %9 : vector<8x200xf32>
    %11 = arith.truncf %10 : vector<8x200xf32> to vector<8x200xbf16>
    %c0_8 = arith.constant 0 : index
    %c0_9 = arith.constant 0 : index
    %12 = vector.load %arg5[%c0_8, %c0_9] : memref<8x200xbf16, #tpu.memory_space<vmem>>, vector<8x200xbf16>
    tpu.vector_store %arg5[%c0_8, %c0_9], %11 {strides = array<i32>} : memref<8x200xbf16, #tpu.memory_space<vmem>>, vector<8x200xbf16>,
    return
  }
  func.func @transform_0(%arg0: i32) -> (i32, i32) {
    %c0_i32 = arith.constant 0 : i32
    %c0_i32_0 = arith.constant 0 : i32
    return %arg0, %c0_i32 : i32, i32
  }
  func.func @transform_1(%arg0: i32) -> (i32, i32) {
    %c0_i32 = arith.constant 0 : i32
    %c0_i32_0 = arith.constant 0 : i32
    %c0_i32_1 = arith.constant 0 : i32
    return %c0_i32, %c0_i32_0 : i32, i32
  }
  func.func @transform_2(%arg0: i32) -> (i32, i32) {
    %c0_i32 = arith.constant 0 : i32
    %c0_i32_0 = arith.constant 0 : i32
    %c0_i32_1 = arith.constant 0 : i32
    return %c0_i32, %c0_i32_0 : i32, i32
  }
  func.func @transform_3(%arg0: i32) -> (i32, i32) {
    %c0_i32 = arith.constant 0 : i32
    %c0_i32_0 = arith.constant 0 : i32
    %c0_i32_1 = arith.constant 0 : i32
    return %c0_i32, %c0_i32_0 : i32, i32
  }
  func.func @transform_4(%arg0: i32) -> (i32, i32) {
    %c0_i32 = arith.constant 0 : i32
    %c0_i32_0 = arith.constant 0 : i32
    return %arg0, %c0_i32 : i32, i32
  }
}

module attributes {stable_mosaic.version = 11 : i64} {
  func.func @_pool3x3_kernel(%arg0: i32, %arg1: memref<1x4x4x200xbf16, #tpu.memory_space<vmem>>, %arg2: memref<1x2x2x200xbf16, #tpu.memory_space<vmem>>) attributes {dimension_semantics = [#tpu.dimension_semantics<parallel>], iteration_bounds = array<i64: 2>, scalar_prefetch = 0 : i64, scratch_operands = 0 : i64, tpu.core_type = #tpu.core_type<tc>, window_params = [{transform_indices = @transform_0, window_bounds = array<i64: 1, 4, 4, 200>}, {transform_indices = @transform_1, window_bounds = array<i64: 1, 2, 2, 200>}]} {
    %c0 = arith.constant 0 : index
    %c0_0 = arith.constant 0 : index
    %c0_1 = arith.constant 0 : index
    %c0_2 = arith.constant 0 : index
    %0 = vector.load %arg1[%c0, %c0_0, %c0_1, %c0_2] : memref<1x4x4x200xbf16, #tpu.memory_space<vmem>>, vector<1x2x2x200xbf16>
    %1 = vector.shape_cast %0 : vector<1x2x2x200xbf16> to vector<2x2x200xbf16>
    %2 = arith.extf %1 : vector<2x2x200xbf16> to vector<2x2x200xf32>
    %c0_3 = arith.constant 0 : index
    %c0_4 = arith.constant 0 : index
    %c1 = arith.constant 1 : index
    %c0_5 = arith.constant 0 : index
    %3 = vector.load %arg1[%c0_3, %c0_4, %c1, %c0_5] : memref<1x4x4x200xbf16, #tpu.memory_space<vmem>>, vector<1x2x2x200xbf16>
    %4 = vector.shape_cast %3 : vector<1x2x2x200xbf16> to vector<2x2x200xbf16>
    %5 = arith.extf %4 : vector<2x2x200xbf16> to vector<2x2x200xf32>
    %6 = arith.addf %2, %5 : vector<2x2x200xf32>
    %c0_6 = arith.constant 0 : index
    %c0_7 = arith.constant 0 : index
    %c2 = arith.constant 2 : index
    %c0_8 = arith.constant 0 : index
    %7 = vector.load %arg1[%c0_6, %c0_7, %c2, %c0_8] : memref<1x4x4x200xbf16, #tpu.memory_space<vmem>>, vector<1x2x2x200xbf16>
    %8 = vector.shape_cast %7 : vector<1x2x2x200xbf16> to vector<2x2x200xbf16>
    %9 = arith.extf %8 : vector<2x2x200xbf16> to vector<2x2x200xf32>
    %10 = arith.addf %6, %9 : vector<2x2x200xf32>
    %c0_9 = arith.constant 0 : index
    %c1_10 = arith.constant 1 : index
    %c0_11 = arith.constant 0 : index
    %c0_12 = arith.constant 0 : index
    %11 = vector.load %arg1[%c0_9, %c1_10, %c0_11, %c0_12] : memref<1x4x4x200xbf16, #tpu.memory_space<vmem>>, vector<1x2x2x200xbf16>
    %12 = vector.shape_cast %11 : vector<1x2x2x200xbf16> to vector<2x2x200xbf16>
    %13 = arith.extf %12 : vector<2x2x200xbf16> to vector<2x2x200xf32>
    %14 = arith.addf %10, %13 : vector<2x2x200xf32>
    %c0_13 = arith.constant 0 : index
    %c1_14 = arith.constant 1 : index
    %c1_15 = arith.constant 1 : index
    %c0_16 = arith.constant 0 : index
    %15 = vector.load %arg1[%c0_13, %c1_14, %c1_15, %c0_16] : memref<1x4x4x200xbf16, #tpu.memory_space<vmem>>, vector<1x2x2x200xbf16>
    %16 = vector.shape_cast %15 : vector<1x2x2x200xbf16> to vector<2x2x200xbf16>
    %17 = arith.extf %16 : vector<2x2x200xbf16> to vector<2x2x200xf32>
    %18 = arith.addf %14, %17 : vector<2x2x200xf32>
    %c0_17 = arith.constant 0 : index
    %c1_18 = arith.constant 1 : index
    %c2_19 = arith.constant 2 : index
    %c0_20 = arith.constant 0 : index
    %19 = vector.load %arg1[%c0_17, %c1_18, %c2_19, %c0_20] : memref<1x4x4x200xbf16, #tpu.memory_space<vmem>>, vector<1x2x2x200xbf16>
    %20 = vector.shape_cast %19 : vector<1x2x2x200xbf16> to vector<2x2x200xbf16>
    %21 = arith.extf %20 : vector<2x2x200xbf16> to vector<2x2x200xf32>
    %22 = arith.addf %18, %21 : vector<2x2x200xf32>
    %c0_21 = arith.constant 0 : index
    %c2_22 = arith.constant 2 : index
    %c0_23 = arith.constant 0 : index
    %c0_24 = arith.constant 0 : index
    %23 = vector.load %arg1[%c0_21, %c2_22, %c0_23, %c0_24] : memref<1x4x4x200xbf16, #tpu.memory_space<vmem>>, vector<1x2x2x200xbf16>
    %24 = vector.shape_cast %23 : vector<1x2x2x200xbf16> to vector<2x2x200xbf16>
    %25 = arith.extf %24 : vector<2x2x200xbf16> to vector<2x2x200xf32>
    %26 = arith.addf %22, %25 : vector<2x2x200xf32>
    %c0_25 = arith.constant 0 : index
    %c2_26 = arith.constant 2 : index
    %c1_27 = arith.constant 1 : index
    %c0_28 = arith.constant 0 : index
    %27 = vector.load %arg1[%c0_25, %c2_26, %c1_27, %c0_28] : memref<1x4x4x200xbf16, #tpu.memory_space<vmem>>, vector<1x2x2x200xbf16>
    %28 = vector.shape_cast %27 : vector<1x2x2x200xbf16> to vector<2x2x200xbf16>
    %29 = arith.extf %28 : vector<2x2x200xbf16> to vector<2x2x200xf32>
    %30 = arith.addf %26, %29 : vector<2x2x200xf32>
    %c0_29 = arith.constant 0 : index
    %c2_30 = arith.constant 2 : index
    %c2_31 = arith.constant 2 : index
    %c0_32 = arith.constant 0 : index
    %31 = vector.load %arg1[%c0_29, %c2_30, %c2_31, %c0_32] : memref<1x4x4x200xbf16, #tpu.memory_space<vmem>>, vector<1x2x2x200xbf16>
    %32 = vector.shape_cast %31 : vector<1x2x2x200xbf16> to vector<2x2x200xbf16>
    %33 = arith.extf %32 : vector<2x2x200xbf16> to vector<2x2x200xf32>
    %34 = arith.addf %30, %33 : vector<2x2x200xf32>
    %cst = arith.constant 0.111111112 : f32
    %35 = vector.broadcast %cst : f32 to vector<2x2x200xf32>
    %36 = arith.mulf %34, %35 : vector<2x2x200xf32>
    %cst_33 = arith.constant 0.000000e+00 : f32
    %37 = vector.broadcast %cst_33 : f32 to vector<2x2x200xf32>
    %38 = arith.maximumf %36, %37 : vector<2x2x200xf32>
    %39 = arith.truncf %38 : vector<2x2x200xf32> to vector<2x2x200xbf16>
    %c0_34 = arith.constant 0 : index
    %c0_35 = arith.constant 0 : index
    %c0_36 = arith.constant 0 : index
    %c0_37 = arith.constant 0 : index
    %40 = vector.load %arg2[%c0_34, %c0_35, %c0_36, %c0_37] : memref<1x2x2x200xbf16, #tpu.memory_space<vmem>>, vector<1x2x2x200xbf16>
    %41 = vector.shape_cast %40 : vector<1x2x2x200xbf16> to vector<2x2x200xbf16>
    %42 = vector.shape_cast %39 : vector<2x2x200xbf16> to vector<1x2x2x200xbf16>
    tpu.vector_store %arg2[%c0_34, %c0_35, %c0_36, %c0_37], %42 {strides = array<i32>} : memref<1x2x2x200xbf16, #tpu.memory_space<vmem>>, vector<1x2x2x200xbf16>,
    return
  }
  func.func @transform_0(%arg0: i32) -> (i32, i32, i32, i32) {
    %c0_i32 = arith.constant 0 : i32
    %c0_i32_0 = arith.constant 0 : i32
    %c0_i32_1 = arith.constant 0 : i32
    %c0_i32_2 = arith.constant 0 : i32
    return %arg0, %c0_i32, %c0_i32_0, %c0_i32_1 : i32, i32, i32, i32
  }
  func.func @transform_1(%arg0: i32) -> (i32, i32, i32, i32) {
    %c0_i32 = arith.constant 0 : i32
    %c0_i32_0 = arith.constant 0 : i32
    %c0_i32_1 = arith.constant 0 : i32
    %c0_i32_2 = arith.constant 0 : i32
    return %arg0, %c0_i32, %c0_i32_0, %c0_i32_1 : i32, i32, i32, i32
  }
}

module attributes {stable_mosaic.version = 11 : i64} {
  func.func @_matmul_bn_kernel(%arg0: i32, %arg1: memref<24x400xbf16, #tpu.memory_space<vmem>>, %arg2: memref<400x400xbf16, #tpu.memory_space<vmem>>, %arg3: memref<1x400xf32, #tpu.memory_space<vmem>>, %arg4: memref<1x400xf32, #tpu.memory_space<vmem>>, %arg5: memref<24x400xbf16, #tpu.memory_space<vmem>>) attributes {dimension_semantics = [#tpu.dimension_semantics<parallel>], iteration_bounds = array<i64: 1>, scalar_prefetch = 0 : i64, scratch_operands = 0 : i64, tpu.core_type = #tpu.core_type<tc>, window_params = [{transform_indices = @transform_0, window_bounds = array<i64: 24, 400>}, {pipeline_mode = #tpu.pipeline_mode<synchronous>, transform_indices = @transform_1, window_bounds = array<i64: 400, 400>}, {pipeline_mode = #tpu.pipeline_mode<synchronous>, transform_indices = @transform_2, window_bounds = array<i64: 1, 400>}, {pipeline_mode = #tpu.pipeline_mode<synchronous>, transform_indices = @transform_3, window_bounds = array<i64: 1, 400>}, {transform_indices = @transform_4, window_bounds = array<i64: 24, 400>}]} {
    %c0 = arith.constant 0 : index
    %c0_0 = arith.constant 0 : index
    %0 = vector.load %arg1[%c0, %c0_0] : memref<24x400xbf16, #tpu.memory_space<vmem>>, vector<24x400xbf16>
    %c0_1 = arith.constant 0 : index
    %c0_2 = arith.constant 0 : index
    %1 = vector.load %arg2[%c0_1, %c0_2] : memref<400x400xbf16, #tpu.memory_space<vmem>>, vector<400x400xbf16>
    %cst = arith.constant dense<0.000000e+00> : vector<24x400xf32>
    %2 = tpu.matmul %0, %1, %cst {dimension_numbers = #tpu.dot_dimension_numbers<[1], [0], [0], [1], [0, 0, 1, 1], [], []>} : vector<24x400xbf16>, vector<400x400xbf16>, vector<24x400xf32> -> vector<24x400xf32>
    %c0_3 = arith.constant 0 : index
    %c0_4 = arith.constant 0 : index
    %3 = vector.load %arg3[%c0_3, %c0_4] : memref<1x400xf32, #tpu.memory_space<vmem>>, vector<1x400xf32>
    %4 = vector.broadcast %3 : vector<1x400xf32> to vector<24x400xf32>
    %5 = arith.mulf %2, %4 : vector<24x400xf32>
    %c0_5 = arith.constant 0 : index
    %c0_6 = arith.constant 0 : index
    %6 = vector.load %arg4[%c0_5, %c0_6] : memref<1x400xf32, #tpu.memory_space<vmem>>, vector<1x400xf32>
    %7 = vector.broadcast %6 : vector<1x400xf32> to vector<24x400xf32>
    %8 = arith.addf %5, %7 : vector<24x400xf32>
    %cst_7 = arith.constant 0.000000e+00 : f32
    %9 = vector.broadcast %cst_7 : f32 to vector<24x400xf32>
    %10 = arith.maximumf %8, %9 : vector<24x400xf32>
    %11 = arith.truncf %10 : vector<24x400xf32> to vector<24x400xbf16>
    %c0_8 = arith.constant 0 : index
    %c0_9 = arith.constant 0 : index
    %12 = vector.load %arg5[%c0_8, %c0_9] : memref<24x400xbf16, #tpu.memory_space<vmem>>, vector<24x400xbf16>
    tpu.vector_store %arg5[%c0_8, %c0_9], %11 {strides = array<i32>} : memref<24x400xbf16, #tpu.memory_space<vmem>>, vector<24x400xbf16>,
    return
  }
  func.func @transform_0(%arg0: i32) -> (i32, i32) {
    %c0_i32 = arith.constant 0 : i32
    %c0_i32_0 = arith.constant 0 : i32
    return %arg0, %c0_i32 : i32, i32
  }
  func.func @transform_1(%arg0: i32) -> (i32, i32) {
    %c0_i32 = arith.constant 0 : i32
    %c0_i32_0 = arith.constant 0 : i32
    %c0_i32_1 = arith.constant 0 : i32
    return %c0_i32, %c0_i32_0 : i32, i32
  }
  func.func @transform_2(%arg0: i32) -> (i32, i32) {
    %c0_i32 = arith.constant 0 : i32
    %c0_i32_0 = arith.constant 0 : i32
    %c0_i32_1 = arith.constant 0 : i32
    return %c0_i32, %c0_i32_0 : i32, i32
  }
  func.func @transform_3(%arg0: i32) -> (i32, i32) {
    %c0_i32 = arith.constant 0 : i32
    %c0_i32_0 = arith.constant 0 : i32
    %c0_i32_1 = arith.constant 0 : i32
    return %c0_i32, %c0_i32_0 : i32, i32
  }
  func.func @transform_4(%arg0: i32) -> (i32, i32) {
    %c0_i32 = arith.constant 0 : i32
    %c0_i32_0 = arith.constant 0 : i32
    return %arg0, %c0_i32 : i32, i32
  }
}

module attributes {stable_mosaic.version = 11 : i64} {
  func.func @_dwconv_bn_kernel(%arg0: i32, %arg1: memref<1x3x3x400xbf16, #tpu.memory_space<vmem>>, %arg2: memref<9x1x1x400xf32, #tpu.memory_space<vmem>>, %arg3: memref<1x1x400xf32, #tpu.memory_space<vmem>>, %arg4: memref<1x1x400xf32, #tpu.memory_space<vmem>>, %arg5: memref<1x1x1x400xbf16, #tpu.memory_space<vmem>>) attributes {dimension_semantics = [#tpu.dimension_semantics<parallel>], iteration_bounds = array<i64: 2>, scalar_prefetch = 0 : i64, scratch_operands = 0 : i64, tpu.core_type = #tpu.core_type<tc>, window_params = [{transform_indices = @transform_0, window_bounds = array<i64: 1, 3, 3, 400>}, {pipeline_mode = #tpu.pipeline_mode<synchronous>, transform_indices = @transform_1, window_bounds = array<i64: 9, 1, 1, 400>}, {pipeline_mode = #tpu.pipeline_mode<synchronous>, transform_indices = @transform_2, window_bounds = array<i64: 1, 1, 400>}, {pipeline_mode = #tpu.pipeline_mode<synchronous>, transform_indices = @transform_3, window_bounds = array<i64: 1, 1, 400>}, {transform_indices = @transform_4, window_bounds = array<i64: 1, 1, 1, 400>}]} {
    %c0 = arith.constant 0 : index
    %c0_0 = arith.constant 0 : index
    %c0_1 = arith.constant 0 : index
    %c0_2 = arith.constant 0 : index
    %0 = vector.load %arg2[%c0, %c0_0, %c0_1, %c0_2] : memref<9x1x1x400xf32, #tpu.memory_space<vmem>>, vector<9x1x1x400xf32>
    %c0_3 = arith.constant 0 : index
    %c0_4 = arith.constant 0 : index
    %c0_5 = arith.constant 0 : index
    %c0_6 = arith.constant 0 : index
    %1 = vector.load %arg1[%c0_3, %c0_4, %c0_5, %c0_6] : memref<1x3x3x400xbf16, #tpu.memory_space<vmem>>, vector<1x1x1x400xbf16>
    %2 = vector.shape_cast %1 : vector<1x1x1x400xbf16> to vector<1x1x400xbf16>
    %3 = arith.extf %2 : vector<1x1x400xbf16> to vector<1x1x400xf32>
    %4 = vector.extract_strided_slice %0 {offsets = [0, 0, 0, 0], sizes = [1, 1, 1, 400], strides = [1, 1, 1, 1]} : vector<9x1x1x400xf32> to vector<1x1x1x400xf32>
    %5 = vector.shape_cast %4 : vector<1x1x1x400xf32> to vector<1x1x400xf32>
    %6 = arith.mulf %3, %5 : vector<1x1x400xf32>
    %c0_7 = arith.constant 0 : index
    %c0_8 = arith.constant 0 : index
    %c1 = arith.constant 1 : index
    %c0_9 = arith.constant 0 : index
    %7 = vector.load %arg1[%c0_7, %c0_8, %c1, %c0_9] : memref<1x3x3x400xbf16, #tpu.memory_space<vmem>>, vector<1x1x1x400xbf16>
    %8 = vector.shape_cast %7 : vector<1x1x1x400xbf16> to vector<1x1x400xbf16>
    %9 = arith.extf %8 : vector<1x1x400xbf16> to vector<1x1x400xf32>
    %10 = vector.extract_strided_slice %0 {offsets = [1, 0, 0, 0], sizes = [1, 1, 1, 400], strides = [1, 1, 1, 1]} : vector<9x1x1x400xf32> to vector<1x1x1x400xf32>
    %11 = vector.shape_cast %10 : vector<1x1x1x400xf32> to vector<1x1x400xf32>
    %12 = arith.mulf %9, %11 : vector<1x1x400xf32>
    %13 = arith.addf %6, %12 : vector<1x1x400xf32>
    %c0_10 = arith.constant 0 : index
    %c0_11 = arith.constant 0 : index
    %c2 = arith.constant 2 : index
    %c0_12 = arith.constant 0 : index
    %14 = vector.load %arg1[%c0_10, %c0_11, %c2, %c0_12] : memref<1x3x3x400xbf16, #tpu.memory_space<vmem>>, vector<1x1x1x400xbf16>
    %15 = vector.shape_cast %14 : vector<1x1x1x400xbf16> to vector<1x1x400xbf16>
    %16 = arith.extf %15 : vector<1x1x400xbf16> to vector<1x1x400xf32>
    %17 = vector.extract_strided_slice %0 {offsets = [2, 0, 0, 0], sizes = [1, 1, 1, 400], strides = [1, 1, 1, 1]} : vector<9x1x1x400xf32> to vector<1x1x1x400xf32>
    %18 = vector.shape_cast %17 : vector<1x1x1x400xf32> to vector<1x1x400xf32>
    %19 = arith.mulf %16, %18 : vector<1x1x400xf32>
    %20 = arith.addf %13, %19 : vector<1x1x400xf32>
    %c0_13 = arith.constant 0 : index
    %c1_14 = arith.constant 1 : index
    %c0_15 = arith.constant 0 : index
    %c0_16 = arith.constant 0 : index
    %21 = vector.load %arg1[%c0_13, %c1_14, %c0_15, %c0_16] : memref<1x3x3x400xbf16, #tpu.memory_space<vmem>>, vector<1x1x1x400xbf16>
    %22 = vector.shape_cast %21 : vector<1x1x1x400xbf16> to vector<1x1x400xbf16>
    %23 = arith.extf %22 : vector<1x1x400xbf16> to vector<1x1x400xf32>
    %24 = vector.extract_strided_slice %0 {offsets = [3, 0, 0, 0], sizes = [1, 1, 1, 400], strides = [1, 1, 1, 1]} : vector<9x1x1x400xf32> to vector<1x1x1x400xf32>
    %25 = vector.shape_cast %24 : vector<1x1x1x400xf32> to vector<1x1x400xf32>
    %26 = arith.mulf %23, %25 : vector<1x1x400xf32>
    %27 = arith.addf %20, %26 : vector<1x1x400xf32>
    %c0_17 = arith.constant 0 : index
    %c1_18 = arith.constant 1 : index
    %c1_19 = arith.constant 1 : index
    %c0_20 = arith.constant 0 : index
    %28 = vector.load %arg1[%c0_17, %c1_18, %c1_19, %c0_20] : memref<1x3x3x400xbf16, #tpu.memory_space<vmem>>, vector<1x1x1x400xbf16>
    %29 = vector.shape_cast %28 : vector<1x1x1x400xbf16> to vector<1x1x400xbf16>
    %30 = arith.extf %29 : vector<1x1x400xbf16> to vector<1x1x400xf32>
    %31 = vector.extract_strided_slice %0 {offsets = [4, 0, 0, 0], sizes = [1, 1, 1, 400], strides = [1, 1, 1, 1]} : vector<9x1x1x400xf32> to vector<1x1x1x400xf32>
    %32 = vector.shape_cast %31 : vector<1x1x1x400xf32> to vector<1x1x400xf32>
    %33 = arith.mulf %30, %32 : vector<1x1x400xf32>
    %34 = arith.addf %27, %33 : vector<1x1x400xf32>
    %c0_21 = arith.constant 0 : index
    %c1_22 = arith.constant 1 : index
    %c2_23 = arith.constant 2 : index
    %c0_24 = arith.constant 0 : index
    %35 = vector.load %arg1[%c0_21, %c1_22, %c2_23, %c0_24] : memref<1x3x3x400xbf16, #tpu.memory_space<vmem>>, vector<1x1x1x400xbf16>
    %36 = vector.shape_cast %35 : vector<1x1x1x400xbf16> to vector<1x1x400xbf16>
    %37 = arith.extf %36 : vector<1x1x400xbf16> to vector<1x1x400xf32>
    %38 = vector.extract_strided_slice %0 {offsets = [5, 0, 0, 0], sizes = [1, 1, 1, 400], strides = [1, 1, 1, 1]} : vector<9x1x1x400xf32> to vector<1x1x1x400xf32>
    %39 = vector.shape_cast %38 : vector<1x1x1x400xf32> to vector<1x1x400xf32>
    %40 = arith.mulf %37, %39 : vector<1x1x400xf32>
    %41 = arith.addf %34, %40 : vector<1x1x400xf32>
    %c0_25 = arith.constant 0 : index
    %c2_26 = arith.constant 2 : index
    %c0_27 = arith.constant 0 : index
    %c0_28 = arith.constant 0 : index
    %42 = vector.load %arg1[%c0_25, %c2_26, %c0_27, %c0_28] : memref<1x3x3x400xbf16, #tpu.memory_space<vmem>>, vector<1x1x1x400xbf16>
    %43 = vector.shape_cast %42 : vector<1x1x1x400xbf16> to vector<1x1x400xbf16>
    %44 = arith.extf %43 : vector<1x1x400xbf16> to vector<1x1x400xf32>
    %45 = vector.extract_strided_slice %0 {offsets = [6, 0, 0, 0], sizes = [1, 1, 1, 400], strides = [1, 1, 1, 1]} : vector<9x1x1x400xf32> to vector<1x1x1x400xf32>
    %46 = vector.shape_cast %45 : vector<1x1x1x400xf32> to vector<1x1x400xf32>
    %47 = arith.mulf %44, %46 : vector<1x1x400xf32>
    %48 = arith.addf %41, %47 : vector<1x1x400xf32>
    %c0_29 = arith.constant 0 : index
    %c2_30 = arith.constant 2 : index
    %c1_31 = arith.constant 1 : index
    %c0_32 = arith.constant 0 : index
    %49 = vector.load %arg1[%c0_29, %c2_30, %c1_31, %c0_32] : memref<1x3x3x400xbf16, #tpu.memory_space<vmem>>, vector<1x1x1x400xbf16>
    %50 = vector.shape_cast %49 : vector<1x1x1x400xbf16> to vector<1x1x400xbf16>
    %51 = arith.extf %50 : vector<1x1x400xbf16> to vector<1x1x400xf32>
    %52 = vector.extract_strided_slice %0 {offsets = [7, 0, 0, 0], sizes = [1, 1, 1, 400], strides = [1, 1, 1, 1]} : vector<9x1x1x400xf32> to vector<1x1x1x400xf32>
    %53 = vector.shape_cast %52 : vector<1x1x1x400xf32> to vector<1x1x400xf32>
    %54 = arith.mulf %51, %53 : vector<1x1x400xf32>
    %55 = arith.addf %48, %54 : vector<1x1x400xf32>
    %c0_33 = arith.constant 0 : index
    %c2_34 = arith.constant 2 : index
    %c2_35 = arith.constant 2 : index
    %c0_36 = arith.constant 0 : index
    %56 = vector.load %arg1[%c0_33, %c2_34, %c2_35, %c0_36] : memref<1x3x3x400xbf16, #tpu.memory_space<vmem>>, vector<1x1x1x400xbf16>
    %57 = vector.shape_cast %56 : vector<1x1x1x400xbf16> to vector<1x1x400xbf16>
    %58 = arith.extf %57 : vector<1x1x400xbf16> to vector<1x1x400xf32>
    %59 = vector.extract_strided_slice %0 {offsets = [8, 0, 0, 0], sizes = [1, 1, 1, 400], strides = [1, 1, 1, 1]} : vector<9x1x1x400xf32> to vector<1x1x1x400xf32>
    %60 = vector.shape_cast %59 : vector<1x1x1x400xf32> to vector<1x1x400xf32>
    %61 = arith.mulf %58, %60 : vector<1x1x400xf32>
    %62 = arith.addf %55, %61 : vector<1x1x400xf32>
    %c0_37 = arith.constant 0 : index
    %c0_38 = arith.constant 0 : index
    %c0_39 = arith.constant 0 : index
    %63 = vector.load %arg3[%c0_37, %c0_38, %c0_39] : memref<1x1x400xf32, #tpu.memory_space<vmem>>, vector<1x1x400xf32>
    %64 = arith.mulf %62, %63 : vector<1x1x400xf32>
    %c0_40 = arith.constant 0 : index
    %c0_41 = arith.constant 0 : index
    %c0_42 = arith.constant 0 : index
    %65 = vector.load %arg4[%c0_40, %c0_41, %c0_42] : memref<1x1x400xf32, #tpu.memory_space<vmem>>, vector<1x1x400xf32>
    %66 = arith.addf %64, %65 : vector<1x1x400xf32>
    %67 = arith.truncf %66 : vector<1x1x400xf32> to vector<1x1x400xbf16>
    %c0_43 = arith.constant 0 : index
    %c0_44 = arith.constant 0 : index
    %c0_45 = arith.constant 0 : index
    %c0_46 = arith.constant 0 : index
    %68 = vector.load %arg5[%c0_43, %c0_44, %c0_45, %c0_46] : memref<1x1x1x400xbf16, #tpu.memory_space<vmem>>, vector<1x1x1x400xbf16>
    %69 = vector.shape_cast %68 : vector<1x1x1x400xbf16> to vector<1x1x400xbf16>
    %70 = vector.shape_cast %67 : vector<1x1x400xbf16> to vector<1x1x1x400xbf16>
    tpu.vector_store %arg5[%c0_43, %c0_44, %c0_45, %c0_46], %70 {strides = array<i32>} : memref<1x1x1x400xbf16, #tpu.memory_space<vmem>>, vector<1x1x1x400xbf16>,
    return
  }
  func.func @transform_0(%arg0: i32) -> (i32, i32, i32, i32) {
    %c0_i32 = arith.constant 0 : i32
    %c0_i32_0 = arith.constant 0 : i32
    %c0_i32_1 = arith.constant 0 : i32
    %c0_i32_2 = arith.constant 0 : i32
    return %arg0, %c0_i32, %c0_i32_0, %c0_i32_1 : i32, i32, i32, i32
  }
  func.func @transform_1(%arg0: i32) -> (i32, i32, i32, i32) {
    %c0_i32 = arith.constant 0 : i32
    %c0_i32_0 = arith.constant 0 : i32
    %c0_i32_1 = arith.constant 0 : i32
    %c0_i32_2 = arith.constant 0 : i32
    %c0_i32_3 = arith.constant 0 : i32
    return %c0_i32, %c0_i32_0, %c0_i32_1, %c0_i32_2 : i32, i32, i32, i32
  }
  func.func @transform_2(%arg0: i32) -> (i32, i32, i32) {
    %c0_i32 = arith.constant 0 : i32
    %c0_i32_0 = arith.constant 0 : i32
    %c0_i32_1 = arith.constant 0 : i32
    %c0_i32_2 = arith.constant 0 : i32
    return %c0_i32, %c0_i32_0, %c0_i32_1 : i32, i32, i32
  }
  func.func @transform_3(%arg0: i32) -> (i32, i32, i32) {
    %c0_i32 = arith.constant 0 : i32
    %c0_i32_0 = arith.constant 0 : i32
    %c0_i32_1 = arith.constant 0 : i32
    %c0_i32_2 = arith.constant 0 : i32
    return %c0_i32, %c0_i32_0, %c0_i32_1 : i32, i32, i32
  }
  func.func @transform_4(%arg0: i32) -> (i32, i32, i32, i32) {
    %c0_i32 = arith.constant 0 : i32
    %c0_i32_0 = arith.constant 0 : i32
    %c0_i32_1 = arith.constant 0 : i32
    %c0_i32_2 = arith.constant 0 : i32
    return %arg0, %c0_i32, %c0_i32_0, %c0_i32_1 : i32, i32, i32, i32
  }
}

module attributes {stable_mosaic.version = 11 : i64} {
  func.func @_matmul_bn_res_kernel(%arg0: i32, %arg1: memref<8x400xbf16, #tpu.memory_space<vmem>>, %arg2: memref<400x400xbf16, #tpu.memory_space<vmem>>, %arg3: memref<1x400xf32, #tpu.memory_space<vmem>>, %arg4: memref<1x400xf32, #tpu.memory_space<vmem>>, %arg5: memref<8x400xbf16, #tpu.memory_space<vmem>>, %arg6: memref<8x400xbf16, #tpu.memory_space<vmem>>) attributes {dimension_semantics = [#tpu.dimension_semantics<parallel>], iteration_bounds = array<i64: 1>, scalar_prefetch = 0 : i64, scratch_operands = 0 : i64, tpu.core_type = #tpu.core_type<tc>, window_params = [{transform_indices = @transform_0, window_bounds = array<i64: 8, 400>}, {pipeline_mode = #tpu.pipeline_mode<synchronous>, transform_indices = @transform_1, window_bounds = array<i64: 400, 400>}, {pipeline_mode = #tpu.pipeline_mode<synchronous>, transform_indices = @transform_2, window_bounds = array<i64: 1, 400>}, {pipeline_mode = #tpu.pipeline_mode<synchronous>, transform_indices = @transform_3, window_bounds = array<i64: 1, 400>}, {transform_indices = @transform_4, window_bounds = array<i64: 8, 400>}, {transform_indices = @transform_5, window_bounds = array<i64: 8, 400>}]} {
    %c0 = arith.constant 0 : index
    %c0_0 = arith.constant 0 : index
    %0 = vector.load %arg1[%c0, %c0_0] : memref<8x400xbf16, #tpu.memory_space<vmem>>, vector<8x400xbf16>
    %c0_1 = arith.constant 0 : index
    %c0_2 = arith.constant 0 : index
    %1 = vector.load %arg2[%c0_1, %c0_2] : memref<400x400xbf16, #tpu.memory_space<vmem>>, vector<400x400xbf16>
    %cst = arith.constant dense<0.000000e+00> : vector<8x400xf32>
    %2 = tpu.matmul %0, %1, %cst {dimension_numbers = #tpu.dot_dimension_numbers<[1], [0], [0], [1], [0, 0, 1, 1], [], []>} : vector<8x400xbf16>, vector<400x400xbf16>, vector<8x400xf32> -> vector<8x400xf32>
    %c0_3 = arith.constant 0 : index
    %c0_4 = arith.constant 0 : index
    %3 = vector.load %arg3[%c0_3, %c0_4] : memref<1x400xf32, #tpu.memory_space<vmem>>, vector<1x400xf32>
    %4 = vector.broadcast %3 : vector<1x400xf32> to vector<8x400xf32>
    %5 = arith.mulf %2, %4 : vector<8x400xf32>
    %c0_5 = arith.constant 0 : index
    %c0_6 = arith.constant 0 : index
    %6 = vector.load %arg4[%c0_5, %c0_6] : memref<1x400xf32, #tpu.memory_space<vmem>>, vector<1x400xf32>
    %7 = vector.broadcast %6 : vector<1x400xf32> to vector<8x400xf32>
    %8 = arith.addf %5, %7 : vector<8x400xf32>
    %c0_7 = arith.constant 0 : index
    %c0_8 = arith.constant 0 : index
    %9 = vector.load %arg5[%c0_7, %c0_8] : memref<8x400xbf16, #tpu.memory_space<vmem>>, vector<8x400xbf16>
    %10 = arith.extf %9 : vector<8x400xbf16> to vector<8x400xf32>
    %11 = arith.addf %8, %10 : vector<8x400xf32>
    %cst_9 = arith.constant 0.000000e+00 : f32
    %12 = vector.broadcast %cst_9 : f32 to vector<8x400xf32>
    %13 = arith.maximumf %11, %12 : vector<8x400xf32>
    %14 = arith.truncf %13 : vector<8x400xf32> to vector<8x400xbf16>
    %c0_10 = arith.constant 0 : index
    %c0_11 = arith.constant 0 : index
    %15 = vector.load %arg6[%c0_10, %c0_11] : memref<8x400xbf16, #tpu.memory_space<vmem>>, vector<8x400xbf16>
    tpu.vector_store %arg6[%c0_10, %c0_11], %14 {strides = array<i32>} : memref<8x400xbf16, #tpu.memory_space<vmem>>, vector<8x400xbf16>,
    return
  }
  func.func @transform_0(%arg0: i32) -> (i32, i32) {
    %c0_i32 = arith.constant 0 : i32
    %c0_i32_0 = arith.constant 0 : i32
    return %arg0, %c0_i32 : i32, i32
  }
  func.func @transform_1(%arg0: i32) -> (i32, i32) {
    %c0_i32 = arith.constant 0 : i32
    %c0_i32_0 = arith.constant 0 : i32
    %c0_i32_1 = arith.constant 0 : i32
    return %c0_i32, %c0_i32_0 : i32, i32
  }
  func.func @transform_2(%arg0: i32) -> (i32, i32) {
    %c0_i32 = arith.constant 0 : i32
    %c0_i32_0 = arith.constant 0 : i32
    %c0_i32_1 = arith.constant 0 : i32
    return %c0_i32, %c0_i32_0 : i32, i32
  }
  func.func @transform_3(%arg0: i32) -> (i32, i32) {
    %c0_i32 = arith.constant 0 : i32
    %c0_i32_0 = arith.constant 0 : i32
    %c0_i32_1 = arith.constant 0 : i32
    return %c0_i32, %c0_i32_0 : i32, i32
  }
  func.func @transform_4(%arg0: i32) -> (i32, i32) {
    %c0_i32 = arith.constant 0 : i32
    %c0_i32_0 = arith.constant 0 : i32
    return %arg0, %c0_i32 : i32, i32
  }
  func.func @transform_5(%arg0: i32) -> (i32, i32) {
    %c0_i32 = arith.constant 0 : i32
    %c0_i32_0 = arith.constant 0 : i32
    return %arg0, %c0_i32 : i32, i32
  }
}

module attributes {stable_mosaic.version = 11 : i64} {
  func.func @_gap_kernel(%arg0: i32, %arg1: memref<2x1x1x400xbf16, #tpu.memory_space<vmem>>, %arg2: memref<2x400xbf16, #tpu.memory_space<vmem>>) attributes {dimension_semantics = [#tpu.dimension_semantics<arbitrary>], iteration_bounds = array<i64: 1>, scalar_prefetch = 0 : i64, scratch_operands = 0 : i64, tpu.core_type = #tpu.core_type<tc>, window_params = [{pipeline_mode = #tpu.pipeline_mode<synchronous>, transform_indices = @transform_0, window_bounds = array<i64: 2, 1, 1, 400>}, {pipeline_mode = #tpu.pipeline_mode<synchronous>, transform_indices = @transform_1, window_bounds = array<i64: 2, 400>}]} {
    %c0 = arith.constant 0 : index
    %c0_0 = arith.constant 0 : index
    %c0_1 = arith.constant 0 : index
    %c0_2 = arith.constant 0 : index
    %0 = vector.load %arg1[%c0, %c0_0, %c0_1, %c0_2] : memref<2x1x1x400xbf16, #tpu.memory_space<vmem>>, vector<2x1x1x400xbf16>
    %1 = arith.extf %0 : vector<2x1x1x400xbf16> to vector<2x1x1x400xf32>
    %cst = arith.constant dense<0.000000e+00> : vector<2x400xf32>
    %2 = vector.multi_reduction <add>, %1, %cst [1, 2] : vector<2x1x1x400xf32> to vector<2x400xf32>
    %cst_3 = arith.constant 1.000000e+00 : f32
    %3 = vector.broadcast %cst_3 : f32 to vector<2x400xf32>
    %4 = arith.mulf %2, %3 : vector<2x400xf32>
    %5 = arith.truncf %4 : vector<2x400xf32> to vector<2x400xbf16>
    %c0_4 = arith.constant 0 : index
    %c0_5 = arith.constant 0 : index
    %6 = vector.load %arg2[%c0_4, %c0_5] : memref<2x400xbf16, #tpu.memory_space<vmem>>, vector<2x400xbf16>
    tpu.vector_store %arg2[%c0_4, %c0_5], %5 {strides = array<i32>} : memref<2x400xbf16, #tpu.memory_space<vmem>>, vector<2x400xbf16>,
    return
  }
  func.func @transform_0(%arg0: i32) -> (i32, i32, i32, i32) {
    %c0_i32 = arith.constant 0 : i32
    %c0_i32_0 = arith.constant 0 : i32
    %c0_i32_1 = arith.constant 0 : i32
    %c0_i32_2 = arith.constant 0 : i32
    %c0_i32_3 = arith.constant 0 : i32
    return %c0_i32, %c0_i32_0, %c0_i32_1, %c0_i32_2 : i32, i32, i32, i32
  }
  func.func @transform_1(%arg0: i32) -> (i32, i32) {
    %c0_i32 = arith.constant 0 : i32
    %c0_i32_0 = arith.constant 0 : i32
    %c0_i32_1 = arith.constant 0 : i32
    return %c0_i32, %c0_i32_0 : i32, i32
  }
}

module attributes {stable_mosaic.version = 11 : i64} {
  func.func @_matmul_bn_kernel(%arg0: i32, %arg1: memref<8x400xbf16, #tpu.memory_space<vmem>>, %arg2: memref<400x128xbf16, #tpu.memory_space<vmem>>, %arg3: memref<1x128xf32, #tpu.memory_space<vmem>>, %arg4: memref<1x128xf32, #tpu.memory_space<vmem>>, %arg5: memref<8x128xf32, #tpu.memory_space<vmem>>) attributes {dimension_semantics = [#tpu.dimension_semantics<parallel>], iteration_bounds = array<i64: 1>, scalar_prefetch = 0 : i64, scratch_operands = 0 : i64, tpu.core_type = #tpu.core_type<tc>, window_params = [{transform_indices = @transform_0, window_bounds = array<i64: 8, 400>}, {pipeline_mode = #tpu.pipeline_mode<synchronous>, transform_indices = @transform_1, window_bounds = array<i64: 400, 128>}, {pipeline_mode = #tpu.pipeline_mode<synchronous>, transform_indices = @transform_2, window_bounds = array<i64: 1, 128>}, {pipeline_mode = #tpu.pipeline_mode<synchronous>, transform_indices = @transform_3, window_bounds = array<i64: 1, 128>}, {transform_indices = @transform_4, window_bounds = array<i64: 8, 128>}]} {
    %c0 = arith.constant 0 : index
    %c0_0 = arith.constant 0 : index
    %0 = vector.load %arg1[%c0, %c0_0] : memref<8x400xbf16, #tpu.memory_space<vmem>>, vector<8x400xbf16>
    %c0_1 = arith.constant 0 : index
    %c0_2 = arith.constant 0 : index
    %1 = vector.load %arg2[%c0_1, %c0_2] : memref<400x128xbf16, #tpu.memory_space<vmem>>, vector<400x128xbf16>
    %cst = arith.constant dense<0.000000e+00> : vector<8x128xf32>
    %2 = tpu.matmul %0, %1, %cst {dimension_numbers = #tpu.dot_dimension_numbers<[1], [0], [0], [1], [0, 0, 1, 1], [], []>} : vector<8x400xbf16>, vector<400x128xbf16>, vector<8x128xf32> -> vector<8x128xf32>
    %c0_3 = arith.constant 0 : index
    %c0_4 = arith.constant 0 : index
    %3 = vector.load %arg3[%c0_3, %c0_4] : memref<1x128xf32, #tpu.memory_space<vmem>>, vector<1x128xf32>
    %4 = vector.broadcast %3 : vector<1x128xf32> to vector<8x128xf32>
    %5 = arith.mulf %2, %4 : vector<8x128xf32>
    %c0_5 = arith.constant 0 : index
    %c0_6 = arith.constant 0 : index
    %6 = vector.load %arg4[%c0_5, %c0_6] : memref<1x128xf32, #tpu.memory_space<vmem>>, vector<1x128xf32>
    %7 = vector.broadcast %6 : vector<1x128xf32> to vector<8x128xf32>
    %8 = arith.addf %5, %7 : vector<8x128xf32>
    %c0_7 = arith.constant 0 : index
    %c0_8 = arith.constant 0 : index
    %9 = vector.load %arg5[%c0_7, %c0_8] : memref<8x128xf32, #tpu.memory_space<vmem>>, vector<8x128xf32>
    tpu.vector_store %arg5[%c0_7, %c0_8], %8 {strides = array<i32>} : memref<8x128xf32, #tpu.memory_space<vmem>>, vector<8x128xf32>,
    return
  }
  func.func @transform_0(%arg0: i32) -> (i32, i32) {
    %c0_i32 = arith.constant 0 : i32
    %c0_i32_0 = arith.constant 0 : i32
    return %arg0, %c0_i32 : i32, i32
  }
  func.func @transform_1(%arg0: i32) -> (i32, i32) {
    %c0_i32 = arith.constant 0 : i32
    %c0_i32_0 = arith.constant 0 : i32
    %c0_i32_1 = arith.constant 0 : i32
    return %c0_i32, %c0_i32_0 : i32, i32
  }
  func.func @transform_2(%arg0: i32) -> (i32, i32) {
    %c0_i32 = arith.constant 0 : i32
    %c0_i32_0 = arith.constant 0 : i32
    %c0_i32_1 = arith.constant 0 : i32
    return %c0_i32, %c0_i32_0 : i32, i32
  }
  func.func @transform_3(%arg0: i32) -> (i32, i32) {
    %c0_i32 = arith.constant 0 : i32
    %c0_i32_0 = arith.constant 0 : i32
    %c0_i32_1 = arith.constant 0 : i32
    return %c0_i32, %c0_i32_0 : i32, i32
  }
  func.func @transform_4(%arg0: i32) -> (i32, i32) {
    %c0_i32 = arith.constant 0 : i32
    %c0_i32_0 = arith.constant 0 : i32
    return %arg0, %c0_i32 : i32, i32
  }
}

</mosaic_0001>

<bundles_post_ra>
// kernel: _lambda_.55
= control target key start
LH: loop header
LB: loop body
LE: loop exit
PB: predicated region body
PF: predicated region fallthrough
CT: control target
= control target key end

     0   :  { %vm321_vm0 = vcmask 1044480   ;;  %vm322_vm1 = vcmask 1045504   ;;  %v1376_v0 = vmov 0.0   ;;  %v1377_v2 = vmov 65535   ;;  %s1940_s1 = inlined_call_operand.vmem [shape: bf16[27,12], index: 1, kind: input, shape index: {}]   ;;  %s1941_s0 = inlined_call_operand.vmem [shape: bf16[456,27], index: 0, kind: input, shape index: {}]   ;;  %s1942_s2 = inlined_call_operand.vmem [shape: f32[1,12], index: 2, kind: input, shape index: {}]   ;;  %s1943_s3 = inlined_call_operand.vmem [shape: f32[1,12], index: 3, kind: input, shape index: {}]   ;;  %s1944_s4 = inlined_call_operand.vmem [shape: bf16[456,12], index: 4, kind: output, shape index: {}]  }
   0x1   :  { %1218 = vmatprep.subr.bf16.mxu0 %v1376_v0  ;;  %v1345_v1 = vld [vmem:[%s1940_s1] sm:$0xff]   ;;  %v323_v3 = vsel %vm321_vm0, 4294967295, %v1377_v2  ;;  %1338 = vmatprep.subr.bf16.mxu1 %v1376_v0  ;;  %v1346_v4 = vld [vmem:[%s1940_s1 + $0x8] sm:$0x3f]   ;;  %vm1378_vm2 = vmmov 0   ;;  %v1348_v8 = vld [vmem:[%s1941_s0 + $0x78] sm:$0xff]  }
   0x2   :  { %1219 = vmatpush3.bf16.msra.mxu0 %v1345_v1  ;;  %v324_v5 = vsel %vm322_vm1, %v323_v3, 0  ;;  %1340 = vmatpush3.bf16.msra.mxu1 %v1345_v1  ;;  %v1347_v7 = vld [vmem:[%s1941_s0] sm:$0xff]   ;;  %vm233_vm3 = vcmask 220160   ;;  %v1349_v9 = vld [vmem:[%s1941_s0 + $0x8] sm:$0xff]   ;;  %v1351_v11 = vld [vmem:[%s1941_s0 + $0x10] sm:$0xff]   ;;  %vm949_vm4 = vcmask 93184  }
   0x3   :  { %1220 = vmatprep.subr.bf16.mxu0 %v1376_v0  ;;  %v326_v6 = vand.u32 %v1346_v4, %v324_v5  ;;  %1222 = vmatprep.mubr.msk.bf16.mxu0 %vm1378_vm2, %v1376_v0  ;;  %v1350_v10 = vld [vmem:[%s1941_s0 + $0x80] sm:$0xff]   ;;  %v1352_v12 = vld [vmem:[%s1941_s0 + $0x88] sm:$0xff]   ;;  %v1353_v13 = vld [vmem:[%s1941_s0 + $0x18] sm:$0xff]  }
   0x4   :  { %1339 = vmatprep.subr.bf16.mxu1 %v1376_v0  ;;  %1282 = vmatprep.mubr.msk.bf16.mxu1 %vm1378_vm2, %v1376_v0  ;;  %v1354_v14 = vld [vmem:[%s1941_s0 + $0x90] sm:$0xff]   ;;  %v1355_v15 = vld [vmem:[%s1941_s0 + $0x20] sm:$0xff]   ;;  %v1356_v16 = vld [vmem:[%s1941_s0 + $0x98] sm:$0xff]  }
   0x5   :  { %v1357_v17 = vld [vmem:[%s1941_s0 + $0x28] sm:$0xff]   ;;  %v1358_v18 = vld [vmem:[%s1941_s0 + $0xa0] sm:$0xff]   ;;  %v1359_v19 = vld [vmem:[%s1941_s0 + $0x30] sm:$0xff]  }
   0x6   :  { %1221 = vmatpush3.bf16.msra.mxu0 %v326_v6  ;;  %1341 = vmatpush3.bf16.msra.mxu1 %v326_v6  ;;  %v1360_v20 = vld [vmem:[%s1941_s0 + $0xa8] sm:$0xff]   ;;  %v1361_v21 = vld [vmem:[%s1941_s0 + $0x38] sm:$0xff]   ;;  %v1362_v22 = vld [vmem:[%s1941_s0 + $0xb0] sm:$0xff]  }
   0x7   :  { %v1363_v23 = vld [vmem:[%s1941_s0 + $0x40] sm:$0xff]   ;;  %v1364_v24 = vld [vmem:[%s1941_s0 + $0xb8] sm:$0xff]   ;;  %v1365_v25 = vld [vmem:[%s1941_s0 + $0x48] sm:$0xff]  }
   0x8   :  { %v1366_v26 = vld [vmem:[%s1941_s0 + $0xc0] sm:$0xff]   ;;  %v1367_v27 = vld [vmem:[%s1941_s0 + $0x50] sm:$0xff]   ;;  %v1368_v28 = vld [vmem:[%s1941_s0 + $0xc8] sm:$0xff]  }
   0x9   :  { %1223 = vmatmul.mubr.msk.bf16.vlgmr.msra.gmra.mrb[0].mxu0 %vm233_vm3, %v1347_v7  ;;  %1283 = vmatmul.mubr.msk.bf16.vlgmr.msra.gmra.mrb[0].mxu1 %vm233_vm3, %v1348_v8  ;;  %v1369_v29 = vld [vmem:[%s1941_s0 + $0x58] sm:$0xff]   ;;  %v1370_v30 = vld [vmem:[%s1941_s0 + $0xd0] sm:$0xff]   ;;  %v1371_v31 = vld [vmem:[%s1941_s0 + $0x60] sm:$0xff]  }
   0xa   :  { %1226 = vmatprep.mubr.msk.bf16.mxu0 %vm1378_vm2, %v1376_v0  ;;  %1286 = vmatprep.mubr.msk.bf16.mxu1 %vm1378_vm2, %v1376_v0  ;;  %v1372_v32 = vld [vmem:[%s1941_s0 + $0xd8] sm:$0xff]   ;;  %v1373_v33 = vld [vmem:[%s1941_s0 + $0x68] sm:$0xff]   ;;  %v1374_v34 = vld [vmem:[%s1941_s0 + $0xe0] ss:$0 sps:$4 sm:$0xff]  }
   0xb   :  { %v1375_v35 = vld [vmem:[%s1941_s0 + $0x70] sm:$0xff]   ;;  %v1591_v36 = vld [vmem:[%s1942_s2] ss:$0 sm:$0xff] }
   0xc   :  { %v1596_v38 = vld [vmem:[%s1943_s3] ss:$0 sm:$0xff] }
  0x11   :  { %1227 = vmatmul.mubr.msk.bf16.gmra.mrb[4].mxu0 %vm233_vm3, %v1349_v9  ;;  %1287 = vmatmul.mubr.msk.bf16.gmra.mrb[4].mxu1 %vm233_vm3, %v1350_v10 }
  0x12   :  { %1230 = vmatprep.mubr.msk.bf16.mxu0 %vm1378_vm2, %v1376_v0  ;;  %1290 = vmatprep.mubr.msk.bf16.mxu1 %vm1378_vm2, %v1376_v0 }
  0x19   :  { %1231 = vmatmul.mubr.msk.bf16.gmra.mrb[8].mxu0 %vm233_vm3, %v1351_v11  ;;  %1291 = vmatmul.mubr.msk.bf16.gmra.mrb[8].mxu1 %vm233_vm3, %v1352_v12 }
  0x1a   :  { %1234 = vmatprep.mubr.msk.bf16.mxu0 %vm1378_vm2, %v1376_v0  ;;  %1294 = vmatprep.mubr.msk.bf16.mxu1 %vm1378_vm2, %v1376_v0 }
  0x21   :  { %1235 = vmatmul.mubr.msk.bf16.gmra.mrb[12].mxu0 %vm233_vm3, %v1353_v13  ;;  %1295 = vmatmul.mubr.msk.bf16.gmra.mrb[12].mxu1 %vm233_vm3, %v1354_v14 }
  0x22   :  { %1238 = vmatprep.mubr.msk.bf16.mxu0 %vm1378_vm2, %v1376_v0  ;;  %1298 = vmatprep.mubr.msk.bf16.mxu1 %vm1378_vm2, %v1376_v0 }
  0x29   :  { %1239 = vmatmul.mubr.msk.bf16.gmra.mrb[16].mxu0 %vm233_vm3, %v1355_v15  ;;  %1299 = vmatmul.mubr.msk.bf16.gmra.mrb[16].mxu1 %vm233_vm3, %v1356_v16 }
  0x2a   :  { %1242 = vmatprep.mubr.msk.bf16.mxu0 %vm1378_vm2, %v1376_v0  ;;  %1302 = vmatprep.mubr.msk.bf16.mxu1 %vm1378_vm2, %v1376_v0 }
  0x31   :  { %1243 = vmatmul.mubr.msk.bf16.gmra.mrb[20].mxu0 %vm233_vm3, %v1357_v17  ;;  %1303 = vmatmul.mubr.msk.bf16.gmra.mrb[20].mxu1 %vm233_vm3, %v1358_v18 }
  0x32   :  { %1246 = vmatprep.mubr.msk.bf16.mxu0 %vm1378_vm2, %v1376_v0  ;;  %1306 = vmatprep.mubr.msk.bf16.mxu1 %vm1378_vm2, %v1376_v0 }
  0x39   :  { %1247 = vmatmul.mubr.msk.bf16.gmra.mrb[24].mxu0 %vm233_vm3, %v1359_v19  ;;  %1307 = vmatmul.mubr.msk.bf16.gmra.mrb[24].mxu1 %vm233_vm3, %v1360_v20 }
  0x3a   :  { %1250 = vmatprep.mubr.msk.bf16.mxu0 %vm1378_vm2, %v1376_v0  ;;  %1310 = vmatprep.mubr.msk.bf16.mxu1 %vm1378_vm2, %v1376_v0 }
  0x41   :  { %1251 = vmatmul.mubr.msk.bf16.gmra.mrb[28].mxu0 %vm233_vm3, %v1361_v21  ;;  %1311 = vmatmul.mubr.msk.bf16.gmra.mrb[28].mxu1 %vm233_vm3, %v1362_v22 }
  0x42   :  { %1254 = vmatprep.mubr.msk.bf16.mxu0 %vm1378_vm2, %v1376_v0  ;;  %1314 = vmatprep.mubr.msk.bf16.mxu1 %vm1378_vm2, %v1376_v0 }
  0x49   :  { %1255 = vmatmul.mubr.msk.bf16.gmra.mrb[32].mxu0 %vm233_vm3, %v1363_v23  ;;  %1315 = vmatmul.mubr.msk.bf16.gmra.mrb[32].mxu1 %vm233_vm3, %v1364_v24 }
  0x4a   :  { %1258 = vmatprep.mubr.msk.bf16.mxu0 %vm1378_vm2, %v1376_v0  ;;  %1318 = vmatprep.mubr.msk.bf16.mxu1 %vm1378_vm2, %v1376_v0 }
  0x51   :  { %1259 = vmatmul.mubr.msk.bf16.gmra.mrb[36].mxu0 %vm233_vm3, %v1365_v25  ;;  %1319 = vmatmul.mubr.msk.bf16.gmra.mrb[36].mxu1 %vm233_vm3, %v1366_v26 }
  0x52   :  { %1262 = vmatprep.mubr.msk.bf16.mxu0 %vm1378_vm2, %v1376_v0  ;;  %1322 = vmatprep.mubr.msk.bf16.mxu1 %vm1378_vm2, %v1376_v0 }
  0x59   :  { %1263 = vmatmul.mubr.msk.bf16.gmra.mrb[40].mxu0 %vm233_vm3, %v1367_v27  ;;  %1323 = vmatmul.mubr.msk.bf16.gmra.mrb[40].mxu1 %vm233_vm3, %v1368_v28 }
  0x5a   :  { %1266 = vmatprep.mubr.msk.bf16.mxu0 %vm1378_vm2, %v1376_v0  ;;  %1326 = vmatprep.mubr.msk.bf16.mxu1 %vm1378_vm2, %v1376_v0 }
  0x61   :  { %1267 = vmatmul.mubr.msk.bf16.gmra.mrb[44].mxu0 %vm233_vm3, %v1369_v29  ;;  %1327 = vmatmul.mubr.msk.bf16.gmra.mrb[44].mxu1 %vm233_vm3, %v1370_v30 }
  0x62   :  { %1270 = vmatprep.mubr.msk.bf16.mxu0 %vm1378_vm2, %v1376_v0  ;;  %1330 = vmatprep.mubr.msk.bf16.mxu1 %vm1378_vm2, %v1376_v0 }
  0x69   :  { %1271 = vmatmul.mubr.msk.bf16.gmra.mrb[48].mxu0 %vm233_vm3, %v1371_v31  ;;  %1331 = vmatmul.mubr.msk.bf16.gmra.mrb[48].mxu1 %vm233_vm3, %v1372_v32 }
  0x6a   :  { %1274 = vmatprep.mubr.msk.bf16.mxu0 %vm1378_vm2, %v1376_v0  ;;  %1334 = vmatprep.mubr.msk.bf16.mxu1 %vm1378_vm2, %v1376_v0 }
  0x71   :  { %1275 = vmatmul.mubr.msk.bf16.gmra.mrb[52].mxu0 %vm233_vm3, %v1373_v33  ;;  %1335 = vmatmul.mubr.msk.bf16.gmra.mrb[52].mxu1 %vm233_vm3, %v1374_v34 }
  0x72   :  { %1278 = vmatprep.mubr.msk.bf16.mxu0 %vm1378_vm2, %v1376_v0 }
  0x79   :  { %1279 = vmatmul.mubr.msk.bf16.gmra.mrb[56].mxu0 %vm233_vm3, %v1375_v35 }
  0xdc   :  { %v362_v37 = vpop.f32.mrb[0].mxu0  ;;  %v482_v39 = vpop.f32.mrb[0].mxu1 }
  0xdd   :  { %v599_v40 = vmul.f32 %v1591_v36, %v362_v37  ;;  %v1224_v41 = vpop.f32.mrb[1].mxu0  ;;  %v629_v42 = vmul.f32 %v1591_v36, %v482_v39  ;;  %v1284_v43 = vpop.f32.mrb[1].mxu1 }
  0xde   :  { %v365_v44 = vpop.f32.mrb[2].mxu0  ;;  %v485_v45 = vpop.f32.mrb[2].mxu1 }
  0xdf   :  { %v663_v46 = vadd.f32 %v1596_v38, %v599_v40  ;;  %v600_v47 = vmul.f32 %v1591_v36, %v365_v44  ;;  %v1225_v48 = vpop.f32.mrb[3].mxu0  ;;  %v693_v49 = vadd.f32 %v1596_v38, %v629_v42  ;;  %v630_v50 = vmul.f32 %v1591_v36, %v485_v45  ;;  %v1285_v51 = vpop.f32.mrb[3].mxu1 }
  0xe1   :  { %v1130_v52 = vpack.c.bf16 %v663_v46, %v663_v46  ;;  %v664_v53 = vadd.f32 %v1596_v38, %v600_v47  ;;  %v1160_v54 = vpack.c.bf16 %v693_v49, %v693_v49  ;;  %v694_v55 = vadd.f32 %v1596_v38, %v630_v50 }
  0xe3   :  { %950 = vst.msk [vmem:[%s1944_s4] sm:$0xf] %vm949_vm4, %v1130_v52  ;;  %v1131_v56 = vpack.c.bf16 %v664_v53, %v664_v53  ;;  %980 = vst.msk [vmem:[%s1944_s4 + $0x78] sm:$0xf] %vm949_vm4, %v1160_v54  ;;  %v1161_v57 = vpack.c.bf16 %v694_v55, %v694_v55 }
  0xe4   :  { %v370_v58 = vpop.f32.mrb[4].mxu0  ;;  %v490_v59 = vpop.f32.mrb[4].mxu1 }
  0xe5   :  { %951 = vst.msk [vmem:[%s1944_s4 + $0x4] sm:$0xf] %vm949_vm4, %v1131_v56  ;;  %v601_v60 = vmul.f32 %v1591_v36, %v370_v58  ;;  %v1228_v61 = vpop.f32.mrb[5].mxu0  ;;  %981 = vst.msk [vmem:[%s1944_s4 + $0x7c] sm:$0xf] %vm949_vm4, %v1161_v57  ;;  %v631_v62 = vmul.f32 %v1591_v36, %v490_v59  ;;  %v1288_v63 = vpop.f32.mrb[5].mxu1 }
  0xe6   :  { %v373_v0 = vpop.f32.mrb[6].mxu0  ;;  %v493_v1 = vpop.f32.mrb[6].mxu1 }
  0xe7   :  { %v665_v2 = vadd.f32 %v1596_v38, %v601_v60  ;;  %v602_v3 = vmul.f32 %v1591_v36, %v373_v0  ;;  %v1229_v4 = vpop.f32.mrb[7].mxu0  ;;  %v695_v5 = vadd.f32 %v1596_v38, %v631_v62  ;;  %v632_v6 = vmul.f32 %v1591_v36, %v493_v1  ;;  %v1289_v7 = vpop.f32.mrb[7].mxu1 }
  0xe9   :  { %v1132_v8 = vpack.c.bf16 %v665_v2, %v665_v2  ;;  %v666_v9 = vadd.f32 %v1596_v38, %v602_v3  ;;  %v1162_v10 = vpack.c.bf16 %v695_v5, %v695_v5  ;;  %v696_v11 = vadd.f32 %v1596_v38, %v632_v6 }
  0xeb   :  { %952 = vst.msk [vmem:[%s1944_s4 + $0x8] sm:$0xf] %vm949_vm4, %v1132_v8  ;;  %v1133_v12 = vpack.c.bf16 %v666_v9, %v666_v9  ;;  %982 = vst.msk [vmem:[%s1944_s4 + $0x80] sm:$0xf] %vm949_vm4, %v1162_v10  ;;  %v1163_v13 = vpack.c.bf16 %v696_v11, %v696_v11 }
  0xec   :  { %v378_v14 = vpop.f32.mrb[8].mxu0  ;;  %v498_v15 = vpop.f32.mrb[8].mxu1 }
  0xed   :  { %953 = vst.msk [vmem:[%s1944_s4 + $0xc] sm:$0xf] %vm949_vm4, %v1133_v12  ;;  %v603_v16 = vmul.f32 %v1591_v36, %v378_v14  ;;  %v1232_v17 = vpop.f32.mrb[9].mxu0  ;;  %983 = vst.msk [vmem:[%s1944_s4 + $0x84] sm:$0xf] %vm949_vm4, %v1163_v13  ;;  %v633_v18 = vmul.f32 %v1591_v36, %v498_v15  ;;  %v1292_v19 = vpop.f32.mrb[9].mxu1 }
  0xee   :  { %v381_v20 = vpop.f32.mrb[10].mxu0  ;;  %v501_v21 = vpop.f32.mrb[10].mxu1 }
  0xef   :  { %v667_v22 = vadd.f32 %v1596_v38, %v603_v16  ;;  %v604_v23 = vmul.f32 %v1591_v36, %v381_v20  ;;  %v1233_v24 = vpop.f32.mrb[11].mxu0  ;;  %v697_v25 = vadd.f32 %v1596_v38, %v633_v18  ;;  %v634_v26 = vmul.f32 %v1591_v36, %v501_v21  ;;  %v1293_v27 = vpop.f32.mrb[11].mxu1 }
  0xf1   :  { %v1134_v28 = vpack.c.bf16 %v667_v22, %v667_v22  ;;  %v668_v29 = vadd.f32 %v1596_v38, %v604_v23  ;;  %v1164_v30 = vpack.c.bf16 %v697_v25, %v697_v25  ;;  %v698_v31 = vadd.f32 %v1596_v38, %v634_v26 }
  0xf3   :  { %954 = vst.msk [vmem:[%s1944_s4 + $0x10] sm:$0xf] %vm949_vm4, %v1134_v28  ;;  %v1135_v32 = vpack.c.bf16 %v668_v29, %v668_v29  ;;  %984 = vst.msk [vmem:[%s1944_s4 + $0x88] sm:$0xf] %vm949_vm4, %v1164_v30  ;;  %v1165_v33 = vpack.c.bf16 %v698_v31, %v698_v31 }
  0xf4   :  { %v386_v34 = vpop.f32.mrb[12].mxu0  ;;  %v506_v35 = vpop.f32.mrb[12].mxu1 }
  0xf5   :  { %955 = vst.msk [vmem:[%s1944_s4 + $0x14] sm:$0xf] %vm949_vm4, %v1135_v32  ;;  %v605_v37 = vmul.f32 %v1591_v36, %v386_v34  ;;  %v1236_v39 = vpop.f32.mrb[13].mxu0  ;;  %985 = vst.msk [vmem:[%s1944_s4 + $0x8c] sm:$0xf] %vm949_vm4, %v1165_v33  ;;  %v635_v40 = vmul.f32 %v1591_v36, %v506_v35  ;;  %v1296_v41 = vpop.f32.mrb[13].mxu1 }
  0xf6   :  { %v389_v42 = vpop.f32.mrb[14].mxu0  ;;  %v509_v43 = vpop.f32.mrb[14].mxu1 }
  0xf7   :  { %v669_v44 = vadd.f32 %v1596_v38, %v605_v37  ;;  %v606_v45 = vmul.f32 %v1591_v36, %v389_v42  ;;  %v1237_v46 = vpop.f32.mrb[15].mxu0  ;;  %v699_v47 = vadd.f32 %v1596_v38, %v635_v40  ;;  %v636_v48 = vmul.f32 %v1591_v36, %v509_v43  ;;  %v1297_v49 = vpop.f32.mrb[15].mxu1 }
  0xf9   :  { %v1136_v50 = vpack.c.bf16 %v669_v44, %v669_v44  ;;  %v670_v51 = vadd.f32 %v1596_v38, %v606_v45  ;;  %v1166_v52 = vpack.c.bf16 %v699_v47, %v699_v47  ;;  %v700_v53 = vadd.f32 %v1596_v38, %v636_v48 }
  0xfb   :  { %956 = vst.msk [vmem:[%s1944_s4 + $0x18] sm:$0xf] %vm949_vm4, %v1136_v50  ;;  %v1137_v54 = vpack.c.bf16 %v670_v51, %v670_v51  ;;  %986 = vst.msk [vmem:[%s1944_s4 + $0x90] sm:$0xf] %vm949_vm4, %v1166_v52  ;;  %v1167_v55 = vpack.c.bf16 %v700_v53, %v700_v53 }
  0xfc   :  { %v394_v56 = vpop.f32.mrb[16].mxu0  ;;  %v514_v57 = vpop.f32.mrb[16].mxu1 }
  0xfd   :  { %957 = vst.msk [vmem:[%s1944_s4 + $0x1c] sm:$0xf] %vm949_vm4, %v1137_v54  ;;  %v607_v58 = vmul.f32 %v1591_v36, %v394_v56  ;;  %v1240_v59 = vpop.f32.mrb[17].mxu0  ;;  %987 = vst.msk [vmem:[%s1944_s4 + $0x94] sm:$0xf] %vm949_vm4, %v1167_v55  ;;  %v637_v60 = vmul.f32 %v1591_v36, %v514_v57  ;;  %v1300_v61 = vpop.f32.mrb[17].mxu1 }
  0xfe   :  { %v397_v62 = vpop.f32.mrb[18].mxu0  ;;  %v517_v63 = vpop.f32.mrb[18].mxu1 }
  0xff   :  { %v671_v0 = vadd.f32 %v1596_v38, %v607_v58  ;;  %v608_v1 = vmul.f32 %v1591_v36, %v397_v62  ;;  %v1241_v2 = vpop.f32.mrb[19].mxu0  ;;  %v701_v3 = vadd.f32 %v1596_v38, %v637_v60  ;;  %v638_v4 = vmul.f32 %v1591_v36, %v517_v63  ;;  %v1301_v5 = vpop.f32.mrb[19].mxu1 }
 0x101   :  { %v1138_v6 = vpack.c.bf16 %v671_v0, %v671_v0  ;;  %v672_v7 = vadd.f32 %v1596_v38, %v608_v1  ;;  %v1168_v8 = vpack.c.bf16 %v701_v3, %v701_v3  ;;  %v702_v9 = vadd.f32 %v1596_v38, %v638_v4 }
 0x103   :  { %958 = vst.msk [vmem:[%s1944_s4 + $0x20] sm:$0xf] %vm949_vm4, %v1138_v6  ;;  %v1139_v10 = vpack.c.bf16 %v672_v7, %v672_v7  ;;  %988 = vst.msk [vmem:[%s1944_s4 + $0x98] sm:$0xf] %vm949_vm4, %v1168_v8  ;;  %v1169_v11 = vpack.c.bf16 %v702_v9, %v702_v9 }
 0x104   :  { %v402_v12 = vpop.f32.mrb[20].mxu0  ;;  %v522_v13 = vpop.f32.mrb[20].mxu1 }
 0x105   :  { %959 = vst.msk [vmem:[%s1944_s4 + $0x24] sm:$0xf] %vm949_vm4, %v1139_v10  ;;  %v609_v14 = vmul.f32 %v1591_v36, %v402_v12  ;;  %v1244_v15 = vpop.f32.mrb[21].mxu0  ;;  %989 = vst.msk [vmem:[%s1944_s4 + $0x9c] sm:$0xf] %vm949_vm4, %v1169_v11  ;;  %v639_v16 = vmul.f32 %v1591_v36, %v522_v13  ;;  %v1304_v17 = vpop.f32.mrb[21].mxu1 }
 0x106   :  { %v405_v18 = vpop.f32.mrb[22].mxu0  ;;  %v525_v19 = vpop.f32.mrb[22].mxu1 }
 0x107   :  { %v673_v20 = vadd.f32 %v1596_v38, %v609_v14  ;;  %v610_v21 = vmul.f32 %v1591_v36, %v405_v18  ;;  %v1245_v22 = vpop.f32.mrb[23].mxu0  ;;  %v703_v23 = vadd.f32 %v1596_v38, %v639_v16  ;;  %v640_v24 = vmul.f32 %v1591_v36, %v525_v19  ;;  %v1305_v25 = vpop.f32.mrb[23].mxu1 }
 0x109   :  { %v1140_v26 = vpack.c.bf16 %v673_v20, %v673_v20  ;;  %v674_v27 = vadd.f32 %v1596_v38, %v610_v21  ;;  %v1170_v28 = vpack.c.bf16 %v703_v23, %v703_v23  ;;  %v704_v29 = vadd.f32 %v1596_v38, %v640_v24 }
 0x10b   :  { %960 = vst.msk [vmem:[%s1944_s4 + $0x28] sm:$0xf] %vm949_vm4, %v1140_v26  ;;  %v1141_v30 = vpack.c.bf16 %v674_v27, %v674_v27  ;;  %990 = vst.msk [vmem:[%s1944_s4 + $0xa0] sm:$0xf] %vm949_vm4, %v1170_v28  ;;  %v1171_v31 = vpack.c.bf16 %v704_v29, %v704_v29 }
 0x10c   :  { %v410_v32 = vpop.f32.mrb[24].mxu0  ;;  %v530_v33 = vpop.f32.mrb[24].mxu1 }
 0x10d   :  { %961 = vst.msk [vmem:[%s1944_s4 + $0x2c] sm:$0xf] %vm949_vm4, %v1141_v30  ;;  %v611_v34 = vmul.f32 %v1591_v36, %v410_v32  ;;  %v1248_v35 = vpop.f32.mrb[25].mxu0  ;;  %991 = vst.msk [vmem:[%s1944_s4 + $0xa4] sm:$0xf] %vm949_vm4, %v1171_v31  ;;  %v641_v37 = vmul.f32 %v1591_v36, %v530_v33  ;;  %v1308_v39 = vpop.f32.mrb[25].mxu1 }
 0x10e   :  { %v413_v40 = vpop.f32.mrb[26].mxu0  ;;  %v533_v41 = vpop.f32.mrb[26].mxu1 }
 0x10f   :  { %v675_v42 = vadd.f32 %v1596_v38, %v611_v34  ;;  %v612_v43 = vmul.f32 %v1591_v36, %v413_v40  ;;  %v1249_v44 = vpop.f32.mrb[27].mxu0  ;;  %v705_v45 = vadd.f32 %v1596_v38, %v641_v37  ;;  %v642_v46 = vmul.f32 %v1591_v36, %v533_v41  ;;  %v1309_v47 = vpop.f32.mrb[27].mxu1 }
 0x111   :  { %v1142_v48 = vpack.c.bf16 %v675_v42, %v675_v42  ;;  %v676_v49 = vadd.f32 %v1596_v38, %v612_v43  ;;  %v1172_v50 = vpack.c.bf16 %v705_v45, %v705_v45  ;;  %v706_v51 = vadd.f32 %v1596_v38, %v642_v46 }
 0x113   :  { %962 = vst.msk [vmem:[%s1944_s4 + $0x30] sm:$0xf] %vm949_vm4, %v1142_v48  ;;  %v1143_v52 = vpack.c.bf16 %v676_v49, %v676_v49  ;;  %992 = vst.msk [vmem:[%s1944_s4 + $0xa8] sm:$0xf] %vm949_vm4, %v1172_v50  ;;  %v1173_v53 = vpack.c.bf16 %v706_v51, %v706_v51 }
 0x114   :  { %v418_v54 = vpop.f32.mrb[28].mxu0  ;;  %v538_v55 = vpop.f32.mrb[28].mxu1 }
 0x115   :  { %963 = vst.msk [vmem:[%s1944_s4 + $0x34] sm:$0xf] %vm949_vm4, %v1143_v52  ;;  %v613_v56 = vmul.f32 %v1591_v36, %v418_v54  ;;  %v1252_v57 = vpop.f32.mrb[29].mxu0  ;;  %993 = vst.msk [vmem:[%s1944_s4 + $0xac] sm:$0xf] %vm949_vm4, %v1173_v53  ;;  %v643_v58 = vmul.f32 %v1591_v36, %v538_v55  ;;  %v1312_v59 = vpop.f32.mrb[29].mxu1 }
 0x116   :  { %v421_v60 = vpop.f32.mrb[30].mxu0  ;;  %v541_v61 = vpop.f32.mrb[30].mxu1 }
 0x117   :  { %v677_v62 = vadd.f32 %v1596_v38, %v613_v56  ;;  %v614_v63 = vmul.f32 %v1591_v36, %v421_v60  ;;  %v1253_v0 = vpop.f32.mrb[31].mxu0  ;;  %v707_v1 = vadd.f32 %v1596_v38, %v643_v58  ;;  %v644_v2 = vmul.f32 %v1591_v36, %v541_v61  ;;  %v1313_v3 = vpop.f32.mrb[31].mxu1 }
 0x119   :  { %v1144_v4 = vpack.c.bf16 %v677_v62, %v677_v62  ;;  %v678_v5 = vadd.f32 %v1596_v38, %v614_v63  ;;  %v1174_v6 = vpack.c.bf16 %v707_v1, %v707_v1  ;;  %v708_v7 = vadd.f32 %v1596_v38, %v644_v2 }
 0x11b   :  { %964 = vst.msk [vmem:[%s1944_s4 + $0x38] sm:$0xf] %vm949_vm4, %v1144_v4  ;;  %v1145_v8 = vpack.c.bf16 %v678_v5, %v678_v5  ;;  %994 = vst.msk [vmem:[%s1944_s4 + $0xb0] sm:$0xf] %vm949_vm4, %v1174_v6  ;;  %v1175_v9 = vpack.c.bf16 %v708_v7, %v708_v7 }
 0x11c   :  { %v426_v10 = vpop.f32.mrb[32].mxu0  ;;  %v546_v11 = vpop.f32.mrb[32].mxu1 }
 0x11d   :  { %965 = vst.msk [vmem:[%s1944_s4 + $0x3c] sm:$0xf] %vm949_vm4, %v1145_v8  ;;  %v615_v12 = vmul.f32 %v1591_v36, %v426_v10  ;;  %v1256_v13 = vpop.f32.mrb[33].mxu0  ;;  %995 = vst.msk [vmem:[%s1944_s4 + $0xb4] sm:$0xf] %vm949_vm4, %v1175_v9  ;;  %v645_v14 = vmul.f32 %v1591_v36, %v546_v11  ;;  %v1316_v15 = vpop.f32.mrb[33].mxu1 }
 0x11e   :  { %v429_v16 = vpop.f32.mrb[34].mxu0  ;;  %v549_v17 = vpop.f32.mrb[34].mxu1 }
 0x11f   :  { %v679_v18 = vadd.f32 %v1596_v38, %v615_v12  ;;  %v616_v19 = vmul.f32 %v1591_v36, %v429_v16  ;;  %v1257_v20 = vpop.f32.mrb[35].mxu0  ;;  %v709_v21 = vadd.f32 %v1596_v38, %v645_v14  ;;  %v646_v22 = vmul.f32 %v1591_v36, %v549_v17  ;;  %v1317_v23 = vpop.f32.mrb[35].mxu1 }
 0x121   :  { %v1146_v24 = vpack.c.bf16 %v679_v18, %v679_v18  ;;  %v680_v25 = vadd.f32 %v1596_v38, %v616_v19  ;;  %v1176_v26 = vpack.c.bf16 %v709_v21, %v709_v21  ;;  %v710_v27 = vadd.f32 %v1596_v38, %v646_v22 }
 0x123   :  { %966 = vst.msk [vmem:[%s1944_s4 + $0x40] sm:$0xf] %vm949_vm4, %v1146_v24  ;;  %v1147_v28 = vpack.c.bf16 %v680_v25, %v680_v25  ;;  %996 = vst.msk [vmem:[%s1944_s4 + $0xb8] sm:$0xf] %vm949_vm4, %v1176_v26  ;;  %v1177_v29 = vpack.c.bf16 %v710_v27, %v710_v27 }
 0x124   :  { %v434_v30 = vpop.f32.mrb[36].mxu0  ;;  %v554_v31 = vpop.f32.mrb[36].mxu1 }
 0x125   :  { %967 = vst.msk [vmem:[%s1944_s4 + $0x44] sm:$0xf] %vm949_vm4, %v1147_v28  ;;  %v617_v32 = vmul.f32 %v1591_v36, %v434_v30  ;;  %v1260_v33 = vpop.f32.mrb[37].mxu0  ;;  %997 = vst.msk [vmem:[%s1944_s4 + $0xbc] sm:$0xf] %vm949_vm4, %v1177_v29  ;;  %v647_v34 = vmul.f32 %v1591_v36, %v554_v31  ;;  %v1320_v35 = vpop.f32.mrb[37].mxu1 }
 0x126   :  { %v437_v37 = vpop.f32.mrb[38].mxu0  ;;  %v557_v39 = vpop.f32.mrb[38].mxu1 }
 0x127   :  { %v681_v40 = vadd.f32 %v1596_v38, %v617_v32  ;;  %v618_v41 = vmul.f32 %v1591_v36, %v437_v37  ;;  %v1261_v42 = vpop.f32.mrb[39].mxu0  ;;  %v711_v43 = vadd.f32 %v1596_v38, %v647_v34  ;;  %v648_v44 = vmul.f32 %v1591_v36, %v557_v39  ;;  %v1321_v45 = vpop.f32.mrb[39].mxu1 }
 0x129   :  { %v1148_v46 = vpack.c.bf16 %v681_v40, %v681_v40  ;;  %v682_v47 = vadd.f32 %v1596_v38, %v618_v41  ;;  %v1178_v48 = vpack.c.bf16 %v711_v43, %v711_v43  ;;  %v712_v49 = vadd.f32 %v1596_v38, %v648_v44 }
 0x12b   :  { %968 = vst.msk [vmem:[%s1944_s4 + $0x48] sm:$0xf] %vm949_vm4, %v1148_v46  ;;  %v1149_v50 = vpack.c.bf16 %v682_v47, %v682_v47  ;;  %998 = vst.msk [vmem:[%s1944_s4 + $0xc0] sm:$0xf] %vm949_vm4, %v1178_v48  ;;  %v1179_v51 = vpack.c.bf16 %v712_v49, %v712_v49 }
 0x12c   :  { %v442_v52 = vpop.f32.mrb[40].mxu0  ;;  %v562_v53 = vpop.f32.mrb[40].mxu1 }
 0x12d   :  { %969 = vst.msk [vmem:[%s1944_s4 + $0x4c] sm:$0xf] %vm949_vm4, %v1149_v50  ;;  %v619_v54 = vmul.f32 %v1591_v36, %v442_v52  ;;  %v1264_v55 = vpop.f32.mrb[41].mxu0  ;;  %999 = vst.msk [vmem:[%s1944_s4 + $0xc4] sm:$0xf] %vm949_vm4, %v1179_v51  ;;  %v649_v56 = vmul.f32 %v1591_v36, %v562_v53  ;;  %v1324_v57 = vpop.f32.mrb[41].mxu1 }
 0x12e   :  { %v445_v58 = vpop.f32.mrb[42].mxu0  ;;  %v565_v59 = vpop.f32.mrb[42].mxu1 }
 0x12f   :  { %v683_v60 = vadd.f32 %v1596_v38, %v619_v54  ;;  %v620_v61 = vmul.f32 %v1591_v36, %v445_v58  ;;  %v1265_v62 = vpop.f32.mrb[43].mxu0  ;;  %v713_v63 = vadd.f32 %v1596_v38, %v649_v56  ;;  %v650_v0 = vmul.f32 %v1591_v36, %v565_v59  ;;  %v1325_v1 = vpop.f32.mrb[43].mxu1 }
 0x131   :  { %v1150_v2 = vpack.c.bf16 %v683_v60, %v683_v60  ;;  %v684_v3 = vadd.f32 %v1596_v38, %v620_v61  ;;  %v1180_v4 = vpack.c.bf16 %v713_v63, %v713_v63  ;;  %v714_v5 = vadd.f32 %v1596_v38, %v650_v0 }
 0x133   :  { %970 = vst.msk [vmem:[%s1944_s4 + $0x50] sm:$0xf] %vm949_vm4, %v1150_v2  ;;  %v1151_v6 = vpack.c.bf16 %v684_v3, %v684_v3  ;;  %1000 = vst.msk [vmem:[%s1944_s4 + $0xc8] sm:$0xf] %vm949_vm4, %v1180_v4  ;;  %v1181_v7 = vpack.c.bf16 %v714_v5, %v714_v5 }
 0x134   :  { %v450_v8 = vpop.f32.mrb[44].mxu0  ;;  %v570_v9 = vpop.f32.mrb[44].mxu1 }
 0x135   :  { %971 = vst.msk [vmem:[%s1944_s4 + $0x54] sm:$0xf] %vm949_vm4, %v1151_v6  ;;  %v621_v10 = vmul.f32 %v1591_v36, %v450_v8  ;;  %v1268_v11 = vpop.f32.mrb[45].mxu0  ;;  %1001 = vst.msk [vmem:[%s1944_s4 + $0xcc] sm:$0xf] %vm949_vm4, %v1181_v7  ;;  %v651_v12 = vmul.f32 %v1591_v36, %v570_v9  ;;  %v1328_v13 = vpop.f32.mrb[45].mxu1 }
 0x136   :  { %v453_v14 = vpop.f32.mrb[46].mxu0  ;;  %v573_v15 = vpop.f32.mrb[46].mxu1 }
 0x137   :  { %v685_v16 = vadd.f32 %v1596_v38, %v621_v10  ;;  %v622_v17 = vmul.f32 %v1591_v36, %v453_v14  ;;  %v1269_v18 = vpop.f32.mrb[47].mxu0  ;;  %v715_v19 = vadd.f32 %v1596_v38, %v651_v12  ;;  %v652_v20 = vmul.f32 %v1591_v36, %v573_v15  ;;  %v1329_v21 = vpop.f32.mrb[47].mxu1 }
 0x139   :  { %v1152_v22 = vpack.c.bf16 %v685_v16, %v685_v16  ;;  %v686_v23 = vadd.f32 %v1596_v38, %v622_v17  ;;  %v1182_v24 = vpack.c.bf16 %v715_v19, %v715_v19  ;;  %v716_v25 = vadd.f32 %v1596_v38, %v652_v20 }
 0x13b   :  { %972 = vst.msk [vmem:[%s1944_s4 + $0x58] sm:$0xf] %vm949_vm4, %v1152_v22  ;;  %v1153_v26 = vpack.c.bf16 %v686_v23, %v686_v23  ;;  %1002 = vst.msk [vmem:[%s1944_s4 + $0xd0] sm:$0xf] %vm949_vm4, %v1182_v24  ;;  %v1183_v27 = vpack.c.bf16 %v716_v25, %v716_v25 }
 0x13c   :  { %v458_v28 = vpop.f32.mrb[48].mxu0  ;;  %v578_v29 = vpop.f32.mrb[48].mxu1 }
 0x13d   :  { %973 = vst.msk [vmem:[%s1944_s4 + $0x5c] sm:$0xf] %vm949_vm4, %v1153_v26  ;;  %v623_v30 = vmul.f32 %v1591_v36, %v458_v28  ;;  %v1272_v31 = vpop.f32.mrb[49].mxu0  ;;  %1003 = vst.msk [vmem:[%s1944_s4 + $0xd4] sm:$0xf] %vm949_vm4, %v1183_v27  ;;  %v653_v32 = vmul.f32 %v1591_v36, %v578_v29  ;;  %v1332_v33 = vpop.f32.mrb[49].mxu1 }
 0x13e   :  { %v461_v34 = vpop.f32.mrb[50].mxu0  ;;  %v581_v35 = vpop.f32.mrb[50].mxu1 }
 0x13f   :  { %v687_v37 = vadd.f32 %v1596_v38, %v623_v30  ;;  %v624_v39 = vmul.f32 %v1591_v36, %v461_v34  ;;  %v1273_v40 = vpop.f32.mrb[51].mxu0  ;;  %v717_v41 = vadd.f32 %v1596_v38, %v653_v32  ;;  %v654_v42 = vmul.f32 %v1591_v36, %v581_v35  ;;  %v1333_v43 = vpop.f32.mrb[51].mxu1 }
 0x141   :  { %v1154_v44 = vpack.c.bf16 %v687_v37, %v687_v37  ;;  %v688_v45 = vadd.f32 %v1596_v38, %v624_v39  ;;  %v1184_v46 = vpack.c.bf16 %v717_v41, %v717_v41  ;;  %v718_v47 = vadd.f32 %v1596_v38, %v654_v42 }
 0x143   :  { %974 = vst.msk [vmem:[%s1944_s4 + $0x60] sm:$0xf] %vm949_vm4, %v1154_v44  ;;  %v1155_v48 = vpack.c.bf16 %v688_v45, %v688_v45  ;;  %1004 = vst.msk [vmem:[%s1944_s4 + $0xd8] sm:$0xf] %vm949_vm4, %v1184_v46  ;;  %v1185_v49 = vpack.c.bf16 %v718_v47, %v718_v47 }
 0x144   :  { %v466_v50 = vpop.f32.mrb[52].mxu0  ;;  %v586_v51 = vpop.f32.mrb[52].mxu1 }
 0x145   :  { %975 = vst.msk [vmem:[%s1944_s4 + $0x64] sm:$0xf] %vm949_vm4, %v1155_v48  ;;  %v625_v52 = vmul.f32 %v1591_v36, %v466_v50  ;;  %v1276_v53 = vpop.f32.mrb[53].mxu0  ;;  %1005 = vst.msk [vmem:[%s1944_s4 + $0xdc] sm:$0xf] %vm949_vm4, %v1185_v49  ;;  %v655_v54 = vmul.f32 %v1591_v36, %v586_v51  ;;  %v1336_v55 = vpop.f32.mrb[53].mxu1 }
 0x146   :  { %v469_v56 = vpop.f32.mrb[54].mxu0  ;;  %v589_v57 = vpop.f32.mrb[54].mxu1 }
 0x147   :  { %v689_v58 = vadd.f32 %v1596_v38, %v625_v52  ;;  %v626_v59 = vmul.f32 %v1591_v36, %v469_v56  ;;  %v1277_v60 = vpop.f32.mrb[55].mxu0  ;;  %v719_v61 = vadd.f32 %v1596_v38, %v655_v54  ;;  %v1337_v62 = vpop.f32.mrb[55].mxu1 }
 0x149   :  { %v1156_v63 = vpack.c.bf16 %v689_v58, %v689_v58  ;;  %v690_v0 = vadd.f32 %v1596_v38, %v626_v59  ;;  %v1186_v1 = vpack.c.bf16 %v719_v61, %v719_v61 }
 0x14b   :  { %976 = vst.msk [vmem:[%s1944_s4 + $0x68] sm:$0xf] %vm949_vm4, %v1156_v63  ;;  %v1157_v2 = vpack.c.bf16 %v690_v0, %v690_v0  ;;  %1006 = vst.msk [vmem:[%s1944_s4 + $0xe0] sm:$0xf] %vm949_vm4, %v1186_v1 }
 0x14c   :  { %v474_v3 = vpop.f32.mrb[56].mxu0 }
 0x14d   :  { %977 = vst.msk [vmem:[%s1944_s4 + $0x6c] sm:$0xf] %vm949_vm4, %v1157_v2  ;;  %v627_v4 = vmul.f32 %v1591_v36, %v474_v3  ;;  %v1280_v5 = vpop.f32.mrb[57].mxu0 }
 0x14e   :  { %v477_v6 = vpop.f32.mrb[58].mxu0 }
 0x14f   :  { %v691_v7 = vadd.f32 %v1596_v38, %v627_v4  ;;  %v628_v8 = vmul.f32 %v1591_v36, %v477_v6  ;;  %v1281_v9 = vpop.f32.mrb[59].mxu0 }
 0x151   :  { %v1158_v10 = vpack.c.bf16 %v691_v7, %v691_v7  ;;  %v692_v11 = vadd.f32 %v1596_v38, %v628_v8 }
 0x153   :  { %978 = vst.msk [vmem:[%s1944_s4 + $0x70] sm:$0xf] %vm949_vm4, %v1158_v10  ;;  %v1159_v12 = vpack.c.bf16 %v692_v11, %v692_v11 }
 0x155   :  { %979 = vst.msk [vmem:[%s1944_s4 + $0x74] sm:$0xf] %vm949_vm4, %v1159_v12 }

// kernel: _lambda_.56
= control target key start
LH: loop header
LB: loop body
LE: loop exit
PB: predicated region body
PF: predicated region fallthrough
CT: control target
= control target key end

     0   :  { %s1595_s6 = smov 0   ;;  %s2136_s0 = inlined_call_operand.vmem [shape: bf16[2,15,15,12], index: 0, kind: input, shape index: {}]   ;;  %s2137_s1 = inlined_call_operand.vmem [shape: bf16[2,13,13,12], index: 1, kind: output, shape index: {}]  }
   0x1 LB: > { %s1402_s7 = sadd.s32 4294967295, %s1583_s6   ;;  %p1406_p0 = scmp.ge.s32.totalorder %s1583_s6, 1  ;;  %s1583_s6 = sphi %s1595_s6, %s11_s6  }
   0x2   : > { %p87_p1 = scmp.lt.s32.totalorder %s1583_s6, 3 }
   0x4   : > { %p88_p2 = pnand %p1406_p0, %p87_p1 }
   0x5   : > { %p107_p3 = scmp.lt.s32.totalorder (!%p88_p2), %s1402_s7, 1  ;;  %vm195_vm0 = vcmask (!%p88_p2), 1046528   ;;  %vm365_vm1 = vcmask (!%p88_p2), 1045504   ;;  %vm1293_vm2 = vcmask (!%p88_p2), 92160   ;;  %vm1294_vm3 = vsmask.f32 (!%p88_p2), 2304 }
   0x6   : > { %91 = sbr.rel (%p88_p2) target bundleno = 191 (0xbf), region = 24  ;;  %vm1291_vm4 = vcmask (!%p88_p2), 93184   ;;  %vm1688_vm5 = vmand (!%p88_p2), %vm1293_vm2, %vm1294_vm3 }
   0xd   : > { %s2141_s7 = smov (!%p107_p3, %s1402_s7), 1 }
   0xe   : > { %s1567_s8 = smul.u32 120, %s2141_s7 }
   0xf   : > { %s1568_s12 = smul.u32 104, %s2141_s7 }
  0x10   : > { %s1609_s11 = scalar_lea.vmem %s2136_s0, %s1567_s8 }
  0x11   : > { %v117_v0 = vld [vmem:[%s1609_s11] sm:$0xff]   ;;  %v1409_v7 = vld [vmem:[%s1609_s11 + $0x8] sm:$0xff]   ;;  %v1618_v14 = vld [vmem:[%s1609_s11 + $0x10] sm:$0xff]   ;;  %s1673_s15 = scalar_lea.vmem %s2137_s1, %s1568_s12 }
  0x12   : > { %v118_v1 = vld [vmem:[%s1609_s11 + $0x4] sm:$0x7]  ;;  %v287_v2 = vld [vmem:[%s1609_s11] sm:$0xe]  ;;  %v143_v3 = vunpack.c.l.bf16 %v117_v0  ;;  %v314_v6 = vunpack.c.h.bf16 %v117_v0  ;;  %v1410_v8 = vld [vmem:[%s1609_s11 + $0xc] sm:$0x7]  ;;  %v484_v10 = vunpack.c.l.bf16 %v1409_v7  ;;  %v680_v13 = vunpack.c.h.bf16 %v1409_v7 }
  0x13   : > { %v144_v4 = vunpack.c.l.bf16 %v118_v1  ;;  %v313_v5 = vunpack.c.l.bf16 %v287_v2  ;;  %v1435_v9 = vld [vmem:[%s1609_s11 + $0x8] sm:$0xe]  ;;  %v485_v11 = vunpack.c.l.bf16 %v1410_v8  ;;  %v1621_v15 = vld [vmem:[%s1609_s11 + $0x14] sm:$0x7]  ;;  %v1487_v20 = vld [vmem:[%s1609_s11 + $0x10] sm:$0xe]  ;;  %v849_v27 = vunpack.c.l.bf16 %v1618_v14 }
  0x14   : > { %v679_v12 = vunpack.c.l.bf16 %v1435_v9  ;;  %v196_v16 = vrot.slane %v143_v3, 1  ;;  %v367_v19 = vrot.slane %v314_v6, 2  ;;  %v562_v21 = vrot.slane %v484_v10, 1  ;;  %v119_v29 = vld [vmem:[%s1609_s11 + $0x8] sm:$0xff]   ;;  %v1411_v44 = vld [vmem:[%s1609_s11 + $0x10] sm:$0xff]   ;;  %v1463_v63 = vld [vmem:[%s1609_s11 + $0x18] sm:$0xff]  }
  0x15   : > { %v197_v17 = vrot.slane %v144_v4, 1  ;;  %v366_v18 = vrot.slane %v313_v5, 2  ;;  %v563_v22 = vrot.slane %v485_v11, 1  ;;  %v732_v24 = vrot.slane %v680_v13, 2  ;;  %v1630_v30 = vld [vmem:[%s1609_s11 + $0xc] sm:$0x7] }
  0x16   : > { %v731_v23 = vrot.slane %v679_v12, 2  ;;  %v850_v28 = vunpack.c.l.bf16 %v1621_v15  ;;  %v1044_v34 = vunpack.c.l.bf16 %v1487_v20  ;;  %v289_v35 = vld [vmem:[%s1609_s11 + $0x8] sm:$0xe]  ;;  %v927_v36 = vrot.slane %v849_v27, 1  ;;  %v1643_v49 = vld [vmem:[%s1609_s11 + $0x14] sm:$0x7] }
  0x17   : > { %v198_v25 = vsel %vm195_vm0, %v196_v16, %v197_v17  ;;  %v368_v26 = vsel %vm365_vm1, %v366_v18, %v367_v19  ;;  %v564_v32 = vsel %vm195_vm0, %v562_v21, %v563_v22  ;;  %v1045_v38 = vunpack.c.h.bf16 %v1618_v14  ;;  %v1437_v54 = vld [vmem:[%s1609_s11 + $0x10] sm:$0xe]  ;;  %v1489_v9 = vld [vmem:[%s1609_s11 + $0x18] sm:$0xe] }
  0x18   : > { %v261_v31 = vmax.f32 %v143_v3, %v198_v25  ;;  %v733_v33 = vsel %vm365_vm1, %v731_v23, %v732_v24  ;;  %v1635_v37 = vrot.slane %v850_v28, 1  ;;  %v262_v39 = vmax.f32 %v144_v4, %v197_v17  ;;  %v1651_v4 = vld [vmem:[%s1609_s11 + $0x1c] sm:$0x7] }
  0x19   : > { %v1096_v41 = vrot.slane %v1044_v34, 2  ;;  %v145_v42 = vunpack.c.l.bf16 %v119_v29  ;;  %v146_v43 = vunpack.c.l.bf16 %v1630_v30  ;;  %v1097_v46 = vrot.slane %v1045_v38, 2 }
  0x1a   : > { %v431_v40 = vmax.f32 %v261_v31, %v368_v26  ;;  %v929_v45 = vsel %vm195_vm0, %v927_v36, %v1635_v37  ;;  %v432_v47 = vmax.f32 %v262_v39, %v367_v19  ;;  %v315_v48 = vunpack.c.l.bf16 %v289_v35 }
  0x1b   : > { %v199_v51 = vrot.slane %v145_v42, 1  ;;  %v200_v52 = vrot.slane %v146_v43, 1  ;;  %v316_v53 = vunpack.c.h.bf16 %v119_v29  ;;  %v1098_v55 = vsel %vm365_vm1, %v1096_v41, %v1097_v46 }
  0x1c   : > { %v510_v50 = vmax.f32 %v431_v40, %v484_v10  ;;  %v511_v56 = vmax.f32 %v432_v47, %v485_v11  ;;  %v369_v57 = vrot.slane %v315_v48, 2  ;;  %v486_v58 = vunpack.c.l.bf16 %v1411_v44 }
  0x1d   : > { %v201_v60 = vsel %vm195_vm0, %v199_v51, %v200_v52  ;;  %v370_v61 = vrot.slane %v316_v53, 2  ;;  %v487_v62 = vunpack.c.l.bf16 %v1643_v49  ;;  %v681_v3 = vunpack.c.l.bf16 %v1437_v54 }
  0x1e   : > { %v627_v59 = vmax.f32 %v510_v50, %v564_v32  ;;  %v628_v0 = vmax.f32 %v511_v56, %v563_v22  ;;  %v263_v1 = vmax.f32 %v145_v42, %v201_v60  ;;  %v565_v2 = vrot.slane %v486_v58, 1  ;;  %v121_v22 = vld [vmem:[%s1609_s11 + $0x10] sm:$0xff]   ;;  %v1413_v42 = vld [vmem:[%s1609_s11 + $0x18] sm:$0xff]  }
  0x1f   : > { %v371_v6 = vsel %vm365_vm1, %v369_v57, %v370_v61  ;;  %v1654_v7 = vrot.slane %v487_v62, 1  ;;  %v682_v8 = vunpack.c.h.bf16 %v1411_v44  ;;  %v734_v12 = vrot.slane %v681_v3, 2  ;;  %v291_v32 = vld [vmem:[%s1609_s11 + $0x10] sm:$0xe]  ;;  %v1439_v57 = vld [vmem:[%s1609_s11 + $0x18] sm:$0xe] }
  0x20   : > { %v796_v5 = vmax.f32 %v627_v59, %v733_v33  ;;  %v797_v10 = vmax.f32 %v628_v0, %v732_v24  ;;  %v433_v11 = vmax.f32 %v263_v1, %v371_v6  ;;  %v851_v13 = vunpack.c.l.bf16 %v1463_v63 }
  0x21   : > { %v567_v15 = vsel %vm195_vm0, %v565_v2, %v1654_v7  ;;  %v735_v16 = vrot.slane %v682_v8, 2  ;;  %v852_v17 = vunpack.c.l.bf16 %v1651_v4  ;;  %v1046_v21 = vunpack.c.l.bf16 %v1489_v9  ;;  %v293_v4 = vld [vmem:[%s1609_s11 + $0x18] sm:$0xe] }
  0x22   : > { %v875_v14 = vmax.f32 %v796_v5, %v849_v27  ;;  %v876_v18 = vmax.f32 %v797_v10, %v850_v28  ;;  %v512_v19 = vmax.f32 %v433_v11, %v486_v58  ;;  %v930_v20 = vrot.slane %v851_v13, 1  ;;  %v1668_v27 = vld [vmem:[%s1609_s11 + $0x14] sm:$0x7]  ;;  %v1491_v10 = vld [vmem:[%s1609_s11 + $0x20] sm:$0xe] }
  0x23   : > { %v736_v24 = vsel %vm365_vm1, %v734_v12, %v735_v16  ;;  %v1665_v25 = vrot.slane %v852_v17, 1  ;;  %v1047_v26 = vunpack.c.h.bf16 %v1463_v63  ;;  %v1099_v30 = vrot.slane %v1046_v21, 2  ;;  %v1465_v63 = vld [vmem:[%s1609_s11 + $0x20] sm:$0xff]  }
  0x24   : > { %v992_v23 = vmax.f32 %v875_v14, %v929_v45  ;;  %v993_v28 = vmax.f32 %v876_v18, %v1635_v37  ;;  %v629_v29 = vmax.f32 %v512_v19, %v567_v15  ;;  %v264_v31 = vmax.f32 %v146_v43, %v200_v52  ;;  %v1684_v37 = vld [vmem:[%s1609_s11 + $0x1c] sm:$0x7]  ;;  %v1296_v45 = vld [vmem:[%s1673_s15 + $0x4] sm:$0x7] }
  0x25   : > { %v932_v34 = vsel %vm195_vm0, %v930_v20, %v1665_v25  ;;  %v1679_v35 = vrot.slane %v1047_v26, 2  ;;  %v147_v36 = vunpack.c.l.bf16 %v121_v22  ;;  %v148_v41 = vunpack.c.l.bf16 %v1668_v27  ;;  %v123_v19 = vld [vmem:[%s1609_s11 + $0x18] sm:$0xff]  }
  0x26   : > { %v1161_v33 = vmax.f32 %v992_v23, %v1098_v55  ;;  %v1162_v38 = vmax.f32 %v993_v28, %v1097_v46  ;;  %v798_v39 = vmax.f32 %v629_v29, %v736_v24  ;;  %v434_v40 = vmax.f32 %v264_v31, %v370_v61  ;;  %v1724_v29 = vld [vmem:[%s1609_s11 + $0x1c] sm:$0x7] }
  0x27   : > { %v1101_v46 = vsel %vm365_vm1, %v1099_v30, %v1679_v35  ;;  %v202_v47 = vrot.slane %v147_v36, 1  ;;  %v317_v48 = vunpack.c.l.bf16 %v291_v32  ;;  %v203_v52 = vrot.slane %v148_v41, 1 }
  0x28   : > { %v1541_v44 = vpack.c.bf16 %v1161_v33, %v1161_v33  ;;  %v1542_v49 = vpack.c.bf16 %v1162_v38, %v1162_v38  ;;  %v877_v50 = vmax.f32 %v798_v39, %v851_v13  ;;  %v513_v51 = vmax.f32 %v434_v40, %v487_v62  ;;  %v1705_v62 = vld [vmem:[%s1609_s11 + $0x24] sm:$0x7]  ;;  %v1300_v39 = vld [vmem:[%s1673_s15 + $0xc] sm:$0x7] }
  0x29   : > { %v318_v53 = vunpack.c.h.bf16 %v121_v22  ;;  %v372_v54 = vrot.slane %v317_v48, 2  ;;  %v488_v55 = vunpack.c.l.bf16 %v1413_v42  ;;  %v489_v56 = vunpack.c.l.bf16 %v1684_v37  ;;  %v1415_v38 = vld [vmem:[%s1609_s11 + $0x20] sm:$0xff]  }
  0x2a   : > { %1292 = vst.msk [vmem:[%s1673_s15] sm:$0xf] %vm1291_vm4, %v1541_v44  ;;  %v1297_v58 = vsel %vm1688_vm5, %v1542_v49, %v1296_v45  ;;  %v994_v59 = vmax.f32 %v877_v50, %v932_v34  ;;  %v630_v60 = vmax.f32 %v513_v51, %v1654_v7  ;;  %v204_v61 = vsel %vm195_vm0, %v202_v47, %v203_v52  ;;  %v1735_v44 = vld [vmem:[%s1609_s11 + $0x24] sm:$0x7]  ;;  %v1441_v48 = vld [vmem:[%s1609_s11 + $0x20] sm:$0xe] }
  0x2b   : > { %1298 = vst [vmem:[%s1673_s15 + $0x4] sm:$0x7] %v1297_v58  ;;  %v265_v0 = vmax.f32 %v147_v36, %v204_v61  ;;  %v373_v1 = vrot.slane %v318_v53, 2  ;;  %v568_v2 = vrot.slane %v488_v55, 1  ;;  %v1708_v3 = vrot.slane %v489_v56, 1  ;;  %v1467_v58 = vld [vmem:[%s1609_s11 + $0x28] sm:$0xff]  }
  0x2c   : > { %v1163_v5 = vmax.f32 %v994_v59, %v1101_v46  ;;  %v799_v6 = vmax.f32 %v630_v60, %v735_v16  ;;  %v683_v8 = vunpack.c.l.bf16 %v1439_v57  ;;  %v684_v9 = vunpack.c.h.bf16 %v1413_v42  ;;  %v1745_v59 = vld [vmem:[%s1609_s11 + $0x2c] sm:$0x7] }
  0x2d   : > { %v374_v7 = vsel %vm365_vm1, %v372_v54, %v373_v1  ;;  %v570_v11 = vsel %vm195_vm0, %v568_v2, %v1708_v3  ;;  %v853_v12 = vunpack.c.l.bf16 %v1465_v63  ;;  %v854_v13 = vunpack.c.l.bf16 %v1705_v62 }
  0x2e   : > { %v1543_v14 = vpack.c.bf16 %v1163_v5, %v1163_v5  ;;  %v878_v15 = vmax.f32 %v799_v6, %v852_v17  ;;  %v435_v18 = vmax.f32 %v265_v0, %v374_v7  ;;  %v737_v16 = vrot.slane %v683_v8, 2  ;;  %v1493_v5 = vld [vmem:[%s1609_s11 + $0x28] sm:$0xe] }
  0x2f   : > { %v738_v20 = vrot.slane %v684_v9, 2  ;;  %v933_v21 = vrot.slane %v853_v12, 1  ;;  %v1718_v22 = vrot.slane %v854_v13, 1  ;;  %v1048_v23 = vunpack.c.l.bf16 %v1491_v10 }
  0x30   : > { %1299 = vst.msk [vmem:[%s1673_s15 + $0x8] sm:$0xf] %vm1291_vm4, %v1543_v14  ;;  %v995_v24 = vmax.f32 %v878_v15, %v1665_v25  ;;  %v514_v26 = vmax.f32 %v435_v18, %v488_v55  ;;  %v1049_v27 = vunpack.c.h.bf16 %v1465_v63  ;;  %v266_v28 = vmax.f32 %v148_v41, %v203_v52 }
  0x31   : > { %v739_v17 = vsel %vm365_vm1, %v737_v16, %v738_v20  ;;  %v935_v30 = vsel %vm195_vm0, %v933_v21, %v1718_v22  ;;  %v1102_v31 = vrot.slane %v1048_v23, 2  ;;  %v149_v32 = vunpack.c.l.bf16 %v123_v19 }
  0x32   : > { %v1164_v33 = vmax.f32 %v995_v24, %v1679_v35  ;;  %v631_v34 = vmax.f32 %v514_v26, %v570_v11  ;;  %v1103_v36 = vrot.slane %v1049_v27, 2  ;;  %v436_v25 = vmax.f32 %v266_v28, %v373_v1  ;;  %v295_v26 = vld [vmem:[%s1609_s11 + $0x20] sm:$0xe] }
  0x33   : > { %v150_v40 = vunpack.c.l.bf16 %v1724_v29  ;;  %v205_v41 = vrot.slane %v149_v32, 1  ;;  %v319_v42 = vunpack.c.l.bf16 %v293_v4  ;;  %v320_v37 = vunpack.c.h.bf16 %v123_v19  ;;  %v125_v19 = vld [vmem:[%s1609_s11 + $0x20] sm:$0xff]  }
  0x34   : > { %v1544_v45 = vpack.c.bf16 %v1164_v33, %v1164_v33  ;;  %v800_v46 = vmax.f32 %v631_v34, %v739_v17  ;;  %v1104_v47 = vsel %vm365_vm1, %v1102_v31, %v1103_v36  ;;  %v515_v35 = vmax.f32 %v436_v25, %v489_v56 }
  0x35   : > { %v206_v49 = vrot.slane %v150_v40, 1  ;;  %v375_v50 = vrot.slane %v319_v42, 2  ;;  %v376_v51 = vrot.slane %v320_v37, 2  ;;  %v490_v52 = vunpack.c.l.bf16 %v1415_v38 }
  0x36   : > { %v1301_v53 = vsel %vm1688_vm5, %v1544_v45, %v1300_v39  ;;  %v879_v54 = vmax.f32 %v800_v46, %v853_v12  ;;  %v632_v55 = vmax.f32 %v515_v35, %v1708_v3  ;;  %v491_v57 = vunpack.c.l.bf16 %v1735_v44  ;;  %v1417_v39 = vld [vmem:[%s1609_s11 + $0x28] sm:$0xff]  }
  0x37   : > { %1302 = vst [vmem:[%s1673_s15 + $0xc] sm:$0x7] %v1301_v53  ;;  %v207_v56 = vsel %vm195_vm0, %v205_v41, %v206_v49  ;;  %v377_v60 = vsel %vm365_vm1, %v375_v50, %v376_v51  ;;  %v571_v61 = vrot.slane %v490_v52, 1  ;;  %v685_v63 = vunpack.c.l.bf16 %v1441_v48  ;;  %v1775_v41 = vld [vmem:[%s1609_s11 + $0x2c] sm:$0x7] }
  0x38   : > { %v996_v62 = vmax.f32 %v879_v54, %v935_v30  ;;  %v801_v0 = vmax.f32 %v632_v55, %v738_v20  ;;  %v267_v1 = vmax.f32 %v149_v32, %v207_v56  ;;  %v1750_v2 = vrot.slane %v491_v57, 1  ;;  %v1304_v32 = vld [vmem:[%s1673_s15 + $0x14] sm:$0x7] }
  0x39   : > { %v686_v3 = vunpack.c.h.bf16 %v1415_v38  ;;  %v740_v6 = vrot.slane %v685_v63, 2  ;;  %v855_v8 = vunpack.c.l.bf16 %v1467_v58  ;;  %v856_v9 = vunpack.c.l.bf16 %v1745_v59 }
  0x3a   : > { %v1165_v10 = vmax.f32 %v996_v62, %v1104_v47  ;;  %v880_v7 = vmax.f32 %v801_v0, %v854_v13  ;;  %v437_v11 = vmax.f32 %v267_v1, %v377_v60  ;;  %v573_v12 = vsel %vm195_vm0, %v571_v61, %v1750_v2  ;;  %v1763_v13 = vld [vmem:[%s1609_s11 + $0x24] sm:$0x7]  ;;  %v1495_v62 = vld [vmem:[%s1609_s11 + $0x30] sm:$0xe] }
  0x3b   : > { %v741_v14 = vrot.slane %v686_v3, 2  ;;  %v936_v15 = vrot.slane %v855_v8, 1  ;;  %v1758_v18 = vrot.slane %v856_v9, 1  ;;  %v1050_v16 = vunpack.c.l.bf16 %v1493_v5 }
  0x3c   : > { %v1545_v20 = vpack.c.bf16 %v1165_v10, %v1165_v10  ;;  %v997_v21 = vmax.f32 %v880_v7, %v1718_v22  ;;  %v516_v23 = vmax.f32 %v437_v11, %v490_v52  ;;  %v1051_v24 = vunpack.c.h.bf16 %v1467_v58  ;;  %v1469_v52 = vld [vmem:[%s1609_s11 + $0x30] sm:$0xff]  }
  0x3d   : > { %v742_v27 = vsel %vm365_vm1, %v740_v6, %v741_v14  ;;  %v938_v28 = vsel %vm195_vm0, %v936_v15, %v1758_v18  ;;  %v1105_v29 = vrot.slane %v1050_v16, 2  ;;  %v268_v4 = vmax.f32 %v150_v40, %v206_v49  ;;  %v1788_v58 = vld [vmem:[%s1609_s11 + $0x34] sm:$0x7] }
  0x3e   : > { %1303 = vst.msk [vmem:[%s1673_s15 + $0x10] sm:$0xf] %vm1291_vm4, %v1545_v20  ;;  %v1166_v17 = vmax.f32 %v997_v21, %v1103_v36  ;;  %v633_v30 = vmax.f32 %v516_v23, %v573_v12  ;;  %v1106_v22 = vrot.slane %v1051_v24, 2  ;;  %v151_v31 = vunpack.c.l.bf16 %v125_v19  ;;  %v1443_v36 = vld [vmem:[%s1609_s11 + $0x28] sm:$0xe] }
  0x3f   : > { %v438_v33 = vmax.f32 %v268_v4, %v376_v51  ;;  %v152_v34 = vunpack.c.l.bf16 %v1763_v13  ;;  %v321_v25 = vunpack.c.l.bf16 %v295_v26  ;;  %v322_v38 = vunpack.c.h.bf16 %v125_v19  ;;  %v1802_v23 = vld [vmem:[%s1609_s11 + $0x2c] sm:$0x7]  ;;  %v297_v24 = vld [vmem:[%s1609_s11 + $0x28] sm:$0xe] }
  0x40   : > { %v1546_v42 = vpack.c.bf16 %v1166_v17, %v1166_v17  ;;  %v802_v40 = vmax.f32 %v633_v30, %v742_v27  ;;  %v1107_v37 = vsel %vm365_vm1, %v1105_v29, %v1106_v22  ;;  %v208_v44 = vrot.slane %v151_v31, 1 }
  0x41   : > { %v517_v45 = vmax.f32 %v438_v33, %v491_v57  ;;  %v209_v46 = vrot.slane %v152_v34, 1  ;;  %v378_v47 = vrot.slane %v321_v25, 2  ;;  %v379_v35 = vrot.slane %v322_v38, 2  ;;  %v1419_v33 = vld [vmem:[%s1609_s11 + $0x30] sm:$0xff]   ;;  %v1308_v25 = vld [vmem:[%s1673_s15 + $0x1c] sm:$0x7] }
  0x42   : > { %v1305_v48 = vsel %vm1688_vm5, %v1546_v42, %v1304_v32  ;;  %v881_v49 = vmax.f32 %v802_v40, %v855_v8  ;;  %v492_v50 = vunpack.c.l.bf16 %v1417_v39  ;;  %v493_v51 = vunpack.c.l.bf16 %v1775_v41  ;;  %v1445_v42 = vld [vmem:[%s1609_s11 + $0x30] sm:$0xe] }
  0x43   : > { %1306 = vst [vmem:[%s1673_s15 + $0x14] sm:$0x7] %v1305_v48  ;;  %v634_v53 = vmax.f32 %v517_v45, %v1750_v2  ;;  %v210_v54 = vsel %vm195_vm0, %v208_v44, %v209_v46  ;;  %v380_v55 = vsel %vm365_vm1, %v378_v47, %v379_v35  ;;  %v687_v57 = vunpack.c.l.bf16 %v1443_v36 }
  0x44   : > { %v998_v56 = vmax.f32 %v881_v49, %v938_v28  ;;  %v269_v60 = vmax.f32 %v151_v31, %v210_v54  ;;  %v574_v61 = vrot.slane %v492_v50, 1  ;;  %v1790_v63 = vrot.slane %v493_v51, 1 }
  0x45   : > { %v803_v0 = vmax.f32 %v634_v53, %v741_v14  ;;  %v688_v1 = vunpack.c.h.bf16 %v1417_v39  ;;  %v743_v5 = vrot.slane %v687_v57, 2  ;;  %v857_v2 = vunpack.c.l.bf16 %v1469_v52  ;;  %v127_v14 = vld [vmem:[%s1609_s11 + $0x28] sm:$0xff]   ;;  %v1826_v53 = vld [vmem:[%s1609_s11 + $0x3c] sm:$0x7] }
  0x46   : > { %v1167_v3 = vmax.f32 %v998_v56, %v1107_v37  ;;  %v439_v6 = vmax.f32 %v269_v60, %v380_v55  ;;  %v576_v8 = vsel %vm195_vm0, %v574_v61, %v1790_v63  ;;  %v858_v10 = vunpack.c.l.bf16 %v1788_v58  ;;  %v1497_v58 = vld [vmem:[%s1609_s11 + $0x38] sm:$0xe] }
  0x47   : > { %v882_v7 = vmax.f32 %v803_v0, %v856_v9  ;;  %v744_v11 = vrot.slane %v688_v1, 2  ;;  %v939_v12 = vrot.slane %v857_v2, 1  ;;  %v1052_v15 = vunpack.c.l.bf16 %v1495_v62 }
  0x48   : > { %v1547_v16 = vpack.c.bf16 %v1167_v3, %v1167_v3  ;;  %v518_v19 = vmax.f32 %v439_v6, %v492_v50  ;;  %v1799_v20 = vrot.slane %v858_v10, 1  ;;  %v1053_v21 = vunpack.c.h.bf16 %v1469_v52  ;;  %v1471_v52 = vld [vmem:[%s1609_s11 + $0x38] sm:$0xff]  }
  0x49   : > { %v999_v13 = vmax.f32 %v882_v7, %v1758_v18  ;;  %v745_v59 = vsel %vm365_vm1, %v743_v5, %v744_v11  ;;  %v1108_v9 = vrot.slane %v1052_v15, 2  ;;  %v270_v26 = vmax.f32 %v152_v34, %v209_v46  ;;  %v1814_v18 = vld [vmem:[%s1609_s11 + $0x34] sm:$0x7] }
  0x4a   : > { %1307 = vst.msk [vmem:[%s1673_s15 + $0x18] sm:$0xf] %vm1291_vm4, %v1547_v16  ;;  %v635_v27 = vmax.f32 %v518_v19, %v576_v8  ;;  %v941_v28 = vsel %vm195_vm0, %v939_v12, %v1799_v20  ;;  %v1109_v29 = vrot.slane %v1053_v21, 2  ;;  %v153_v4 = vunpack.c.l.bf16 %v127_v14  ;;  %v129_v7 = vld [vmem:[%s1609_s11 + $0x30] sm:$0xff]  }
  0x4b   : > { %v1168_v17 = vmax.f32 %v999_v13, %v1106_v22  ;;  %v440_v30 = vmax.f32 %v270_v26, %v379_v35  ;;  %v154_v31 = vunpack.c.l.bf16 %v1802_v23  ;;  %v323_v32 = vunpack.c.l.bf16 %v297_v24  ;;  %v1842_v16 = vld [vmem:[%s1609_s11 + $0x34] sm:$0x7]  ;;  %v299_v19 = vld [vmem:[%s1609_s11 + $0x30] sm:$0xe] }
  0x4c   : > { %v804_v38 = vmax.f32 %v635_v27, %v745_v59  ;;  %v1110_v34 = vsel %vm365_vm1, %v1108_v9, %v1109_v29  ;;  %v211_v39 = vrot.slane %v153_v4, 1  ;;  %v324_v41 = vunpack.c.h.bf16 %v127_v14 }
  0x4d   : > { %v1548_v40 = vpack.c.bf16 %v1168_v17, %v1168_v17  ;;  %v519_v37 = vmax.f32 %v440_v30, %v493_v51  ;;  %v212_v22 = vrot.slane %v154_v31, 1  ;;  %v381_v44 = vrot.slane %v323_v32, 2  ;;  %v1421_v30 = vld [vmem:[%s1609_s11 + $0x38] sm:$0xff]  }
  0x4e   : > { %v883_v36 = vmax.f32 %v804_v38, %v857_v2  ;;  %v382_v45 = vrot.slane %v324_v41, 2  ;;  %v494_v46 = vunpack.c.l.bf16 %v1419_v33  ;;  %v495_v47 = vunpack.c.l.bf16 %v1814_v18  ;;  %v1857_v38 = vld [vmem:[%s1609_s11 + $0x3c] sm:$0x7] }
  0x4f   : > { %v1309_v35 = vsel %vm1688_vm5, %v1548_v40, %v1308_v25  ;;  %v636_v48 = vmax.f32 %v519_v37, %v1790_v63  ;;  %v213_v49 = vsel %vm195_vm0, %v211_v39, %v212_v22  ;;  %v689_v50 = vunpack.c.l.bf16 %v1445_v42 }
  0x50   : > { %1310 = vst [vmem:[%s1673_s15 + $0x1c] sm:$0x7] %v1309_v35  ;;  %v1000_v51 = vmax.f32 %v883_v36, %v941_v28  ;;  %v271_v54 = vmax.f32 %v153_v4, %v213_v49  ;;  %v383_v55 = vsel %vm365_vm1, %v381_v44, %v382_v45  ;;  %v577_v57 = vrot.slane %v494_v46, 1  ;;  %v1312_v28 = vld [vmem:[%s1673_s15 + $0x24] sm:$0x7] }
  0x51   : > { %v805_v56 = vmax.f32 %v636_v48, %v744_v11  ;;  %v1831_v60 = vrot.slane %v495_v47, 1  ;;  %v690_v61 = vunpack.c.h.bf16 %v1419_v33  ;;  %v746_v63 = vrot.slane %v689_v50, 2  ;;  %v1473_v35 = vld [vmem:[%s1609_s11 + $0x40] sm:$0xff]  }
  0x52   : > { %v1169_v62 = vmax.f32 %v1000_v51, %v1110_v34  ;;  %v441_v0 = vmax.f32 %v271_v54, %v383_v55  ;;  %v859_v1 = vunpack.c.l.bf16 %v1471_v52  ;;  %v860_v5 = vunpack.c.l.bf16 %v1826_v53  ;;  %v1447_v34 = vld [vmem:[%s1609_s11 + $0x38] sm:$0xe]  ;;  %v1499_v51 = vld [vmem:[%s1609_s11 + $0x40] sm:$0xe] }
  0x53   : > { %v884_v2 = vmax.f32 %v805_v56, %v858_v10  ;;  %v579_v3 = vsel %vm195_vm0, %v577_v57, %v1831_v60  ;;  %v747_v6 = vrot.slane %v690_v61, 2  ;;  %v1054_v8 = vunpack.c.l.bf16 %v1497_v58 }
  0x54   : > { %v1549_v11 = vpack.c.bf16 %v1169_v62, %v1169_v62  ;;  %v520_v12 = vmax.f32 %v441_v0, %v494_v46  ;;  %v942_v15 = vrot.slane %v859_v1, 1  ;;  %v1839_v14 = vrot.slane %v860_v5, 1 }
  0x55   : > { %v1001_v10 = vmax.f32 %v884_v2, %v1799_v20  ;;  %v748_v21 = vsel %vm365_vm1, %v746_v63, %v747_v6  ;;  %v1055_v23 = vunpack.c.h.bf16 %v1471_v52  ;;  %v1111_v24 = vrot.slane %v1054_v8, 2 }
  0x56   : > { %1311 = vst.msk [vmem:[%s1673_s15 + $0x20] sm:$0xf] %vm1291_vm4, %v1549_v11  ;;  %v637_v13 = vmax.f32 %v520_v12, %v579_v3  ;;  %v944_v59 = vsel %vm195_vm0, %v942_v15, %v1839_v14  ;;  %v272_v9 = vmax.f32 %v154_v31, %v212_v22  ;;  %v155_v26 = vunpack.c.l.bf16 %v129_v7  ;;  %v131_v3 = vld [vmem:[%s1609_s11 + $0x38] sm:$0xff]  }
  0x57   : > { %v1170_v27 = vmax.f32 %v1001_v10, %v1109_v29  ;;  %v1852_v4 = vrot.slane %v1055_v23, 2  ;;  %v156_v20 = vunpack.c.l.bf16 %v1842_v16  ;;  %v325_v17 = vunpack.c.l.bf16 %v299_v19  ;;  %v1883_v15 = vld [vmem:[%s1609_s11 + $0x3c] sm:$0x7] }
  0x58   : > { %v806_v32 = vmax.f32 %v637_v13, %v748_v21  ;;  %v442_v33 = vmax.f32 %v272_v9, %v382_v45  ;;  %v214_v18 = vrot.slane %v155_v26, 1  ;;  %v326_v25 = vunpack.c.h.bf16 %v129_v7 }
  0x59   : > { %v1550_v39 = vpack.c.bf16 %v1170_v27, %v1170_v27  ;;  %v1113_v29 = vsel %vm365_vm1, %v1111_v24, %v1852_v4  ;;  %v215_v31 = vrot.slane %v156_v20, 1  ;;  %v384_v41 = vrot.slane %v325_v17, 2  ;;  %v1423_v27 = vld [vmem:[%s1609_s11 + $0x40] sm:$0xff]  }
  0x5a   : > { %v885_v42 = vmax.f32 %v806_v32, %v859_v1  ;;  %v521_v40 = vmax.f32 %v442_v33, %v495_v47  ;;  %v385_v37 = vrot.slane %v326_v25, 2  ;;  %v496_v22 = vunpack.c.l.bf16 %v1421_v30  ;;  %v1871_v47 = vld [vmem:[%s1609_s11 + $0x44] sm:$0x7] }
  0x5b   : > { %v1313_v44 = vsel %vm1688_vm5, %v1550_v39, %v1312_v28  ;;  %v216_v36 = vsel %vm195_vm0, %v214_v18, %v215_v31  ;;  %v497_v45 = vunpack.c.l.bf16 %v1857_v38  ;;  %v691_v46 = vunpack.c.l.bf16 %v1447_v34  ;;  %v1902_v33 = vld [vmem:[%s1609_s11 + $0x44] sm:$0x7]  ;;  %v1316_v18 = vld [vmem:[%s1673_s15 + $0x2c] sm:$0x7] }
  0x5c   : > { %1314 = vst [vmem:[%s1673_s15 + $0x24] sm:$0x7] %v1313_v44  ;;  %v1002_v48 = vmax.f32 %v885_v42, %v944_v59  ;;  %v638_v49 = vmax.f32 %v521_v40, %v1831_v60  ;;  %v273_v50 = vmax.f32 %v155_v26, %v216_v36  ;;  %v386_v52 = vsel %vm365_vm1, %v384_v41, %v385_v37 }
  0x5d   : > { %v580_v54 = vrot.slane %v496_v22, 1  ;;  %v1874_v55 = vrot.slane %v497_v45, 1  ;;  %v692_v57 = vunpack.c.h.bf16 %v1421_v30  ;;  %v749_v58 = vrot.slane %v691_v46, 2 }
  0x5e   : > { %v1171_v56 = vmax.f32 %v1002_v48, %v1113_v29  ;;  %v807_v61 = vmax.f32 %v638_v49, %v747_v6  ;;  %v443_v63 = vmax.f32 %v273_v50, %v386_v52  ;;  %v861_v62 = vunpack.c.l.bf16 %v1473_v35  ;;  %v301_v6 = vld [vmem:[%s1609_s11 + $0x38] sm:$0xe]  ;;  %v1915_v48 = vld [vmem:[%s1609_s11 + $0x4c] sm:$0x7] }
  0x5f   : > { %v582_v60 = vsel %vm195_vm0, %v580_v54, %v1874_v55  ;;  %v750_v0 = vrot.slane %v692_v57, 2  ;;  %v862_v1 = vunpack.c.l.bf16 %v1871_v47  ;;  %v1056_v2 = vunpack.c.l.bf16 %v1499_v51  ;;  %v1501_v51 = vld [vmem:[%s1609_s11 + $0x48] sm:$0xe] }
  0x60   : > { %v1551_v8 = vpack.c.bf16 %v1171_v56, %v1171_v56  ;;  %v886_v7 = vmax.f32 %v807_v61, %v860_v5  ;;  %v522_v11 = vmax.f32 %v443_v63, %v496_v22  ;;  %v945_v12 = vrot.slane %v861_v62, 1 }
  0x61   : > { %v751_v16 = vsel %vm365_vm1, %v749_v58, %v750_v0  ;;  %v1889_v19 = vrot.slane %v862_v1, 1  ;;  %v1057_v10 = vunpack.c.h.bf16 %v1473_v35  ;;  %v1114_v21 = vrot.slane %v1056_v2, 2  ;;  %v1475_v35 = vld [vmem:[%s1609_s11 + $0x48] sm:$0xff]  }
  0x62   : > { %1315 = vst.msk [vmem:[%s1673_s15 + $0x28] sm:$0xf] %vm1291_vm4, %v1551_v8  ;;  %v1003_v53 = vmax.f32 %v886_v7, %v1839_v14  ;;  %v639_v5 = vmax.f32 %v522_v11, %v582_v60  ;;  %v274_v23 = vmax.f32 %v156_v20, %v215_v31  ;;  %v157_v24 = vunpack.c.l.bf16 %v131_v3  ;;  %v1449_v14 = vld [vmem:[%s1609_s11 + $0x40] sm:$0xe]  ;;  %v1929_v11 = vld [vmem:[%s1609_s11 + $0x44] sm:$0x7] }
  0x63   : > { %v947_v13 = vsel %vm195_vm0, %v945_v12, %v1889_v19  ;;  %v1896_v59 = vrot.slane %v1057_v10, 2  ;;  %v158_v9 = vunpack.c.l.bf16 %v1883_v15  ;;  %v327_v26 = vunpack.c.l.bf16 %v301_v6  ;;  %v133_v7 = vld [vmem:[%s1609_s11 + $0x40] sm:$0xff]  }
  0x64   : > { %v1172_v28 = vmax.f32 %v1003_v53, %v1852_v4  ;;  %v808_v17 = vmax.f32 %v639_v5, %v751_v16  ;;  %v444_v30 = vmax.f32 %v274_v23, %v385_v37  ;;  %v217_v32 = vrot.slane %v157_v24, 1  ;;  %v303_v16 = vld [vmem:[%s1609_s11 + $0x40] sm:$0xe] }
  0x65   : > { %v1116_v20 = vsel %vm365_vm1, %v1114_v21, %v1896_v59  ;;  %v218_v25 = vrot.slane %v158_v9, 1  ;;  %v328_v38 = vunpack.c.h.bf16 %v131_v3  ;;  %v387_v34 = vrot.slane %v327_v26, 2 }
  0x66   : > { %v1552_v39 = vpack.c.bf16 %v1172_v28, %v1172_v28  ;;  %v887_v29 = vmax.f32 %v808_v17, %v861_v62  ;;  %v523_v31 = vmax.f32 %v444_v30, %v497_v45  ;;  %v498_v4 = vunpack.c.l.bf16 %v1423_v27  ;;  %v1425_v17 = vld [vmem:[%s1609_s11 + $0x48] sm:$0xff]  }
  0x67   : > { %v219_v41 = vsel %vm195_vm0, %v217_v32, %v218_v25  ;;  %v388_v42 = vrot.slane %v328_v38, 2  ;;  %v499_v40 = vunpack.c.l.bf16 %v1902_v33  ;;  %v693_v37 = vunpack.c.l.bf16 %v1449_v14  ;;  %v1946_v30 = vld [vmem:[%s1609_s11 + $0x4c] sm:$0x7]  ;;  %v1451_v38 = vld [vmem:[%s1609_s11 + $0x48] sm:$0xe] }
  0x68   : > { %v1317_v22 = vsel %vm1688_vm5, %v1552_v39, %v1316_v18  ;;  %v1004_v44 = vmax.f32 %v887_v29, %v947_v13  ;;  %v640_v36 = vmax.f32 %v523_v31, %v1874_v55  ;;  %v275_v46 = vmax.f32 %v157_v24, %v219_v41 }
  0x69   : > { %1318 = vst [vmem:[%s1673_s15 + $0x2c] sm:$0x7] %v1317_v22  ;;  %v389_v45 = vsel %vm365_vm1, %v387_v34, %v388_v42  ;;  %v583_v49 = vrot.slane %v498_v4, 1  ;;  %v1919_v50 = vrot.slane %v499_v40, 1  ;;  %v694_v52 = vunpack.c.h.bf16 %v1423_v27  ;;  %v1477_v22 = vld [vmem:[%s1609_s11 + $0x50] sm:$0xff]  }
  0x6a   : > { %v1173_v54 = vmax.f32 %v1004_v44, %v1116_v20  ;;  %v809_v57 = vmax.f32 %v640_v36, %v750_v0  ;;  %v445_v58 = vmax.f32 %v275_v46, %v389_v45  ;;  %v752_v56 = vrot.slane %v693_v37, 2  ;;  %v1959_v44 = vld [vmem:[%s1609_s11 + $0x54] sm:$0x7] }
  0x6b   : > { %v585_v55 = vsel %vm195_vm0, %v583_v49, %v1919_v50  ;;  %v753_v61 = vrot.slane %v694_v52, 2  ;;  %v863_v63 = vunpack.c.l.bf16 %v1475_v35  ;;  %v864_v62 = vunpack.c.l.bf16 %v1915_v48 }
  0x6c   : > { %v1553_v60 = vpack.c.bf16 %v1173_v54, %v1173_v54  ;;  %v888_v2 = vmax.f32 %v809_v57, %v862_v1  ;;  %v524_v3 = vmax.f32 %v445_v58, %v498_v4  ;;  %v1058_v8 = vunpack.c.l.bf16 %v1501_v51  ;;  %v1503_v51 = vld [vmem:[%s1609_s11 + $0x50] sm:$0xe] }
  0x6d   : > { %v754_v0 = vsel %vm365_vm1, %v752_v56, %v753_v61  ;;  %v948_v12 = vrot.slane %v863_v63, 1  ;;  %v1932_v15 = vrot.slane %v864_v62, 1  ;;  %v1059_v6 = vunpack.c.h.bf16 %v1475_v35 }
  0x6e   : > { %1319 = vst.msk [vmem:[%s1673_s15 + $0x30] sm:$0xf] %vm1291_vm4, %v1553_v60  ;;  %v1005_v47 = vmax.f32 %v888_v2, %v1889_v19  ;;  %v641_v1 = vmax.f32 %v524_v3, %v585_v55  ;;  %v1117_v10 = vrot.slane %v1058_v8, 2  ;;  %v276_v21 = vmax.f32 %v158_v9, %v218_v25  ;;  %v1320_v19 = vld [vmem:[%s1673_s15 + $0x34] sm:$0x7]  ;;  %v135_v2 = vld [vmem:[%s1609_s11 + $0x48] sm:$0xff]  }
  0x6f   : > { %v950_v53 = vsel %vm195_vm0, %v948_v12, %v1932_v15  ;;  %v1940_v5 = vrot.slane %v1059_v6, 2  ;;  %v159_v23 = vunpack.c.l.bf16 %v133_v7  ;;  %v160_v24 = vunpack.c.l.bf16 %v1929_v11  ;;  %v1973_v11 = vld [vmem:[%s1609_s11 + $0x4c] sm:$0x7] }
  0x70   : > { %v1174_v13 = vmax.f32 %v1005_v47, %v1896_v59  ;;  %v810_v26 = vmax.f32 %v641_v1, %v754_v0  ;;  %v446_v27 = vmax.f32 %v276_v21, %v388_v42  ;;  %v329_v28 = vunpack.c.l.bf16 %v303_v16  ;;  %v305_v16 = vld [vmem:[%s1609_s11 + $0x48] sm:$0xe] }
  0x71   : > { %v1119_v9 = vsel %vm365_vm1, %v1117_v10, %v1940_v5  ;;  %v220_v32 = vrot.slane %v159_v23, 1  ;;  %v221_v33 = vrot.slane %v160_v24, 1  ;;  %v330_v14 = vunpack.c.h.bf16 %v133_v7 }
  0x72   : > { %v1554_v18 = vpack.c.bf16 %v1174_v13, %v1174_v13  ;;  %v889_v20 = vmax.f32 %v810_v26, %v863_v63  ;;  %v525_v25 = vmax.f32 %v446_v27, %v499_v40  ;;  %v390_v59 = vrot.slane %v329_v28, 2  ;;  %v1427_v27 = vld [vmem:[%s1609_s11 + $0x50] sm:$0xff]   ;;  %v1324_v28 = vld [vmem:[%s1673_s15 + $0x3c] sm:$0x7] }
  0x73   : > { %v222_v34 = vsel %vm195_vm0, %v220_v32, %v221_v33  ;;  %v391_v39 = vrot.slane %v330_v14, 2  ;;  %v500_v29 = vunpack.c.l.bf16 %v1425_v17  ;;  %v501_v31 = vunpack.c.l.bf16 %v1946_v30 }
  0x74   : > { %v1321_v4 = vsel %vm1688_vm5, %v1554_v18, %v1320_v19  ;;  %v1006_v41 = vmax.f32 %v889_v20, %v950_v53  ;;  %v642_v42 = vmax.f32 %v525_v25, %v1919_v50  ;;  %v277_v37 = vmax.f32 %v159_v23, %v222_v34 }
  0x75   : > { %1322 = vst [vmem:[%s1673_s15 + $0x34] sm:$0x7] %v1321_v4  ;;  %v392_v40 = vsel %vm365_vm1, %v390_v59, %v391_v39  ;;  %v586_v36 = vrot.slane %v500_v29, 1  ;;  %v1963_v46 = vrot.slane %v501_v31, 1  ;;  %v695_v35 = vunpack.c.l.bf16 %v1451_v38  ;;  %v1453_v59 = vld [vmem:[%s1609_s11 + $0x50] sm:$0xe] }
  0x76   : > { %v1175_v48 = vmax.f32 %v1006_v41, %v1119_v9  ;;  %v811_v45 = vmax.f32 %v642_v42, %v753_v61  ;;  %v447_v49 = vmax.f32 %v277_v37, %v392_v40  ;;  %v696_v52 = vunpack.c.h.bf16 %v1425_v17  ;;  %v1479_v4 = vld [vmem:[%s1609_s11 + $0x58] sm:$0xff]  }
  0x77   : > { %v588_v50 = vsel %vm195_vm0, %v586_v36, %v1963_v46  ;;  %v755_v54 = vrot.slane %v695_v35, 2  ;;  %v865_v57 = vunpack.c.l.bf16 %v1477_v22  ;;  %v866_v58 = vunpack.c.l.bf16 %v1959_v44  ;;  %v1998_v41 = vld [vmem:[%s1609_s11 + $0x5c] sm:$0x7] }
  0x78   : > { %v1555_v56 = vpack.c.bf16 %v1175_v48, %v1175_v48  ;;  %v890_v55 = vmax.f32 %v811_v45, %v864_v62  ;;  %v526_v63 = vmax.f32 %v447_v49, %v500_v29  ;;  %v756_v60 = vrot.slane %v696_v52, 2  ;;  %v1505_v48 = vld [vmem:[%s1609_s11 + $0x58] sm:$0xe] }
  0x79   : > { %v951_v3 = vrot.slane %v865_v57, 1  ;;  %v1970_v61 = vrot.slane %v866_v58, 1  ;;  %v1060_v8 = vunpack.c.l.bf16 %v1503_v51  ;;  %v1061_v7 = vunpack.c.h.bf16 %v1477_v22 }
  0x7a   : > { %1323 = vst.msk [vmem:[%s1673_s15 + $0x38] sm:$0xf] %vm1291_vm4, %v1555_v56  ;;  %v1007_v0 = vmax.f32 %v890_v55, %v1932_v15  ;;  %v643_v12 = vmax.f32 %v526_v63, %v588_v50  ;;  %v757_v62 = vsel %vm365_vm1, %v755_v54, %v756_v60  ;;  %v278_v6 = vmax.f32 %v160_v24, %v221_v33  ;;  %v1986_v15 = vld [vmem:[%s1609_s11 + $0x54] sm:$0x7] }
  0x7b   : > { %v953_v47 = vsel %vm195_vm0, %v951_v3, %v1970_v61  ;;  %v1120_v1 = vrot.slane %v1060_v8, 2  ;;  %v1121_v10 = vrot.slane %v1061_v7, 2  ;;  %v161_v21 = vunpack.c.l.bf16 %v135_v2  ;;  %v137_v56 = vld [vmem:[%s1609_s11 + $0x50] sm:$0xff]  }
  0x7c   : > { %v1176_v53 = vmax.f32 %v1007_v0, %v1940_v5  ;;  %v812_v23 = vmax.f32 %v643_v12, %v757_v62  ;;  %v448_v13 = vmax.f32 %v278_v6, %v391_v39  ;;  %v162_v26 = vunpack.c.l.bf16 %v1973_v11  ;;  %v2009_v3 = vld [vmem:[%s1609_s11 + $0x54] sm:$0x7]  ;;  %v307_v0 = vld [vmem:[%s1609_s11 + $0x50] sm:$0xe] }
  0x7d   : > { %v1122_v24 = vsel %vm365_vm1, %v1120_v1, %v1121_v10  ;;  %v223_v17 = vrot.slane %v161_v21, 1  ;;  %v331_v30 = vunpack.c.l.bf16 %v305_v16  ;;  %v332_v19 = vunpack.c.h.bf16 %v135_v2 }
  0x7e   : > { %v1556_v9 = vpack.c.bf16 %v1176_v53, %v1176_v53  ;;  %v891_v32 = vmax.f32 %v812_v23, %v865_v57  ;;  %v527_v5 = vmax.f32 %v448_v13, %v501_v31  ;;  %v224_v33 = vrot.slane %v162_v26, 1  ;;  %v1429_v23 = vld [vmem:[%s1609_s11 + $0x58] sm:$0xff]  }
  0x7f   : > { %v393_v14 = vrot.slane %v331_v30, 2  ;;  %v394_v18 = vrot.slane %v332_v19, 2  ;;  %v502_v20 = vunpack.c.l.bf16 %v1427_v27  ;;  %v503_v25 = vunpack.c.l.bf16 %v1986_v15 }
  0x80   : > { %v1325_v38 = vsel %vm1688_vm5, %v1556_v9, %v1324_v28  ;;  %v1008_v34 = vmax.f32 %v891_v32, %v953_v47  ;;  %v644_v39 = vmax.f32 %v527_v5, %v1963_v46  ;;  %v225_v29 = vsel %vm195_vm0, %v223_v17, %v224_v33  ;;  %v2022_v28 = vld [vmem:[%s1609_s11 + $0x5c] sm:$0x7] }
  0x81   : > { %1326 = vst [vmem:[%s1673_s15 + $0x3c] sm:$0x7] %v1325_v38  ;;  %v279_v31 = vmax.f32 %v161_v21, %v225_v29  ;;  %v395_v42 = vsel %vm365_vm1, %v393_v14, %v394_v18  ;;  %v589_v37 = vrot.slane %v502_v20, 1  ;;  %v590_v22 = vrot.slane %v503_v25, 1  ;;  %v1481_v38 = vld [vmem:[%s1609_s11 + $0x60] sm:$0xff]  }
  0x82   : > { %v1177_v44 = vmax.f32 %v1008_v34, %v1122_v24  ;;  %v813_v40 = vmax.f32 %v644_v39, %v756_v60  ;;  %v697_v36 = vunpack.c.l.bf16 %v1453_v59  ;;  %v698_v35 = vunpack.c.h.bf16 %v1427_v27  ;;  %v2032_v34 = vld [vmem:[%s1609_s11 + $0x64] sm:$0x7] }
  0x83   : > { %v449_v46 = vmax.f32 %v279_v31, %v395_v42  ;;  %v591_v45 = vsel %vm195_vm0, %v589_v37, %v590_v22  ;;  %v867_v49 = vunpack.c.l.bf16 %v1479_v4  ;;  %v868_v52 = vunpack.c.l.bf16 %v1998_v41 }
  0x84   : > { %v1557_v51 = vpack.c.bf16 %v1177_v44, %v1177_v44  ;;  %v892_v50 = vmax.f32 %v813_v40, %v866_v58  ;;  %v758_v54 = vrot.slane %v697_v36, 2  ;;  %v759_v57 = vrot.slane %v698_v35, 2  ;;  %v1507_v35 = vld [vmem:[%s1609_s11 + $0x60] sm:$0xe] }
  0x85   : > { %v528_v55 = vmax.f32 %v449_v46, %v502_v20  ;;  %v954_v63 = vrot.slane %v867_v49, 1  ;;  %v2006_v60 = vrot.slane %v868_v52, 1  ;;  %v1062_v2 = vunpack.c.l.bf16 %v1505_v48 }
  0x86   : > { %1327 = vst.msk [vmem:[%s1673_s15 + $0x40] sm:$0xf] %vm1291_vm4, %v1557_v51  ;;  %v1009_v8 = vmax.f32 %v892_v50, %v1970_v61  ;;  %v760_v7 = vsel %vm365_vm1, %v758_v54, %v759_v57  ;;  %v1063_v11 = vunpack.c.h.bf16 %v1479_v4  ;;  %v280_v58 = vmax.f32 %v162_v26, %v224_v33  ;;  %v1328_v61 = vld [vmem:[%s1673_s15 + $0x44] sm:$0x7]  ;;  %v1455_v33 = vld [vmem:[%s1609_s11 + $0x58] sm:$0xe] }
  0x87   : > { %v645_v12 = vmax.f32 %v528_v55, %v591_v45  ;;  %v956_v62 = vsel %vm195_vm0, %v954_v63, %v2006_v60  ;;  %v1123_v6 = vrot.slane %v1062_v2, 2  ;;  %v163_v16 = vunpack.c.l.bf16 %v137_v56  ;;  %v139_v51 = vld [vmem:[%s1609_s11 + $0x58] sm:$0xff]  }
  0x88   : > { %v1178_v47 = vmax.f32 %v1009_v8, %v1121_v10  ;;  %v1124_v1 = vrot.slane %v1063_v11, 2  ;;  %v450_v21 = vmax.f32 %v280_v58, %v394_v18  ;;  %v164_v53 = vunpack.c.l.bf16 %v2009_v3  ;;  %v2048_v55 = vld [vmem:[%s1609_s11 + $0x5c] sm:$0x7]  ;;  %v309_v8 = vld [vmem:[%s1609_s11 + $0x58] sm:$0xe] }
  0x89   : > { %v814_v13 = vmax.f32 %v645_v12, %v760_v7  ;;  %v226_v27 = vrot.slane %v163_v16, 1  ;;  %v333_v15 = vunpack.c.l.bf16 %v307_v0  ;;  %v334_v26 = vunpack.c.h.bf16 %v137_v56 }
  0x8a   : > { %v1558_v24 = vpack.c.bf16 %v1178_v47, %v1178_v47  ;;  %v1125_v17 = vsel %vm365_vm1, %v1123_v6, %v1124_v1  ;;  %v529_v10 = vmax.f32 %v450_v21, %v503_v25  ;;  %v227_v30 = vrot.slane %v164_v53, 1  ;;  %v1332_v47 = vld [vmem:[%s1673_s15 + $0x4c] sm:$0x7] }
  0x8b   : > { %v893_v19 = vmax.f32 %v814_v13, %v867_v49  ;;  %v396_v9 = vrot.slane %v333_v15, 2  ;;  %v397_v32 = vrot.slane %v334_v26, 2  ;;  %v504_v5 = vunpack.c.l.bf16 %v1429_v23 }
  0x8c   : > { %v1329_v14 = vsel %vm1688_vm5, %v1558_v24, %v1328_v61  ;;  %v646_v18 = vmax.f32 %v529_v10, %v590_v22  ;;  %v228_v20 = vsel %vm195_vm0, %v226_v27, %v227_v30  ;;  %v505_v59 = vunpack.c.l.bf16 %v2022_v28  ;;  %v2063_v27 = vld [vmem:[%s1609_s11 + $0x64] sm:$0x7] }
  0x8d   : > { %1330 = vst [vmem:[%s1673_s15 + $0x44] sm:$0x7] %v1329_v14  ;;  %v1010_v25 = vmax.f32 %v893_v19, %v956_v62  ;;  %v281_v39 = vmax.f32 %v163_v16, %v228_v20  ;;  %v398_v29 = vsel %vm365_vm1, %v396_v9, %v397_v32  ;;  %v592_v4 = vrot.slane %v504_v5, 1  ;;  %v1431_v16 = vld [vmem:[%s1609_s11 + $0x60] sm:$0xff]  }
  0x8e   : > { %v815_v41 = vmax.f32 %v646_v18, %v759_v57  ;;  %v2036_v31 = vrot.slane %v505_v59, 1  ;;  %v699_v42 = vunpack.c.l.bf16 %v1455_v33  ;;  %v700_v37 = vunpack.c.h.bf16 %v1429_v23  ;;  %v1483_v33 = vld [vmem:[%s1609_s11 + $0x68] sm:$0xff]  }
  0x8f   : > { %v1179_v22 = vmax.f32 %v1010_v25, %v1125_v17  ;;  %v451_v44 = vmax.f32 %v281_v39, %v398_v29  ;;  %v869_v40 = vunpack.c.l.bf16 %v1481_v38  ;;  %v870_v36 = vunpack.c.l.bf16 %v2032_v34 }
  0x90   : > { %v894_v48 = vmax.f32 %v815_v41, %v868_v52  ;;  %v594_v46 = vsel %vm195_vm0, %v592_v4, %v2036_v31  ;;  %v761_v45 = vrot.slane %v699_v42, 2  ;;  %v762_v49 = vrot.slane %v700_v37, 2 }
  0x91   : > { %v1559_v50 = vpack.c.bf16 %v1179_v22, %v1179_v22  ;;  %v530_v54 = vmax.f32 %v451_v44, %v504_v5  ;;  %v957_v57 = vrot.slane %v869_v40, 1  ;;  %v2045_v56 = vrot.slane %v870_v36, 1  ;;  %v1509_v44 = vld [vmem:[%s1609_s11 + $0x68] sm:$0xe] }
  0x92   : > { %v1011_v63 = vmax.f32 %v894_v48, %v2006_v60  ;;  %v763_v52 = vsel %vm365_vm1, %v761_v45, %v762_v49  ;;  %v1064_v2 = vunpack.c.l.bf16 %v1507_v35  ;;  %v1065_v3 = vunpack.c.h.bf16 %v1481_v38  ;;  %v2076_v38 = vld [vmem:[%s1609_s11 + $0x6c] sm:$0x7] }
  0x93   : > { %1331 = vst.msk [vmem:[%s1673_s15 + $0x48] sm:$0xf] %vm1291_vm4, %v1559_v50  ;;  %v647_v7 = vmax.f32 %v530_v54, %v594_v46  ;;  %v959_v11 = vsel %vm195_vm0, %v957_v57, %v2045_v56  ;;  %v282_v58 = vmax.f32 %v164_v53, %v227_v30  ;;  %v165_v0 = vunpack.c.l.bf16 %v139_v51  ;;  %v1457_v30 = vld [vmem:[%s1609_s11 + $0x60] sm:$0xe] }
  0x94   : > { %v1180_v12 = vmax.f32 %v1011_v63, %v1124_v1  ;;  %v1126_v62 = vrot.slane %v1064_v2, 2  ;;  %v2057_v6 = vrot.slane %v1065_v3, 2  ;;  %v166_v60 = vunpack.c.l.bf16 %v2048_v55  ;;  %v141_v46 = vld [vmem:[%s1609_s11 + $0x60] sm:$0xff]  }
  0x95   : > { %v816_v21 = vmax.f32 %v647_v7, %v763_v52  ;;  %v452_v23 = vmax.f32 %v282_v58, %v397_v32  ;;  %v229_v61 = vrot.slane %v165_v0, 1  ;;  %v335_v13 = vunpack.c.l.bf16 %v309_v8  ;;  %v311_v8 = vld [vmem:[%s1609_s11 + $0x60] sm:$0xe] }
  0x96   : > { %v1560_v15 = vpack.c.bf16 %v1180_v12, %v1180_v12  ;;  %v1128_v1 = vsel %vm365_vm1, %v1126_v62, %v2057_v6  ;;  %v230_v53 = vrot.slane %v166_v60, 1  ;;  %v336_v26 = vunpack.c.h.bf16 %v139_v51  ;;  %v1433_v12 = vld [vmem:[%s1609_s11 + $0x68] sm:$0xff]  }
  0x97   : > { %v895_v28 = vmax.f32 %v816_v21, %v869_v40  ;;  %v531_v24 = vmax.f32 %v452_v23, %v505_v59  ;;  %v399_v17 = vrot.slane %v335_v13, 2  ;;  %v506_v10 = vunpack.c.l.bf16 %v1431_v16  ;;  %v1434_v23 = vld [vmem:[%s1609_s11 + $0x6c] sm:$0x7] }
  0x98   : > { %v1333_v19 = vsel %vm1688_vm5, %v1560_v15, %v1332_v47  ;;  %v231_v9 = vsel %vm195_vm0, %v229_v61, %v230_v53  ;;  %v400_v32 = vrot.slane %v336_v26, 2  ;;  %v507_v5 = vunpack.c.l.bf16 %v2063_v27 }
  0x99   : > { %1334 = vst [vmem:[%s1673_s15 + $0x4c] sm:$0x7] %v1333_v19  ;;  %v1012_v14 = vmax.f32 %v895_v28, %v959_v11  ;;  %v648_v18 = vmax.f32 %v531_v24, %v2036_v31  ;;  %v283_v20 = vmax.f32 %v165_v0, %v231_v9  ;;  %v595_v59 = vrot.slane %v506_v10, 1  ;;  %v1459_v28 = vld [vmem:[%s1609_s11 + $0x68] sm:$0xe] }
  0x9a   : > { %v401_v25 = vsel %vm365_vm1, %v399_v17, %v400_v32  ;;  %v2079_v39 = vrot.slane %v507_v5, 1  ;;  %v701_v29 = vunpack.c.l.bf16 %v1457_v30  ;;  %v702_v4 = vunpack.c.h.bf16 %v1431_v16 }
  0x9b   : > { %v1181_v41 = vmax.f32 %v1012_v14, %v1128_v1  ;;  %v817_v42 = vmax.f32 %v648_v18, %v762_v49  ;;  %v453_v37 = vmax.f32 %v283_v20, %v401_v25  ;;  %v871_v22 = vunpack.c.l.bf16 %v1483_v33  ;;  %v2089_v49 = vld [vmem:[%s1609_s11 + $0x64] sm:$0x7]  ;;  %v1486_v14 = vld [vmem:[%s1609_s11 + $0x74] sm:$0x7] }
  0x9c   : > { %v597_v31 = vsel %vm195_vm0, %v595_v59, %v2079_v39  ;;  %v764_v40 = vrot.slane %v701_v29, 2  ;;  %v765_v35 = vrot.slane %v702_v4, 2  ;;  %v872_v48 = vunpack.c.l.bf16 %v2076_v38 }
  0x9d   : > { %v1561_v45 = vpack.c.bf16 %v1181_v41, %v1181_v41  ;;  %v896_v51 = vmax.f32 %v817_v42, %v870_v36  ;;  %v532_v50 = vmax.f32 %v453_v37, %v506_v10  ;;  %v960_v54 = vrot.slane %v871_v22, 1  ;;  %v1511_v41 = vld [vmem:[%s1609_s11 + $0x70] sm:$0xe] }
  0x9e   : > { %v766_v57 = vsel %vm365_vm1, %v764_v40, %v765_v35  ;;  %v2092_v55 = vrot.slane %v872_v48, 1  ;;  %v1066_v63 = vunpack.c.l.bf16 %v1509_v44  ;;  %v1067_v52 = vunpack.c.h.bf16 %v1483_v33  ;;  %v1485_v33 = vld [vmem:[%s1609_s11 + $0x70] sm:$0xff]  }
  0x9f   : > { %1335 = vst.msk [vmem:[%s1673_s15 + $0x50] sm:$0xf] %vm1291_vm4, %v1561_v45  ;;  %v1013_v2 = vmax.f32 %v896_v51, %v2045_v56  ;;  %v649_v3 = vmax.f32 %v532_v50, %v597_v31  ;;  %v284_v34 = vmax.f32 %v166_v60, %v230_v53  ;;  %v167_v36 = vunpack.c.l.bf16 %v141_v46  ;;  %v1336_v56 = vld [vmem:[%s1673_s15 + $0x54] sm:$0x7] }
  0xa0   : > { %v962_v7 = vsel %vm195_vm0, %v960_v54, %v2092_v55  ;;  %v1129_v11 = vrot.slane %v1066_v63, 2  ;;  %v1130_v58 = vrot.slane %v1067_v52, 2  ;;  %v168_v0 = vunpack.c.l.bf16 %v2089_v49 }
  0xa1   : > { %v1182_v62 = vmax.f32 %v1013_v2, %v2057_v6  ;;  %v818_v16 = vmax.f32 %v649_v3, %v766_v57  ;;  %v454_v47 = vmax.f32 %v284_v34, %v400_v32  ;;  %v232_v21 = vrot.slane %v167_v36, 1 }
  0xa2   : > { %v1131_v60 = vsel %vm365_vm1, %v1129_v11, %v1130_v58  ;;  %v233_v61 = vrot.slane %v168_v0, 1  ;;  %v337_v13 = vunpack.c.l.bf16 %v311_v8  ;;  %v338_v27 = vunpack.c.h.bf16 %v141_v46 }
  0xa3   : > { %v1562_v15 = vpack.c.bf16 %v1182_v62, %v1182_v62  ;;  %v897_v1 = vmax.f32 %v818_v16, %v871_v22  ;;  %v533_v53 = vmax.f32 %v454_v47, %v507_v5  ;;  %v508_v26 = vunpack.c.l.bf16 %v1433_v12 }
  0xa4   : > { %v234_v6 = vsel %vm195_vm0, %v232_v21, %v233_v61  ;;  %v402_v24 = vrot.slane %v337_v13, 2  ;;  %v403_v17 = vrot.slane %v338_v27, 2  ;;  %v509_v10 = vunpack.c.l.bf16 %v1434_v23 }
  0xa5   : > { %v1337_v30 = vsel %vm1688_vm5, %v1562_v15, %v1336_v56  ;;  %v1014_v19 = vmax.f32 %v897_v1, %v962_v7  ;;  %v650_v9 = vmax.f32 %v533_v53, %v2079_v39  ;;  %v285_v32 = vmax.f32 %v167_v36, %v234_v6  ;;  %v1340_v36 = vld [vmem:[%s1673_s15 + $0x5c] sm:$0x7] }
  0xa6   : > { %1338 = vst [vmem:[%s1673_s15 + $0x54] sm:$0x7] %v1337_v30  ;;  %v404_v5 = vsel %vm365_vm1, %v402_v24, %v403_v17  ;;  %v598_v18 = vrot.slane %v508_v26, 1  ;;  %v599_v20 = vrot.slane %v509_v10, 1  ;;  %v703_v59 = vunpack.c.l.bf16 %v1459_v28 }
  0xa7   : > { %v1183_v38 = vmax.f32 %v1014_v19, %v1131_v60  ;;  %v819_v25 = vmax.f32 %v650_v9, %v765_v35  ;;  %v455_v29 = vmax.f32 %v285_v32, %v404_v5  ;;  %v704_v4 = vunpack.c.h.bf16 %v1433_v12 }
  0xa8   : > { %v600_v42 = vsel %vm195_vm0, %v598_v18, %v599_v20  ;;  %v767_v37 = vrot.slane %v703_v59, 2  ;;  %v873_v22 = vunpack.c.l.bf16 %v1485_v33  ;;  %v874_v39 = vunpack.c.l.bf16 %v1486_v14 }
  0xa9   : > { %v1563_v44 = vpack.c.bf16 %v1183_v38, %v1183_v38  ;;  %v898_v31 = vmax.f32 %v819_v25, %v872_v48  ;;  %v534_v40 = vmax.f32 %v455_v29, %v508_v26  ;;  %v768_v46 = vrot.slane %v704_v4, 2 }
  0xaa   : > { %v963_v45 = vrot.slane %v873_v22, 1  ;;  %v964_v51 = vrot.slane %v874_v39, 1  ;;  %v1068_v50 = vunpack.c.l.bf16 %v1511_v41  ;;  %v1069_v54 = vunpack.c.h.bf16 %v1485_v33 }
  0xab   : > { %1339 = vst.msk [vmem:[%s1673_s15 + $0x58] sm:$0xf] %vm1291_vm4, %v1563_v44  ;;  %v1015_v35 = vmax.f32 %v898_v31, %v2092_v55  ;;  %v651_v49 = vmax.f32 %v534_v40, %v600_v42  ;;  %v769_v57 = vsel %vm365_vm1, %v767_v37, %v768_v46  ;;  %v286_v63 = vmax.f32 %v168_v0, %v233_v61  ;;  %v1344_v61 = vld [vmem:[%s1673_s15 + $0x64] sm:$0x7] }
  0xac   : > { %v1132_v52 = vrot.slane %v1068_v50, 2  ;;  %v1133_v2 = vrot.slane %v1069_v54, 2  ;;  %v965_v8 = vsel %vm195_vm0, %v963_v45, %v964_v51 }
  0xad   : > { %v1184_v3 = vmax.f32 %v1015_v35, %v1130_v58  ;;  %v820_v48 = vmax.f32 %v651_v49, %v769_v57  ;;  %v456_v34 = vmax.f32 %v286_v63, %v403_v17 }
  0xae   : > { %v1134_v55 = vsel %vm365_vm1, %v1132_v52, %v1133_v2 }
  0xaf   : > { %v1564_v7 = vpack.c.bf16 %v1184_v3, %v1184_v3  ;;  %v899_v11 = vmax.f32 %v820_v48, %v873_v22  ;;  %v535_v12 = vmax.f32 %v456_v34, %v509_v10 }
  0xb1   : > { %v1341_v62 = vsel %vm1688_vm5, %v1564_v7, %v1340_v36  ;;  %v1016_v0 = vmax.f32 %v899_v11, %v965_v8  ;;  %v652_v16 = vmax.f32 %v535_v12, %v599_v20 }
  0xb2   : > { %1342 = vst [vmem:[%s1673_s15 + $0x5c] sm:$0x7] %v1341_v62 }
  0xb3   : > { %v1185_v58 = vmax.f32 %v1016_v0, %v1134_v55  ;;  %v821_v47 = vmax.f32 %v652_v16, %v768_v46 }
  0xb5   : > { %v1565_v21 = vpack.c.bf16 %v1185_v58, %v1185_v58  ;;  %v900_v23 = vmax.f32 %v821_v47, %v874_v39 }
  0xb7   : > { %1343 = vst.msk [vmem:[%s1673_s15 + $0x60] sm:$0xf] %vm1291_vm4, %v1565_v21  ;;  %v1017_v56 = vmax.f32 %v900_v23, %v964_v51 }
  0xb9   : > { %v1186_v60 = vmax.f32 %v1017_v56, %v1133_v2 }
  0xbb   : > { %v1566_v13 = vpack.c.bf16 %v1186_v60, %v1186_v60 }
  0xbd   : > { %v1345_v27 = vsel %vm1688_vm5, %v1566_v13, %v1344_v61 }
  0xbe   : > { %1346 = vst [vmem:[%s1673_s15 + $0x64] sm:$0x7] %v1345_v27 }
  0xbf PF: > { %s11_s6 = sadd.s32 1, %s1583_s6  }
  0xc0   : > { %p8_p4 = scmp.ge.s32.totalorder %s11_s6, 4  }
  0xc2   :  { %10 = sbr.rel (!%p8_p4) target bundleno = 1 (0x1), region = 56 }

// kernel: _lambda_.58
= control target key start
LH: loop header
LB: loop body
LE: loop exit
PB: predicated region body
PF: predicated region fallthrough
CT: control target
= control target key end

     0   :  { %vm133_vm0 = vcmask 1045504   ;;  %v586_v0 = vmov 0.0   ;;  %vm587_vm1 = vmmov 0   ;;  %vm99_vm2 = vcmask 97280   ;;  %s807_s1 = inlined_call_operand.vmem [shape: bf16[12,88], index: 1, kind: input, shape index: {}]   ;;  %s808_s0 = inlined_call_operand.vmem [shape: bf16[168,12], index: 0, kind: input, shape index: {}]   ;;  %s809_s2 = inlined_call_operand.vmem [shape: f32[1,88], index: 2, kind: input, shape index: {}]   ;;  %s810_s3 = inlined_call_operand.vmem [shape: f32[1,88], index: 3, kind: input, shape index: {}]   ;;  %s811_s4 = inlined_call_operand.vmem [shape: bf16[168,88], index: 4, kind: output, shape index: {}]  }
   0x1   :  { %524 = vmatprep.subr.bf16.mxu0 %v586_v0  ;;  %v574_v1 = vld [vmem:[%s807_s1] sm:$0x3f]   ;;  %526 = vmatprep.mubr.msk.bf16.mxu0 %vm587_vm1, %v586_v0  ;;  %v576_v4 = vld [vmem:[%s808_s0 + $0x30] sm:$0xff]   ;;  %v577_v5 = vld [vmem:[%s808_s0 + $0x8] sm:$0xff]   ;;  %vm419_vm3 = vcmask 715776  }
   0x2   :  { %v575_v2 = vld [vmem:[%s808_s0] sm:$0xff]   ;;  %570 = vmatprep.subr.bf16.mxu1 %v586_v0  ;;  %550 = vmatprep.mubr.msk.bf16.mxu1 %vm587_vm1, %v586_v0  ;;  %v135_v3 = vsel %vm133_vm0, %v574_v1, 0  ;;  %v578_v6 = vld [vmem:[%s808_s0 + $0x38] sm:$0xff]   ;;  %v579_v7 = vld [vmem:[%s808_s0 + $0x10] sm:$0xff]  }
   0x3   :  { %525 = vmatpush3.bf16.msra.mxu0 %v135_v3  ;;  %571 = vmatpush3.bf16.msra.mxu1 %v135_v3  ;;  %v580_v8 = vld [vmem:[%s808_s0 + $0x40] sm:$0xff]   ;;  %v581_v9 = vld [vmem:[%s808_s0 + $0x18] sm:$0xff]   ;;  %v582_v10 = vld [vmem:[%s808_s0 + $0x48] sm:$0xff]  }
   0x4   :  { %v583_v11 = vld [vmem:[%s808_s0 + $0x20] sm:$0xff]   ;;  %v584_v12 = vld [vmem:[%s808_s0 + $0x50] ss:$0 sps:$4 sm:$0xff]   ;;  %v585_v13 = vld [vmem:[%s808_s0 + $0x28] sm:$0xff]  }
   0x5   :  { %v674_v14 = vld [vmem:[%s809_s2] ss:$0 sm:$0xff] }
   0x6   :  { %527 = vmatmul.mubr.msk.bf16.vlgmr.msra.gmra.mrb[0].mxu0 %vm99_vm2, %v575_v2  ;;  %551 = vmatmul.mubr.msk.bf16.vlgmr.msra.gmra.mrb[0].mxu1 %vm99_vm2, %v576_v4  ;;  %v679_v16 = vld [vmem:[%s810_s3] ss:$0 sm:$0xff] }
   0x7   :  { %530 = vmatprep.mubr.msk.bf16.mxu0 %vm587_vm1, %v586_v0  ;;  %554 = vmatprep.mubr.msk.bf16.mxu1 %vm587_vm1, %v586_v0 }
   0xe   :  { %531 = vmatmul.mubr.msk.bf16.gmra.mrb[4].mxu0 %vm99_vm2, %v577_v5  ;;  %555 = vmatmul.mubr.msk.bf16.gmra.mrb[4].mxu1 %vm99_vm2, %v578_v6 }
   0xf   :  { %534 = vmatprep.mubr.msk.bf16.mxu0 %vm587_vm1, %v586_v0  ;;  %558 = vmatprep.mubr.msk.bf16.mxu1 %vm587_vm1, %v586_v0 }
  0x16   :  { %535 = vmatmul.mubr.msk.bf16.gmra.mrb[8].mxu0 %vm99_vm2, %v579_v7  ;;  %559 = vmatmul.mubr.msk.bf16.gmra.mrb[8].mxu1 %vm99_vm2, %v580_v8 }
  0x17   :  { %538 = vmatprep.mubr.msk.bf16.mxu0 %vm587_vm1, %v586_v0  ;;  %562 = vmatprep.mubr.msk.bf16.mxu1 %vm587_vm1, %v586_v0 }
  0x1e   :  { %539 = vmatmul.mubr.msk.bf16.gmra.mrb[12].mxu0 %vm99_vm2, %v581_v9  ;;  %563 = vmatmul.mubr.msk.bf16.gmra.mrb[12].mxu1 %vm99_vm2, %v582_v10 }
  0x1f   :  { %542 = vmatprep.mubr.msk.bf16.mxu0 %vm587_vm1, %v586_v0  ;;  %566 = vmatprep.mubr.msk.bf16.mxu1 %vm587_vm1, %v586_v0 }
  0x26   :  { %543 = vmatmul.mubr.msk.bf16.gmra.mrb[16].mxu0 %vm99_vm2, %v583_v11  ;;  %567 = vmatmul.mubr.msk.bf16.gmra.mrb[16].mxu1 %vm99_vm2, %v584_v12 }
  0x27   :  { %546 = vmatprep.mubr.msk.bf16.mxu0 %vm587_vm1, %v586_v0 }
  0x2e   :  { %547 = vmatmul.mubr.msk.bf16.gmra.mrb[20].mxu0 %vm99_vm2, %v585_v13 }
  0xd9   :  { %v171_v15 = vpop.f32.mrb[0].mxu0  ;;  %v219_v17 = vpop.f32.mrb[0].mxu1 }
  0xda   :  { %v264_v18 = vmul.f32 %v674_v14, %v171_v15  ;;  %v528_v19 = vpop.f32.mrb[1].mxu0  ;;  %v276_v20 = vmul.f32 %v674_v14, %v219_v17  ;;  %v552_v21 = vpop.f32.mrb[1].mxu1 }
  0xdb   :  { %v174_v22 = vpop.f32.mrb[2].mxu0  ;;  %v222_v23 = vpop.f32.mrb[2].mxu1 }
  0xdc   :  { %v292_v24 = vadd.f32 %v679_v16, %v264_v18  ;;  %v265_v25 = vmul.f32 %v674_v14, %v174_v22  ;;  %v529_v26 = vpop.f32.mrb[3].mxu0  ;;  %v304_v27 = vadd.f32 %v679_v16, %v276_v20  ;;  %v277_v28 = vmul.f32 %v674_v14, %v222_v23  ;;  %v553_v29 = vpop.f32.mrb[3].mxu1 }
  0xde   :  { %v313_v30 = vmax.f32 %v292_v24, 0.0  ;;  %v293_v31 = vadd.f32 %v679_v16, %v265_v25  ;;  %v325_v32 = vmax.f32 %v304_v27, 0.0  ;;  %v305_v33 = vadd.f32 %v679_v16, %v277_v28 }
  0xe0   :  { %v491_v34 = vpack.c.bf16 %v313_v30, %v313_v30  ;;  %v314_v35 = vmax.f32 %v293_v31, 0.0  ;;  %v503_v36 = vpack.c.bf16 %v325_v32, %v325_v32  ;;  %v326_v37 = vmax.f32 %v305_v33, 0.0 }
  0xe1   :  { %v179_v38 = vpop.f32.mrb[4].mxu0  ;;  %v227_v39 = vpop.f32.mrb[4].mxu1 }
  0xe2   :  { %420 = vst.msk [vmem:[%s811_s4] sm:$0xf] %vm419_vm3, %v491_v34  ;;  %v492_v40 = vpack.c.bf16 %v314_v35, %v314_v35  ;;  %432 = vst.msk [vmem:[%s811_s4 + $0x30] sm:$0xf] %vm419_vm3, %v503_v36  ;;  %v266_v41 = vmul.f32 %v674_v14, %v179_v38  ;;  %v532_v42 = vpop.f32.mrb[5].mxu0  ;;  %v504_v43 = vpack.c.bf16 %v326_v37, %v326_v37  ;;  %v556_v45 = vpop.f32.mrb[5].mxu1 }
  0xe3   :  { %v278_v44 = vmul.f32 %v674_v14, %v227_v39  ;;  %v182_v46 = vpop.f32.mrb[6].mxu0  ;;  %v230_v47 = vpop.f32.mrb[6].mxu1 }
  0xe4   :  { %421 = vst.msk [vmem:[%s811_s4 + $0x4] sm:$0xf] %vm419_vm3, %v492_v40  ;;  %v294_v48 = vadd.f32 %v679_v16, %v266_v41  ;;  %433 = vst.msk [vmem:[%s811_s4 + $0x34] sm:$0xf] %vm419_vm3, %v504_v43  ;;  %v267_v49 = vmul.f32 %v674_v14, %v182_v46  ;;  %v533_v50 = vpop.f32.mrb[7].mxu0  ;;  %v279_v52 = vmul.f32 %v674_v14, %v230_v47  ;;  %v557_v53 = vpop.f32.mrb[7].mxu1 }
  0xe5   :  { %v306_v51 = vadd.f32 %v679_v16, %v278_v44 }
  0xe6   :  { %v315_v54 = vmax.f32 %v294_v48, 0.0  ;;  %v295_v55 = vadd.f32 %v679_v16, %v267_v49  ;;  %v307_v57 = vadd.f32 %v679_v16, %v279_v52 }
  0xe7   :  { %v327_v56 = vmax.f32 %v306_v51, 0.0 }
  0xe8   :  { %v493_v58 = vpack.c.bf16 %v315_v54, %v315_v54  ;;  %v316_v59 = vmax.f32 %v295_v55, 0.0  ;;  %v328_v61 = vmax.f32 %v307_v57, 0.0 }
  0xe9   :  { %v505_v60 = vpack.c.bf16 %v327_v56, %v327_v56  ;;  %v187_v62 = vpop.f32.mrb[8].mxu0  ;;  %v235_v63 = vpop.f32.mrb[8].mxu1 }
  0xea   :  { %422 = vst.msk [vmem:[%s811_s4 + $0x8] sm:$0xf] %vm419_vm3, %v493_v58  ;;  %v494_v0 = vpack.c.bf16 %v316_v59, %v316_v59  ;;  %v268_v1 = vmul.f32 %v674_v14, %v187_v62  ;;  %v536_v2 = vpop.f32.mrb[9].mxu0  ;;  %v506_v3 = vpack.c.bf16 %v328_v61, %v328_v61  ;;  %v280_v4 = vmul.f32 %v674_v14, %v235_v63  ;;  %v560_v5 = vpop.f32.mrb[9].mxu1 }
  0xeb   :  { %434 = vst.msk [vmem:[%s811_s4 + $0x38] sm:$0xf] %vm419_vm3, %v505_v60  ;;  %v190_v6 = vpop.f32.mrb[10].mxu0  ;;  %v238_v7 = vpop.f32.mrb[10].mxu1 }
  0xec   :  { %423 = vst.msk [vmem:[%s811_s4 + $0xc] sm:$0xf] %vm419_vm3, %v494_v0  ;;  %v296_v8 = vadd.f32 %v679_v16, %v268_v1  ;;  %435 = vst.msk [vmem:[%s811_s4 + $0x3c] sm:$0xf] %vm419_vm3, %v506_v3  ;;  %v269_v9 = vmul.f32 %v674_v14, %v190_v6  ;;  %v537_v10 = vpop.f32.mrb[11].mxu0  ;;  %v308_v11 = vadd.f32 %v679_v16, %v280_v4  ;;  %v561_v13 = vpop.f32.mrb[11].mxu1 }
  0xed   :  { %v281_v12 = vmul.f32 %v674_v14, %v238_v7 }
  0xee   :  { %v317_v15 = vmax.f32 %v296_v8, 0.0  ;;  %v297_v17 = vadd.f32 %v679_v16, %v269_v9  ;;  %v329_v18 = vmax.f32 %v308_v11, 0.0 }
  0xef   :  { %v309_v19 = vadd.f32 %v679_v16, %v281_v12 }
  0xf0   :  { %v495_v20 = vpack.c.bf16 %v317_v15, %v317_v15  ;;  %v318_v21 = vmax.f32 %v297_v17, 0.0  ;;  %v507_v22 = vpack.c.bf16 %v329_v18, %v329_v18 }
  0xf1   :  { %v330_v23 = vmax.f32 %v309_v19, 0.0  ;;  %v195_v24 = vpop.f32.mrb[12].mxu0  ;;  %v243_v25 = vpop.f32.mrb[12].mxu1 }
  0xf2   :  { %424 = vst.msk [vmem:[%s811_s4 + $0x10] sm:$0xf] %vm419_vm3, %v495_v20  ;;  %v496_v26 = vpack.c.bf16 %v318_v21, %v318_v21  ;;  %436 = vst.msk [vmem:[%s811_s4 + $0x40] sm:$0xf] %vm419_vm3, %v507_v22  ;;  %v270_v27 = vmul.f32 %v674_v14, %v195_v24  ;;  %v540_v28 = vpop.f32.mrb[13].mxu0  ;;  %v282_v30 = vmul.f32 %v674_v14, %v243_v25  ;;  %v564_v31 = vpop.f32.mrb[13].mxu1 }
  0xf3   :  { %v508_v29 = vpack.c.bf16 %v330_v23, %v330_v23  ;;  %v198_v32 = vpop.f32.mrb[14].mxu0  ;;  %v246_v33 = vpop.f32.mrb[14].mxu1 }
  0xf4   :  { %425 = vst.msk [vmem:[%s811_s4 + $0x14] sm:$0xf] %vm419_vm3, %v496_v26  ;;  %v298_v34 = vadd.f32 %v679_v16, %v270_v27  ;;  %v271_v35 = vmul.f32 %v674_v14, %v198_v32  ;;  %v541_v36 = vpop.f32.mrb[15].mxu0  ;;  %v310_v37 = vadd.f32 %v679_v16, %v282_v30  ;;  %v283_v38 = vmul.f32 %v674_v14, %v246_v33  ;;  %v565_v39 = vpop.f32.mrb[15].mxu1 }
  0xf5   :  { %437 = vst.msk [vmem:[%s811_s4 + $0x44] sm:$0xf] %vm419_vm3, %v508_v29 }
  0xf6   :  { %v319_v40 = vmax.f32 %v298_v34, 0.0  ;;  %v299_v41 = vadd.f32 %v679_v16, %v271_v35  ;;  %v331_v42 = vmax.f32 %v310_v37, 0.0  ;;  %v311_v43 = vadd.f32 %v679_v16, %v283_v38 }
  0xf8   :  { %v497_v44 = vpack.c.bf16 %v319_v40, %v319_v40  ;;  %v320_v45 = vmax.f32 %v299_v41, 0.0  ;;  %v509_v46 = vpack.c.bf16 %v331_v42, %v331_v42  ;;  %v332_v47 = vmax.f32 %v311_v43, 0.0 }
  0xf9   :  { %v203_v48 = vpop.f32.mrb[16].mxu0  ;;  %v251_v49 = vpop.f32.mrb[16].mxu1 }
  0xfa   :  { %426 = vst.msk [vmem:[%s811_s4 + $0x18] sm:$0xf] %vm419_vm3, %v497_v44  ;;  %v498_v50 = vpack.c.bf16 %v320_v45, %v320_v45  ;;  %438 = vst.msk [vmem:[%s811_s4 + $0x48] sm:$0xf] %vm419_vm3, %v509_v46  ;;  %v272_v51 = vmul.f32 %v674_v14, %v203_v48  ;;  %v544_v52 = vpop.f32.mrb[17].mxu0  ;;  %v510_v53 = vpack.c.bf16 %v332_v47, %v332_v47  ;;  %v568_v55 = vpop.f32.mrb[17].mxu1 }
  0xfb   :  { %v284_v54 = vmul.f32 %v674_v14, %v251_v49  ;;  %v206_v56 = vpop.f32.mrb[18].mxu0  ;;  %v254_v57 = vpop.f32.mrb[18].mxu1 }
  0xfc   :  { %427 = vst.msk [vmem:[%s811_s4 + $0x1c] sm:$0xf] %vm419_vm3, %v498_v50  ;;  %v300_v58 = vadd.f32 %v679_v16, %v272_v51  ;;  %439 = vst.msk [vmem:[%s811_s4 + $0x4c] sm:$0xf] %vm419_vm3, %v510_v53  ;;  %v273_v59 = vmul.f32 %v674_v14, %v206_v56  ;;  %v545_v60 = vpop.f32.mrb[19].mxu0  ;;  %v569_v62 = vpop.f32.mrb[19].mxu1 }
  0xfd   :  { %v312_v61 = vadd.f32 %v679_v16, %v284_v54 }
  0xfe   :  { %v321_v63 = vmax.f32 %v300_v58, 0.0  ;;  %v301_v0 = vadd.f32 %v679_v16, %v273_v59 }
  0xff   :  { %v333_v1 = vmax.f32 %v312_v61, 0.0 }
 0x100   :  { %v499_v2 = vpack.c.bf16 %v321_v63, %v321_v63  ;;  %v322_v3 = vmax.f32 %v301_v0, 0.0 }
 0x101   :  { %v511_v4 = vpack.c.bf16 %v333_v1, %v333_v1  ;;  %v211_v5 = vpop.f32.mrb[20].mxu0 }
 0x102   :  { %428 = vst.msk [vmem:[%s811_s4 + $0x20] sm:$0xf] %vm419_vm3, %v499_v2  ;;  %v500_v6 = vpack.c.bf16 %v322_v3, %v322_v3  ;;  %v274_v7 = vmul.f32 %v674_v14, %v211_v5  ;;  %v548_v8 = vpop.f32.mrb[21].mxu0 }
 0x103   :  { %440 = vst.msk [vmem:[%s811_s4 + $0x50] sm:$0xf] %vm419_vm3, %v511_v4  ;;  %v214_v9 = vpop.f32.mrb[22].mxu0 }
 0x104   :  { %429 = vst.msk [vmem:[%s811_s4 + $0x24] sm:$0xf] %vm419_vm3, %v500_v6  ;;  %v302_v10 = vadd.f32 %v679_v16, %v274_v7  ;;  %v275_v11 = vmul.f32 %v674_v14, %v214_v9  ;;  %v549_v12 = vpop.f32.mrb[23].mxu0 }
 0x106   :  { %v323_v13 = vmax.f32 %v302_v10, 0.0  ;;  %v303_v15 = vadd.f32 %v679_v16, %v275_v11 }
 0x108   :  { %v501_v17 = vpack.c.bf16 %v323_v13, %v323_v13  ;;  %v324_v18 = vmax.f32 %v303_v15, 0.0 }
 0x10a   :  { %430 = vst.msk [vmem:[%s811_s4 + $0x28] sm:$0xf] %vm419_vm3, %v501_v17  ;;  %v502_v19 = vpack.c.bf16 %v324_v18, %v324_v18 }
 0x10c   :  { %431 = vst.msk [vmem:[%s811_s4 + $0x2c] sm:$0xf] %vm419_vm3, %v502_v19 }

// kernel: _lambda_.59
= control target key start
LH: loop header
LB: loop body
LE: loop exit
PB: predicated region body
PF: predicated region fallthrough
CT: control target
= control target key end

     0   :  { %s938_s15 = smov 0   ;;  %s1227_s0 = inlined_call_operand.vmem [shape: bf16[2,9,9,88], index: 0, kind: input, shape index: {}]   ;;  %s1228_s1 = inlined_call_operand.vmem [shape: f32[9,1,1,88], index: 1, kind: input, shape index: {}]   ;;  %s1229_s2 = inlined_call_operand.vmem [shape: f32[1,1,88], index: 2, kind: input, shape index: {}]   ;;  %s1230_s3 = inlined_call_operand.vmem [shape: f32[1,1,88], index: 3, kind: input, shape index: {}]   ;;  %s1231_s4 = inlined_call_operand.vmem [shape: bf16[2,7,7,88], index: 4, kind: output, shape index: {}]  }
   0x1 LB: > { %s833_s16 = sadd.s32 4294967295, %s911_s15   ;;  %p837_p0 = scmp.ge.s32.totalorder %s911_s15, 1  ;;  %s911_s15 = sphi %s938_s15, %s14_s15  }
   0x2   : > { %p162_p1 = scmp.lt.s32.totalorder %s911_s15, 3 }
   0x4   : > { %p163_p2 = pnand %p837_p0, %p162_p1 }
   0x5   : > { %p188_p3 = scmp.lt.s32.totalorder (!%p163_p2), %s833_s16, 1  ;;  %v952_v0 = vld [vmem:[%s1228_s1] ss:$0 sm:$0xff] (!%p163_p2)  ;;  %v957_v1 = vld [vmem:[%s1228_s1 + $0x1] ss:$0 sm:$0xff] (!%p163_p2)  ;;  %vm337_vm0 = vcmask (!%p163_p2), 1045504  }
   0x6   : > { %166 = sbr.rel (%p163_p2) target bundleno = 112 (0x70), region = 36  ;;  %v962_v2 = vld [vmem:[%s1228_s1 + $0x2] ss:$0 sm:$0xff] (!%p163_p2)  ;;  %v972_v3 = vld [vmem:[%s1228_s1 + $0x3] ss:$0 sm:$0xff] (!%p163_p2)  ;;  %vm754_vm1 = vcmask (!%p163_p2), 715776  }
   0x7   : > { %v977_v4 = vld [vmem:[%s1228_s1 + $0x4] ss:$0 sm:$0xff] (!%p163_p2)  ;;  %v982_v5 = vld [vmem:[%s1228_s1 + $0x5] ss:$0 sm:$0xff] (!%p163_p2)  ;;  %v993_v16 = vld [vmem:[%s1228_s1 + $0x6] ss:$0 sm:$0xff] (!%p163_p2) }
   0x8   : > { %v998_v21 = vld [vmem:[%s1228_s1 + $0x7] ss:$0 sm:$0xff] (!%p163_p2)  ;;  %v1013_v32 = vld [vmem:[%s1228_s1 + $0x8] ss:$0 sm:$0xff] (!%p163_p2)  ;;  %vm755_vm2 = vsmask.f32 (!%p163_p2), 3328 }
   0x9   : > { %vm1082_vm3 = vmand (!%p163_p2), %vm754_vm1, %vm755_vm2 }
   0xd   : > { %s1235_s16 = smov (!%p188_p3, %s833_s16), 1 }
   0xe   : > { %s895_s17 = smul.u32 72, %s1235_s16 }
   0xf   : > { %s896_s13 = smul.u32 28, %s1235_s16 }
  0x10   : > { %s967_s26 = scalar_lea.vmem %s1227_s0, %s895_s17 }
  0x11   : > { %v207_v6 = vld [vmem:[%s967_s26] ss:$8 sps:$4 sm:$0xff]   ;;  %v276_v8 = vld [vmem:[%s967_s26 + $0x4] sm:$0x1]  ;;  %v853_v14 = vld [vmem:[%s967_s26 + $0xc] sm:$0x1]  ;;  %s1070_s21 = scalar_lea.vmem %s1231_s4, %s896_s13 }
  0x12   : > { %v275_v7 = vld [vmem:[%s967_s26] sm:$0xe]  ;;  %v214_v9 = vunpack.c.l.bf16 %v207_v6  ;;  %v290_v11 = vunpack.c.l.bf16 %v276_v8  ;;  %v381_v12 = vunpack.c.h.bf16 %v207_v6  ;;  %v852_v13 = vld [vmem:[%s967_s26 + $0x8] sm:$0xe]  ;;  %v464_v18 = vunpack.c.l.bf16 %v853_v14  ;;  %v876_v30 = vld [vmem:[%s967_s26 + $0x10] sm:$0xe] }
  0x13   : > { %v289_v10 = vunpack.c.l.bf16 %v275_v7  ;;  %v867_v15 = vld [vmem:[%s967_s26 + $0x8] ss:$8 sps:$4 sm:$0xff]   ;;  %v463_v17 = vunpack.c.l.bf16 %v852_v13  ;;  %v877_v31 = vld [vmem:[%s967_s26 + $0x14] sm:$0x1]  ;;  %v636_v44 = vunpack.c.l.bf16 %v876_v30  ;;  %v278_v46 = vld [vmem:[%s967_s26 + $0xc] sm:$0x1] }
  0x14   : > { %v554_v19 = vunpack.c.h.bf16 %v867_v15  ;;  %v215_v20 = vunpack.c.l.bf16 %v867_v15  ;;  %v227_v22 = vmul.f32 %v952_v0, %v214_v9  ;;  %v240_v23 = vmul.f32 %v957_v1, %v214_v9  ;;  %v277_v41 = vld [vmem:[%s967_s26 + $0x8] sm:$0xe]  ;;  %v844_v47 = vld [vmem:[%s967_s26 + $0x10] ss:$8 sps:$4 sm:$0xff]   ;;  %v855_v60 = vld [vmem:[%s967_s26 + $0x14] sm:$0x1] }
  0x15   : > { %v309_v24 = vmul.f32 %v962_v2, %v289_v10  ;;  %v310_v25 = vmul.f32 %v962_v2, %v290_v11  ;;  %v394_v26 = vmul.f32 %v972_v3, %v381_v12  ;;  %v414_v27 = vmul.f32 %v977_v4, %v381_v12  ;;  %v854_v48 = vld [vmem:[%s967_s26 + $0x10] sm:$0xe]  ;;  %v878_v12 = vld [vmem:[%s967_s26 + $0x18] sm:$0xe]  ;;  %v879_v13 = vld [vmem:[%s967_s26 + $0x1c] sm:$0x1] }
  0x16   : > { %v483_v28 = vmul.f32 %v982_v5, %v463_v17  ;;  %v484_v29 = vmul.f32 %v982_v5, %v464_v18  ;;  %v254_v33 = vrot.slane %v240_v23, 1  ;;  %v567_v36 = vmul.f32 %v993_v16, %v554_v19 }
  0x17   : > { %v338_v34 = vrot.slane %v309_v24, 2  ;;  %v339_v35 = vrot.slane %v310_v25, 2  ;;  %v428_v37 = vrot.slane %v414_v27, 1  ;;  %v1017_v40 = vmul.f32 %v998_v21, %v554_v19 }
  0x18   : > { %v511_v38 = vrot.slane %v483_v28, 2  ;;  %v512_v39 = vrot.slane %v484_v29, 2  ;;  %v268_v42 = vadd.f32 %v254_v33, %v227_v22  ;;  %v637_v45 = vunpack.c.l.bf16 %v877_v31  ;;  %v209_v28 = vld [vmem:[%s967_s26 + $0x10] ss:$8 sps:$4 sm:$0xff]  }
  0x19   : > { %v340_v43 = vsel %vm337_vm0, %v338_v34, %v339_v35  ;;  %v601_v50 = vrot.slane %v1017_v40, 1  ;;  %v228_v51 = vmul.f32 %v952_v0, %v215_v20  ;;  %v241_v52 = vmul.f32 %v957_v1, %v215_v20  ;;  %v279_v29 = vld [vmem:[%s967_s26 + $0x10] sm:$0xe]  ;;  %v280_v40 = vld [vmem:[%s967_s26 + $0x14] sm:$0x1] }
  0x1a   : > { %v513_v49 = vsel %vm337_vm0, %v511_v38, %v512_v39  ;;  %v366_v53 = vadd.f32 %v340_v43, %v268_v42  ;;  %v656_v54 = vmul.f32 %v1013_v32, %v636_v44  ;;  %v657_v55 = vmul.f32 %v1013_v32, %v637_v45 }
  0x1b   : > { %v291_v56 = vunpack.c.l.bf16 %v277_v41  ;;  %v255_v57 = vrot.slane %v241_v52, 1  ;;  %v292_v58 = vunpack.c.l.bf16 %v278_v46  ;;  %v382_v59 = vunpack.c.l.bf16 %v844_v47 }
  0x1c   : > { %v465_v61 = vunpack.c.l.bf16 %v854_v48  ;;  %v401_v62 = vadd.f32 %v394_v26, %v366_v53  ;;  %v684_v63 = vrot.slane %v656_v54, 2  ;;  %v685_v6 = vrot.slane %v657_v55, 2 }
  0x1d   : > { %v311_v7 = vmul.f32 %v962_v2, %v291_v56  ;;  %v269_v8 = vadd.f32 %v255_v57, %v228_v51  ;;  %v312_v9 = vmul.f32 %v962_v2, %v292_v58  ;;  %v395_v10 = vmul.f32 %v972_v3, %v382_v59  ;;  %v857_v58 = vld [vmem:[%s967_s26 + $0x1c] sm:$0x1] }
  0x1e   : > { %v415_v11 = vmul.f32 %v977_v4, %v382_v59  ;;  %v442_v14 = vadd.f32 %v428_v37, %v401_v62  ;;  %v686_v15 = vsel %vm337_vm0, %v684_v63, %v685_v6  ;;  %v466_v18 = vunpack.c.l.bf16 %v855_v60  ;;  %v1063_v59 = vld [vmem:[%s1230_s3] ss:$0 sm:$0xff] }
  0x1f   : > { %v341_v17 = vrot.slane %v311_v7, 2  ;;  %v342_v19 = vrot.slane %v312_v9, 2  ;;  %v485_v22 = vmul.f32 %v982_v5, %v465_v61  ;;  %v555_v23 = vunpack.c.h.bf16 %v844_v47 }
  0x20   : > { %v429_v20 = vrot.slane %v415_v11, 1  ;;  %v539_v24 = vadd.f32 %v513_v49, %v442_v14  ;;  %v486_v25 = vmul.f32 %v982_v5, %v466_v18  ;;  %v638_v26 = vunpack.c.l.bf16 %v878_v12  ;;  %v856_v49 = vld [vmem:[%s967_s26 + $0x18] sm:$0xe] }
  0x21   : > { %v639_v27 = vunpack.c.l.bf16 %v879_v13  ;;  %v343_v30 = vsel %vm337_vm0, %v341_v17, %v342_v19  ;;  %v514_v31 = vrot.slane %v485_v22, 2  ;;  %v568_v33 = vmul.f32 %v993_v16, %v555_v23  ;;  %v881_v22 = vld [vmem:[%s967_s26 + $0x24] sm:$0x1] }
  0x22   : > { %v588_v34 = vmul.f32 %v998_v21, %v555_v23  ;;  %v574_v35 = vadd.f32 %v567_v36, %v539_v24  ;;  %v367_v37 = vadd.f32 %v343_v30, %v269_v8  ;;  %v515_v38 = vrot.slane %v486_v25, 2  ;;  %v1054_v36 = vld [vmem:[%s1229_s2] ss:$0 sm:$0xff] }
  0x23   : > { %v658_v39 = vmul.f32 %v1013_v32, %v638_v26  ;;  %v659_v42 = vmul.f32 %v1013_v32, %v639_v27  ;;  %v216_v43 = vunpack.c.l.bf16 %v209_v28  ;;  %v293_v44 = vunpack.c.l.bf16 %v279_v29  ;;  %v757_v24 = vld [vmem:[%s1070_s21] sm:$0xf] }
  0x24   : > { %v602_v41 = vrot.slane %v588_v34, 1  ;;  %v615_v45 = vadd.f32 %v601_v50, %v574_v35  ;;  %v402_v46 = vadd.f32 %v395_v10, %v367_v37  ;;  %v516_v47 = vsel %vm337_vm0, %v514_v31, %v515_v38  ;;  %v880_v10 = vld [vmem:[%s967_s26 + $0x20] sm:$0xe] }
  0x25   : > { %v687_v48 = vrot.slane %v658_v39, 2  ;;  %v688_v51 = vrot.slane %v659_v42, 2  ;;  %v229_v52 = vmul.f32 %v952_v0, %v216_v43  ;;  %v242_v53 = vmul.f32 %v957_v1, %v216_v43  ;;  %v281_v39 = vld [vmem:[%s967_s26 + $0x18] sm:$0xe] }
  0x26   : > { %v294_v54 = vunpack.c.l.bf16 %v280_v40  ;;  %v712_v55 = vadd.f32 %v686_v15, %v615_v45  ;;  %v443_v56 = vadd.f32 %v429_v20, %v402_v46  ;;  %v313_v50 = vmul.f32 %v962_v2, %v293_v44  ;;  %v869_v15 = vld [vmem:[%s967_s26 + $0x18] ss:$8 sps:$4 sm:$0xff]   ;;  %v282_v45 = vld [vmem:[%s967_s26 + $0x1c] sm:$0x1] }
  0x27   : > { %v383_v57 = vunpack.c.h.bf16 %v209_v28  ;;  %v689_v60 = vsel %vm337_vm0, %v687_v48, %v688_v51  ;;  %v256_v61 = vrot.slane %v242_v53, 1  ;;  %v467_v63 = vunpack.c.l.bf16 %v856_v49  ;;  %v846_v49 = vld [vmem:[%s967_s26 + $0x20] ss:$8 sps:$4 sm:$0xff]  }
  0x28   : > { %v314_v62 = vmul.f32 %v962_v2, %v294_v54  ;;  %v726_v6 = vmul.f32 %v1054_v36, %v712_v55  ;;  %v540_v7 = vadd.f32 %v516_v47, %v443_v56  ;;  %v344_v8 = vrot.slane %v313_v50, 2  ;;  %v858_v55 = vld [vmem:[%s967_s26 + $0x20] sm:$0xe] }
  0x29   : > { %v396_v9 = vmul.f32 %v972_v3, %v383_v57  ;;  %v270_v11 = vadd.f32 %v256_v61, %v229_v52  ;;  %v416_v13 = vmul.f32 %v977_v4, %v383_v57  ;;  %v468_v14 = vunpack.c.l.bf16 %v857_v58 }
  0x2a   : > { %v345_v12 = vrot.slane %v314_v62, 2  ;;  %v740_v17 = vadd.f32 %v1063_v59, %v726_v6  ;;  %v575_v18 = vadd.f32 %v568_v33, %v540_v7  ;;  %v487_v19 = vmul.f32 %v982_v5, %v467_v63  ;;  %v859_v6 = vld [vmem:[%s967_s26 + $0x24] sm:$0x1] }
  0x2b   : > { %v556_v20 = vunpack.c.h.bf16 %v869_v15  ;;  %v430_v26 = vrot.slane %v416_v13, 1  ;;  %v488_v27 = vmul.f32 %v982_v5, %v468_v14  ;;  %v640_v28 = vunpack.c.l.bf16 %v880_v10  ;;  %v760_v7 = vld [vmem:[%s1070_s21 + $0x4] sm:$0xf] }
  0x2c   : > { %v346_v25 = vsel %vm337_vm0, %v344_v8, %v345_v12  ;;  %v747_v29 = vpack.c.bf16 %v740_v17, %v740_v17  ;;  %v616_v30 = vadd.f32 %v602_v41, %v575_v18  ;;  %v517_v33 = vrot.slane %v487_v19, 2  ;;  %v882_v17 = vld [vmem:[%s967_s26 + $0x28] sm:$0xe] }
  0x2d   : > { %v368_v31 = vadd.f32 %v346_v25, %v270_v11  ;;  %v518_v34 = vrot.slane %v488_v27, 2  ;;  %v569_v35 = vmul.f32 %v993_v16, %v556_v20  ;;  %v589_v37 = vmul.f32 %v998_v21, %v556_v20 }
  0x2e   : > { %v641_v38 = vunpack.c.l.bf16 %v881_v22  ;;  %v758_v40 = vsel %vm1082_vm3, %v747_v29, %v757_v24  ;;  %v713_v42 = vadd.f32 %v689_v60, %v616_v30  ;;  %v660_v44 = vmul.f32 %v1013_v32, %v640_v28  ;;  %v883_v28 = vld [vmem:[%s967_s26 + $0x2c] sm:$0x1] }
  0x2f   : > { %v403_v43 = vadd.f32 %v396_v9, %v368_v31  ;;  %759 = vst [vmem:[%s1070_s21] sm:$0xf] %v758_v40  ;;  %v519_v41 = vsel %vm337_vm0, %v517_v33, %v518_v34  ;;  %v603_v46 = vrot.slane %v589_v37, 1  ;;  %v217_v48 = vunpack.c.l.bf16 %v869_v15  ;;  %v211_v34 = vld [vmem:[%s967_s26 + $0x20] ss:$8 sps:$4 sm:$0xff]  }
  0x30   : > { %v661_v47 = vmul.f32 %v1013_v32, %v641_v38  ;;  %v727_v51 = vmul.f32 %v1054_v36, %v713_v42  ;;  %v690_v53 = vrot.slane %v660_v44, 2  ;;  %v295_v54 = vunpack.c.l.bf16 %v281_v39 }
  0x31   : > { %v444_v52 = vadd.f32 %v430_v26, %v403_v43  ;;  %v230_v50 = vmul.f32 %v952_v0, %v217_v48  ;;  %v243_v57 = vmul.f32 %v957_v1, %v217_v48  ;;  %v296_v58 = vunpack.c.l.bf16 %v282_v45  ;;  %v284_v48 = vld [vmem:[%s967_s26 + $0x24] sm:$0x1] }
  0x32   : > { %v691_v56 = vrot.slane %v661_v47, 2  ;;  %v741_v60 = vadd.f32 %v1063_v59, %v727_v51  ;;  %v315_v62 = vmul.f32 %v962_v2, %v295_v54  ;;  %v384_v63 = vunpack.c.l.bf16 %v846_v49 }
  0x33   : > { %v541_v61 = vadd.f32 %v519_v41, %v444_v52  ;;  %v257_v9 = vrot.slane %v243_v57, 1  ;;  %v316_v10 = vmul.f32 %v962_v2, %v296_v58  ;;  %v469_v11 = vunpack.c.l.bf16 %v858_v55  ;;  %v860_v55 = vld [vmem:[%s967_s26 + $0x28] sm:$0xe] }
  0x34   : > { %v692_v8 = vsel %vm337_vm0, %v690_v53, %v691_v56  ;;  %v748_v12 = vpack.c.bf16 %v741_v60, %v741_v60  ;;  %v347_v14 = vrot.slane %v315_v62, 2  ;;  %v397_v15 = vmul.f32 %v972_v3, %v384_v63  ;;  %v763_v60 = vld [vmem:[%s1070_s21 + $0x8] sm:$0xf] }
  0x35   : > { %v576_v13 = vadd.f32 %v569_v35, %v541_v61  ;;  %v271_v18 = vadd.f32 %v257_v9, %v230_v50  ;;  %v348_v19 = vrot.slane %v316_v10, 2  ;;  %v417_v20 = vmul.f32 %v977_v4, %v384_v63  ;;  %v283_v35 = vld [vmem:[%s967_s26 + $0x20] sm:$0xe]  ;;  %v861_v10 = vld [vmem:[%s967_s26 + $0x2c] sm:$0x1] }
  0x36   : > { %v470_v22 = vunpack.c.l.bf16 %v859_v6  ;;  %v761_v24 = vsel %vm1082_vm3, %v748_v12, %v760_v7  ;;  %v489_v26 = vmul.f32 %v982_v5, %v469_v11  ;;  %v557_v27 = vunpack.c.h.bf16 %v846_v49 }
  0x37   : > { %v617_v25 = vadd.f32 %v603_v46, %v576_v13  ;;  %762 = vst [vmem:[%s1070_s21 + $0x4] sm:$0xf] %v761_v24  ;;  %v349_v29 = vsel %vm337_vm0, %v347_v14, %v348_v19  ;;  %v431_v30 = vrot.slane %v417_v20, 1  ;;  %v642_v33 = vunpack.c.l.bf16 %v882_v17  ;;  %v884_v17 = vld [vmem:[%s967_s26 + $0x30] sm:$0xe] }
  0x38   : > { %v490_v31 = vmul.f32 %v982_v5, %v470_v22  ;;  %v369_v38 = vadd.f32 %v349_v29, %v271_v18  ;;  %v520_v39 = vrot.slane %v489_v26, 2  ;;  %v570_v40 = vmul.f32 %v993_v16, %v557_v27  ;;  %v885_v18 = vld [vmem:[%s967_s26 + $0x34] sm:$0x1] }
  0x39   : > { %v714_v37 = vadd.f32 %v692_v8, %v617_v25  ;;  %v590_v43 = vmul.f32 %v998_v21, %v557_v27  ;;  %v643_v44 = vunpack.c.l.bf16 %v883_v28  ;;  %v662_v45 = vmul.f32 %v1013_v32, %v642_v33  ;;  %v871_v25 = vld [vmem:[%s967_s26 + $0x28] ss:$8 sps:$4 sm:$0xff]  }
  0x3a   : > { %v521_v42 = vrot.slane %v490_v31, 2  ;;  %v404_v46 = vadd.f32 %v397_v15, %v369_v38  ;;  %v218_v47 = vunpack.c.l.bf16 %v211_v34  ;;  %v297_v49 = vunpack.c.l.bf16 %v283_v35  ;;  %v285_v35 = vld [vmem:[%s967_s26 + $0x28] sm:$0xe] }
  0x3b   : > { %v728_v41 = vmul.f32 %v1054_v36, %v714_v37  ;;  %v604_v52 = vrot.slane %v590_v43, 1  ;;  %v663_v53 = vmul.f32 %v1013_v32, %v643_v44  ;;  %v693_v54 = vrot.slane %v662_v45, 2 }
  0x3c   : > { %v522_v51 = vsel %vm337_vm0, %v520_v39, %v521_v42  ;;  %v445_v50 = vadd.f32 %v431_v30, %v404_v46  ;;  %v231_v57 = vmul.f32 %v952_v0, %v218_v47  ;;  %v244_v58 = vmul.f32 %v957_v1, %v218_v47 }
  0x3d   : > { %v742_v56 = vadd.f32 %v1063_v59, %v728_v41  ;;  %v694_v61 = vrot.slane %v663_v53, 2  ;;  %v298_v62 = vunpack.c.l.bf16 %v284_v48  ;;  %v317_v63 = vmul.f32 %v962_v2, %v297_v49  ;;  %v286_v48 = vld [vmem:[%s967_s26 + $0x2c] sm:$0x1] }
  0x3e   : > { %v385_v6 = vunpack.c.h.bf16 %v211_v34  ;;  %v542_v8 = vadd.f32 %v522_v51, %v445_v50  ;;  %v258_v9 = vrot.slane %v244_v58, 1  ;;  %v471_v11 = vunpack.c.l.bf16 %v860_v55  ;;  %v848_v55 = vld [vmem:[%s967_s26 + $0x30] ss:$8 sps:$4 sm:$0xff]  }
  0x3f   : > { %v749_v7 = vpack.c.bf16 %v742_v56, %v742_v56  ;;  %v695_v12 = vsel %vm337_vm0, %v693_v54, %v694_v61  ;;  %v318_v13 = vmul.f32 %v962_v2, %v298_v62  ;;  %v350_v14 = vrot.slane %v317_v63, 2  ;;  %v862_v56 = vld [vmem:[%s967_s26 + $0x30] sm:$0xe] }
  0x40   : > { %v398_v15 = vmul.f32 %v972_v3, %v385_v6  ;;  %v577_v20 = vadd.f32 %v570_v40, %v542_v8  ;;  %v272_v22 = vadd.f32 %v258_v9, %v231_v57  ;;  %v418_v24 = vmul.f32 %v977_v4, %v385_v6  ;;  %v766_v8 = vld [vmem:[%s1070_s21 + $0xc] sm:$0xf] }
  0x41   : > { %v764_v19 = vsel %vm1082_vm3, %v749_v7, %v763_v60  ;;  %v351_v26 = vrot.slane %v318_v13, 2  ;;  %v472_v27 = vunpack.c.l.bf16 %v861_v10  ;;  %v491_v28 = vmul.f32 %v982_v5, %v471_v11  ;;  %v863_v7 = vld [vmem:[%s967_s26 + $0x34] sm:$0x1] }
  0x42   : > { %765 = vst [vmem:[%s1070_s21 + $0x8] sm:$0xf] %v764_v19  ;;  %v558_v29 = vunpack.c.h.bf16 %v871_v25  ;;  %v618_v30 = vadd.f32 %v604_v52, %v577_v20  ;;  %v432_v31 = vrot.slane %v418_v24, 1  ;;  %v644_v33 = vunpack.c.l.bf16 %v884_v17 }
  0x43   : > { %v645_v34 = vunpack.c.l.bf16 %v885_v18  ;;  %v352_v37 = vsel %vm337_vm0, %v350_v14, %v351_v26  ;;  %v492_v38 = vmul.f32 %v982_v5, %v472_v27  ;;  %v523_v39 = vrot.slane %v491_v28, 2  ;;  %v886_v18 = vld [vmem:[%s967_s26 + $0x38] sm:$0xe] }
  0x44   : > { %v571_v40 = vmul.f32 %v993_v16, %v558_v29  ;;  %v715_v42 = vadd.f32 %v695_v12, %v618_v30  ;;  %v370_v43 = vadd.f32 %v352_v37, %v272_v22  ;;  %v591_v44 = vmul.f32 %v998_v21, %v558_v29 }
  0x45   : > { %v664_v45 = vmul.f32 %v1013_v32, %v644_v33  ;;  %v524_v41 = vrot.slane %v492_v38, 2  ;;  %v665_v46 = vmul.f32 %v1013_v32, %v645_v34  ;;  %v219_v47 = vunpack.c.l.bf16 %v871_v25  ;;  %v887_v25 = vld [vmem:[%s967_s26 + $0x3c] sm:$0x1] }
  0x46   : > { %v299_v49 = vunpack.c.l.bf16 %v285_v35  ;;  %v729_v51 = vmul.f32 %v1054_v36, %v715_v42  ;;  %v405_v52 = vadd.f32 %v398_v15, %v370_v43  ;;  %v605_v53 = vrot.slane %v591_v44, 1  ;;  %v213_v35 = vld [vmem:[%s967_s26 + $0x30] ss:$8 sps:$4 sm:$0xff]  }
  0x47   : > { %v696_v54 = vrot.slane %v664_v45, 2  ;;  %v525_v50 = vsel %vm337_vm0, %v523_v39, %v524_v41  ;;  %v697_v57 = vrot.slane %v665_v46, 2  ;;  %v232_v58 = vmul.f32 %v952_v0, %v219_v47  ;;  %v287_v43 = vld [vmem:[%s967_s26 + $0x30] sm:$0xe] }
  0x48   : > { %v245_v60 = vmul.f32 %v957_v1, %v219_v47  ;;  %v743_v61 = vadd.f32 %v1063_v59, %v729_v51  ;;  %v446_v62 = vadd.f32 %v432_v31, %v405_v52  ;;  %v300_v63 = vunpack.c.l.bf16 %v286_v48  ;;  %v288_v51 = vld [vmem:[%s967_s26 + $0x34] sm:$0x1] }
  0x49   : > { %v319_v6 = vmul.f32 %v962_v2, %v299_v49  ;;  %v698_v9 = vsel %vm337_vm0, %v696_v54, %v697_v57  ;;  %v386_v11 = vunpack.c.l.bf16 %v848_v55  ;;  %v473_v12 = vunpack.c.l.bf16 %v862_v56  ;;  %v864_v56 = vld [vmem:[%s967_s26 + $0x38] sm:$0xe] }
  0x4a   : > { %v259_v10 = vrot.slane %v245_v60, 1  ;;  %v750_v13 = vpack.c.bf16 %v743_v61, %v743_v61  ;;  %v543_v14 = vadd.f32 %v525_v50, %v446_v62  ;;  %v320_v15 = vmul.f32 %v962_v2, %v300_v63 }
  0x4b   : > { %v353_v17 = vrot.slane %v319_v6, 2  ;;  %v399_v20 = vmul.f32 %v972_v3, %v386_v11  ;;  %v419_v22 = vmul.f32 %v977_v4, %v386_v11  ;;  %v474_v24 = vunpack.c.l.bf16 %v863_v7  ;;  %v865_v7 = vld [vmem:[%s967_s26 + $0x3c] sm:$0x1] }
  0x4c   : > { %v273_v19 = vadd.f32 %v259_v10, %v232_v58  ;;  %v767_v26 = vsel %vm1082_vm3, %v750_v13, %v766_v8  ;;  %v578_v27 = vadd.f32 %v571_v40, %v543_v14  ;;  %v354_v28 = vrot.slane %v320_v15, 2 }
  0x4d   : > { %v493_v29 = vmul.f32 %v982_v5, %v473_v12  ;;  %768 = vst [vmem:[%s1070_s21 + $0xc] sm:$0xf] %v767_v26  ;;  %v433_v30 = vrot.slane %v419_v22, 1  ;;  %v494_v31 = vmul.f32 %v982_v5, %v474_v24  ;;  %v559_v33 = vunpack.c.h.bf16 %v848_v55  ;;  %v769_v12 = vld [vmem:[%s1070_s21 + $0x10] sm:$0xf] }
  0x4e   : > { %v646_v34 = vunpack.c.l.bf16 %v886_v18  ;;  %v619_v37 = vadd.f32 %v605_v53, %v578_v27  ;;  %v355_v38 = vsel %vm337_vm0, %v353_v17, %v354_v28  ;;  %v647_v42 = vunpack.c.l.bf16 %v887_v25  ;;  %v888_v22 = vld [vmem:[%s967_s26 + $0x40] sm:$0xe] }
  0x4f   : > { %v526_v39 = vrot.slane %v493_v29, 2  ;;  %v371_v44 = vadd.f32 %v355_v38, %v273_v19  ;;  %v527_v40 = vrot.slane %v494_v31, 2  ;;  %v572_v45 = vmul.f32 %v993_v16, %v559_v33  ;;  %v889_v31 = vld [vmem:[%s967_s26 + $0x44] sm:$0x1] }
  0x50   : > { %v592_v41 = vmul.f32 %v998_v21, %v559_v33  ;;  %v716_v46 = vadd.f32 %v698_v9, %v619_v37  ;;  %v666_v47 = vmul.f32 %v1013_v32, %v646_v34  ;;  %v667_v48 = vmul.f32 %v1013_v32, %v647_v42 }
  0x51   : > { %v220_v49 = vunpack.c.l.bf16 %v213_v35  ;;  %v406_v52 = vadd.f32 %v399_v20, %v371_v44  ;;  %v528_v53 = vsel %vm337_vm0, %v526_v39, %v527_v40  ;;  %v301_v55 = vunpack.c.l.bf16 %v287_v43 }
  0x52   : > { %v606_v54 = vrot.slane %v592_v41, 1  ;;  %v730_v50 = vmul.f32 %v1054_v36, %v716_v46  ;;  %v699_v57 = vrot.slane %v666_v47, 2  ;;  %v700_v58 = vrot.slane %v667_v48, 2 }
  0x53   : > { %v233_v60 = vmul.f32 %v952_v0, %v220_v49  ;;  %v447_v61 = vadd.f32 %v433_v30, %v406_v52  ;;  %v246_v62 = vmul.f32 %v957_v1, %v220_v49  ;;  %v302_v63 = vunpack.c.l.bf16 %v288_v51  ;;  %v873_v1 = vld [vmem:[%s967_s26 + $0x40] sm:$0xf] }
  0x54   : > { %v321_v6 = vmul.f32 %v962_v2, %v301_v55  ;;  %v744_v8 = vadd.f32 %v1063_v59, %v730_v50  ;;  %v701_v9 = vsel %vm337_vm0, %v699_v57, %v700_v58  ;;  %v387_v10 = vunpack.c.h.bf16 %v213_v35  ;;  %v775_v58 = vld [vmem:[%s1070_s21 + $0x18] sm:$0xf] }
  0x55   : > { %v475_v11 = vunpack.c.l.bf16 %v864_v56  ;;  %v544_v13 = vadd.f32 %v528_v53, %v447_v61  ;;  %v260_v14 = vrot.slane %v246_v62, 1  ;;  %v322_v15 = vmul.f32 %v962_v2, %v302_v63 }
  0x56   : > { %v356_v0 = vrot.slane %v321_v6, 2  ;;  %v751_v17 = vpack.c.bf16 %v744_v8, %v744_v8  ;;  %v400_v18 = vmul.f32 %v972_v3, %v387_v10  ;;  %v420_v19 = vmul.f32 %v977_v4, %v387_v10 }
  0x57   : > { %v476_v20 = vunpack.c.l.bf16 %v865_v7  ;;  %v579_v24 = vadd.f32 %v572_v45, %v544_v13  ;;  %v274_v25 = vadd.f32 %v260_v14, %v233_v60  ;;  %v357_v26 = vrot.slane %v322_v15, 2 }
  0x58   : > { %v495_v27 = vmul.f32 %v982_v5, %v475_v11  ;;  %v770_v28 = vsel %vm1082_vm3, %v751_v17, %v769_v12  ;;  %v434_v2 = vrot.slane %v420_v19, 1  ;;  %v560_v30 = vunpack.c.l.bf16 %v873_v1 }
  0x59   : > { %v496_v29 = vmul.f32 %v982_v5, %v476_v20  ;;  %771 = vst [vmem:[%s1070_s21 + $0x10] sm:$0xf] %v770_v28  ;;  %v620_v33 = vadd.f32 %v606_v54, %v579_v24  ;;  %v358_v3 = vsel %vm337_vm0, %v356_v0, %v357_v26  ;;  %v648_v34 = vunpack.c.l.bf16 %v888_v22 }
  0x5a   : > { %v529_v4 = vrot.slane %v495_v27, 2  ;;  %v372_v35 = vadd.f32 %v358_v3, %v274_v25  ;;  %v573_v38 = vmul.f32 %v993_v16, %v560_v30  ;;  %v593_v39 = vmul.f32 %v998_v21, %v560_v30  ;;  %v772_v21 = vld [vmem:[%s1070_s21 + $0x14] sm:$0xf] }
  0x5b   : > { %v530_v37 = vrot.slane %v496_v29, 2  ;;  %v717_v42 = vadd.f32 %v701_v9, %v620_v33  ;;  %v649_v43 = vunpack.c.l.bf16 %v889_v31  ;;  %v668_v44 = vmul.f32 %v1013_v32, %v648_v34 }
  0x5c   : > { %v407_v5 = vadd.f32 %v400_v18, %v372_v35  ;;  %v607_v51 = vrot.slane %v593_v39, 1 }
  0x5d   : > { %v531_v40 = vsel %vm337_vm0, %v529_v4, %v530_v37  ;;  %v731_v45 = vmul.f32 %v1054_v36, %v717_v42  ;;  %v669_v41 = vmul.f32 %v1013_v32, %v649_v43  ;;  %v702_v46 = vrot.slane %v668_v44, 2 }
  0x5e   : > { %v448_v47 = vadd.f32 %v434_v2, %v407_v5 }
  0x5f   : > { %v745_v48 = vadd.f32 %v1063_v59, %v731_v45  ;;  %v703_v16 = vrot.slane %v669_v41, 2 }
  0x60   : > { %v545_v49 = vadd.f32 %v531_v40, %v448_v47 }
  0x61   : > { %v752_v52 = vpack.c.bf16 %v745_v48, %v745_v48  ;;  %v704_v53 = vsel %vm337_vm0, %v702_v46, %v703_v16 }
  0x62   : > { %v580_v54 = vadd.f32 %v573_v38, %v545_v49 }
  0x63   : > { %v773_v55 = vsel %vm1082_vm3, %v752_v52, %v772_v21 }
  0x64   : > { %774 = vst [vmem:[%s1070_s21 + $0x14] sm:$0xf] %v773_v55  ;;  %v621_v56 = vadd.f32 %v607_v51, %v580_v54 }
  0x66   : > { %v718_v32 = vadd.f32 %v704_v53, %v621_v56 }
  0x68   : > { %v732_v50 = vmul.f32 %v1054_v36, %v718_v32 }
  0x6a   : > { %v746_v57 = vadd.f32 %v1063_v59, %v732_v50 }
  0x6c   : > { %v753_v60 = vpack.c.bf16 %v746_v57, %v746_v57 }
  0x6e   : > { %v776_v61 = vsel %vm1082_vm3, %v753_v60, %v775_v58 }
  0x6f   : > { %777 = vst [vmem:[%s1070_s21 + $0x18] sm:$0xf] %v776_v61 }
  0x70 PF: > { %s14_s15 = sadd.s32 1, %s911_s15  }
  0x71   : > { %p11_p4 = scmp.ge.s32.totalorder %s14_s15, 4  }
  0x73   :  { %13 = sbr.rel (!%p11_p4) target bundleno = 1 (0x1), region = 68 }

// kernel: _lambda_.60
= control target key start
LH: loop header
LB: loop body
LE: loop exit
PB: predicated region body
PF: predicated region fallthrough
CT: control target
= control target key end

     0   :  { %vm76_vm0 = vcmask 719872   ;;  %vm83_vm1 = vcmask 1043456   ;;  %vm178_vm2 = vcmask 715776   ;;  %s309_s1 = inlined_call_operand.vmem [shape: bf16[88,88], index: 1, kind: input, shape index: {}]   ;;  %s310_s0 = inlined_call_operand.vmem [shape: bf16[32,88], index: 0, kind: input, shape index: {}]   ;;  %s311_s2 = inlined_call_operand.vmem [shape: f32[1,88], index: 2, kind: input, shape index: {}]   ;;  %s312_s3 = inlined_call_operand.vmem [shape: f32[1,88], index: 3, kind: input, shape index: {}]   ;;  %s313_s4 = inlined_call_operand.vmem [shape: bf16[32,88], index: 4, kind: output, shape index: {}]  }
   0x1   :  { %v232_v0 = vld [vmem:[%s309_s1] sm:$0xff]   ;;  %v233_v1 = vld [vmem:[%s309_s1 + $0x8] sm:$0xff]   ;;  %v234_v2 = vld [vmem:[%s309_s1 + $0x10] sm:$0xff]  }
   0x2   :  { %215 = vmatprep.subr.bf16.mxu0 %v232_v0  ;;  %v238_v3 = vld [vmem:[%s310_s0] sm:$0xff]   ;;  %v235_v4 = vld [vmem:[%s309_s1 + $0x18] sm:$0xff]   ;;  %v237_v6 = vld [vmem:[%s309_s1 + $0x28] ss:$0 sps:$4 sm:$0xff]  }
   0x3   :  { %216 = vmatpush3.bf16.msra.mxu0 %v232_v0  ;;  %227 = vmatprep.mubr.msk.bf16.mxu0 %vm76_vm0, %v238_v3  ;;  %v236_v5 = vld [vmem:[%s309_s1 + $0x20] sm:$0xff]   ;;  %v85_v7 = vsel %vm83_vm1, %v237_v6, 0  ;;  %v239_v8 = vld [vmem:[%s310_s0 + $0x8] sm:$0xff]  }
   0x4   :  { %217 = vmatprep.subr.bf16.mxu0 %v233_v1  ;;  %v197_v9 = vld [vmem:[%s311_s2] ss:$0 sm:$0xff] }
   0x5   :  { %v198_v11 = vld [vmem:[%s312_s3] ss:$0 sm:$0xff] }
   0x7   :  { %218 = vmatpush3.bf16.msra.mxu0 %v233_v1 }
   0x8   :  { %219 = vmatprep.subr.bf16.mxu0 %v234_v2 }
   0xb   :  { %220 = vmatpush3.bf16.msra.mxu0 %v234_v2 }
   0xc   :  { %221 = vmatprep.subr.bf16.mxu0 %v235_v4 }
   0xf   :  { %222 = vmatpush3.bf16.msra.mxu0 %v235_v4 }
  0x10   :  { %223 = vmatprep.subr.bf16.mxu0 %v236_v5 }
  0x13   :  { %224 = vmatpush3.bf16.msra.mxu0 %v236_v5 }
  0x14   :  { %231 = vmatprep.subr.msk.bf16.mxu0 %vm83_vm1, %v237_v6 }
  0x17   :  { %226 = vmatpush3.bf16.msra.mxu0 %v85_v7 }
  0x1a   :  { %228 = vmatmul.mubr.msk.bf16.vlgmr.msra.gmra.mrb[0].mxu0 %vm76_vm0, %v239_v8 }
  0xed   :  { %v229_v10 = vpop.f32.mrb[0].mxu0 }
  0xee   :  { %v145_v12 = vmul.f32 %v229_v10, %v197_v9  ;;  %v121_v13 = vpop.f32.mrb[1].mxu0 }
  0xef   :  { %v143_v14 = vmul.f32 %v197_v9, %v121_v13  ;;  %v230_v15 = vpop.f32.mrb[2].mxu0 }
  0xf0   :  { %v156_v16 = vadd.f32 %v198_v11, %v145_v12  ;;  %v146_v17 = vmul.f32 %v230_v15, %v197_v9  ;;  %v124_v18 = vpop.f32.mrb[3].mxu0 }
  0xf1   :  { %v154_v19 = vadd.f32 %v198_v11, %v143_v14  ;;  %v144_v20 = vmul.f32 %v197_v9, %v124_v18 }
  0xf2   :  { %v160_v21 = vmax.f32 %v156_v16, 0.0  ;;  %v157_v22 = vadd.f32 %v198_v11, %v146_v17 }
  0xf3   :  { %v158_v23 = vmax.f32 %v154_v19, 0.0  ;;  %v155_v24 = vadd.f32 %v198_v11, %v144_v20 }
  0xf4   :  { %v205_v25 = vpack.c.bf16 %v160_v21, %v160_v21  ;;  %v161_v26 = vmax.f32 %v157_v22, 0.0 }
  0xf5   :  { %v203_v27 = vpack.c.bf16 %v158_v23, %v158_v23  ;;  %v159_v28 = vmax.f32 %v155_v24, 0.0 }
  0xf6   :  { %181 = vst.msk [vmem:[%s313_s4 + $0x8] sm:$0xf] %vm178_vm2, %v205_v25  ;;  %v206_v29 = vpack.c.bf16 %v161_v26, %v161_v26 }
  0xf7   :  { %179 = vst.msk [vmem:[%s313_s4] sm:$0xf] %vm178_vm2, %v203_v27  ;;  %v204_v30 = vpack.c.bf16 %v159_v28, %v159_v28 }
  0xf8   :  { %182 = vst.msk [vmem:[%s313_s4 + $0xc] sm:$0xf] %vm178_vm2, %v206_v29 }
  0xf9   :  { %180 = vst.msk [vmem:[%s313_s4 + $0x4] sm:$0xf] %vm178_vm2, %v204_v30 }

// kernel: _lambda_.57
= control target key start
LH: loop header
LB: loop body
LE: loop exit
PB: predicated region body
PF: predicated region fallthrough
CT: control target
= control target key end

     0   :  { %s670_s6 = smov 0   ;;  %s823_s0 = inlined_call_operand.vmem [shape: bf16[2,9,9,12], index: 0, kind: input, shape index: {}]   ;;  %s824_s1 = inlined_call_operand.vmem [shape: bf16[2,7,7,12], index: 1, kind: output, shape index: {}]  }
   0x1 LB: > { %s591_s7 = sadd.s32 4294967295, %s658_s6   ;;  %p595_p0 = scmp.ge.s32.totalorder %s658_s6, 1  ;;  %s658_s6 = sphi %s670_s6, %s11_s6  }
   0x2   : > { %p87_p1 = scmp.lt.s32.totalorder %s658_s6, 3 }
   0x4   : > { %p88_p2 = pnand %p595_p0, %p87_p1 }
   0x5   : > { %p107_p3 = scmp.lt.s32.totalorder (!%p88_p2), %s591_s7, 1  ;;  %vm201_vm0 = vcmask (!%p88_p2), 1045504   ;;  %vm512_vm1 = vcmask (!%p88_p2), 93184   ;;  %vm513_vm2 = vsmask.f32 (!%p88_p2), 3328 }
   0x6   : > { %91 = sbr.rel (%p88_p2) target bundleno = 90 (0x5a), region = 24  ;;  %vm746_vm3 = vmand (!%p88_p2), %vm512_vm1, %vm513_vm2 }
   0xd   : > { %s828_s7 = smov (!%p107_p3, %s591_s7), 1 }
   0xe   : > { %s642_s8 = smul.u32 72, %s828_s7 }
   0xf   : > { %s643_s12 = smul.u32 28, %s828_s7 }
  0x10   : > { %s684_s11 = scalar_lea.vmem %s823_s0, %s642_s8 }
  0x11   : > { %v117_v0 = vld [vmem:[%s684_s11] ss:$8 sps:$4 sm:$0xff]   ;;  %v160_v2 = vld [vmem:[%s684_s11 + $0x4] sm:$0x1]  ;;  %v606_v8 = vld [vmem:[%s684_s11 + $0xc] sm:$0x1]  ;;  %s738_s15 = scalar_lea.vmem %s824_s1, %s643_s12 }
  0x12   : > { %v159_v1 = vld [vmem:[%s684_s11] sm:$0xe]  ;;  %v124_v3 = vunpack.c.l.bf16 %v117_v0  ;;  %v174_v5 = vunpack.c.l.bf16 %v160_v2  ;;  %v245_v6 = vunpack.c.h.bf16 %v117_v0  ;;  %v605_v7 = vld [vmem:[%s684_s11 + $0x8] sm:$0xe]  ;;  %v302_v11 = vunpack.c.l.bf16 %v606_v8  ;;  %v626_v13 = vld [vmem:[%s684_s11 + $0x10] sm:$0xe] }
  0x13   : > { %v173_v4 = vunpack.c.l.bf16 %v159_v1  ;;  %v692_v9 = vld [vmem:[%s684_s11 + $0x8] ss:$8 sps:$4 sm:$0xff]   ;;  %v301_v10 = vunpack.c.l.bf16 %v605_v7  ;;  %v627_v14 = vld [vmem:[%s684_s11 + $0x14] sm:$0x1]  ;;  %v428_v23 = vunpack.c.l.bf16 %v626_v13  ;;  %v162_v24 = vld [vmem:[%s684_s11 + $0xc] sm:$0x1] }
  0x14   : > { %v372_v12 = vunpack.c.h.bf16 %v692_v9  ;;  %v125_v15 = vunpack.c.l.bf16 %v692_v9  ;;  %v138_v16 = vrot.slane %v124_v3, 1  ;;  %v203_v18 = vrot.slane %v174_v5, 2  ;;  %v161_v19 = vld [vmem:[%s684_s11 + $0x8] sm:$0xe]  ;;  %v702_v29 = vld [vmem:[%s684_s11 + $0x10] ss:$8 sps:$4 sm:$0xff]  }
  0x15   : > { %v202_v17 = vrot.slane %v173_v4, 2  ;;  %v266_v20 = vrot.slane %v245_v6, 1  ;;  %v329_v21 = vrot.slane %v301_v10, 2  ;;  %v330_v22 = vrot.slane %v302_v11, 2  ;;  %v607_v30 = vld [vmem:[%s684_s11 + $0x10] sm:$0xe] }
  0x16   : > { %v152_v25 = vadd.f32 %v138_v16, %v124_v3  ;;  %v429_v27 = vunpack.c.l.bf16 %v627_v14  ;;  %v139_v28 = vrot.slane %v125_v15, 1  ;;  %v393_v31 = vrot.slane %v372_v12, 1  ;;  %v608_v35 = vld [vmem:[%s684_s11 + $0x14] sm:$0x1]  ;;  %v628_v40 = vld [vmem:[%s684_s11 + $0x18] sm:$0xe] }
  0x17   : > { %v204_v26 = vsel %vm201_vm0, %v202_v17, %v203_v18  ;;  %v456_v32 = vrot.slane %v428_v23, 2  ;;  %v175_v33 = vunpack.c.l.bf16 %v161_v19  ;;  %v176_v34 = vunpack.c.l.bf16 %v162_v24  ;;  %v629_v45 = vld [vmem:[%s684_s11 + $0x1c] sm:$0x1]  ;;  %v119_v50 = vld [vmem:[%s684_s11 + $0x10] ss:$8 sps:$4 sm:$0xff]  }
  0x18   : > { %v230_v36 = vadd.f32 %v204_v26, %v152_v25  ;;  %v457_v37 = vrot.slane %v429_v27, 2  ;;  %v153_v38 = vadd.f32 %v139_v28, %v125_v15  ;;  %v246_v39 = vunpack.c.l.bf16 %v702_v29  ;;  %v163_v51 = vld [vmem:[%s684_s11 + $0x10] sm:$0xe]  ;;  %v164_v56 = vld [vmem:[%s684_s11 + $0x14] sm:$0x1] }
  0x19   : > { %v205_v41 = vrot.slane %v175_v33, 2  ;;  %v206_v42 = vrot.slane %v176_v34, 2  ;;  %v303_v43 = vunpack.c.l.bf16 %v607_v30  ;;  %v304_v44 = vunpack.c.l.bf16 %v608_v35  ;;  %v609_v61 = vld [vmem:[%s684_s11 + $0x18] sm:$0xe]  ;;  %v630_v17 = vld [vmem:[%s684_s11 + $0x20] sm:$0xe] }
  0x1a   : > { %v252_v46 = vadd.f32 %v245_v6, %v230_v36  ;;  %v331_v47 = vsel %vm201_vm0, %v329_v21, %v330_v22  ;;  %v458_v48 = vsel %vm201_vm0, %v456_v32, %v457_v37  ;;  %v373_v49 = vunpack.c.h.bf16 %v702_v29  ;;  %v610_v6 = vld [vmem:[%s684_s11 + $0x1c] sm:$0x1]  ;;  %v631_v18 = vld [vmem:[%s684_s11 + $0x24] sm:$0x1]  ;;  %v621_v23 = vld [vmem:[%s684_s11 + $0x18] ss:$8 sps:$4 sm:$0xff]  }
  0x1b   : > { %v207_v52 = vsel %vm201_vm0, %v205_v41, %v206_v42  ;;  %v332_v53 = vrot.slane %v303_v43, 2  ;;  %v333_v54 = vrot.slane %v304_v44, 2  ;;  %v430_v55 = vunpack.c.l.bf16 %v628_v40  ;;  %v165_v30 = vld [vmem:[%s684_s11 + $0x18] sm:$0xe]  ;;  %v166_v36 = vld [vmem:[%s684_s11 + $0x1c] sm:$0x1] }
  0x1c   : > { %v280_v57 = vadd.f32 %v266_v20, %v252_v46  ;;  %v231_v58 = vadd.f32 %v207_v52, %v153_v38  ;;  %v267_v59 = vrot.slane %v246_v39, 1  ;;  %v431_v60 = vunpack.c.l.bf16 %v629_v45  ;;  %v732_v37 = vld [vmem:[%s684_s11 + $0x20] ss:$8 sps:$4 sm:$0xff]  }
  0x1d   : > { %v334_v62 = vsel %vm201_vm0, %v332_v53, %v333_v54  ;;  %v394_v63 = vrot.slane %v373_v49, 1  ;;  %v126_v0 = vunpack.c.l.bf16 %v119_v50  ;;  %v177_v1 = vunpack.c.l.bf16 %v163_v51  ;;  %v611_v45 = vld [vmem:[%s684_s11 + $0x20] sm:$0xe] }
  0x1e   : > { %v357_v2 = vadd.f32 %v331_v47, %v280_v57  ;;  %v253_v3 = vadd.f32 %v246_v39, %v231_v58  ;;  %v459_v4 = vrot.slane %v430_v55, 2  ;;  %v178_v5 = vunpack.c.l.bf16 %v164_v56  ;;  %v632_v55 = vld [vmem:[%s684_s11 + $0x28] sm:$0xe]  ;;  %v515_v57 = vld [vmem:[%s738_s15] sm:$0xf] }
  0x1f   : > { %v140_v7 = vrot.slane %v126_v0, 1  ;;  %v208_v8 = vrot.slane %v177_v1, 2  ;;  %v247_v10 = vunpack.c.h.bf16 %v119_v50  ;;  %v305_v11 = vunpack.c.l.bf16 %v609_v61  ;;  %v612_v50 = vld [vmem:[%s684_s11 + $0x24] sm:$0x1] }
  0x20   : > { %v379_v13 = vadd.f32 %v372_v12, %v357_v2  ;;  %v281_v14 = vadd.f32 %v267_v59, %v253_v3  ;;  %v460_v15 = vrot.slane %v431_v60, 2  ;;  %v209_v16 = vrot.slane %v178_v5, 2  ;;  %v633_v2 = vld [vmem:[%s684_s11 + $0x2c] sm:$0x1] }
  0x21   : > { %v154_v19 = vadd.f32 %v140_v7, %v126_v0  ;;  %v268_v20 = vrot.slane %v247_v10, 1  ;;  %v306_v21 = vunpack.c.l.bf16 %v610_v6  ;;  %v335_v22 = vrot.slane %v305_v11, 2  ;;  %v121_v7 = vld [vmem:[%s684_s11 + $0x20] ss:$8 sps:$4 sm:$0xff]  }
  0x22   : > { %v407_v24 = vadd.f32 %v393_v31, %v379_v13  ;;  %v358_v25 = vadd.f32 %v334_v62, %v281_v14  ;;  %v210_v26 = vsel %vm201_vm0, %v208_v8, %v209_v16  ;;  %v374_v9 = vunpack.c.h.bf16 %v621_v23  ;;  %v167_v14 = vld [vmem:[%s684_s11 + $0x20] sm:$0xe]  ;;  %v518_v16 = vld [vmem:[%s738_s15 + $0x4] sm:$0xf] }
  0x23   : > { %v232_v12 = vadd.f32 %v210_v26, %v154_v19  ;;  %v336_v27 = vrot.slane %v306_v21, 2  ;;  %v432_v28 = vunpack.c.l.bf16 %v630_v17  ;;  %v433_v29 = vunpack.c.l.bf16 %v631_v18 }
  0x24   : > { %v484_v32 = vadd.f32 %v458_v48, %v407_v24  ;;  %v380_v33 = vadd.f32 %v373_v49, %v358_v25  ;;  %v461_v34 = vsel %vm201_vm0, %v459_v4, %v460_v15  ;;  %v127_v35 = vunpack.c.l.bf16 %v621_v23  ;;  %v168_v15 = vld [vmem:[%s684_s11 + $0x24] sm:$0x1] }
  0x25   : > { %v254_v31 = vadd.f32 %v247_v10, %v232_v12  ;;  %v337_v38 = vsel %vm201_vm0, %v335_v22, %v336_v27  ;;  %v462_v39 = vrot.slane %v432_v28, 2  ;;  %v463_v40 = vrot.slane %v433_v29, 2  ;;  %v613_v27 = vld [vmem:[%s684_s11 + $0x28] sm:$0xe] }
  0x26   : > { %v491_v41 = vmul.f32 0.11111111, %v484_v32  ;;  %v408_v42 = vadd.f32 %v394_v63, %v380_v33  ;;  %v141_v43 = vrot.slane %v127_v35, 1  ;;  %v179_v44 = vunpack.c.l.bf16 %v165_v30  ;;  %v614_v33 = vld [vmem:[%s684_s11 + $0x2c] sm:$0x1] }
  0x27   : > { %v282_v46 = vadd.f32 %v268_v20, %v254_v31  ;;  %v395_v47 = vrot.slane %v374_v9, 1  ;;  %v180_v48 = vunpack.c.l.bf16 %v166_v36  ;;  %v248_v49 = vunpack.c.l.bf16 %v732_v37 }
  0x28   : > { %v498_v51 = vmax.f32 %v491_v41, 0.0  ;;  %v485_v52 = vadd.f32 %v461_v34, %v408_v42  ;;  %v155_v53 = vadd.f32 %v141_v43, %v127_v35  ;;  %v211_v54 = vrot.slane %v179_v44, 2  ;;  %v634_v34 = vld [vmem:[%s684_s11 + $0x30] sm:$0xe]  ;;  %v635_v42 = vld [vmem:[%s684_s11 + $0x34] sm:$0x1] }
  0x29   : > { %v359_v58 = vadd.f32 %v337_v38, %v282_v46  ;;  %v464_v59 = vsel %vm201_vm0, %v462_v39, %v463_v40  ;;  %v212_v60 = vrot.slane %v180_v48, 2  ;;  %v307_v61 = vunpack.c.l.bf16 %v611_v45  ;;  %v521_v48 = vld [vmem:[%s738_s15 + $0x8] sm:$0xf] }
  0x2a   : > { %v505_v62 = vpack.c.bf16 %v498_v51, %v498_v51  ;;  %v492_v63 = vmul.f32 0.11111111, %v485_v52  ;;  %v269_v0 = vrot.slane %v248_v49, 1  ;;  %v308_v1 = vunpack.c.l.bf16 %v612_v50 }
  0x2b   : > { %v381_v3 = vadd.f32 %v374_v9, %v359_v58  ;;  %v213_v4 = vsel %vm201_vm0, %v211_v54, %v212_v60  ;;  %v338_v5 = vrot.slane %v307_v61, 2  ;;  %v434_v6 = vunpack.c.l.bf16 %v632_v55 }
  0x2c   : > { %v516_v8 = vsel %vm746_vm3, %v505_v62, %v515_v57  ;;  %v499_v10 = vmax.f32 %v492_v63, 0.0  ;;  %v233_v11 = vadd.f32 %v213_v4, %v155_v53  ;;  %v339_v13 = vrot.slane %v308_v1, 2  ;;  %v169_v53 = vld [vmem:[%s684_s11 + $0x28] sm:$0xe]  ;;  %v615_v1 = vld [vmem:[%s684_s11 + $0x30] sm:$0xe] }
  0x2d   : > { %517 = vst [vmem:[%s738_s15] sm:$0xf] %v516_v8  ;;  %v409_v17 = vadd.f32 %v395_v47, %v381_v3  ;;  %v375_v18 = vunpack.c.h.bf16 %v732_v37  ;;  %v435_v19 = vunpack.c.l.bf16 %v633_v2  ;;  %v465_v20 = vrot.slane %v434_v6, 2  ;;  %v623_v47 = vld [vmem:[%s684_s11 + $0x28] ss:$8 sps:$4 sm:$0xff]  }
  0x2e   : > { %v506_v21 = vpack.c.bf16 %v499_v10, %v499_v10  ;;  %v255_v22 = vadd.f32 %v248_v49, %v233_v11  ;;  %v340_v23 = vsel %vm201_vm0, %v338_v5, %v339_v13  ;;  %v128_v24 = vunpack.c.l.bf16 %v121_v7  ;;  %v616_v11 = vld [vmem:[%s684_s11 + $0x34] sm:$0x1] }
  0x2f   : > { %v486_v25 = vadd.f32 %v464_v59, %v409_v17  ;;  %v466_v26 = vrot.slane %v435_v19, 2  ;;  %v181_v9 = vunpack.c.l.bf16 %v167_v14  ;;  %v182_v12 = vunpack.c.l.bf16 %v168_v15  ;;  %v170_v59 = vld [vmem:[%s684_s11 + $0x2c] sm:$0x1]  ;;  %v636_v17 = vld [vmem:[%s684_s11 + $0x38] sm:$0xe] }
  0x30   : > { %v519_v28 = vsel %vm746_vm3, %v506_v21, %v518_v16  ;;  %v283_v29 = vadd.f32 %v269_v0, %v255_v22  ;;  %v142_v30 = vrot.slane %v128_v24, 1  ;;  %v249_v32 = vunpack.c.h.bf16 %v121_v7  ;;  %v777_v0 = vld [vmem:[%s684_s11 + $0x30] ss:$8 sps:$4 sm:$0xff]   ;;  %v637_v22 = vld [vmem:[%s684_s11 + $0x3c] sm:$0x1] }
  0x31   : > { %520 = vst [vmem:[%s738_s15 + $0x4] sm:$0xf] %v519_v28  ;;  %v493_v35 = vmul.f32 0.11111111, %v486_v25  ;;  %v396_v36 = vrot.slane %v375_v18, 1  ;;  %v214_v37 = vrot.slane %v181_v9, 2  ;;  %v467_v39 = vsel %vm201_vm0, %v465_v20, %v466_v26 }
  0x32   : > { %v215_v31 = vrot.slane %v182_v12, 2  ;;  %v360_v38 = vadd.f32 %v340_v23, %v283_v29  ;;  %v156_v40 = vadd.f32 %v142_v30, %v128_v24  ;;  %v309_v41 = vunpack.c.l.bf16 %v613_v27  ;;  %v123_v26 = vld [vmem:[%s684_s11 + $0x30] ss:$8 sps:$4 sm:$0xff]   ;;  %v524_v30 = vld [vmem:[%s738_s15 + $0xc] sm:$0xf] }
  0x33   : > { %v500_v43 = vmax.f32 %v493_v35, 0.0  ;;  %v270_v45 = vrot.slane %v249_v32, 1  ;;  %v310_v46 = vunpack.c.l.bf16 %v614_v33  ;;  %v436_v52 = vunpack.c.l.bf16 %v634_v34  ;;  %v171_v29 = vld [vmem:[%s684_s11 + $0x30] sm:$0xe] }
  0x34   : > { %v216_v44 = vsel %vm201_vm0, %v214_v37, %v215_v31  ;;  %v382_v49 = vadd.f32 %v375_v18, %v360_v38  ;;  %v341_v51 = vrot.slane %v309_v41, 2  ;;  %v376_v57 = vunpack.c.h.bf16 %v623_v47 }
  0x35   : > { %v234_v50 = vadd.f32 %v216_v44, %v156_v40  ;;  %v507_v54 = vpack.c.bf16 %v500_v43, %v500_v43  ;;  %v342_v55 = vrot.slane %v310_v46, 2  ;;  %v437_v58 = vunpack.c.l.bf16 %v635_v42  ;;  %v617_v44 = vld [vmem:[%s684_s11 + $0x38] sm:$0xe] }
  0x36   : > { %v410_v60 = vadd.f32 %v396_v36, %v382_v49  ;;  %v468_v62 = vrot.slane %v436_v52, 2  ;;  %v129_v63 = vunpack.c.l.bf16 %v623_v47  ;;  %v183_v5 = vunpack.c.l.bf16 %v169_v53  ;;  %v172_v36 = vld [vmem:[%s684_s11 + $0x34] sm:$0x1]  ;;  %v618_v49 = vld [vmem:[%s684_s11 + $0x3c] sm:$0x1] }
  0x37   : > { %v256_v61 = vadd.f32 %v249_v32, %v234_v50  ;;  %v522_v2 = vsel %vm746_vm3, %v507_v54, %v521_v48  ;;  %v343_v3 = vsel %vm201_vm0, %v341_v51, %v342_v55  ;;  %v469_v4 = vrot.slane %v437_v58, 2 }
  0x38   : > { %523 = vst [vmem:[%s738_s15 + $0x8] sm:$0xf] %v522_v2  ;;  %v487_v6 = vadd.f32 %v467_v39, %v410_v60  ;;  %v143_v8 = vrot.slane %v129_v63, 1  ;;  %v184_v10 = vunpack.c.l.bf16 %v170_v59  ;;  %v397_v13 = vrot.slane %v376_v57, 1 }
  0x39   : > { %v284_v7 = vadd.f32 %v270_v45, %v256_v61  ;;  %v217_v14 = vrot.slane %v183_v5, 2  ;;  %v250_v15 = vunpack.c.l.bf16 %v777_v0  ;;  %v311_v16 = vunpack.c.l.bf16 %v615_v1 }
  0x3a   : > { %v494_v18 = vmul.f32 0.11111111, %v487_v6  ;;  %v157_v20 = vadd.f32 %v143_v8, %v129_v63  ;;  %v218_v21 = vrot.slane %v184_v10, 2  ;;  %v470_v23 = vsel %vm201_vm0, %v468_v62, %v469_v4  ;;  %v638_v62 = vld [vmem:[%s684_s11 + $0x40] sm:$0xe] }
  0x3b   : > { %v361_v19 = vadd.f32 %v343_v3, %v284_v7  ;;  %v312_v24 = vunpack.c.l.bf16 %v616_v11  ;;  %v344_v25 = vrot.slane %v311_v16, 2  ;;  %v438_v28 = vunpack.c.l.bf16 %v636_v17  ;;  %v639_v63 = vld [vmem:[%s684_s11 + $0x44] sm:$0x1]  ;;  %v625_v3 = vld [vmem:[%s684_s11 + $0x40] sm:$0xf] }
  0x3c   : > { %v501_v9 = vmax.f32 %v494_v18, 0.0  ;;  %v219_v27 = vsel %vm201_vm0, %v217_v14, %v218_v21  ;;  %v271_v33 = vrot.slane %v250_v15, 1  ;;  %v439_v35 = vunpack.c.l.bf16 %v637_v22  ;;  %v527_v4 = vld [vmem:[%s738_s15 + $0x10] sm:$0xf] }
  0x3d   : > { %v383_v12 = vadd.f32 %v376_v57, %v361_v19  ;;  %v235_v32 = vadd.f32 %v219_v27, %v157_v20  ;;  %v345_v34 = vrot.slane %v312_v24, 2  ;;  %v377_v38 = vunpack.c.h.bf16 %v777_v0  ;;  %v530_v27 = vld [vmem:[%s738_s15 + $0x14] sm:$0xf] }
  0x3e   : > { %v508_v37 = vpack.c.bf16 %v501_v9, %v501_v9  ;;  %v130_v39 = vunpack.c.l.bf16 %v123_v26  ;;  %v471_v42 = vrot.slane %v438_v28, 2  ;;  %v185_v43 = vunpack.c.l.bf16 %v171_v29 }
  0x3f   : > { %v411_v31 = vadd.f32 %v397_v13, %v383_v12  ;;  %v257_v40 = vadd.f32 %v250_v15, %v235_v32  ;;  %v346_v41 = vsel %vm201_vm0, %v344_v25, %v345_v34  ;;  %v186_v48 = vunpack.c.l.bf16 %v172_v36  ;;  %v533_v36 = vld [vmem:[%s738_s15 + $0x18] sm:$0xf] }
  0x40   : > { %v525_v45 = vsel %vm746_vm3, %v508_v37, %v524_v30  ;;  %v144_v47 = vrot.slane %v130_v39, 1  ;;  %v472_v51 = vrot.slane %v439_v35, 2  ;;  %v220_v52 = vrot.slane %v185_v43, 2 }
  0x41   : > { %v488_v46 = vadd.f32 %v470_v23, %v411_v31  ;;  %526 = vst [vmem:[%s738_s15 + $0xc] sm:$0xf] %v525_v45  ;;  %v285_v50 = vadd.f32 %v271_v33, %v257_v40  ;;  %v251_v53 = vunpack.c.h.bf16 %v123_v26  ;;  %v221_v57 = vrot.slane %v186_v48, 2 }
  0x42   : > { %v158_v55 = vadd.f32 %v144_v47, %v130_v39  ;;  %v313_v58 = vunpack.c.l.bf16 %v617_v44  ;;  %v398_v60 = vrot.slane %v377_v38, 1  ;;  %v314_v61 = vunpack.c.l.bf16 %v618_v49 }
  0x43   : > { %v495_v54 = vmul.f32 0.11111111, %v488_v46  ;;  %v362_v59 = vadd.f32 %v346_v41, %v285_v50  ;;  %v222_v1 = vsel %vm201_vm0, %v220_v52, %v221_v57  ;;  %v272_v7 = vrot.slane %v251_v53, 1 }
  0x44   : > { %v347_v2 = vrot.slane %v313_v58, 2  ;;  %v236_v6 = vadd.f32 %v222_v1, %v158_v55  ;;  %v348_v8 = vrot.slane %v314_v61, 2  ;;  %v473_v11 = vsel %vm201_vm0, %v471_v42, %v472_v51 }
  0x45   : > { %v502_v0 = vmax.f32 %v495_v54, 0.0  ;;  %v384_v5 = vadd.f32 %v377_v38, %v362_v59  ;;  %v440_v13 = vunpack.c.l.bf16 %v638_v62  ;;  %v441_v14 = vunpack.c.l.bf16 %v639_v63 }
  0x46   : > { %v258_v16 = vadd.f32 %v251_v53, %v236_v6  ;;  %v378_v17 = vunpack.c.l.bf16 %v625_v3  ;;  %v349_v19 = vsel %vm201_vm0, %v347_v2, %v348_v8 }
  0x47   : > { %v509_v10 = vpack.c.bf16 %v502_v0, %v502_v0  ;;  %v412_v15 = vadd.f32 %v398_v60, %v384_v5  ;;  %v474_v22 = vrot.slane %v440_v13, 2  ;;  %v475_v23 = vrot.slane %v441_v14, 2 }
  0x48   : > { %v286_v21 = vadd.f32 %v272_v7, %v258_v16  ;;  %v399_v26 = vrot.slane %v378_v17, 1 }
  0x49   : > { %v528_v18 = vsel %vm746_vm3, %v509_v10, %v527_v4  ;;  %v489_v20 = vadd.f32 %v473_v11, %v412_v15  ;;  %v476_v28 = vsel %vm201_vm0, %v474_v22, %v475_v23 }
  0x4a   : > { %529 = vst [vmem:[%s738_s15 + $0x10] sm:$0xf] %v528_v18  ;;  %v363_v25 = vadd.f32 %v349_v19, %v286_v21 }
  0x4b   : > { %v496_v24 = vmul.f32 0.11111111, %v489_v20 }
  0x4c   : > { %v385_v12 = vadd.f32 %v378_v17, %v363_v25 }
  0x4d   : > { %v503_v9 = vmax.f32 %v496_v24, 0.0 }
  0x4e   : > { %v413_v30 = vadd.f32 %v399_v26, %v385_v12 }
  0x4f   : > { %v510_v29 = vpack.c.bf16 %v503_v9, %v503_v9 }
  0x50   : > { %v490_v33 = vadd.f32 %v476_v28, %v413_v30 }
  0x51   : > { %v531_v32 = vsel %vm746_vm3, %v510_v29, %v530_v27 }
  0x52   : > { %532 = vst [vmem:[%s738_s15 + $0x14] sm:$0xf] %v531_v32  ;;  %v497_v34 = vmul.f32 0.11111111, %v490_v33 }
  0x54   : > { %v504_v35 = vmax.f32 %v497_v34, 0.0 }
  0x56   : > { %v511_v37 = vpack.c.bf16 %v504_v35, %v504_v35 }
  0x58   : > { %v534_v31 = vsel %vm746_vm3, %v511_v37, %v533_v36 }
  0x59   : > { %535 = vst [vmem:[%s738_s15 + $0x18] sm:$0xf] %v534_v31 }
  0x5a PF: > { %s11_s6 = sadd.s32 1, %s658_s6  }
  0x5b   : > { %p8_p4 = scmp.ge.s32.totalorder %s11_s6, 4  }
  0x5d   :  { %10 = sbr.rel (!%p8_p4) target bundleno = 1 (0x1), region = 56 }

// kernel: _lambda_.61
= control target key start
LH: loop header
LB: loop body
LE: loop exit
PB: predicated region body
PF: predicated region fallthrough
CT: control target
= control target key end

     0   :  { %v397_v0 = vmov 0.0   ;;  %vm398_vm0 = vmmov 0   ;;  %vm118_vm1 = vcmask 1041408   ;;  %vm102_vm2 = vcmask 818176   ;;  %s507_s1 = inlined_call_operand.vmem [shape: bf16[100,100], index: 1, kind: input, shape index: {}]   ;;  %s508_s0 = inlined_call_operand.vmem [shape: bf16[72,100], index: 0, kind: input, shape index: {}]   ;;  %s509_s2 = inlined_call_operand.vmem [shape: f32[1,100], index: 2, kind: input, shape index: {}]   ;;  %s510_s3 = inlined_call_operand.vmem [shape: f32[1,100], index: 3, kind: input, shape index: {}]   ;;  %s511_s4 = inlined_call_operand.vmem [shape: bf16[72,100], index: 4, kind: output, shape index: {}]  }
   0x1   :  { %335 = vmatprep.subr.bf16.mxu0 %v397_v0  ;;  %v385_v1 = vld [vmem:[%s507_s1] sm:$0xff]   ;;  %369 = vmatprep.subr.bf16.mxu1 %v397_v0  ;;  %v386_v2 = vld [vmem:[%s507_s1 + $0x8] sm:$0xff]   ;;  %v387_v3 = vld [vmem:[%s507_s1 + $0x10] sm:$0xff]   ;;  %vm272_vm3 = vcmask 814080  }
   0x2   :  { %349 = vmatprep.mubr.msk.bf16.mxu0 %vm398_vm0, %v397_v0  ;;  %361 = vmatprep.mubr.msk.bf16.mxu1 %vm398_vm0, %v397_v0  ;;  %v388_v4 = vld [vmem:[%s507_s1 + $0x18] sm:$0xff]   ;;  %v389_v5 = vld [vmem:[%s507_s1 + $0x20] sm:$0xff]   ;;  %v390_v6 = vld [vmem:[%s507_s1 + $0x28] sm:$0xff]  }
   0x3   :  { %336 = vmatpush3.bf16.msra.mxu0 %v385_v1  ;;  %376 = vmatpush3.bf16.msra.mxu1 %v385_v1  ;;  %v391_v7 = vld [vmem:[%s507_s1 + $0x30] ss:$0 sps:$4 sm:$0x33]   ;;  %v392_v9 = vld [vmem:[%s508_s0] sm:$0xff]   ;;  %v393_v10 = vld [vmem:[%s508_s0 + $0x18] sm:$0xff]  }
   0x4   :  { %337 = vmatprep.subr.bf16.mxu0 %v397_v0  ;;  %370 = vmatprep.subr.bf16.mxu1 %v397_v0  ;;  %v120_v8 = vsel %vm118_vm1, %v391_v7, 0  ;;  %v394_v11 = vld [vmem:[%s508_s0 + $0x8] sm:$0xff]   ;;  %v395_v12 = vld [vmem:[%s508_s0 + $0x20] ss:$0 sps:$4 sm:$0xff]   ;;  %v396_v13 = vld [vmem:[%s508_s0 + $0x10] sm:$0xff]  }
   0x5   :  { %v303_v14 = vld [vmem:[%s509_s2] ss:$0 sm:$0xff] }
   0x6   :  { %v304_v16 = vld [vmem:[%s510_s3] ss:$0 sm:$0xff] }
   0x7   :  { %338 = vmatpush3.bf16.msra.mxu0 %v386_v2  ;;  %377 = vmatpush3.bf16.msra.mxu1 %v386_v2 }
   0x8   :  { %339 = vmatprep.subr.bf16.mxu0 %v397_v0  ;;  %371 = vmatprep.subr.bf16.mxu1 %v397_v0 }
   0xb   :  { %340 = vmatpush3.bf16.msra.mxu0 %v387_v3  ;;  %378 = vmatpush3.bf16.msra.mxu1 %v387_v3 }
   0xc   :  { %341 = vmatprep.subr.bf16.mxu0 %v397_v0  ;;  %372 = vmatprep.subr.bf16.mxu1 %v397_v0 }
   0xf   :  { %342 = vmatpush3.bf16.msra.mxu0 %v388_v4  ;;  %379 = vmatpush3.bf16.msra.mxu1 %v388_v4 }
  0x10   :  { %343 = vmatprep.subr.bf16.mxu0 %v397_v0  ;;  %373 = vmatprep.subr.bf16.mxu1 %v397_v0 }
  0x13   :  { %344 = vmatpush3.bf16.msra.mxu0 %v389_v5  ;;  %380 = vmatpush3.bf16.msra.mxu1 %v389_v5 }
  0x14   :  { %345 = vmatprep.subr.bf16.mxu0 %v397_v0  ;;  %374 = vmatprep.subr.bf16.mxu1 %v397_v0 }
  0x17   :  { %346 = vmatpush3.bf16.msra.mxu0 %v390_v6  ;;  %381 = vmatpush3.bf16.msra.mxu1 %v390_v6 }
  0x18   :  { %347 = vmatprep.subr.bf16.mxu0 %v397_v0  ;;  %375 = vmatprep.subr.bf16.mxu1 %v397_v0 }
  0x1b   :  { %348 = vmatpush3.bf16.msra.mxu0 %v120_v8  ;;  %382 = vmatpush3.bf16.msra.mxu1 %v120_v8 }
  0x1e   :  { %350 = vmatmul.mubr.msk.bf16.vlgmr.msra.gmra.mrb[0].mxu0 %vm102_vm2, %v392_v9  ;;  %362 = vmatmul.mubr.msk.bf16.vlgmr.msra.gmra.mrb[0].mxu1 %vm102_vm2, %v393_v10 }
  0x1f   :  { %353 = vmatprep.mubr.msk.bf16.mxu0 %vm398_vm0, %v397_v0  ;;  %365 = vmatprep.mubr.msk.bf16.mxu1 %vm398_vm0, %v397_v0 }
  0x26   :  { %354 = vmatmul.mubr.msk.bf16.gmra.mrb[4].mxu0 %vm102_vm2, %v394_v11  ;;  %366 = vmatmul.mubr.msk.bf16.gmra.mrb[4].mxu1 %vm102_vm2, %v395_v12 }
  0x27   :  { %357 = vmatprep.mubr.msk.bf16.mxu0 %vm398_vm0, %v397_v0 }
  0x2e   :  { %358 = vmatmul.mubr.msk.bf16.gmra.mrb[8].mxu0 %vm102_vm2, %v396_v13 }
  0xf1   :  { %v156_v15 = vpop.f32.mrb[0].mxu0  ;;  %v180_v17 = vpop.f32.mrb[0].mxu1 }
  0xf2   :  { %v201_v18 = vmul.f32 %v303_v14, %v156_v15  ;;  %v351_v19 = vpop.f32.mrb[1].mxu0  ;;  %v207_v20 = vmul.f32 %v303_v14, %v180_v17  ;;  %v363_v21 = vpop.f32.mrb[1].mxu1 }
  0xf3   :  { %v159_v22 = vpop.f32.mrb[2].mxu0  ;;  %v183_v23 = vpop.f32.mrb[2].mxu1 }
  0xf4   :  { %v217_v24 = vadd.f32 %v304_v16, %v201_v18  ;;  %v202_v25 = vmul.f32 %v303_v14, %v159_v22  ;;  %v352_v26 = vpop.f32.mrb[3].mxu0  ;;  %v223_v27 = vadd.f32 %v304_v16, %v207_v20  ;;  %v208_v28 = vmul.f32 %v303_v14, %v183_v23  ;;  %v364_v29 = vpop.f32.mrb[3].mxu1 }
  0xf6   :  { %v226_v30 = vmax.f32 %v217_v24, 0.0  ;;  %v218_v31 = vadd.f32 %v304_v16, %v202_v25  ;;  %v232_v32 = vmax.f32 %v223_v27, 0.0  ;;  %v224_v33 = vadd.f32 %v304_v16, %v208_v28 }
  0xf8   :  { %v314_v34 = vpack.c.bf16 %v226_v30, %v226_v30  ;;  %v227_v35 = vmax.f32 %v218_v31, 0.0  ;;  %v320_v36 = vpack.c.bf16 %v232_v32, %v232_v32  ;;  %v233_v37 = vmax.f32 %v224_v33, 0.0 }
  0xf9   :  { %v164_v38 = vpop.f32.mrb[4].mxu0  ;;  %v188_v39 = vpop.f32.mrb[4].mxu1 }
  0xfa   :  { %273 = vst.msk [vmem:[%s511_s4] sm:$0xf] %vm272_vm3, %v314_v34  ;;  %v315_v40 = vpack.c.bf16 %v227_v35, %v227_v35  ;;  %279 = vst.msk [vmem:[%s511_s4 + $0x18] sm:$0xf] %vm272_vm3, %v320_v36  ;;  %v203_v41 = vmul.f32 %v303_v14, %v164_v38  ;;  %v355_v42 = vpop.f32.mrb[5].mxu0  ;;  %v321_v43 = vpack.c.bf16 %v233_v37, %v233_v37  ;;  %v367_v45 = vpop.f32.mrb[5].mxu1 }
  0xfb   :  { %v209_v44 = vmul.f32 %v303_v14, %v188_v39  ;;  %v167_v46 = vpop.f32.mrb[6].mxu0  ;;  %v191_v47 = vpop.f32.mrb[6].mxu1 }
  0xfc   :  { %274 = vst.msk [vmem:[%s511_s4 + $0x4] sm:$0xf] %vm272_vm3, %v315_v40  ;;  %v219_v48 = vadd.f32 %v304_v16, %v203_v41  ;;  %280 = vst.msk [vmem:[%s511_s4 + $0x1c] sm:$0xf] %vm272_vm3, %v321_v43  ;;  %v204_v49 = vmul.f32 %v303_v14, %v167_v46  ;;  %v356_v50 = vpop.f32.mrb[7].mxu0  ;;  %v368_v52 = vpop.f32.mrb[7].mxu1 }
  0xfd   :  { %v225_v51 = vadd.f32 %v304_v16, %v209_v44 }
  0xfe   :  { %v228_v53 = vmax.f32 %v219_v48, 0.0  ;;  %v220_v54 = vadd.f32 %v304_v16, %v204_v49 }
  0xff   :  { %v234_v55 = vmax.f32 %v225_v51, 0.0 }
 0x100   :  { %v316_v56 = vpack.c.bf16 %v228_v53, %v228_v53  ;;  %v229_v57 = vmax.f32 %v220_v54, 0.0 }
 0x101   :  { %v322_v58 = vpack.c.bf16 %v234_v55, %v234_v55  ;;  %v172_v59 = vpop.f32.mrb[8].mxu0 }
 0x102   :  { %275 = vst.msk [vmem:[%s511_s4 + $0x8] sm:$0xf] %vm272_vm3, %v316_v56  ;;  %v317_v60 = vpack.c.bf16 %v229_v57, %v229_v57  ;;  %v205_v61 = vmul.f32 %v303_v14, %v172_v59  ;;  %v359_v62 = vpop.f32.mrb[9].mxu0 }
 0x103   :  { %281 = vst.msk [vmem:[%s511_s4 + $0x20] sm:$0xf] %vm272_vm3, %v322_v58  ;;  %v175_v63 = vpop.f32.mrb[10].mxu0 }
 0x104   :  { %276 = vst.msk [vmem:[%s511_s4 + $0xc] sm:$0xf] %vm272_vm3, %v317_v60  ;;  %v221_v0 = vadd.f32 %v304_v16, %v205_v61  ;;  %v206_v1 = vmul.f32 %v303_v14, %v175_v63  ;;  %v360_v2 = vpop.f32.mrb[11].mxu0 }
 0x106   :  { %v230_v3 = vmax.f32 %v221_v0, 0.0  ;;  %v222_v4 = vadd.f32 %v304_v16, %v206_v1 }
 0x108   :  { %v318_v5 = vpack.c.bf16 %v230_v3, %v230_v3  ;;  %v231_v6 = vmax.f32 %v222_v4, 0.0 }
 0x10a   :  { %277 = vst.msk [vmem:[%s511_s4 + $0x10] sm:$0xf] %vm272_vm3, %v318_v5  ;;  %v319_v7 = vpack.c.bf16 %v231_v6, %v231_v6 }
 0x10c   :  { %278 = vst.msk [vmem:[%s511_s4 + $0x14] sm:$0xf] %vm272_vm3, %v319_v7 }

// kernel: _lambda_.62
= control target key start
LH: loop header
LB: loop body
LE: loop exit
PB: predicated region body
PF: predicated region fallthrough
CT: control target
= control target key end

     0   :  { %s649_s15 = smov 0   ;;  %s823_s0 = inlined_call_operand.vmem [shape: bf16[2,6,6,100], index: 0, kind: input, shape index: {}]   ;;  %s824_s1 = inlined_call_operand.vmem [shape: f32[9,1,1,100], index: 1, kind: input, shape index: {}]   ;;  %s825_s2 = inlined_call_operand.vmem [shape: f32[1,1,100], index: 2, kind: input, shape index: {}]   ;;  %s826_s3 = inlined_call_operand.vmem [shape: f32[1,1,100], index: 3, kind: input, shape index: {}]   ;;  %s827_s4 = inlined_call_operand.vmem [shape: bf16[2,4,4,100], index: 4, kind: output, shape index: {}]  }
   0x1 LB: > { %s561_s16 = sadd.s32 4294967295, %s622_s15   ;;  %p565_p0 = scmp.ge.s32.totalorder %s622_s15, 1  ;;  %s622_s15 = sphi %s649_s15, %s14_s15  }
   0x2   : > { %p162_p1 = scmp.lt.s32.totalorder %s622_s15, 3 }
   0x4   : > { %p163_p2 = pnand %p565_p0, %p162_p1 }
   0x5   : > { %p188_p3 = scmp.lt.s32.totalorder (!%p163_p2), %s561_s16, 1  ;;  %v663_v0 = vld [vmem:[%s824_s1] ss:$0 sm:$0xff] (!%p163_p2)  ;;  %v668_v1 = vld [vmem:[%s824_s1 + $0x1] ss:$0 sm:$0xff] (!%p163_p2)  ;;  %vm501_vm0 = vcmask (!%p163_p2), 812032  }
   0x6   : > { %166 = sbr.rel (%p163_p2) target bundleno = 68 (0x44), region = 36  ;;  %v678_v2 = vld [vmem:[%s824_s1 + $0x2] ss:$0 sm:$0xff] (!%p163_p2)  ;;  %v683_v3 = vld [vmem:[%s824_s1 + $0x4] ss:$0 sm:$0xff] (!%p163_p2) }
   0x7   : > { %v688_v4 = vld [vmem:[%s824_s1 + $0x5] ss:$0 sm:$0xff] (!%p163_p2)  ;;  %v696_v8 = vld [vmem:[%s824_s1 + $0x3] ss:$0 sm:$0xff] (!%p163_p2)  ;;  %v707_v21 = vld [vmem:[%s824_s1 + $0x6] ss:$0 sm:$0xff] (!%p163_p2) }
   0x8   : > { %v712_v22 = vld [vmem:[%s824_s1 + $0x7] ss:$0 sm:$0xff] (!%p163_p2)  ;;  %v721_v28 = vld [vmem:[%s824_s1 + $0x8] ss:$0 sm:$0xff] (!%p163_p2) }
   0xd   : > { %s829_s16 = smov (!%p188_p3, %s561_s16), 1 }
   0xe   : > { %s607_s17 = smul.u32 24, %s829_s16 }
  0x10   : > { %s673_s24 = scalar_lea.vmem %s823_s0, %s607_s17  ;;  %s606_s17 = sshll.u32 %s829_s16, 3 }
  0x11   : > { %v207_v5 = vld [vmem:[%s673_s24] sm:$0x3]  ;;  %v572_v12 = vld [vmem:[%s673_s24 + $0x4] sm:$0x3]  ;;  %v587_v18 = vld [vmem:[%s673_s24 + $0x8] sm:$0x3]  ;;  %s795_s21 = scalar_lea.vmem %s827_s4, %s606_s17 }
  0x12   : > { %v225_v6 = vld [vmem:[%s673_s24] sm:$0x7]  ;;  %v211_v9 = vunpack.c.l.bf16 %v207_v5  ;;  %v577_v13 = vld [vmem:[%s673_s24 + $0x4] sm:$0x7]  ;;  %v298_v15 = vunpack.c.l.bf16 %v572_v12  ;;  %v592_v19 = vld [vmem:[%s673_s24 + $0x8] sm:$0x7]  ;;  %v389_v26 = vunpack.c.l.bf16 %v587_v18 }
  0x13   : > { %v259_v7 = vld [vmem:[%s673_s24] sm:$0x6]  ;;  %v229_v10 = vunpack.c.l.bf16 %v225_v6  ;;  %v582_v14 = vld [vmem:[%s673_s24 + $0x4] sm:$0x6]  ;;  %v320_v16 = vunpack.c.l.bf16 %v577_v13  ;;  %v597_v20 = vld [vmem:[%s673_s24 + $0x8] sm:$0x6]  ;;  %v411_v31 = vunpack.c.l.bf16 %v592_v19 }
  0x14   : > { %v263_v11 = vunpack.c.l.bf16 %v259_v7  ;;  %v354_v17 = vunpack.c.l.bf16 %v582_v14  ;;  %v221_v23 = vmul.f32 %v663_v0, %v211_v9  ;;  %v208_v27 = vld [vmem:[%s673_s24 + $0x4] sm:$0x3]  ;;  %v445_v36 = vunpack.c.l.bf16 %v597_v20  ;;  %v573_v37 = vld [vmem:[%s673_s24 + $0x8] sm:$0x3]  ;;  %v588_v48 = vld [vmem:[%s673_s24 + $0xc] sm:$0x3] }
  0x15   : > { %v239_v24 = vmul.f32 %v668_v1, %v229_v10  ;;  %v330_v29 = vmul.f32 %v683_v3, %v320_v16  ;;  %v226_v32 = vld [vmem:[%s673_s24 + $0x4] sm:$0x7]  ;;  %v578_v38 = vld [vmem:[%s673_s24 + $0x8] sm:$0x7]  ;;  %v308_v39 = vmul.f32 %v696_v8, %v298_v15  ;;  %v399_v40 = vmul.f32 %v707_v21, %v389_v26  ;;  %v593_v53 = vld [vmem:[%s673_s24 + $0xc] sm:$0x7] }
  0x16   : > { %v273_v25 = vmul.f32 %v678_v2, %v263_v11  ;;  %v364_v30 = vmul.f32 %v688_v4, %v354_v17  ;;  %v260_v33 = vld [vmem:[%s673_s24 + $0x4] sm:$0x6]  ;;  %v732_v41 = vmul.f32 %v712_v22, %v411_v31  ;;  %v212_v42 = vunpack.c.l.bf16 %v208_v27  ;;  %v583_v47 = vld [vmem:[%s673_s24 + $0x8] sm:$0x6]  ;;  %v598_v58 = vld [vmem:[%s673_s24 + $0xc] sm:$0x6] }
  0x17   : > { %v247_v34 = vrot.slane %v239_v24, 1  ;;  %v338_v44 = vrot.slane %v330_v29, 1  ;;  %v230_v45 = vunpack.c.l.bf16 %v226_v32  ;;  %v264_v46 = vunpack.c.l.bf16 %v260_v33  ;;  %v209_v63 = vld [vmem:[%s673_s24 + $0x8] sm:$0x3]  ;;  %v574_v20 = vld [vmem:[%s673_s24 + $0xc] sm:$0x3] }
  0x18   : > { %v281_v35 = vrot.slane %v273_v25, 2  ;;  %v372_v49 = vrot.slane %v364_v30, 2  ;;  %v737_v50 = vmul.f32 %v721_v28, %v445_v36  ;;  %v299_v51 = vunpack.c.l.bf16 %v573_v37  ;;  %v227_v10 = vld [vmem:[%s673_s24 + $0x8] sm:$0x7]  ;;  %v579_v27 = vld [vmem:[%s673_s24 + $0xc] sm:$0x7] }
  0x19   : > { %v255_v43 = vadd.f32 %v247_v34, %v221_v23  ;;  %v321_v52 = vunpack.c.l.bf16 %v578_v38  ;;  %v222_v55 = vmul.f32 %v663_v0, %v212_v42  ;;  %v240_v56 = vmul.f32 %v668_v1, %v230_v45  ;;  %v261_v11 = vld [vmem:[%s673_s24 + $0x8] sm:$0x6]  ;;  %v584_v29 = vld [vmem:[%s673_s24 + $0xc] sm:$0x6]  ;;  %v589_v34 = vld [vmem:[%s673_s24 + $0x10] sm:$0x3] }
  0x1a   : > { %v274_v57 = vmul.f32 %v678_v2, %v264_v46  ;;  %v429_v59 = vrot.slane %v732_v41, 1  ;;  %v355_v61 = vunpack.c.l.bf16 %v583_v47  ;;  %v390_v62 = vunpack.c.l.bf16 %v588_v48  ;;  %v599_v45 = vld [vmem:[%s673_s24 + $0x10] sm:$0x6] }
  0x1b   : > { %v289_v54 = vadd.f32 %v281_v35, %v255_v43  ;;  %v331_v60 = vmul.f32 %v683_v3, %v321_v52  ;;  %v248_v6 = vrot.slane %v240_v56, 1  ;;  %v412_v9 = vunpack.c.l.bf16 %v593_v53 }
  0x1c   : > { %v282_v7 = vrot.slane %v274_v57, 2  ;;  %v463_v12 = vrot.slane %v737_v50, 2  ;;  %v309_v13 = vmul.f32 %v696_v8, %v299_v51  ;;  %v365_v14 = vmul.f32 %v688_v4, %v355_v61 }
  0x1d   : > { %v312_v5 = vadd.f32 %v308_v39, %v289_v54  ;;  %v446_v15 = vunpack.c.l.bf16 %v598_v58  ;;  %v256_v17 = vadd.f32 %v248_v6, %v222_v55  ;;  %v339_v18 = vrot.slane %v331_v60, 1  ;;  %v770_v54 = vld [vmem:[%s825_s2] ss:$0 sm:$0xff]  ;;  %v228_v60 = vld [vmem:[%s673_s24 + $0xc] sm:$0x7] }
  0x1e   : > { %v213_v19 = vunpack.c.l.bf16 %v209_v63  ;;  %v400_v23 = vmul.f32 %v707_v21, %v390_v62  ;;  %v422_v24 = vmul.f32 %v712_v22, %v412_v9  ;;  %v231_v25 = vunpack.c.l.bf16 %v227_v10  ;;  %v780_v6 = vld [vmem:[%s826_s3] ss:$0 sm:$0xff] }
  0x1f   : > { %v346_v16 = vadd.f32 %v338_v44, %v312_v5  ;;  %v265_v26 = vunpack.c.l.bf16 %v261_v11  ;;  %v290_v31 = vadd.f32 %v282_v7, %v256_v17  ;;  %v373_v32 = vrot.slane %v365_v14, 2  ;;  %v594_v44 = vld [vmem:[%s673_s24 + $0x10] sm:$0x7] }
  0x20   : > { %v456_v33 = vmul.f32 %v721_v28, %v446_v15  ;;  %v223_v35 = vmul.f32 %v663_v0, %v213_v19  ;;  %v241_v36 = vmul.f32 %v668_v1, %v231_v25  ;;  %v300_v38 = vunpack.c.l.bf16 %v574_v20  ;;  %v580_v17 = vld [vmem:[%s673_s24 + $0x10] sm:$0x7] }
  0x21   : > { %v380_v30 = vadd.f32 %v372_v49, %v346_v16  ;;  %v275_v37 = vmul.f32 %v678_v2, %v265_v26  ;;  %v313_v41 = vadd.f32 %v309_v13, %v290_v31  ;;  %v322_v42 = vunpack.c.l.bf16 %v579_v27  ;;  %v575_v16 = vld [vmem:[%s673_s24 + $0x10] sm:$0x3] }
  0x22   : > { %v356_v43 = vunpack.c.l.bf16 %v584_v29  ;;  %v430_v46 = vrot.slane %v422_v24, 1  ;;  %v249_v47 = vrot.slane %v241_v36, 1  ;;  %v391_v49 = vunpack.c.l.bf16 %v589_v34  ;;  %v595_v34 = vld [vmem:[%s673_s24 + $0x14] sm:$0x7] }
  0x23   : > { %v403_v39 = vadd.f32 %v399_v40, %v380_v30  ;;  %v283_v48 = vrot.slane %v275_v37, 2  ;;  %v347_v51 = vadd.f32 %v339_v18, %v313_v41  ;;  %v332_v52 = vmul.f32 %v683_v3, %v322_v42  ;;  %v210_v40 = vld [vmem:[%s673_s24 + $0xc] sm:$0x3]  ;;  %v585_v18 = vld [vmem:[%s673_s24 + $0x10] sm:$0x6] }
  0x24   : > { %v366_v53 = vmul.f32 %v688_v4, %v356_v43  ;;  %v257_v55 = vadd.f32 %v249_v47, %v223_v35  ;;  %v310_v56 = vmul.f32 %v696_v8, %v300_v38  ;;  %v413_v57 = vunpack.c.l.bf16 %v594_v44  ;;  %v590_v38 = vld [vmem:[%s673_s24 + $0x14] sm:$0x3] }
  0x25   : > { %v437_v50 = vadd.f32 %v429_v59, %v403_v39  ;;  %v447_v58 = vunpack.c.l.bf16 %v599_v45  ;;  %v262_v59 = vld [vmem:[%s673_s24 + $0xc] sm:$0x6]  ;;  %v381_v62 = vadd.f32 %v373_v32, %v347_v51  ;;  %v464_v63 = vrot.slane %v456_v33, 2  ;;  %v600_v42 = vld [vmem:[%s673_s24 + $0x14] sm:$0x6] }
  0x26   : > { %v401_v5 = vmul.f32 %v707_v21, %v391_v49  ;;  %v291_v7 = vadd.f32 %v283_v48, %v257_v55  ;;  %v340_v9 = vrot.slane %v332_v52, 1  ;;  %v374_v10 = vrot.slane %v366_v53, 2 }
  0x27   : > { %v471_v61 = vadd.f32 %v463_v12, %v437_v50  ;;  %v214_v11 = vunpack.c.l.bf16 %v210_v40  ;;  %v404_v14 = vadd.f32 %v400_v23, %v381_v62  ;;  %v232_v15 = vunpack.c.l.bf16 %v228_v60 }
  0x28   : > { %v266_v12 = vunpack.c.l.bf16 %v262_v59  ;;  %v314_v19 = vadd.f32 %v310_v56, %v291_v7  ;;  %v423_v20 = vmul.f32 %v712_v22, %v413_v57  ;;  %v457_v24 = vmul.f32 %v721_v28, %v447_v58 }
  0x29   : > { %v482_v13 = vmul.f32 %v770_v54, %v471_v61  ;;  %v224_v25 = vmul.f32 %v663_v0, %v214_v11  ;;  %v438_v27 = vadd.f32 %v430_v46, %v404_v14  ;;  %v242_v29 = vmul.f32 %v668_v1, %v232_v15 }
  0x2a   : > { %v276_v23 = vmul.f32 %v678_v2, %v266_v12  ;;  %v348_v30 = vadd.f32 %v340_v9, %v314_v19  ;;  %v301_v31 = vunpack.c.l.bf16 %v575_v16  ;;  %v323_v32 = vunpack.c.l.bf16 %v580_v17 }
  0x2b   : > { %v493_v26 = vadd.f32 %v780_v6, %v482_v13  ;;  %v357_v33 = vunpack.c.l.bf16 %v585_v18  ;;  %v472_v35 = vadd.f32 %v464_v63, %v438_v27  ;;  %v250_v36 = vrot.slane %v242_v29, 1 }
  0x2c   : > { %v284_v37 = vrot.slane %v276_v23, 2  ;;  %v382_v1 = vadd.f32 %v374_v10, %v348_v30  ;;  %v431_v39 = vrot.slane %v423_v20, 1  ;;  %v311_v2 = vmul.f32 %v696_v8, %v301_v31 }
  0x2d   : > { %v497_v0 = vpack.c.bf16 %v493_v26, %v493_v26  ;;  %v333_v41 = vmul.f32 %v683_v3, %v323_v32  ;;  %v483_v43 = vmul.f32 %v770_v54, %v472_v35  ;;  %v258_v44 = vadd.f32 %v250_v36, %v224_v25 }
  0x2e   : > { %v367_v45 = vmul.f32 %v688_v4, %v357_v33  ;;  %v414_v46 = vunpack.c.l.bf16 %v595_v34  ;;  %v405_v47 = vadd.f32 %v401_v5, %v382_v1  ;;  %v465_v48 = vrot.slane %v457_v24, 2 }
  0x2f   : > { %502 = vst.msk [vmem:[%s795_s21] sm:$0x3] %vm501_vm0, %v497_v0  ;;  %v392_v49 = vunpack.c.l.bf16 %v590_v38  ;;  %v494_v50 = vadd.f32 %v780_v6, %v483_v43  ;;  %v292_v51 = vadd.f32 %v284_v37, %v258_v44  ;;  %v341_v52 = vrot.slane %v333_v41, 1 }
  0x30   : > { %v448_v8 = vunpack.c.l.bf16 %v600_v42  ;;  %v439_v53 = vadd.f32 %v431_v39, %v405_v47  ;;  %v375_v55 = vrot.slane %v367_v45, 2  ;;  %v424_v56 = vmul.f32 %v712_v22, %v414_v46 }
  0x31   : > { %v498_v3 = vpack.c.bf16 %v494_v50, %v494_v50  ;;  %v315_v40 = vadd.f32 %v311_v2, %v292_v51  ;;  %v402_v58 = vmul.f32 %v707_v21, %v392_v49 }
  0x32   : > { %v473_v57 = vadd.f32 %v465_v48, %v439_v53  ;;  %v458_v60 = vmul.f32 %v721_v28, %v448_v8  ;;  %v432_v62 = vrot.slane %v424_v56, 1 }
  0x33   : > { %503 = vst.msk [vmem:[%s795_s21 + $0x2] sm:$0x3] %vm501_vm0, %v498_v3  ;;  %v349_v4 = vadd.f32 %v341_v52, %v315_v40 }
  0x34   : > { %v484_v59 = vmul.f32 %v770_v54, %v473_v57  ;;  %v466_v7 = vrot.slane %v458_v60, 2 }
  0x35   : > { %v383_v61 = vadd.f32 %v375_v55, %v349_v4 }
  0x36   : > { %v495_v63 = vadd.f32 %v780_v6, %v484_v59 }
  0x37   : > { %v406_v5 = vadd.f32 %v402_v58, %v383_v61 }
  0x38   : > { %v499_v9 = vpack.c.bf16 %v495_v63, %v495_v63 }
  0x39   : > { %v440_v10 = vadd.f32 %v432_v62, %v406_v5 }
  0x3a   : > { %504 = vst.msk [vmem:[%s795_s21 + $0x4] sm:$0x3] %vm501_vm0, %v499_v9 }
  0x3b   : > { %v474_v22 = vadd.f32 %v466_v7, %v440_v10 }
  0x3d   : > { %v485_v11 = vmul.f32 %v770_v54, %v474_v22 }
  0x3f   : > { %v496_v13 = vadd.f32 %v780_v6, %v485_v11 }
  0x41   : > { %v500_v21 = vpack.c.bf16 %v496_v13, %v496_v13 }
  0x43   : > { %505 = vst.msk [vmem:[%s795_s21 + $0x6] sm:$0x3] %vm501_vm0, %v500_v21 }
  0x44 PF: > { %s14_s15 = sadd.s32 1, %s622_s15  }
  0x45   : > { %p11_p4 = scmp.ge.s32.totalorder %s14_s15, 4  }
  0x47   :  { %13 = sbr.rel (!%p11_p4) target bundleno = 1 (0x1), region = 68 }

// kernel: _lambda_.63
= control target key start
LH: loop header
LB: loop body
LE: loop exit
PB: predicated region body
PF: predicated region fallthrough
CT: control target
= control target key end

     0   :  { %vm87_vm0 = vcmask 818176   ;;  %vm94_vm1 = vcmask 1041408   ;;  %vm201_vm2 = vcmask 814080   ;;  %s360_s1 = inlined_call_operand.vmem [shape: bf16[100,100], index: 1, kind: input, shape index: {}]   ;;  %s361_s0 = inlined_call_operand.vmem [shape: bf16[32,100], index: 0, kind: input, shape index: {}]   ;;  %s362_s2 = inlined_call_operand.vmem [shape: f32[1,100], index: 2, kind: input, shape index: {}]   ;;  %s363_s4 = inlined_call_operand.vmem [shape: bf16[32,100], index: 4, kind: input, shape index: {}]   ;;  %s364_s3 = inlined_call_operand.vmem [shape: f32[1,100], index: 3, kind: input, shape index: {}]   ;;  %s365_s5 = inlined_call_operand.vmem [shape: bf16[32,100], index: 5, kind: output, shape index: {}]  }
   0x1   :  { %v268_v0 = vld [vmem:[%s360_s1] sm:$0xff]   ;;  %v269_v1 = vld [vmem:[%s360_s1 + $0x8] sm:$0xff]   ;;  %v270_v2 = vld [vmem:[%s360_s1 + $0x10] sm:$0xff]  }
   0x2   :  { %249 = vmatprep.subr.bf16.mxu0 %v268_v0  ;;  %v275_v3 = vld [vmem:[%s361_s0] sm:$0xff]   ;;  %v271_v4 = vld [vmem:[%s360_s1 + $0x18] sm:$0xff]   ;;  %v273_v6 = vld [vmem:[%s360_s1 + $0x28] sm:$0xff]  }
   0x3   :  { %250 = vmatpush3.bf16.msra.mxu0 %v268_v0  ;;  %263 = vmatprep.mubr.msk.bf16.mxu0 %vm87_vm0, %v275_v3  ;;  %v272_v5 = vld [vmem:[%s360_s1 + $0x20] sm:$0xff]   ;;  %v274_v7 = vld [vmem:[%s360_s1 + $0x30] ss:$0 sps:$4 sm:$0x33]   ;;  %v276_v9 = vld [vmem:[%s361_s0 + $0x8] sm:$0xff]  }
   0x4   :  { %251 = vmatprep.subr.bf16.mxu0 %v269_v1  ;;  %v96_v8 = vsel %vm94_vm1, %v274_v7, 0  ;;  %v221_v10 = vld [vmem:[%s362_s2] ss:$0 sm:$0xff]  ;;  %v239_v11 = vld [vmem:[%s363_s4 + $0x8] sm:$0xff]  }
   0x5   :  { %v232_v12 = vld [vmem:[%s363_s4] sm:$0xff]   ;;  %v237_v16 = vunpack.c.l.bf16 %v239_v11  ;;  %v238_v23 = vunpack.c.h.bf16 %v239_v11 }
   0x6   :  { %v222_v14 = vld [vmem:[%s364_s3] ss:$0 sm:$0xff]  ;;  %v233_v19 = vunpack.c.l.bf16 %v232_v12  ;;  %v234_v27 = vunpack.c.h.bf16 %v232_v12 }
   0x7   :  { %252 = vmatpush3.bf16.msra.mxu0 %v269_v1 }
   0x8   :  { %253 = vmatprep.subr.bf16.mxu0 %v270_v2 }
   0xb   :  { %254 = vmatpush3.bf16.msra.mxu0 %v270_v2 }
   0xc   :  { %255 = vmatprep.subr.bf16.mxu0 %v271_v4 }
   0xf   :  { %256 = vmatpush3.bf16.msra.mxu0 %v271_v4 }
  0x10   :  { %257 = vmatprep.subr.bf16.mxu0 %v272_v5 }
  0x13   :  { %258 = vmatpush3.bf16.msra.mxu0 %v272_v5 }
  0x14   :  { %259 = vmatprep.subr.bf16.mxu0 %v273_v6 }
  0x17   :  { %260 = vmatpush3.bf16.msra.mxu0 %v273_v6 }
  0x18   :  { %267 = vmatprep.subr.msk.bf16.mxu0 %vm94_vm1, %v274_v7 }
  0x1b   :  { %262 = vmatpush3.bf16.msra.mxu0 %v96_v8 }
  0x1e   :  { %264 = vmatmul.mubr.msk.bf16.vlgmr.msra.gmra.mrb[0].mxu0 %vm87_vm0, %v276_v9 }
  0xf1   :  { %v265_v13 = vpop.f32.mrb[0].mxu0 }
  0xf2   :  { %v156_v15 = vmul.f32 %v265_v13, %v221_v10  ;;  %v132_v17 = vpop.f32.mrb[1].mxu0 }
  0xf3   :  { %v154_v18 = vmul.f32 %v221_v10, %v132_v17  ;;  %v266_v20 = vpop.f32.mrb[2].mxu0 }
  0xf4   :  { %v167_v21 = vadd.f32 %v222_v14, %v156_v15  ;;  %v157_v22 = vmul.f32 %v266_v20, %v221_v10  ;;  %v135_v24 = vpop.f32.mrb[3].mxu0 }
  0xf5   :  { %v165_v25 = vadd.f32 %v222_v14, %v154_v18  ;;  %v155_v26 = vmul.f32 %v221_v10, %v135_v24 }
  0xf6   :  { %v179_v28 = vadd.f32 %v237_v16, %v167_v21  ;;  %v168_v29 = vadd.f32 %v222_v14, %v157_v22 }
  0xf7   :  { %v177_v30 = vadd.f32 %v233_v19, %v165_v25  ;;  %v166_v31 = vadd.f32 %v222_v14, %v155_v26 }
  0xf8   :  { %v183_v32 = vmax.f32 %v179_v28, 0.0  ;;  %v180_v33 = vadd.f32 %v238_v23, %v168_v29 }
  0xf9   :  { %v181_v34 = vmax.f32 %v177_v30, 0.0  ;;  %v178_v35 = vadd.f32 %v234_v27, %v166_v31 }
  0xfa   :  { %v229_v36 = vpack.c.bf16 %v183_v32, %v183_v32  ;;  %v184_v37 = vmax.f32 %v180_v33, 0.0 }
  0xfb   :  { %v227_v38 = vpack.c.bf16 %v181_v34, %v181_v34  ;;  %v182_v39 = vmax.f32 %v178_v35, 0.0 }
  0xfc   :  { %204 = vst.msk [vmem:[%s365_s5 + $0x8] sm:$0xf] %vm201_vm2, %v229_v36  ;;  %v230_v40 = vpack.c.bf16 %v184_v37, %v184_v37 }
  0xfd   :  { %202 = vst.msk [vmem:[%s365_s5] sm:$0xf] %vm201_vm2, %v227_v38  ;;  %v228_v41 = vpack.c.bf16 %v182_v39, %v182_v39 }
  0xfe   :  { %205 = vst.msk [vmem:[%s365_s5 + $0xc] sm:$0xf] %vm201_vm2, %v230_v40 }
  0xff   :  { %203 = vst.msk [vmem:[%s365_s5 + $0x4] sm:$0xf] %vm201_vm2, %v228_v41 }

// kernel: _lambda_.73
= control target key start
LH: loop header
LB: loop body
LE: loop exit
PB: predicated region body
PF: predicated region fallthrough
CT: control target
= control target key end

     0   :  { %v188_v0 = vmov 0.0   ;;  %vm189_vm0 = vmmov 0   ;;  %vm75_vm1 = vcmask 1041408   ;;  %vm71_vm2 = vcmask 818176   ;;  %s248_s1 = inlined_call_operand.vmem [shape: bf16[100,100], index: 1, kind: input, shape index: {}]   ;;  %s249_s0 = inlined_call_operand.vmem [shape: bf16[8,100], index: 0, kind: input, shape index: {}]   ;;  %s250_s2 = inlined_call_operand.vmem [shape: f32[1,100], index: 2, kind: input, shape index: {}]   ;;  %s251_s3 = inlined_call_operand.vmem [shape: f32[1,100], index: 3, kind: input, shape index: {}]   ;;  %s252_s4 = inlined_call_operand.vmem [shape: bf16[8,100], index: 4, kind: output, shape index: {}]  }
   0x1   :  { %161 = vmatprep.subr.bf16.mxu0 %v188_v0  ;;  %v181_v1 = vld [vmem:[%s248_s1] sm:$0xff]   ;;  %175 = vmatprep.mubr.msk.bf16.mxu0 %vm189_vm0, %v188_v0  ;;  %v182_v2 = vld [vmem:[%s248_s1 + $0x8] sm:$0xff]   ;;  %v183_v3 = vld [vmem:[%s248_s1 + $0x10] sm:$0xff]   ;;  %vm137_vm3 = vcmask 814080  }
   0x2   :  { %162 = vmatpush3.bf16.msra.mxu0 %v181_v1  ;;  %v184_v4 = vld [vmem:[%s248_s1 + $0x18] sm:$0xff]   ;;  %v185_v5 = vld [vmem:[%s248_s1 + $0x20] sm:$0xff]   ;;  %v186_v6 = vld [vmem:[%s248_s1 + $0x28] sm:$0xff]  }
   0x3   :  { %163 = vmatprep.subr.bf16.mxu0 %v188_v0  ;;  %v187_v7 = vld [vmem:[%s248_s1 + $0x30] ss:$0 sps:$4 sm:$0x33]   ;;  %v18_v9 = vld [vmem:[%s249_s0] sm:$0xf] }
   0x4   :  { %v77_v8 = vsel %vm75_vm1, %v187_v7, 0  ;;  %v151_v10 = vld [vmem:[%s250_s2] ss:$0 sm:$0xff] }
   0x5   :  { %v152_v12 = vld [vmem:[%s251_s3] ss:$0 sm:$0xff] }
   0x6   :  { %164 = vmatpush3.bf16.msra.mxu0 %v182_v2 }
   0x7   :  { %165 = vmatprep.subr.bf16.mxu0 %v188_v0 }
   0xa   :  { %166 = vmatpush3.bf16.msra.mxu0 %v183_v3 }
   0xb   :  { %167 = vmatprep.subr.bf16.mxu0 %v188_v0 }
   0xe   :  { %168 = vmatpush3.bf16.msra.mxu0 %v184_v4 }
   0xf   :  { %169 = vmatprep.subr.bf16.mxu0 %v188_v0 }
  0x12   :  { %170 = vmatpush3.bf16.msra.mxu0 %v185_v5 }
  0x13   :  { %171 = vmatprep.subr.bf16.mxu0 %v188_v0 }
  0x16   :  { %172 = vmatpush3.bf16.msra.mxu0 %v186_v6 }
  0x17   :  { %173 = vmatprep.subr.bf16.mxu0 %v188_v0 }
  0x1a   :  { %174 = vmatpush3.bf16.msra.mxu0 %v77_v8 }
  0x1d   :  { %176 = vmatmul.mubr.msk.bf16.vlgmr.msra.gmra.mrb[0].mxu0 %vm71_vm2, %v18_v9 }
  0xf0   :  { %v113_v11 = vpop.f32.mrb[0].mxu0 }
  0xf1   :  { %v126_v13 = vmul.f32 %v151_v10, %v113_v11  ;;  %v177_v14 = vpop.f32.mrb[1].mxu0 }
  0xf2   :  { %v116_v15 = vpop.f32.mrb[2].mxu0 }
  0xf3   :  { %v134_v16 = vadd.f32 %v152_v12, %v126_v13  ;;  %v178_v17 = vpop.f32.mrb[3].mxu0 }
  0xf5   :  { %v135_v18 = vmax.f32 %v134_v16, 0.0 }
  0xf7   :  { %v136_v19 = vpack.c.bf16 %v135_v18, %v135_v18 }
  0xf9   :  { %138 = vst.msk [vmem:[%s252_s4] sm:$0xf] %vm137_vm3, %v136_v19 }

// kernel: _lambda_.70
= control target key start
LH: loop header
LB: loop body
LE: loop exit
PB: predicated region body
PF: predicated region fallthrough
CT: control target
= control target key end

     0   :  { %s429_s6 = smov 0   ;;  %s495_s0 = inlined_call_operand.vmem [shape: bf16[2,6,6,100], index: 0, kind: input, shape index: {}]   ;;  %s496_s1 = inlined_call_operand.vmem [shape: bf16[2,4,4,100], index: 1, kind: output, shape index: {}]  }
   0x1 LB: > { %s367_s7 = sadd.s32 4294967295, %s417_s6   ;;  %p371_p0 = scmp.ge.s32.totalorder %s417_s6, 1  ;;  %s417_s6 = sphi %s429_s6, %s11_s6  }
   0x2   : > { %p87_p1 = scmp.lt.s32.totalorder %s417_s6, 3 }
   0x4   : > { %p88_p2 = pnand %p371_p0, %p87_p1 }
   0x5   : > { %p107_p3 = scmp.lt.s32.totalorder (!%p88_p2), %s367_s7, 1  ;;  %vm307_vm0 = vcmask (!%p88_p2), 812032  }
   0x6   : > { %91 = sbr.rel (%p88_p2) target bundleno = 58 (0x3a), region = 24 }
   0xd   : > { %s498_s7 = smov (!%p107_p3, %s367_s7), 1 }
   0xe   : > { %s402_s8 = smul.u32 24, %s498_s7  ;;  %s401_s12 = sshll.u32 %s498_s7, 3 }
   0xf   : > { %s116_s15 = scalar_lea.vmem %s496_s1, %s401_s12 }
  0x10   : > { %s443_s11 = scalar_lea.vmem %s495_s0, %s402_s8 }
  0x11   : > { %v117_v0 = vld [vmem:[%s443_s11] sm:$0x3]  ;;  %v375_v6 = vld [vmem:[%s443_s11 + $0x4] sm:$0x3]  ;;  %v391_v11 = vld [vmem:[%s443_s11 + $0x8] sm:$0x7] }
  0x12   : > { %v125_v1 = vld [vmem:[%s443_s11] sm:$0x7]  ;;  %v121_v3 = vunpack.c.l.bf16 %v117_v0  ;;  %v379_v7 = vld [vmem:[%s443_s11 + $0x4] sm:$0x7]  ;;  %v395_v12 = vld [vmem:[%s443_s11 + $0x8] sm:$0x6]  ;;  %v251_v15 = vunpack.c.l.bf16 %v391_v11  ;;  %v178_v18 = vunpack.c.l.bf16 %v375_v6 }
  0x13   : > { %v149_v2 = vld [vmem:[%s443_s11] sm:$0x6]  ;;  %v129_v4 = vunpack.c.l.bf16 %v125_v1  ;;  %v383_v8 = vld [vmem:[%s443_s11 + $0x4] sm:$0x6]  ;;  %v190_v9 = vunpack.c.l.bf16 %v379_v7  ;;  %v387_v20 = vld [vmem:[%s443_s11 + $0x8] sm:$0x3]  ;;  %v275_v21 = vunpack.c.l.bf16 %v395_v12 }
  0x14   : > { %v153_v5 = vunpack.c.l.bf16 %v149_v2  ;;  %v214_v10 = vunpack.c.l.bf16 %v383_v8  ;;  %v118_v16 = vld [vmem:[%s443_s11 + $0x4] sm:$0x3]  ;;  %v376_v27 = vld [vmem:[%s443_s11 + $0x8] sm:$0x3]  ;;  %v259_v31 = vrot.slane %v251_v15, 1  ;;  %v239_v36 = vunpack.c.l.bf16 %v387_v20 }
  0x15   : > { %v137_v13 = vrot.slane %v129_v4, 1  ;;  %v126_v17 = vld [vmem:[%s443_s11 + $0x4] sm:$0x7]  ;;  %v198_v19 = vrot.slane %v190_v9, 1  ;;  %v122_v24 = vunpack.c.l.bf16 %v118_v16  ;;  %v380_v28 = vld [vmem:[%s443_s11 + $0x8] sm:$0x7]  ;;  %v179_v42 = vunpack.c.l.bf16 %v376_v27 }
  0x16   : > { %v161_v14 = vrot.slane %v153_v5, 2  ;;  %v150_v22 = vld [vmem:[%s443_s11 + $0x4] sm:$0x6]  ;;  %v130_v25 = vunpack.c.l.bf16 %v126_v17  ;;  %v384_v29 = vld [vmem:[%s443_s11 + $0x8] sm:$0x6]  ;;  %v222_v30 = vrot.slane %v214_v10, 2  ;;  %v191_v32 = vunpack.c.l.bf16 %v380_v28 }
  0x17   : > { %v145_v23 = vadd.f32 %v137_v13, %v121_v3  ;;  %v154_v26 = vunpack.c.l.bf16 %v150_v22  ;;  %v461_v33 = vld [vmem:[%s443_s11 + $0xc] sm:$0x3]  ;;  %v119_v40 = vld [vmem:[%s443_s11 + $0x8] sm:$0x3]  ;;  %v283_v41 = vrot.slane %v275_v21, 2  ;;  %v215_v43 = vunpack.c.l.bf16 %v384_v29 }
  0x18   : > { %v392_v34 = vld [vmem:[%s443_s11 + $0xc] sm:$0x7]  ;;  %v138_v37 = vrot.slane %v130_v25, 1  ;;  %v127_v45 = vld [vmem:[%s443_s11 + $0x8] sm:$0x7]  ;;  %v123_v49 = vunpack.c.l.bf16 %v119_v40  ;;  %v199_v53 = vrot.slane %v191_v32, 1  ;;  %v240_v54 = vunpack.c.l.bf16 %v461_v33 }
  0x19   : > { %v169_v35 = vadd.f32 %v161_v14, %v145_v23  ;;  %v162_v38 = vrot.slane %v154_v26, 2  ;;  %v396_v39 = vld [vmem:[%s443_s11 + $0xc] sm:$0x6]  ;;  %v252_v44 = vunpack.c.l.bf16 %v392_v34  ;;  %v151_v46 = vld [vmem:[%s443_s11 + $0x8] sm:$0x6]  ;;  %v131_v50 = vunpack.c.l.bf16 %v127_v45 }
  0x1a   : > { %v146_v48 = vadd.f32 %v138_v37, %v122_v24  ;;  %v381_v51 = vld [vmem:[%s443_s11 + $0xc] sm:$0x7]  ;;  %v276_v55 = vunpack.c.l.bf16 %v396_v39  ;;  %v155_v56 = vunpack.c.l.bf16 %v151_v46  ;;  %v389_v62 = vld [vmem:[%s443_s11 + $0x10] sm:$0x3]  ;;  %v223_v0 = vrot.slane %v215_v43, 2 }
  0x1b   : > { %v182_v47 = vadd.f32 %v178_v18, %v169_v35  ;;  %v385_v52 = vld [vmem:[%s443_s11 + $0xc] sm:$0x6]  ;;  %v139_v60 = vrot.slane %v131_v50, 1  ;;  %v192_v61 = vunpack.c.l.bf16 %v381_v51  ;;  %v260_v1 = vrot.slane %v252_v44, 1  ;;  %v393_v9 = vld [vmem:[%s443_s11 + $0x10] sm:$0x7] }
  0x1c   : > { %v377_v57 = vld [vmem:[%s443_s11 + $0xc] sm:$0x3]  ;;  %v170_v59 = vadd.f32 %v162_v38, %v146_v48  ;;  %v163_v2 = vrot.slane %v155_v56, 2  ;;  %v216_v3 = vunpack.c.l.bf16 %v385_v52  ;;  %v382_v11 = vld [vmem:[%s443_s11 + $0x10] sm:$0x7]  ;;  %v284_v12 = vrot.slane %v276_v55, 2 }
  0x1d   : > { %v206_v58 = vadd.f32 %v198_v19, %v182_v47  ;;  %v120_v63 = vld [vmem:[%s443_s11 + $0xc] sm:$0x3]  ;;  %v147_v7 = vadd.f32 %v139_v60, %v123_v49  ;;  %v180_v8 = vunpack.c.l.bf16 %v377_v57  ;;  %v200_v13 = vrot.slane %v192_v61, 1  ;;  %v397_v19 = vld [vmem:[%s443_s11 + $0x10] sm:$0x6] }
  0x1e   : > { %v128_v4 = vld [vmem:[%s443_s11 + $0xc] sm:$0x7]  ;;  %v183_v6 = vadd.f32 %v179_v42, %v170_v59  ;;  %v241_v14 = vunpack.c.l.bf16 %v389_v62  ;;  %v124_v15 = vunpack.c.l.bf16 %v120_v63  ;;  %v378_v21 = vld [vmem:[%s443_s11 + $0x10] sm:$0x3]  ;;  %v224_v23 = vrot.slane %v216_v3, 2 }
  0x1f   : > { %v230_v5 = vadd.f32 %v222_v30, %v206_v58  ;;  %v152_v10 = vld [vmem:[%s443_s11 + $0xc] sm:$0x6]  ;;  %v171_v18 = vadd.f32 %v163_v2, %v147_v7  ;;  %v132_v20 = vunpack.c.l.bf16 %v128_v4  ;;  %v386_v22 = vld [vmem:[%s443_s11 + $0x10] sm:$0x6]  ;;  %v253_v24 = vunpack.c.l.bf16 %v393_v9  ;;  %v394_v40 = vld [vmem:[%s443_s11 + $0x14] sm:$0x7] }
  0x20   : > { %v207_v17 = vadd.f32 %v199_v53, %v183_v6  ;;  %v156_v25 = vunpack.c.l.bf16 %v152_v10  ;;  %v193_v26 = vunpack.c.l.bf16 %v382_v11  ;;  %v277_v32 = vunpack.c.l.bf16 %v397_v19  ;;  %v390_v47 = vld [vmem:[%s443_s11 + $0x14] sm:$0x3] }
  0x21   : > { %v243_v16 = vadd.f32 %v239_v36, %v230_v5  ;;  %v184_v29 = vadd.f32 %v180_v8, %v171_v18  ;;  %v140_v30 = vrot.slane %v132_v20, 1  ;;  %v181_v34 = vunpack.c.l.bf16 %v378_v21  ;;  %v398_v48 = vld [vmem:[%s443_s11 + $0x14] sm:$0x6] }
  0x22   : > { %v231_v28 = vadd.f32 %v223_v0, %v207_v17  ;;  %v164_v33 = vrot.slane %v156_v25, 2  ;;  %v217_v35 = vunpack.c.l.bf16 %v386_v22  ;;  %v261_v42 = vrot.slane %v253_v24, 1 }
  0x23   : > { %v267_v27 = vadd.f32 %v259_v31, %v243_v16  ;;  %v208_v38 = vadd.f32 %v200_v13, %v184_v29  ;;  %v148_v39 = vadd.f32 %v140_v30, %v124_v15  ;;  %v201_v43 = vrot.slane %v193_v26, 1 }
  0x24   : > { %v244_v37 = vadd.f32 %v240_v54, %v231_v28  ;;  %v285_v49 = vrot.slane %v277_v32, 2  ;;  %v225_v50 = vrot.slane %v217_v35, 2  ;;  %v254_v51 = vunpack.c.l.bf16 %v394_v40 }
  0x25   : > { %v291_v36 = vadd.f32 %v283_v41, %v267_v27  ;;  %v232_v31 = vadd.f32 %v224_v23, %v208_v38  ;;  %v172_v46 = vadd.f32 %v164_v33, %v148_v39  ;;  %v242_v54 = vunpack.c.l.bf16 %v390_v47 }
  0x26   : > { %v268_v45 = vadd.f32 %v260_v1, %v244_v37  ;;  %v278_v56 = vunpack.c.l.bf16 %v398_v48  ;;  %v262_v0 = vrot.slane %v254_v51, 1 }
  0x27   : > { %v295_v44 = vmul.f32 0.11111111, %v291_v36  ;;  %v245_v55 = vadd.f32 %v241_v14, %v232_v31  ;;  %v185_v41 = vadd.f32 %v181_v34, %v172_v46 }
  0x28   : > { %v292_v53 = vadd.f32 %v284_v12, %v268_v45  ;;  %v286_v4 = vrot.slane %v278_v56, 2 }
  0x29   : > { %v299_v52 = vmax.f32 %v295_v44, 0.0  ;;  %v269_v59 = vadd.f32 %v261_v42, %v245_v55  ;;  %v209_v60 = vadd.f32 %v201_v43, %v185_v41 }
  0x2a   : > { %v296_v58 = vmul.f32 0.11111111, %v292_v53 }
  0x2b   : > { %v303_v57 = vpack.c.bf16 %v299_v52, %v299_v52  ;;  %v293_v62 = vadd.f32 %v285_v49, %v269_v59  ;;  %v233_v63 = vadd.f32 %v225_v50, %v209_v60 }
  0x2c   : > { %v300_v61 = vmax.f32 %v296_v58, 0.0 }
  0x2d   : > { %308 = vst.msk [vmem:[%s116_s15] sm:$0x3] %vm307_vm0, %v303_v57  ;;  %v297_v2 = vmul.f32 0.11111111, %v293_v62  ;;  %v246_v3 = vadd.f32 %v242_v54, %v233_v63 }
  0x2e   : > { %v304_v1 = vpack.c.bf16 %v300_v61, %v300_v61 }
  0x2f   : > { %v301_v5 = vmax.f32 %v297_v2, 0.0  ;;  %v270_v6 = vadd.f32 %v262_v0, %v246_v3 }
  0x30   : > { %309 = vst.msk [vmem:[%s116_s15 + $0x2] sm:$0x3] %vm307_vm0, %v304_v1 }
  0x31   : > { %v305_v7 = vpack.c.bf16 %v301_v5, %v301_v5  ;;  %v294_v8 = vadd.f32 %v286_v4, %v270_v6 }
  0x33   : > { %310 = vst.msk [vmem:[%s116_s15 + $0x4] sm:$0x3] %vm307_vm0, %v305_v7  ;;  %v298_v9 = vmul.f32 0.11111111, %v294_v8 }
  0x35   : > { %v302_v10 = vmax.f32 %v298_v9, 0.0 }
  0x37   : > { %v306_v11 = vpack.c.bf16 %v302_v10, %v302_v10 }
  0x39   : > { %311 = vst.msk [vmem:[%s116_s15 + $0x6] sm:$0x3] %vm307_vm0, %v306_v11 }
  0x3a PF: > { %s11_s6 = sadd.s32 1, %s417_s6  }
  0x3b   : > { %p8_p4 = scmp.ge.s32.totalorder %s11_s6, 4  }
  0x3d   :  { %10 = sbr.rel (!%p8_p4) target bundleno = 1 (0x1), region = 56 }

// kernel: _lambda_.74
= control target key start
LH: loop header
LB: loop body
LE: loop exit
PB: predicated region body
PF: predicated region fallthrough
CT: control target
= control target key end

     0   :  { %vm190_vm0 = vcmask 588800   ;;  %vm197_vm1 = vcmask 1043456   ;;  %v259_v32 = vlaneseq  ;;  %vm329_vm2 = vcmask 588804   ;;  %s585_s1 = inlined_call_operand.vmem [shape: bf16[200,200], index: 1, kind: input, shape index: {}]   ;;  %s586_s0 = inlined_call_operand.vmem [shape: bf16[32,200], index: 0, kind: input, shape index: {}]   ;;  %s587_s2 = inlined_call_operand.vmem [shape: f32[1,200], index: 2, kind: input, shape index: {}]   ;;  %s588_s3 = inlined_call_operand.vmem [shape: f32[1,200], index: 3, kind: input, shape index: {}]   ;;  %s589_s4 = inlined_call_operand.vmem [shape: bf16[32,200], index: 4, kind: output, shape index: {}]  }
   0x1   :  { %v406_v0 = vld [vmem:[%s585_s1 + $0x4] ss:$8 sps:$4 sm:$0xff]   ;;  %v408_v1 = vld [vmem:[%s585_s1] ss:$8 sps:$4 sm:$0xff]   ;;  %v409_v2 = vld [vmem:[%s585_s1 + $0x14] ss:$8 sps:$4 sm:$0xff]  }
   0x2   :  { %204 = vmatprep.subr.bf16.mxu0 %v406_v0  ;;  %380 = vmatprep.subr.bf16.mxu1 %v406_v0  ;;  %v411_v3 = vld [vmem:[%s585_s1 + $0x10] ss:$8 sps:$4 sm:$0xff]   ;;  %v412_v4 = vld [vmem:[%s585_s1 + $0x24] ss:$8 sps:$4 sm:$0xff]   ;;  %v414_v5 = vld [vmem:[%s585_s1 + $0x20] ss:$8 sps:$4 sm:$0xff]  }
   0x3   :  { %205 = vmatpush1.bf16.msra.mxu0 %v408_v1  ;;  %393 = vmatpush1.bf16.msra.mxu1 %v408_v1  ;;  %v415_v6 = vld [vmem:[%s585_s1 + $0x34] ss:$8 sps:$4 sm:$0xff]   ;;  %v417_v7 = vld [vmem:[%s585_s1 + $0x30] ss:$8 sps:$4 sm:$0xff]   ;;  %v418_v8 = vld [vmem:[%s585_s1 + $0x44] ss:$8 sps:$4 sm:$0xff]  }
   0x4   :  { %206 = vmatprep.subr.bf16.mxu0 %v409_v2  ;;  %381 = vmatprep.subr.bf16.mxu1 %v409_v2  ;;  %v420_v9 = vld [vmem:[%s585_s1 + $0x40] ss:$8 sps:$4 sm:$0xff]   ;;  %v421_v10 = vld [vmem:[%s585_s1 + $0x54] ss:$8 sps:$4 sm:$0xff]   ;;  %v446_v11 = vld [vmem:[%s586_s0 + $0x4] ss:$8 sps:$4 sm:$0xff]  }
   0x5   :  { %v423_v12 = vld [vmem:[%s585_s1 + $0x50] ss:$8 sps:$4 sm:$0xff]   ;;  %v449_v13 = vld [vmem:[%s586_s0 + $0x14] ss:$8 sps:$4 sm:$0xff]   ;;  %v424_v14 = vld [vmem:[%s585_s1 + $0x64] ss:$8 sps:$4 sm:$0xff]   ;;  %370 = vmatprep.mubr.msk.bf16.mxu0 %vm190_vm0, %v446_v11 }
   0x6   :  { %371 = vmatprep.mubr.msk.bf16.mxu1 %vm190_vm0, %v449_v13  ;;  %v426_v15 = vld [vmem:[%s585_s1 + $0x60] ss:$8 sps:$4 sm:$0xff]   ;;  %v427_v16 = vld [vmem:[%s585_s1 + $0x74] ss:$8 sps:$4 sm:$0xff]   ;;  %v429_v17 = vld [vmem:[%s585_s1 + $0x70] ss:$8 sps:$4 sm:$0xff]  }
   0x7   :  { %207 = vmatpush1.bf16.msra.mxu0 %v411_v3  ;;  %394 = vmatpush1.bf16.msra.mxu1 %v411_v3  ;;  %v430_v18 = vld [vmem:[%s585_s1 + $0x84] ss:$8 sps:$4 sm:$0xff]   ;;  %v432_v19 = vld [vmem:[%s585_s1 + $0x80] ss:$8 sps:$4 sm:$0xff]   ;;  %v433_v20 = vld [vmem:[%s585_s1 + $0x94] ss:$8 sps:$4 sm:$0xff]  }
   0x8   :  { %208 = vmatprep.subr.bf16.mxu0 %v412_v4  ;;  %382 = vmatprep.subr.bf16.mxu1 %v412_v4  ;;  %v435_v21 = vld [vmem:[%s585_s1 + $0x90] ss:$8 sps:$4 sm:$0xff]   ;;  %v436_v22 = vld [vmem:[%s585_s1 + $0xa4] ss:$8 sps:$4 sm:$0xff]   ;;  %v438_v23 = vld [vmem:[%s585_s1 + $0xa0] ss:$8 sps:$4 sm:$0xff]  }
   0x9   :  { %v439_v24 = vld [vmem:[%s585_s1 + $0xb4] ss:$8 sps:$4 sm:$0xff]   ;;  %v46_v25 = vld [vmem:[%s585_s1 + $0xc0] sm:$0xff]  ;;  %v441_v26 = vld [vmem:[%s585_s1 + $0xb0] ss:$8 sps:$4 sm:$0xff]   ;;  %v260_v33 = vshrl.u32 %v259_v32, 7 }
   0xa   :  { %v368_v27 = vcombine.high %v46_v25, %v46_v25  ;;  %v367_v28 = vcombine.low %v46_v25, %v46_v25  ;;  %v444_v30 = vld [vmem:[%s586_s0] ss:$8 sps:$4 sm:$0xff]   ;;  %v447_v31 = vld [vmem:[%s586_s0 + $0x10] ss:$8 sps:$4 sm:$0xff]   ;;  %vm330_vm3 = vmor %vm329_vm2, %vm197_vm1 }
   0xb   :  { %209 = vmatpush1.bf16.msra.mxu0 %v414_v5  ;;  %395 = vmatpush1.bf16.msra.mxu1 %v414_v5  ;;  %v261_v34 = vsub.s32 0, %v260_v33  ;;  %v257_v35 = vld [vmem:[%s587_s2] sm:$0x3]  ;;  %v265_v36 = vsub.s32 1, %v260_v33 }
   0xc   :  { %210 = vmatprep.subr.bf16.mxu0 %v415_v6  ;;  %383 = vmatprep.subr.bf16.mxu1 %v415_v6  ;;  %v199_v29 = vsel %vm197_vm1, %v367_v28, 0  ;;  %v277_v37 = vld [vmem:[%s588_s3] sm:$0x3] }
   0xd   :  { %v262_v38 = vrot.slane %v257_v35, %v261_v34  ;;  %v266_v39 = vrot.slane %v257_v35, %v265_v36  ;;  %v282_v40 = vrot.slane %v277_v37, %v261_v34  ;;  %v286_v43 = vrot.slane %v277_v37, %v265_v36 }
   0xf   :  { %211 = vmatpush1.bf16.msra.mxu0 %v417_v7  ;;  %396 = vmatpush1.bf16.msra.mxu1 %v417_v7 }
  0x10   :  { %212 = vmatprep.subr.bf16.mxu0 %v418_v8  ;;  %384 = vmatprep.subr.bf16.mxu1 %v418_v8 }
  0x13   :  { %213 = vmatpush1.bf16.msra.mxu0 %v420_v9  ;;  %397 = vmatpush1.bf16.msra.mxu1 %v420_v9 }
  0x14   :  { %214 = vmatprep.subr.bf16.mxu0 %v421_v10  ;;  %385 = vmatprep.subr.bf16.mxu1 %v421_v10 }
  0x17   :  { %215 = vmatpush1.bf16.msra.mxu0 %v423_v12  ;;  %398 = vmatpush1.bf16.msra.mxu1 %v423_v12 }
  0x18   :  { %216 = vmatprep.subr.bf16.mxu0 %v424_v14  ;;  %386 = vmatprep.subr.bf16.mxu1 %v424_v14 }
  0x1b   :  { %217 = vmatpush1.bf16.msra.mxu0 %v426_v15  ;;  %399 = vmatpush1.bf16.msra.mxu1 %v426_v15 }
  0x1c   :  { %218 = vmatprep.subr.bf16.mxu0 %v427_v16  ;;  %387 = vmatprep.subr.bf16.mxu1 %v427_v16 }
  0x1f   :  { %219 = vmatpush1.bf16.msra.mxu0 %v429_v17  ;;  %400 = vmatpush1.bf16.msra.mxu1 %v429_v17 }
  0x20   :  { %220 = vmatprep.subr.bf16.mxu0 %v430_v18  ;;  %388 = vmatprep.subr.bf16.mxu1 %v430_v18 }
  0x23   :  { %221 = vmatpush1.bf16.msra.mxu0 %v432_v19  ;;  %401 = vmatpush1.bf16.msra.mxu1 %v432_v19 }
  0x24   :  { %222 = vmatprep.subr.bf16.mxu0 %v433_v20  ;;  %389 = vmatprep.subr.bf16.mxu1 %v433_v20 }
  0x27   :  { %223 = vmatpush1.bf16.msra.mxu0 %v435_v21  ;;  %402 = vmatpush1.bf16.msra.mxu1 %v435_v21 }
  0x28   :  { %224 = vmatprep.subr.bf16.mxu0 %v436_v22  ;;  %390 = vmatprep.subr.bf16.mxu1 %v436_v22 }
  0x2b   :  { %225 = vmatpush1.bf16.msra.mxu0 %v438_v23  ;;  %403 = vmatpush1.bf16.msra.mxu1 %v438_v23 }
  0x2c   :  { %226 = vmatprep.subr.bf16.mxu0 %v439_v24  ;;  %391 = vmatprep.subr.bf16.mxu1 %v439_v24 }
  0x2f   :  { %227 = vmatpush1.bf16.msra.mxu0 %v441_v26  ;;  %404 = vmatpush1.bf16.msra.mxu1 %v441_v26 }
  0x30   :  { %369 = vmatprep.subr.msk.bf16.mxu0 %vm197_vm1, %v368_v27  ;;  %392 = vmatprep.subr.msk.bf16.mxu1 %vm197_vm1, %v368_v27 }
  0x33   :  { %229 = vmatpush1.bf16.msra.mxu0 %v199_v29  ;;  %405 = vmatpush1.bf16.msra.mxu1 %v199_v29 }
  0x36   :  { %237 = vmatmul.mubr.bf16.vlgmr.msra.gmra.mrb[0].mxu0 %v444_v30  ;;  %247 = vmatmul.mubr.bf16.vlgmr.msra.gmra.mrb[0].mxu1 %v447_v31 }
 0x109   :  { %v238_v41 = vpop.f32.mrb[0].mxu0  ;;  %v248_v42 = vpop.f32.mrb[0].mxu1 }
 0x10a   :  { %v269_v44 = vmul.f32 %v262_v38, %v238_v41  ;;  %v273_v45 = vmul.f32 %v262_v38, %v248_v42  ;;  %v240_v46 = vpop.f32.mrb[1].mxu0  ;;  %v250_v47 = vpop.f32.mrb[1].mxu1 }
 0x10b   :  { %v270_v48 = vmul.f32 %v266_v39, %v240_v46  ;;  %v274_v49 = vmul.f32 %v266_v39, %v250_v47  ;;  %v242_v50 = vpop.f32.mrb[2].mxu0  ;;  %v252_v51 = vpop.f32.mrb[2].mxu1 }
 0x10c   :  { %v289_v52 = vadd.f32 %v282_v40, %v269_v44  ;;  %v293_v53 = vadd.f32 %v282_v40, %v273_v45  ;;  %v271_v54 = vmul.f32 %v262_v38, %v242_v50  ;;  %v275_v55 = vmul.f32 %v262_v38, %v252_v51  ;;  %v244_v56 = vpop.f32.mrb[3].mxu0  ;;  %v254_v57 = vpop.f32.mrb[3].mxu1 }
 0x10d   :  { %v290_v58 = vadd.f32 %v286_v43, %v270_v48  ;;  %v294_v59 = vadd.f32 %v286_v43, %v274_v49  ;;  %v272_v60 = vmul.f32 %v266_v39, %v244_v56  ;;  %v276_v61 = vmul.f32 %v266_v39, %v254_v57 }
 0x10e   :  { %v297_v62 = vmax.f32 %v289_v52, 0.0  ;;  %v301_v63 = vmax.f32 %v293_v53, 0.0  ;;  %v291_v0 = vadd.f32 %v282_v40, %v271_v54  ;;  %v295_v1 = vadd.f32 %v282_v40, %v275_v55 }
 0x10f   :  { %v298_v2 = vmax.f32 %v290_v58, 0.0  ;;  %v302_v3 = vmax.f32 %v294_v59, 0.0  ;;  %v292_v4 = vadd.f32 %v286_v43, %v272_v60  ;;  %v296_v5 = vadd.f32 %v286_v43, %v276_v61 }
 0x110   :  { %v299_v6 = vmax.f32 %v291_v0, 0.0  ;;  %v303_v7 = vmax.f32 %v295_v1, 0.0 }
 0x111   :  { %v376_v8 = vpack.c.bf16 %v298_v2, %v297_v62  ;;  %v378_v9 = vpack.c.bf16 %v302_v3, %v301_v63  ;;  %v300_v10 = vmax.f32 %v292_v4, 0.0  ;;  %v304_v11 = vmax.f32 %v296_v5, 0.0 }
 0x113   :  { %331 = vst.msk [vmem:[%s589_s4] sm:$0xff] %vm330_vm3, %v376_v8  ;;  %333 = vst.msk [vmem:[%s589_s4 + $0x10] sm:$0xff] %vm330_vm3, %v378_v9  ;;  %v377_v12 = vpack.c.bf16 %v300_v10, %v299_v6  ;;  %v379_v13 = vpack.c.bf16 %v304_v11, %v303_v7 }
 0x115   :  { %332 = vst.msk [vmem:[%s589_s4 + $0x8] sm:$0xff] %vm330_vm3, %v377_v12  ;;  %334 = vst.msk [vmem:[%s589_s4 + $0x18] sm:$0xff] %vm330_vm3, %v379_v13 }

// kernel: _lambda_.76
= control target key start
LH: loop header
LB: loop body
LE: loop exit
PB: predicated region body
PF: predicated region fallthrough
CT: control target
= control target key end

     0   :  { %vm178_vm0 = vcmask 588800   ;;  %vm182_vm1 = vcmask 1043456   ;;  %v232_v31 = vlaneseq  ;;  %vm273_vm2 = vcmask 588804   ;;  %s475_s1 = inlined_call_operand.vmem [shape: bf16[200,200], index: 1, kind: input, shape index: {}]   ;;  %s476_s0 = inlined_call_operand.vmem [shape: bf16[8,200], index: 0, kind: input, shape index: {}]   ;;  %s477_s2 = inlined_call_operand.vmem [shape: f32[1,200], index: 2, kind: input, shape index: {}]   ;;  %s478_s3 = inlined_call_operand.vmem [shape: f32[1,200], index: 3, kind: input, shape index: {}]   ;;  %s479_s4 = inlined_call_operand.vmem [shape: bf16[8,200], index: 4, kind: input, shape index: {}]   ;;  %s480_s5 = inlined_call_operand.vmem [shape: bf16[8,200], index: 5, kind: output, shape index: {}]  }
   0x1   :  { %v312_v0 = vld [vmem:[%s475_s1 + $0x4] ss:$8 sps:$4 sm:$0xff]   ;;  %v314_v1 = vld [vmem:[%s475_s1] ss:$8 sps:$4 sm:$0xff]   ;;  %v315_v2 = vld [vmem:[%s475_s1 + $0x14] ss:$8 sps:$4 sm:$0xff]  }
   0x2   :  { %189 = vmatprep.subr.bf16.mxu0 %v312_v0  ;;  %v317_v3 = vld [vmem:[%s475_s1 + $0x10] ss:$8 sps:$4 sm:$0xff]   ;;  %v318_v4 = vld [vmem:[%s475_s1 + $0x24] ss:$8 sps:$4 sm:$0xff]   ;;  %v320_v5 = vld [vmem:[%s475_s1 + $0x20] ss:$8 sps:$4 sm:$0xff]  }
   0x3   :  { %190 = vmatpush1.bf16.msra.mxu0 %v314_v1  ;;  %v321_v6 = vld [vmem:[%s475_s1 + $0x34] ss:$8 sps:$4 sm:$0xff]   ;;  %v323_v7 = vld [vmem:[%s475_s1 + $0x30] ss:$8 sps:$4 sm:$0xff]   ;;  %v324_v8 = vld [vmem:[%s475_s1 + $0x44] ss:$8 sps:$4 sm:$0xff]  }
   0x4   :  { %191 = vmatprep.subr.bf16.mxu0 %v315_v2  ;;  %v326_v9 = vld [vmem:[%s475_s1 + $0x40] ss:$8 sps:$4 sm:$0xff]   ;;  %v327_v10 = vld [vmem:[%s475_s1 + $0x54] ss:$8 sps:$4 sm:$0xff]   ;;  %v329_v13 = vld [vmem:[%s475_s1 + $0x50] ss:$8 sps:$4 sm:$0xff]  }
   0x5   :  { %v21_v11 = vld [vmem:[%s476_s0] sm:$0xff]  ;;  %v333_v16 = vld [vmem:[%s475_s1 + $0x74] ss:$8 sps:$4 sm:$0xff]   ;;  %v335_v17 = vld [vmem:[%s475_s1 + $0x70] ss:$8 sps:$4 sm:$0xff]   ;;  %v233_v32 = vshrl.u32 %v232_v31, 7 }
   0x6   :  { %v281_v12 = vcombine.high %v21_v11, %v21_v11  ;;  %v330_v14 = vld [vmem:[%s475_s1 + $0x64] ss:$8 sps:$4 sm:$0xff]   ;;  %v332_v15 = vld [vmem:[%s475_s1 + $0x60] ss:$8 sps:$4 sm:$0xff]   ;;  %v339_v20 = vld [vmem:[%s475_s1 + $0x94] ss:$8 sps:$4 sm:$0xff]   ;;  %v280_v30 = vcombine.low %v21_v11, %v21_v11 }
   0x7   :  { %192 = vmatpush1.bf16.msra.mxu0 %v317_v3  ;;  %v336_v18 = vld [vmem:[%s475_s1 + $0x84] ss:$8 sps:$4 sm:$0xff]   ;;  %v338_v19 = vld [vmem:[%s475_s1 + $0x80] ss:$8 sps:$4 sm:$0xff]   ;;  %v341_v21 = vld [vmem:[%s475_s1 + $0x90] ss:$8 sps:$4 sm:$0xff]  }
   0x8   :  { %193 = vmatprep.subr.bf16.mxu0 %v318_v4  ;;  %309 = vmatprep.mubr.msk.bf16.mxu0 %vm178_vm0, %v281_v12  ;;  %v342_v22 = vld [vmem:[%s475_s1 + $0xa4] ss:$8 sps:$4 sm:$0xff]   ;;  %v344_v23 = vld [vmem:[%s475_s1 + $0xa0] ss:$8 sps:$4 sm:$0xff]   ;;  %v345_v24 = vld [vmem:[%s475_s1 + $0xb4] ss:$8 sps:$4 sm:$0xff]  }
   0x9   :  { %v46_v25 = vld [vmem:[%s475_s1 + $0xc0] sm:$0xff]  ;;  %v347_v26 = vld [vmem:[%s475_s1 + $0xb0] ss:$8 sps:$4 sm:$0xff]   ;;  %v234_v33 = vsub.s32 0, %v233_v32  ;;  %v238_v35 = vsub.s32 1, %v233_v32  ;;  %vm274_vm3 = vmor %vm273_vm2, %vm182_vm1 }
   0xa   :  { %v307_v27 = vcombine.high %v46_v25, %v46_v25  ;;  %v306_v28 = vcombine.low %v46_v25, %v46_v25  ;;  %v230_v34 = vld [vmem:[%s477_s2] sm:$0x3] }
   0xb   :  { %194 = vmatpush1.bf16.msra.mxu0 %v320_v5  ;;  %v244_v36 = vld [vmem:[%s478_s3] sm:$0x3]  ;;  %v235_v37 = vrot.slane %v230_v34, %v234_v33  ;;  %v239_v39 = vrot.slane %v230_v34, %v238_v35 }
   0xc   :  { %195 = vmatprep.subr.bf16.mxu0 %v321_v6  ;;  %v184_v29 = vsel %vm182_vm1, %v306_v28, 0  ;;  %v258_v38 = vld [vmem:[%s479_s4] sm:$0xff]  ;;  %v249_v40 = vrot.slane %v244_v36, %v234_v33  ;;  %v253_v42 = vrot.slane %v244_v36, %v238_v35 }
   0xd   :  { %v259_v44 = vunpack.c.l.bf16 %v258_v38  ;;  %v260_v47 = vunpack.c.h.bf16 %v258_v38 }
   0xf   :  { %196 = vmatpush1.bf16.msra.mxu0 %v323_v7 }
  0x10   :  { %197 = vmatprep.subr.bf16.mxu0 %v324_v8 }
  0x13   :  { %198 = vmatpush1.bf16.msra.mxu0 %v326_v9 }
  0x14   :  { %199 = vmatprep.subr.bf16.mxu0 %v327_v10 }
  0x17   :  { %200 = vmatpush1.bf16.msra.mxu0 %v329_v13 }
  0x18   :  { %201 = vmatprep.subr.bf16.mxu0 %v330_v14 }
  0x1b   :  { %202 = vmatpush1.bf16.msra.mxu0 %v332_v15 }
  0x1c   :  { %203 = vmatprep.subr.bf16.mxu0 %v333_v16 }
  0x1f   :  { %204 = vmatpush1.bf16.msra.mxu0 %v335_v17 }
  0x20   :  { %205 = vmatprep.subr.bf16.mxu0 %v336_v18 }
  0x23   :  { %206 = vmatpush1.bf16.msra.mxu0 %v338_v19 }
  0x24   :  { %207 = vmatprep.subr.bf16.mxu0 %v339_v20 }
  0x27   :  { %208 = vmatpush1.bf16.msra.mxu0 %v341_v21 }
  0x28   :  { %209 = vmatprep.subr.bf16.mxu0 %v342_v22 }
  0x2b   :  { %210 = vmatpush1.bf16.msra.mxu0 %v344_v23 }
  0x2c   :  { %211 = vmatprep.subr.bf16.mxu0 %v345_v24 }
  0x2f   :  { %212 = vmatpush1.bf16.msra.mxu0 %v347_v26 }
  0x30   :  { %308 = vmatprep.subr.msk.bf16.mxu0 %vm182_vm1, %v307_v27 }
  0x33   :  { %214 = vmatpush1.bf16.msra.mxu0 %v184_v29 }
  0x36   :  { %222 = vmatmul.mubr.bf16.vlgmr.msra.gmra.mrb[0].mxu0 %v280_v30 }
 0x109   :  { %v223_v41 = vpop.f32.mrb[0].mxu0 }
 0x10a   :  { %v242_v43 = vmul.f32 %v235_v37, %v223_v41  ;;  %v225_v45 = vpop.f32.mrb[1].mxu0 }
 0x10b   :  { %v243_v46 = vmul.f32 %v239_v39, %v225_v45  ;;  %v227_v48 = vpop.f32.mrb[2].mxu0 }
 0x10c   :  { %v256_v49 = vadd.f32 %v249_v40, %v242_v43  ;;  %v228_v50 = vpop.f32.mrb[3].mxu0 }
 0x10d   :  { %v257_v51 = vadd.f32 %v253_v42, %v243_v46 }
 0x10e   :  { %v261_v52 = vadd.f32 %v259_v44, %v256_v49 }
 0x10f   :  { %v262_v53 = vadd.f32 %v260_v47, %v257_v51 }
 0x110   :  { %v263_v54 = vmax.f32 %v261_v52, 0.0 }
 0x111   :  { %v264_v55 = vmax.f32 %v262_v53, 0.0 }
 0x113   :  { %v311_v56 = vpack.c.bf16 %v264_v55, %v263_v54 }
 0x115   :  { %275 = vst.msk [vmem:[%s480_s5] sm:$0xff] %vm274_vm3, %v311_v56 }

// kernel: _lambda_.75
= control target key start
LH: loop header
LB: loop body
LE: loop exit
PB: predicated region body
PF: predicated region fallthrough
CT: control target
= control target key end

     0   :  { %s651_s15 = smov 0   ;;  %s753_s0 = inlined_call_operand.vmem [shape: bf16[2,4,4,200], index: 0, kind: input, shape index: {}]   ;;  %s754_s1 = inlined_call_operand.vmem [shape: f32[9,1,1,200], index: 1, kind: input, shape index: {}]   ;;  %s755_s2 = inlined_call_operand.vmem [shape: f32[1,1,200], index: 2, kind: input, shape index: {}]   ;;  %s756_s3 = inlined_call_operand.vmem [shape: f32[1,1,200], index: 3, kind: input, shape index: {}]   ;;  %s757_s4 = inlined_call_operand.vmem [shape: bf16[2,2,2,200], index: 4, kind: output, shape index: {}]  }
   0x1 LB: > { %s562_s16 = sadd.s32 4294967295, %s623_s15   ;;  %p566_p0 = scmp.ge.s32.totalorder %s623_s15, 1  ;;  %s623_s15 = sphi %s651_s15, %s14_s15  }
   0x2   : > { %p162_p1 = scmp.lt.s32.totalorder %s623_s15, 3 }
   0x4   : > { %p163_p2 = pnand %p566_p0, %p162_p1 }
   0x5   : > { %p187_p3 = scmp.lt.s32.totalorder (!%p163_p2), %s562_s16, 1  ;;  %v210_v0 = vlaneseq (!%p163_p2)  ;;  %v196_v2 = vld [vmem:[%s754_s1] sm:$0x3] (!%p163_p2)  ;;  %v197_v3 = vld [vmem:[%s754_s1 + $0x2] sm:$0x3] (!%p163_p2)  ;;  %vm504_vm0 = vcmask (!%p163_p2), 1040384  }
   0x6   : > { %166 = sbr.rel (%p163_p2) target bundleno = 56 (0x38), region = 36  ;;  %v198_v6 = vld [vmem:[%s754_s1 + $0x4] sm:$0x3] (!%p163_p2)  ;;  %v199_v7 = vld [vmem:[%s754_s1 + $0x6] sm:$0x3] (!%p163_p2)  ;;  %vm505_vm1 = vcmask (!%p163_p2), 582657  }
   0x7   : > { %v661_v1 = vshrl.u32 (!%p163_p2), %v210_v0, 7  ;;  %v200_v25 = vld [vmem:[%s754_s1 + $0x8] sm:$0x3] (!%p163_p2)  ;;  %v201_v35 = vld [vmem:[%s754_s1 + $0xa] sm:$0x3] (!%p163_p2)  ;;  %vm506_vm2 = vmor (!%p163_p2), %vm505_vm1, %vm504_vm0 }
   0x8   : > { %v202_v54 = vld [vmem:[%s754_s1 + $0xc] sm:$0x3] (!%p163_p2) }
   0x9   : > { %v671_v4 = vsub.s32 (!%p163_p2), 0, %v661_v1  ;;  %v674_v5 = vsub.s32 (!%p163_p2), 1, %v661_v1 }
   0xb   : > { %v213_v10 = vrot.slane (!%p163_p2), %v196_v2, %v671_v4  ;;  %v217_v11 = vrot.slane (!%p163_p2), %v196_v2, %v674_v5  ;;  %v230_v13 = vrot.slane (!%p163_p2), %v197_v3, %v671_v4  ;;  %v234_v14 = vrot.slane (!%p163_p2), %v197_v3, %v674_v5 }
   0xc   : > { %v258_v28 = vrot.slane (!%p163_p2), %v198_v6, %v671_v4  ;;  %v262_v29 = vrot.slane (!%p163_p2), %v198_v6, %v674_v5  ;;  %v287_v33 = vrot.slane (!%p163_p2), %v199_v7, %v671_v4  ;;  %v291_v39 = vrot.slane (!%p163_p2), %v199_v7, %v674_v5 }
   0xd   : > { %s759_s16 = smov (!%p187_p3, %s562_s16), 1  ;;  %v218_v20 = vcombine.low %v213_v10, %v217_v11  ;;  %v235_v23 = vcombine.low %v230_v13, %v234_v14  ;;  %v306_v42 = vrot.slane %v200_v25, %v671_v4  ;;  %v310_v43 = vrot.slane %v200_v25, %v674_v5 }
   0xe   : > { %s598_s21 = sshll.u32 %s759_s16, 4  ;;  %v263_v38 = vcombine.low %v258_v28, %v262_v29  ;;  %v292_v47 = vcombine.low %v287_v33, %v291_v39  ;;  %v334_v53 = vrot.slane %v201_v35, %v671_v4  ;;  %v338_v62 = vrot.slane %v201_v35, %v674_v5  ;;  %s569_s19 = sshll.u32 %s759_s16, 2 }
   0xf   : > { %s679_s24 = scalar_lea.vmem %s753_s0, %s598_s21  ;;  %v236_v30 = vrot.slane %v235_v23, 7  ;;  %v311_v52 = vcombine.low %v306_v42, %v310_v43  ;;  %s195_s22 = scalar_lea.vmem %s757_s4, %s569_s19 }
  0x10   : > { %v205_v8 = vld [vmem:[%s679_s24] sm:$0x5]  ;;  %v206_v9 = vld [vmem:[%s679_s24 + $0x4] sm:$0x5]  ;;  %v250_v17 = vld [vmem:[%s679_s24] sm:$0xa]  ;;  %v339_v11 = vcombine.low %v334_v53, %v338_v62 }
  0x11   : > { %v600_v12 = vld [vmem:[%s679_s24] sm:$0xff]   ;;  %v207_v15 = vunpack.c.l.bf16 %v205_v8  ;;  %v208_v16 = vunpack.c.l.bf16 %v206_v9  ;;  %v575_v24 = vld [vmem:[%s679_s24 + $0x8] sm:$0x5]  ;;  %v252_v26 = vunpack.c.l.bf16 %v250_v17  ;;  %v581_v45 = vld [vmem:[%s679_s24 + $0x8] sm:$0xa]  ;;  %v264_v46 = vrot.slane %v263_v38, 6 }
  0x12   : > { %v251_v18 = vld [vmem:[%s679_s24 + $0x4] sm:$0xa]  ;;  %v574_v19 = vld [vmem:[%s679_s24 + $0x4] sm:$0x5]  ;;  %v601_v21 = vunpack.c.l.bf16 %v600_v12  ;;  %v602_v22 = vunpack.c.h.bf16 %v600_v12  ;;  %v282_v32 = vunpack.c.l.bf16 %v575_v24  ;;  %v329_v58 = vunpack.c.l.bf16 %v581_v45  ;;  %v584_v63 = vld [vmem:[%s679_s24 + $0x8] sm:$0x5] }
  0x13   : > { %v253_v27 = vunpack.c.l.bf16 %v251_v18  ;;  %v281_v31 = vunpack.c.l.bf16 %v574_v19  ;;  %v576_v34 = vld [vmem:[%s679_s24 + $0x4] sm:$0xff]   ;;  %v220_v36 = vmul.f32 %v218_v20, %v207_v15  ;;  %v221_v37 = vmul.f32 %v218_v20, %v208_v16  ;;  %v585_v7 = vld [vmem:[%s679_s24 + $0xc] sm:$0x5] }
  0x14   : > { %v238_v40 = vmul.f32 %v601_v21, %v236_v30  ;;  %v239_v41 = vmul.f32 %v602_v22, %v236_v30  ;;  %v580_v44 = vld [vmem:[%s679_s24 + $0x4] sm:$0xa]  ;;  %v300_v48 = vunpack.c.l.bf16 %v576_v34  ;;  %v301_v49 = vunpack.c.h.bf16 %v576_v34  ;;  %v203_v8 = vld [vmem:[%s754_s1 + $0xe] sm:$0x3]  ;;  %v590_v39 = vld [vmem:[%s679_s24 + $0x8] sm:$0xa] }
  0x15   : > { %v266_v55 = vmul.f32 %v264_v46, %v252_v26  ;;  %v267_v56 = vmul.f32 %v264_v46, %v253_v27  ;;  %v328_v57 = vunpack.c.l.bf16 %v580_v44  ;;  %v312_v61 = vrot.slane %v311_v52, 7  ;;  %v607_v17 = vld [vmem:[%s679_s24 + $0x8] sm:$0xff]   ;;  %v204_v26 = vld [vmem:[%s754_s1 + $0x10] sm:$0x3]  ;;  %v430_v46 = vld [vmem:[%s755_s2] sm:$0x3] }
  0x16   : > { %v570_v50 = vrot.slane %v238_v40, 9  ;;  %v571_v51 = vrot.slane %v239_v41, 9  ;;  %v294_v3 = vmul.f32 %v292_v47, %v281_v31  ;;  %v295_v6 = vmul.f32 %v292_v47, %v282_v32  ;;  %v591_v40 = vld [vmem:[%s679_s24 + $0xc] sm:$0xa] }
  0x17   : > { %v572_v0 = vrot.slane %v266_v55, 10  ;;  %v573_v2 = vrot.slane %v267_v56, 10  ;;  %v314_v9 = vmul.f32 %v312_v61, %v300_v48  ;;  %v315_v10 = vmul.f32 %v312_v61, %v301_v49 }
  0x18   : > { %v248_v59 = vadd.f32 %v570_v50, %v220_v36  ;;  %v249_v60 = vadd.f32 %v571_v51, %v221_v37  ;;  %v363_v12 = vrot.slane %v202_v54, %v671_v4  ;;  %v357_v15 = vunpack.c.l.bf16 %v584_v63 }
  0x19   : > { %v367_v16 = vrot.slane %v202_v54, %v674_v5  ;;  %v578_v18 = vrot.slane %v314_v9, 9  ;;  %v579_v19 = vrot.slane %v315_v10, 9  ;;  %v340_v20 = vrot.slane %v339_v11, 6  ;;  %v444_v54 = vld [vmem:[%s756_s3] sm:$0x3] }
  0x1a   : > { %v276_v13 = vadd.f32 %v572_v0, %v248_v59  ;;  %v277_v14 = vadd.f32 %v573_v2, %v249_v60  ;;  %v358_v21 = vunpack.c.l.bf16 %v585_v7  ;;  %v382_v25 = vrot.slane %v203_v8, %v671_v4 }
  0x1b   : > { %v368_v24 = vcombine.low %v363_v12, %v367_v16  ;;  %v342_v27 = vmul.f32 %v340_v20, %v328_v57  ;;  %v343_v28 = vmul.f32 %v340_v20, %v329_v58  ;;  %v605_v29 = vunpack.c.l.bf16 %v607_v17 }
  0x1c   : > { %v296_v22 = vadd.f32 %v294_v3, %v276_v13  ;;  %v297_v23 = vadd.f32 %v295_v6, %v277_v14  ;;  %v386_v30 = vrot.slane %v203_v8, %v674_v5  ;;  %v606_v34 = vunpack.c.h.bf16 %v607_v17 }
  0x1d   : > { %v370_v33 = vmul.f32 %v368_v24, %v357_v15  ;;  %v582_v35 = vrot.slane %v342_v27, 10  ;;  %v583_v36 = vrot.slane %v343_v28, 10  ;;  %v371_v37 = vmul.f32 %v368_v24, %v358_v21 }
  0x1e   : > { %v324_v31 = vadd.f32 %v578_v18, %v296_v22  ;;  %v325_v32 = vadd.f32 %v579_v19, %v297_v23  ;;  %v387_v38 = vcombine.low %v382_v25, %v386_v30  ;;  %v410_v41 = vrot.slane %v204_v26, %v671_v4 }
  0x1f   : > { %v414_v42 = vrot.slane %v204_v26, %v674_v5  ;;  %v404_v47 = vunpack.c.l.bf16 %v590_v39  ;;  %v405_v48 = vunpack.c.l.bf16 %v591_v40  ;;  %v435_v56 = vrot.slane %v430_v46, %v671_v4 }
  0x20   : > { %v352_v43 = vadd.f32 %v582_v35, %v324_v31  ;;  %v353_v44 = vadd.f32 %v583_v36, %v325_v32  ;;  %v388_v45 = vrot.slane %v387_v38, 7  ;;  %v439_v57 = vrot.slane %v430_v46, %v674_v5 }
  0x21   : > { %v415_v49 = vcombine.low %v410_v41, %v414_v42  ;;  %v449_v62 = vrot.slane %v444_v54, %v671_v4  ;;  %v453_v63 = vrot.slane %v444_v54, %v674_v5  ;;  %v625_v8 = vmov 1966171168  }
  0x22   : > { %v372_v50 = vadd.f32 %v370_v33, %v352_v43  ;;  %v373_v51 = vadd.f32 %v371_v37, %v353_v44  ;;  %v390_v52 = vmul.f32 %v605_v29, %v388_v45  ;;  %v391_v53 = vmul.f32 %v606_v34, %v388_v45 }
  0x23   : > { %v416_v55 = vrot.slane %v415_v49, 6  ;;  %v440_v7 = vcombine.low %v435_v56, %v439_v57  ;;  %v474_v9 = vunpack.c.l.s4 %v625_v8  ;;  %v454_v12 = vcombine.low %v449_v62, %v453_v63 }
  0x24   : > { %v588_v58 = vrot.slane %v390_v52, 9  ;;  %v589_v59 = vrot.slane %v391_v53, 9 }
  0x25   : > { %v418_v60 = vmul.f32 %v416_v55, %v404_v47  ;;  %v419_v61 = vmul.f32 %v416_v55, %v405_v48  ;;  %v475_v15 = vunpack.c.0.s8 %v474_v9 }
  0x26   : > { %v400_v0 = vadd.f32 %v588_v58, %v372_v50  ;;  %v401_v2 = vadd.f32 %v589_v59, %v373_v51 }
  0x27   : > { %v592_v3 = vrot.slane %v418_v60, 10  ;;  %v593_v6 = vrot.slane %v419_v61, 10  ;;  %v478_v5 = vsub.s32 %v475_v15, %v661_v1 }
  0x29   : > { %v428_v10 = vadd.f32 %v592_v3, %v400_v0  ;;  %v429_v11 = vadd.f32 %v593_v6, %v401_v2 }
  0x2b   : > { %v442_v13 = vmul.f32 %v440_v7, %v428_v10  ;;  %v443_v14 = vmul.f32 %v440_v7, %v429_v11 }
  0x2d   : > { %v456_v16 = vadd.f32 %v454_v12, %v442_v13  ;;  %v457_v17 = vadd.f32 %v454_v12, %v443_v14 }
  0x2f   : > { %v460_v18 = vcombine.high %v456_v16, %v456_v16  ;;  %v461_v4 = vcombine.high %v457_v17, %v457_v17 }
  0x31   : > { %v594_v19 = vpack.c.bf16 %v460_v18, %v456_v16  ;;  %v595_v20 = vpack.c.bf16 %v461_v4, %v457_v17 }
  0x33   : > { %v479_v21 = vrot.slane %v594_v19, %v478_v5  ;;  %v494_v22 = vrot.slane %v595_v20, %v478_v5 }
  0x35   : > { %v486_v23 = vrot.slane %v479_v21, %v478_v5  ;;  %v501_v24 = vrot.slane %v494_v22, %v478_v5 }
  0x37   : > { %507 = vst.msk [vmem:[%s195_s22] sm:$0x3] %vm506_vm2, %v486_v23  ;;  %508 = vst.msk [vmem:[%s195_s22 + $0x2] sm:$0x3] %vm506_vm2, %v501_v24 }
  0x38 PF: > { %s14_s15 = sadd.s32 1, %s623_s15  }
  0x39   : > { %p11_p4 = scmp.ge.s32.totalorder %s14_s15, 4  }
  0x3b   :  { %13 = sbr.rel (!%p11_p4) target bundleno = 1 (0x1), region = 68 }

// kernel: _lambda_.98
= control target key start
LH: loop header
LB: loop body
LE: loop exit
PB: predicated region body
PF: predicated region fallthrough
CT: control target
= control target key end

     0   :  { %vm175_vm0 = vcmask 588800   ;;  %vm179_vm1 = vcmask 1043456   ;;  %v229_v31 = vlaneseq  ;;  %vm265_vm2 = vcmask 588804   ;;  %s459_s1 = inlined_call_operand.vmem [shape: bf16[200,200], index: 1, kind: input, shape index: {}]   ;;  %s460_s0 = inlined_call_operand.vmem [shape: bf16[8,200], index: 0, kind: input, shape index: {}]   ;;  %s461_s2 = inlined_call_operand.vmem [shape: f32[1,200], index: 2, kind: input, shape index: {}]   ;;  %s462_s3 = inlined_call_operand.vmem [shape: f32[1,200], index: 3, kind: input, shape index: {}]   ;;  %s463_s4 = inlined_call_operand.vmem [shape: bf16[8,200], index: 4, kind: output, shape index: {}]  }
   0x1   :  { %v304_v0 = vld [vmem:[%s459_s1 + $0x4] ss:$8 sps:$4 sm:$0xff]   ;;  %v306_v1 = vld [vmem:[%s459_s1] ss:$8 sps:$4 sm:$0xff]   ;;  %v307_v2 = vld [vmem:[%s459_s1 + $0x14] ss:$8 sps:$4 sm:$0xff]  }
   0x2   :  { %186 = vmatprep.subr.bf16.mxu0 %v304_v0  ;;  %v309_v3 = vld [vmem:[%s459_s1 + $0x10] ss:$8 sps:$4 sm:$0xff]   ;;  %v310_v4 = vld [vmem:[%s459_s1 + $0x24] ss:$8 sps:$4 sm:$0xff]   ;;  %v312_v5 = vld [vmem:[%s459_s1 + $0x20] ss:$8 sps:$4 sm:$0xff]  }
   0x3   :  { %187 = vmatpush1.bf16.msra.mxu0 %v306_v1  ;;  %v313_v6 = vld [vmem:[%s459_s1 + $0x34] ss:$8 sps:$4 sm:$0xff]   ;;  %v315_v7 = vld [vmem:[%s459_s1 + $0x30] ss:$8 sps:$4 sm:$0xff]   ;;  %v316_v8 = vld [vmem:[%s459_s1 + $0x44] ss:$8 sps:$4 sm:$0xff]  }
   0x4   :  { %188 = vmatprep.subr.bf16.mxu0 %v307_v2  ;;  %v318_v9 = vld [vmem:[%s459_s1 + $0x40] ss:$8 sps:$4 sm:$0xff]   ;;  %v319_v10 = vld [vmem:[%s459_s1 + $0x54] ss:$8 sps:$4 sm:$0xff]   ;;  %v321_v13 = vld [vmem:[%s459_s1 + $0x50] ss:$8 sps:$4 sm:$0xff]  }
   0x5   :  { %v18_v11 = vld [vmem:[%s460_s0] sm:$0xff]  ;;  %v325_v16 = vld [vmem:[%s459_s1 + $0x74] ss:$8 sps:$4 sm:$0xff]   ;;  %v327_v17 = vld [vmem:[%s459_s1 + $0x70] ss:$8 sps:$4 sm:$0xff]   ;;  %v230_v32 = vshrl.u32 %v229_v31, 7 }
   0x6   :  { %v273_v12 = vcombine.high %v18_v11, %v18_v11  ;;  %v322_v14 = vld [vmem:[%s459_s1 + $0x64] ss:$8 sps:$4 sm:$0xff]   ;;  %v324_v15 = vld [vmem:[%s459_s1 + $0x60] ss:$8 sps:$4 sm:$0xff]   ;;  %v331_v20 = vld [vmem:[%s459_s1 + $0x94] ss:$8 sps:$4 sm:$0xff]   ;;  %v272_v30 = vcombine.low %v18_v11, %v18_v11 }
   0x7   :  { %189 = vmatpush1.bf16.msra.mxu0 %v309_v3  ;;  %v328_v18 = vld [vmem:[%s459_s1 + $0x84] ss:$8 sps:$4 sm:$0xff]   ;;  %v330_v19 = vld [vmem:[%s459_s1 + $0x80] ss:$8 sps:$4 sm:$0xff]   ;;  %v333_v21 = vld [vmem:[%s459_s1 + $0x90] ss:$8 sps:$4 sm:$0xff]  }
   0x8   :  { %190 = vmatprep.subr.bf16.mxu0 %v310_v4  ;;  %301 = vmatprep.mubr.msk.bf16.mxu0 %vm175_vm0, %v273_v12  ;;  %v334_v22 = vld [vmem:[%s459_s1 + $0xa4] ss:$8 sps:$4 sm:$0xff]   ;;  %v336_v23 = vld [vmem:[%s459_s1 + $0xa0] ss:$8 sps:$4 sm:$0xff]   ;;  %v337_v24 = vld [vmem:[%s459_s1 + $0xb4] ss:$8 sps:$4 sm:$0xff]  }
   0x9   :  { %v43_v25 = vld [vmem:[%s459_s1 + $0xc0] sm:$0xff]  ;;  %v339_v26 = vld [vmem:[%s459_s1 + $0xb0] ss:$8 sps:$4 sm:$0xff]   ;;  %v231_v33 = vsub.s32 0, %v230_v32  ;;  %v235_v35 = vsub.s32 1, %v230_v32  ;;  %vm266_vm3 = vmor %vm265_vm2, %vm179_vm1 }
   0xa   :  { %v299_v27 = vcombine.high %v43_v25, %v43_v25  ;;  %v298_v28 = vcombine.low %v43_v25, %v43_v25  ;;  %v227_v34 = vld [vmem:[%s461_s2] sm:$0x3] }
   0xb   :  { %191 = vmatpush1.bf16.msra.mxu0 %v312_v5  ;;  %v241_v36 = vld [vmem:[%s462_s3] sm:$0x3]  ;;  %v232_v37 = vrot.slane %v227_v34, %v231_v33  ;;  %v236_v38 = vrot.slane %v227_v34, %v235_v35 }
   0xc   :  { %192 = vmatprep.subr.bf16.mxu0 %v313_v6  ;;  %v181_v29 = vsel %vm179_vm1, %v298_v28, 0  ;;  %v246_v39 = vrot.slane %v241_v36, %v231_v33  ;;  %v250_v41 = vrot.slane %v241_v36, %v235_v35 }
   0xf   :  { %193 = vmatpush1.bf16.msra.mxu0 %v315_v7 }
  0x10   :  { %194 = vmatprep.subr.bf16.mxu0 %v316_v8 }
  0x13   :  { %195 = vmatpush1.bf16.msra.mxu0 %v318_v9 }
  0x14   :  { %196 = vmatprep.subr.bf16.mxu0 %v319_v10 }
  0x17   :  { %197 = vmatpush1.bf16.msra.mxu0 %v321_v13 }
  0x18   :  { %198 = vmatprep.subr.bf16.mxu0 %v322_v14 }
  0x1b   :  { %199 = vmatpush1.bf16.msra.mxu0 %v324_v15 }
  0x1c   :  { %200 = vmatprep.subr.bf16.mxu0 %v325_v16 }
  0x1f   :  { %201 = vmatpush1.bf16.msra.mxu0 %v327_v17 }
  0x20   :  { %202 = vmatprep.subr.bf16.mxu0 %v328_v18 }
  0x23   :  { %203 = vmatpush1.bf16.msra.mxu0 %v330_v19 }
  0x24   :  { %204 = vmatprep.subr.bf16.mxu0 %v331_v20 }
  0x27   :  { %205 = vmatpush1.bf16.msra.mxu0 %v333_v21 }
  0x28   :  { %206 = vmatprep.subr.bf16.mxu0 %v334_v22 }
  0x2b   :  { %207 = vmatpush1.bf16.msra.mxu0 %v336_v23 }
  0x2c   :  { %208 = vmatprep.subr.bf16.mxu0 %v337_v24 }
  0x2f   :  { %209 = vmatpush1.bf16.msra.mxu0 %v339_v26 }
  0x30   :  { %300 = vmatprep.subr.msk.bf16.mxu0 %vm179_vm1, %v299_v27 }
  0x33   :  { %211 = vmatpush1.bf16.msra.mxu0 %v181_v29 }
  0x36   :  { %219 = vmatmul.mubr.bf16.vlgmr.msra.gmra.mrb[0].mxu0 %v272_v30 }
 0x109   :  { %v220_v40 = vpop.f32.mrb[0].mxu0 }
 0x10a   :  { %v239_v42 = vmul.f32 %v232_v37, %v220_v40  ;;  %v222_v43 = vpop.f32.mrb[1].mxu0 }
 0x10b   :  { %v240_v44 = vmul.f32 %v236_v38, %v222_v43  ;;  %v224_v45 = vpop.f32.mrb[2].mxu0 }
 0x10c   :  { %v253_v46 = vadd.f32 %v246_v39, %v239_v42  ;;  %v225_v47 = vpop.f32.mrb[3].mxu0 }
 0x10d   :  { %v254_v48 = vadd.f32 %v250_v41, %v240_v44 }
 0x10e   :  { %v255_v49 = vmax.f32 %v253_v46, 0.0 }
 0x10f   :  { %v256_v50 = vmax.f32 %v254_v48, 0.0 }
 0x111   :  { %v303_v51 = vpack.c.bf16 %v256_v50, %v255_v49 }
 0x113   :  { %267 = vst.msk [vmem:[%s463_s4] sm:$0xff] %vm266_vm3, %v303_v51 }

// kernel: _lambda_.95
= control target key start
LH: loop header
LB: loop body
LE: loop exit
PB: predicated region body
PF: predicated region fallthrough
CT: control target
= control target key end

     0   :  { %s399_s6 = smov 0   ;;  %s437_s0 = inlined_call_operand.vmem [shape: bf16[2,4,4,200], index: 0, kind: input, shape index: {}]   ;;  %s438_s1 = inlined_call_operand.vmem [shape: bf16[2,2,2,200], index: 1, kind: output, shape index: {}]  }
   0x1 LB: > { %s325_s7 = sadd.s32 4294967295, %s386_s6   ;;  %p329_p0 = scmp.ge.s32.totalorder %s386_s6, 1  ;;  %s386_s6 = sphi %s399_s6, %s11_s6  }
   0x2   : > { %p87_p1 = scmp.lt.s32.totalorder %s386_s6, 3 }
   0x4   : > { %p88_p2 = pnand %p329_p0, %p87_p1 }
   0x5   : > { %p106_p3 = scmp.lt.s32.totalorder (!%p88_p2), %s325_s7, 1  ;;  %v239_v55 = vlaneseq (!%p88_p2)  ;;  %v388_v57 = vmov (!%p88_p2), 1966171168   ;;  %vm267_vm0 = vcmask (!%p88_p2), 1040384   ;;  %vm268_vm1 = vcmask (!%p88_p2), 582657  }
   0x6   : > { %91 = sbr.rel (%p88_p2) target bundleno = 52 (0x34), region = 24  ;;  %v237_v58 = vunpack.c.l.s4 (!%p88_p2), %v388_v57  ;;  %vm269_vm2 = vmor (!%p88_p2), %vm268_vm1, %vm267_vm0 }
   0xd   : > { %s440_s7 = smov (!%p106_p3, %s325_s7), 1 }
   0xe   : > { %s361_s8 = sshll.u32 %s440_s7, 4  ;;  %s332_s12 = sshll.u32 %s440_s7, 2 }
   0xf   : > { %s413_s11 = scalar_lea.vmem %s437_s0, %s361_s8  ;;  %s114_s15 = scalar_lea.vmem %s438_s1, %s332_s12 }
  0x10   : > { %v115_v0 = vld [vmem:[%s413_s11] sm:$0x5]  ;;  %v133_v2 = vld [vmem:[%s413_s11] sm:$0xa]  ;;  %v337_v6 = vld [vmem:[%s413_s11 + $0x4] sm:$0x5] }
  0x11   : > { %v363_v1 = vld [vmem:[%s413_s11] sm:$0xff]   ;;  %v117_v3 = vunpack.c.l.bf16 %v115_v0  ;;  %v135_v5 = vunpack.c.l.bf16 %v133_v2  ;;  %v150_v15 = vunpack.c.l.bf16 %v337_v6  ;;  %v338_v18 = vld [vmem:[%s413_s11 + $0x8] sm:$0x5]  ;;  %v344_v19 = vld [vmem:[%s413_s11 + $0x8] sm:$0xa]  ;;  %v238_v0 = vunpack.c.0.s8 %v237_v58 }
  0x12   : > { %v364_v4 = vunpack.c.l.bf16 %v363_v1  ;;  %v339_v7 = vld [vmem:[%s413_s11 + $0x4] sm:$0xff]   ;;  %v365_v9 = vunpack.c.h.bf16 %v363_v1  ;;  %v151_v26 = vunpack.c.l.bf16 %v338_v18  ;;  %v171_v32 = vunpack.c.l.bf16 %v344_v19  ;;  %v348_v40 = vld [vmem:[%s413_s11 + $0xc] sm:$0x5]  ;;  %v354_v41 = vld [vmem:[%s413_s11 + $0xc] sm:$0xa] }
  0x13   : > { %v343_v8 = vld [vmem:[%s413_s11 + $0x4] sm:$0xa]  ;;  %v156_v10 = vunpack.c.l.bf16 %v339_v7  ;;  %v335_v12 = vrot.slane %v135_v5, 10  ;;  %v116_v13 = vld [vmem:[%s413_s11 + $0x4] sm:$0x5]  ;;  %v370_v21 = vld [vmem:[%s413_s11 + $0x8] sm:$0xff]   ;;  %v157_v24 = vunpack.c.h.bf16 %v339_v7  ;;  %v186_v49 = vunpack.c.l.bf16 %v348_v40 }
  0x14   : > { %v333_v11 = vrot.slane %v364_v4, 9  ;;  %v134_v14 = vld [vmem:[%s413_s11 + $0x4] sm:$0xa]  ;;  %v170_v16 = vunpack.c.l.bf16 %v343_v8  ;;  %v118_v17 = vunpack.c.l.bf16 %v116_v13  ;;  %v334_v22 = vrot.slane %v365_v9, 9  ;;  %v347_v28 = vld [vmem:[%s413_s11 + $0x8] sm:$0x5] }
  0x15   : > { %v136_v23 = vunpack.c.l.bf16 %v134_v14  ;;  %v341_v25 = vrot.slane %v156_v10, 9  ;;  %v353_v29 = vld [vmem:[%s413_s11 + $0x8] sm:$0xa]  ;;  %v368_v33 = vunpack.c.l.bf16 %v370_v21  ;;  %v342_v37 = vrot.slane %v157_v24, 9 }
  0x16   : > { %v131_v20 = vadd.f32 %v333_v11, %v117_v3  ;;  %v132_v30 = vadd.f32 %v334_v22, %v118_v17  ;;  %v345_v35 = vrot.slane %v170_v16, 10  ;;  %v185_v38 = vunpack.c.l.bf16 %v347_v28 }
  0x17   : > { %v336_v31 = vrot.slane %v136_v23, 10  ;;  %v205_v39 = vunpack.c.l.bf16 %v353_v29  ;;  %v346_v44 = vrot.slane %v171_v32, 10  ;;  %v369_v45 = vunpack.c.h.bf16 %v370_v21 }
  0x18   : > { %v145_v27 = vadd.f32 %v335_v12, %v131_v20  ;;  %v351_v46 = vrot.slane %v368_v33, 9  ;;  %v206_v50 = vunpack.c.l.bf16 %v354_v41  ;;  %v240_v1 = vshrl.u32 %v239_v55, 7 }
  0x19   : > { %v146_v36 = vadd.f32 %v336_v31, %v132_v30  ;;  %v355_v52 = vrot.slane %v205_v39, 10  ;;  %v352_v54 = vrot.slane %v369_v45, 9 }
  0x1a   : > { %v152_v34 = vadd.f32 %v150_v15, %v145_v27  ;;  %v356_v60 = vrot.slane %v206_v50, 10  ;;  %v241_v6 = vsub.s32 %v238_v0, %v240_v1 }
  0x1b   : > { %v153_v43 = vadd.f32 %v151_v26, %v146_v36 }
  0x1c   : > { %v166_v42 = vadd.f32 %v341_v25, %v152_v34 }
  0x1d   : > { %v167_v48 = vadd.f32 %v342_v37, %v153_v43 }
  0x1e   : > { %v180_v47 = vadd.f32 %v345_v35, %v166_v42 }
  0x1f   : > { %v181_v53 = vadd.f32 %v346_v44, %v167_v48 }
  0x20   : > { %v187_v51 = vadd.f32 %v185_v38, %v180_v47 }
  0x21   : > { %v188_v59 = vadd.f32 %v186_v49, %v181_v53 }
  0x22   : > { %v201_v56 = vadd.f32 %v351_v46, %v187_v51 }
  0x23   : > { %v202_v62 = vadd.f32 %v352_v54, %v188_v59 }
  0x24   : > { %v215_v61 = vadd.f32 %v355_v52, %v201_v56 }
  0x25   : > { %v216_v2 = vadd.f32 %v356_v60, %v202_v62 }
  0x26   : > { %v217_v63 = vmul.f32 0.11111111, %v215_v61 }
  0x27   : > { %v218_v4 = vmul.f32 0.11111111, %v216_v2 }
  0x28   : > { %v219_v3 = vmax.f32 %v217_v63, 0.0 }
  0x29   : > { %v220_v7 = vmax.f32 %v218_v4, 0.0 }
  0x2a   : > { %v223_v5 = vcombine.high %v219_v3, %v219_v3 }
  0x2b   : > { %v224_v9 = vcombine.high %v220_v7, %v220_v7 }
  0x2c   : > { %v357_v8 = vpack.c.bf16 %v223_v5, %v219_v3 }
  0x2d   : > { %v358_v11 = vpack.c.bf16 %v224_v9, %v220_v7 }
  0x2e   : > { %v242_v10 = vrot.slane %v357_v8, %v241_v6 }
  0x2f   : > { %v257_v13 = vrot.slane %v358_v11, %v241_v6 }
  0x30   : > { %v249_v12 = vrot.slane %v242_v10, %v241_v6 }
  0x31   : > { %v264_v14 = vrot.slane %v257_v13, %v241_v6 }
  0x32   : > { %270 = vst.msk [vmem:[%s114_s15] sm:$0x3] %vm269_vm2, %v249_v12 }
  0x33   : > { %271 = vst.msk [vmem:[%s114_s15 + $0x2] sm:$0x3] %vm269_vm2, %v264_v14 }
  0x34 PF: > { %s11_s6 = sadd.s32 1, %s386_s6  }
  0x35   : > { %p8_p4 = scmp.ge.s32.totalorder %s11_s6, 4  }
  0x37   :  { %10 = sbr.rel (!%p8_p4) target bundleno = 1 (0x1), region = 56 }

// kernel: _lambda_.100
= control target key start
LH: loop header
LB: loop body
LE: loop exit
PB: predicated region body
PF: predicated region fallthrough
CT: control target
= control target key end

     0   :  { %s701_s15 = smov 0   ;;  %s808_s0 = inlined_call_operand.vmem [shape: bf16[2,3,3,400], index: 0, kind: input, shape index: {}]   ;;  %s809_s1 = inlined_call_operand.vmem [shape: f32[9,1,1,400], index: 1, kind: input, shape index: {}]   ;;  %s810_s2 = inlined_call_operand.vmem [shape: f32[1,1,400], index: 2, kind: input, shape index: {}]   ;;  %s811_s3 = inlined_call_operand.vmem [shape: f32[1,1,400], index: 3, kind: input, shape index: {}]   ;;  %s812_s4 = inlined_call_operand.vmem [shape: bf16[2,1,1,400], index: 4, kind: output, shape index: {}]  }
   0x1 LB: > { %s626_s16 = sadd.s32 4294967295, %s671_s15   ;;  %p630_p0 = scmp.ge.s32.totalorder %s671_s15, 1  ;;  %s671_s15 = sphi %s701_s15, %s14_s15  }
   0x2   : > { %p162_p1 = scmp.lt.s32.totalorder %s671_s15, 3 }
   0x4   : > { %p163_p2 = pnand %p630_p0, %p162_p1 }
   0x5   : > { %p187_p3 = scmp.lt.s32.totalorder (!%p163_p2), %s626_s16, 1  ;;  %v212_v0 = vlaneseq (!%p163_p2)  ;;  %v673_v1 = vmov (!%p163_p2), 286326784   ;;  %v196_v4 = vld [vmem:[%s809_s1] sm:$0xf] (!%p163_p2)  ;;  %v197_v5 = vld [vmem:[%s809_s1 + $0x4] sm:$0xf] (!%p163_p2) }
   0x6   : > { %166 = sbr.rel (%p163_p2) target bundleno = 57 (0x39), region = 36  ;;  %v210_v2 = vunpack.c.l.s4 (!%p163_p2), %v673_v1  ;;  %v198_v7 = vld [vmem:[%s809_s1 + $0x8] sm:$0xf] (!%p163_p2)  ;;  %v199_v8 = vld [vmem:[%s809_s1 + $0xc] sm:$0xf] (!%p163_p2)  ;;  %vm555_vm0 = vcmask (!%p163_p2), 1040384  }
   0x7   : > { %v711_v3 = vshrl.u32 (!%p163_p2), %v212_v0, 7  ;;  %v674_v9 = vmov (!%p163_p2), 858989090   ;;  %v200_v12 = vld [vmem:[%s809_s1 + $0x10] sm:$0xf] (!%p163_p2)  ;;  %vm558_vm2 = vcmask (!%p163_p2), 1041409  }
   0x8   : > { %v211_v6 = vunpack.c.0.s8 (!%p163_p2), %v210_v2  ;;  %v217_v10 = vunpack.c.l.s4 (!%p163_p2), %v674_v9  ;;  %v201_v38 = vld [vmem:[%s809_s1 + $0x14] sm:$0xf] (!%p163_p2)  ;;  %v202_v47 = vld [vmem:[%s809_s1 + $0x18] sm:$0xf] (!%p163_p2)  ;;  %v203_v57 = vld [vmem:[%s809_s1 + $0x1c] sm:$0xf] (!%p163_p2) }
   0x9   : > { %vm556_vm1 = vsmask.f32 (!%p163_p2), 256  ;;  %vm559_vm3 = vsmask.f32 (!%p163_p2), 1280  ;;  %vm562_vm6 = vcmask (!%p163_p2), 1042434   ;;  %vm566_vm10 = vcmask (!%p163_p2), 125955  }
   0xa   : > { %v727_v11 = vsub.s32 (!%p163_p2), %v211_v6, %v711_v3  ;;  %v218_v13 = vunpack.c.0.s8 (!%p163_p2), %v217_v10  ;;  %vm788_vm4 = vmand (!%p163_p2), %vm555_vm0, %vm556_vm1  ;;  %vm563_vm7 = vsmask.f32 (!%p163_p2), 2304  ;;  %vm567_vm11 = vsmask.f32 (!%p163_p2), 3328 }
   0xb   : > { %vm792_vm5 = vmand (!%p163_p2), %vm558_vm2, %vm559_vm3 }
   0xc   : > { %v215_v15 = vrot.slane (!%p163_p2), %v196_v4, %v727_v11  ;;  %v234_v16 = vrot.slane (!%p163_p2), %v197_v5, %v727_v11  ;;  %v266_v18 = vrot.slane (!%p163_p2), %v198_v7, %v727_v11  ;;  %v299_v20 = vrot.slane (!%p163_p2), %v199_v8, %v727_v11  ;;  %vm561_vm8 = vmor (!%p163_p2), %vm792_vm5, %vm788_vm4 }
   0xd   : > { %s818_s16 = smov (!%p187_p3, %s626_s16), 1  ;;  %v745_v23 = vsub.s32 %v218_v13, %v711_v3  ;;  %v320_v28 = vrot.slane %v200_v12, %v727_v11  ;;  %v352_v56 = vrot.slane %v201_v38, %v727_v11  ;;  %v385_v1 = vrot.slane %v202_v47, %v727_v11  ;;  %vm564_vm9 = vmand %vm562_vm6, %vm563_vm7 }
   0xe   : > { %s653_s21 = smul.u32 24, %s818_s16  ;;  %s632_s19 = sshll.u32 %s818_s16, 2  ;;  %vm565_vm12 = vmor %vm564_vm9, %vm561_vm8 }
   0xf   : > { %v222_v29 = vrot.slane %v196_v4, %v745_v23  ;;  %v241_v31 = vrot.slane %v197_v5, %v745_v23  ;;  %v273_v33 = vrot.slane %v198_v7, %v745_v23  ;;  %v306_v35 = vrot.slane %v199_v8, %v745_v23  ;;  %v204_v8 = vld [vmem:[%s809_s1 + $0x20] sm:$0xf]  ;;  %s195_s22 = scalar_lea.vmem %s812_s4, %s632_s19  ;;  %vm568_vm13 = vmand %vm566_vm10, %vm567_vm11 }
  0x10   : > { %s732_s28 = scalar_lea.vmem %s808_s0, %s653_s21  ;;  %v327_v42 = vrot.slane %v200_v12, %v745_v23  ;;  %v359_v61 = vrot.slane %v201_v38, %v745_v23  ;;  %v392_v6 = vrot.slane %v202_v47, %v745_v23  ;;  %v406_v12 = vrot.slane %v203_v57, %v727_v11  ;;  %vm569_vm14 = vmor %vm568_vm13, %vm565_vm12 }
  0x11   : > { %v205_v14 = vld [vmem:[%s732_s28] sm:$0x55]  ;;  %v256_v17 = vld [vmem:[%s732_s28] sm:$0xaa]  ;;  %v637_v19 = vld [vmem:[%s732_s28 + $0x8] sm:$0x55]  ;;  %v413_v13 = vrot.slane %v203_v57, %v745_v23 }
  0x12   : > { %v206_v21 = vunpack.c.l.bf16 %v205_v14  ;;  %v207_v22 = vunpack.c.h.bf16 %v205_v14  ;;  %v257_v24 = vunpack.c.l.bf16 %v256_v17  ;;  %v258_v25 = vunpack.c.h.bf16 %v256_v17  ;;  %v640_v37 = vld [vmem:[%s732_s28 + $0x8] sm:$0xaa]  ;;  %v643_v52 = vld [vmem:[%s732_s28 + $0x10] sm:$0x55]  ;;  %v646_v7 = vld [vmem:[%s732_s28 + $0x10] sm:$0xaa] }
  0x13   : > { %v290_v26 = vunpack.c.l.bf16 %v637_v19  ;;  %v291_v27 = vunpack.c.h.bf16 %v637_v19  ;;  %v343_v51 = vunpack.c.l.bf16 %v640_v37  ;;  %v344_v55 = vunpack.c.h.bf16 %v640_v37 }
  0x14   : > { %v225_v30 = vmul.f32 %v215_v15, %v206_v21  ;;  %v244_v32 = vmul.f32 %v234_v16, %v206_v21  ;;  %v276_v34 = vmul.f32 %v266_v18, %v257_v24  ;;  %v226_v39 = vmul.f32 %v222_v29, %v207_v22 }
  0x15   : > { %v309_v36 = vmul.f32 %v299_v20, %v290_v26  ;;  %v245_v40 = vmul.f32 %v241_v31, %v207_v22  ;;  %v277_v43 = vmul.f32 %v273_v33, %v258_v25  ;;  %v310_v45 = vmul.f32 %v306_v35, %v291_v27  ;;  %v480_v35 = vld [vmem:[%s811_s3] sm:$0xf] }
  0x16   : > { %v633_v41 = vrot.slane %v244_v32, 9  ;;  %v635_v44 = vrot.slane %v276_v34, 10  ;;  %v330_v46 = vmul.f32 %v320_v28, %v290_v26  ;;  %v331_v50 = vmul.f32 %v327_v42, %v291_v27  ;;  %v460_v27 = vld [vmem:[%s810_s2] sm:$0xf] }
  0x17   : > { %v634_v48 = vrot.slane %v245_v40, 9  ;;  %v636_v53 = vrot.slane %v277_v43, 10  ;;  %v362_v62 = vmul.f32 %v352_v56, %v343_v51  ;;  %v376_v63 = vunpack.c.l.bf16 %v643_v52 }
  0x18   : > { %v254_v49 = vadd.f32 %v633_v41, %v225_v30  ;;  %v638_v54 = vrot.slane %v330_v46, 9  ;;  %v639_v60 = vrot.slane %v331_v50, 9  ;;  %v377_v0 = vunpack.c.h.bf16 %v643_v52 }
  0x19   : > { %v255_v58 = vadd.f32 %v634_v48, %v226_v39  ;;  %v363_v5 = vmul.f32 %v359_v61, %v344_v55  ;;  %v641_v9 = vrot.slane %v362_v62, 10  ;;  %v395_v10 = vmul.f32 %v385_v1, %v376_v63 }
  0x1a   : > { %v286_v59 = vadd.f32 %v635_v44, %v254_v49  ;;  %v396_v17 = vmul.f32 %v392_v6, %v377_v0  ;;  %v416_v18 = vmul.f32 %v406_v12, %v376_v63  ;;  %v417_v19 = vmul.f32 %v413_v13, %v377_v0  ;;  %v570_v0 = vld [vmem:[%s195_s22] sm:$0xf] }
  0x1b   : > { %v287_v2 = vadd.f32 %v636_v53, %v255_v58  ;;  %v642_v16 = vrot.slane %v363_v5, 10  ;;  %v429_v20 = vunpack.c.l.bf16 %v646_v7  ;;  %v430_v21 = vunpack.c.h.bf16 %v646_v7 }
  0x1c   : > { %v311_v4 = vadd.f32 %v309_v36, %v286_v59  ;;  %v438_v25 = vrot.slane %v204_v8, %v727_v11  ;;  %v445_v26 = vrot.slane %v204_v8, %v745_v23  ;;  %v644_v28 = vrot.slane %v416_v18, 9 }
  0x1d   : > { %v312_v14 = vadd.f32 %v310_v45, %v287_v2  ;;  %v645_v29 = vrot.slane %v417_v19, 9  ;;  %v468_v34 = vrot.slane %v460_v27, %v727_v11  ;;  %v675_v36 = vmov 1966171168  }
  0x1e   : > { %v340_v15 = vadd.f32 %v638_v54, %v311_v4  ;;  %v448_v32 = vmul.f32 %v438_v25, %v429_v20  ;;  %v449_v33 = vmul.f32 %v445_v26, %v430_v21  ;;  %v533_v37 = vunpack.c.l.s4 %v675_v36 }
  0x1f   : > { %v341_v22 = vadd.f32 %v639_v60, %v312_v14  ;;  %v475_v44 = vrot.slane %v460_v27, %v745_v23  ;;  %v488_v45 = vrot.slane %v480_v35, %v727_v11  ;;  %v504_v46 = vsub.s32 0, %v711_v3 }
  0x20   : > { %v372_v24 = vadd.f32 %v641_v9, %v340_v15  ;;  %v647_v40 = vrot.slane %v448_v32, 10  ;;  %v648_v41 = vrot.slane %v449_v33, 10  ;;  %v508_v47 = vsub.s32 4, %v711_v3 }
  0x21   : > { %v373_v30 = vadd.f32 %v642_v16, %v341_v22  ;;  %v495_v50 = vrot.slane %v480_v35, %v745_v23  ;;  %v534_v51 = vunpack.c.0.s8 %v533_v37 }
  0x22   : > { %v397_v31 = vadd.f32 %v395_v10, %v372_v24 }
  0x23   : > { %v398_v38 = vadd.f32 %v396_v17, %v373_v30  ;;  %v537_v58 = vsub.s32 %v534_v51, %v711_v3 }
  0x24   : > { %v426_v39 = vadd.f32 %v644_v28, %v397_v31 }
  0x25   : > { %v427_v42 = vadd.f32 %v645_v29, %v398_v38 }
  0x26   : > { %v458_v43 = vadd.f32 %v647_v40, %v426_v39 }
  0x27   : > { %v459_v48 = vadd.f32 %v648_v41, %v427_v42 }
  0x28   : > { %v478_v49 = vmul.f32 %v468_v34, %v458_v43 }
  0x29   : > { %v479_v53 = vmul.f32 %v475_v44, %v459_v48 }
  0x2a   : > { %v498_v54 = vadd.f32 %v488_v45, %v478_v49 }
  0x2b   : > { %v499_v55 = vadd.f32 %v495_v50, %v479_v53 }
  0x2c   : > { %v505_v56 = vrot.slane %v498_v54, %v504_v46  ;;  %v509_v57 = vrot.slane %v498_v54, %v508_v47 }
  0x2d   : > { %v513_v23 = vrot.slane %v499_v55, %v504_v46  ;;  %v517_v59 = vrot.slane %v499_v55, %v508_v47 }
  0x2e   : > { %v649_v60 = vpack.c.bf16 %v509_v57, %v505_v56 }
  0x2f   : > { %v650_v61 = vpack.c.bf16 %v517_v59, %v513_v23 }
  0x30   : > { %v538_v62 = vrot.slane %v649_v60, %v537_v58 }
  0x31   : > { %v545_v3 = vrot.slane %v650_v61, %v537_v58 }
  0x33   : > { %v546_v63 = vcombine.low %v538_v62, %v545_v3 }
  0x35   : > { %v553_v1 = vrot.slane %v546_v63, %v537_v58 }
  0x37   : > { %v571_v2 = vsel %vm569_vm14, %v553_v1, %v570_v0 }
  0x38   : > { %572 = vst [vmem:[%s195_s22] sm:$0xf] %v571_v2 }
  0x39 PF: > { %s14_s15 = sadd.s32 1, %s671_s15  }
  0x3a   : > { %p11_p4 = scmp.ge.s32.totalorder %s14_s15, 4  }
  0x3c   :  { %13 = sbr.rel (!%p11_p4) target bundleno = 1 (0x1), region = 68 }

// kernel: _lambda_.108
= control target key start
LH: loop header
LB: loop body
LE: loop exit
PB: predicated region body
PF: predicated region fallthrough
CT: control target
= control target key end

     0   :  { %v16_v0 = vlaneseq  ;;  %v227_v2 = vmov 1966171168   ;;  %v228_v13 = vmov 1935823168   ;;  %vm173_vm0 = vcmask 1041409   ;;  %s245_s0 = inlined_call_operand.vmem [shape: bf16[2,1,1,400], index: 0, kind: input, shape index: {}]   ;;  %s246_s1 = inlined_call_operand.vmem [shape: bf16[2,400], index: 1, kind: output, shape index: {}]  }
   0x1   :  { %v222_v1 = vld [vmem:[%s245_s0] sm:$0xff]   ;;  %v75_v3 = vunpack.c.l.s4 %v227_v2  ;;  %v121_v14 = vunpack.c.l.s4 %v228_v13  ;;  %vm206_vm1 = vcmask 1040384   ;;  %vm208_vm3 = vcmask 1042434  }
   0x2   :  { %v223_v4 = vunpack.c.l.bf16 %v222_v1  ;;  %v17_v5 = vshrl.u32 %v16_v0, 7  ;;  %v224_v6 = vunpack.c.h.bf16 %v222_v1  ;;  %vm207_vm2 = vmor %vm173_vm0, %vm206_vm1  ;;  %vm210_vm5 = vcmask 125955  }
   0x3   :  { %v76_v7 = vunpack.c.0.s8 %v75_v3  ;;  %v122_v27 = vunpack.c.0.s8 %v121_v14  ;;  %vm209_vm4 = vmor %vm208_vm3, %vm207_vm2 }
   0x4   :  { %v18_v8 = vsub.s32 0, %v17_v5  ;;  %v22_v9 = vsub.s32 2, %v17_v5  ;;  %v26_v10 = vsub.s32 4, %v17_v5  ;;  %v30_v11 = vsub.s32 6, %v17_v5  ;;  %vm211_vm6 = vmor %vm210_vm5, %vm209_vm4 }
   0x5   :  { %v79_v12 = vsub.s32 %v76_v7, %v17_v5  ;;  %v125_v34 = vsub.s32 %v122_v27, %v17_v5 }
   0x6   :  { %v19_v15 = vrot.slane %v223_v4, %v18_v8  ;;  %v23_v16 = vrot.slane %v223_v4, %v22_v9  ;;  %v27_v17 = vrot.slane %v223_v4, %v26_v10  ;;  %v31_v18 = vrot.slane %v223_v4, %v30_v11 }
   0x7   :  { %v35_v19 = vrot.slane %v224_v6, %v18_v8  ;;  %v39_v20 = vrot.slane %v224_v6, %v22_v9  ;;  %v43_v21 = vrot.slane %v224_v6, %v26_v10  ;;  %v47_v22 = vrot.slane %v224_v6, %v30_v11 }
   0x8   :  { %v217_v23 = vpack.c.bf16 %v23_v16, %v19_v15  ;;  %v218_v24 = vpack.c.bf16 %v31_v18, %v27_v17 }
   0x9   :  { %v219_v25 = vpack.c.bf16 %v39_v20, %v35_v19  ;;  %v220_v26 = vpack.c.bf16 %v47_v22, %v43_v21 }
   0xa   :  { %v80_v28 = vrot.slane %v217_v23, %v79_v12  ;;  %v87_v29 = vrot.slane %v218_v24, %v79_v12 }
   0xb   :  { %v104_v30 = vrot.slane %v219_v25, %v79_v12  ;;  %v111_v31 = vrot.slane %v220_v26, %v79_v12 }
   0xc   :  { %v88_v32 = vcombine.low %v80_v28, %v87_v29 }
   0xd   :  { %v112_v33 = vcombine.low %v104_v30, %v111_v31 }
   0xe   :  { %v95_v35 = vrot.slane %v88_v32, %v79_v12 }
   0xf   :  { %v119_v36 = vrot.slane %v112_v33, %v79_v12 }
  0x10   :  { %v126_v37 = vrot.slane %v95_v35, %v125_v34 }
  0x11   :  { %v148_v38 = vrot.slane %v119_v36, %v125_v34 }
  0x12   :  { %v127_v39 = vcombine.high %v126_v37, %v126_v37  ;;  %v134_v40 = vrot.slane %v126_v37, %v125_v34 }
  0x13   :  { %v149_v41 = vcombine.high %v148_v38, %v148_v38  ;;  %v156_v42 = vrot.slane %v148_v38, %v125_v34 }
  0x14   :  { %v141_v43 = vrot.slane %v127_v39, %v125_v34  ;;  %v164_v44 = vunpack.c.l.b16 %v134_v40  ;;  %v165_v46 = vunpack.c.h.b16 %v134_v40 }
  0x15   :  { %v163_v45 = vrot.slane %v149_v41, %v125_v34  ;;  %v168_v47 = vunpack.c.l.b16 %v156_v42  ;;  %v169_v48 = vunpack.c.h.b16 %v156_v42 }
  0x16   :  { %v166_v49 = vunpack.c.l.b16 %v141_v43  ;;  %v167_v50 = vunpack.c.h.b16 %v141_v43 }
  0x17   :  { %v170_v51 = vunpack.c.l.b16 %v163_v45  ;;  %v171_v52 = vunpack.c.h.b16 %v163_v45  ;;  %v172_v53 = vrot.slane %v168_v47, 7  ;;  %v175_v54 = vrot.slane %v169_v48, 7 }
  0x19   :  { %v174_v55 = vsel %vm173_vm0, %v172_v53, %v164_v44  ;;  %v176_v56 = vsel %vm173_vm0, %v175_v54, %v165_v46  ;;  %v177_v57 = vrot.slane %v170_v51, 7  ;;  %v179_v58 = vrot.slane %v171_v52, 7 }
  0x1a   :  { %v181_v59 = vpack.c.b16 %v176_v56, %v174_v55 }
  0x1b   :  { %v178_v60 = vsel %vm173_vm0, %v177_v57, %v166_v49  ;;  %v180_v61 = vsel %vm173_vm0, %v179_v58, %v167_v50 }
  0x1c   :  { %v182_v62 = vpack.c.b16 %v180_v61, %v178_v60  ;;  %v189_v63 = vrot.slane %v181_v59, %v79_v12 }
  0x1e   :  { %v196_v0 = vrot.slane %v182_v62, %v79_v12 }
  0x20   :  { %v197_v1 = vcombine.low %v189_v63, %v196_v0 }
  0x22   :  { %v204_v2 = vrot.slane %v197_v1, %v79_v12 }
  0x24   :  { %212 = vst.msk [vmem:[%s246_s1] sm:$0xf] %vm211_vm6, %v204_v2 }

// kernel: _lambda_.99
= control target key start
LH: loop header
LB: loop body
LE: loop exit
PB: predicated region body
PF: predicated region fallthrough
CT: control target
= control target key end

     0   :  { %vm656_vm0 = vcmask 130048   ;;  %vm988_vm1 = vcmask 1043456   ;;  %vm989_vm2 = vcmask 130052   ;;  %s1683_s1 = inlined_call_operand.vmem [shape: bf16[400,400], index: 1, kind: input, shape index: {}]   ;;  %s1684_s0 = inlined_call_operand.vmem [shape: bf16[24,400], index: 0, kind: input, shape index: {}]   ;;  %s1685_s2 = inlined_call_operand.vmem [shape: f32[1,400], index: 2, kind: input, shape index: {}]   ;;  %s1686_s3 = inlined_call_operand.vmem [shape: f32[1,400], index: 3, kind: input, shape index: {}]   ;;  %s1687_s4 = inlined_call_operand.vmem [shape: bf16[24,400], index: 4, kind: output, shape index: {}]  }
   0x1   :  { %v1140_v0 = vld [vmem:[%s1683_s1 + $0x4] ss:$16 sps:$4 sm:$0xff]   ;;  %v1142_v1 = vld [vmem:[%s1683_s1 + $0xc] ss:$16 sps:$4 sm:$0xff]   ;;  %v1144_v2 = vld [vmem:[%s1683_s1] ss:$16 sps:$4 sm:$0xff]  }
   0x2   :  { %663 = vmatprep.subr.bf16.mxu0 %v1140_v0  ;;  %v1145_v3 = vld [vmem:[%s1683_s1 + $0x8] ss:$16 sps:$4 sm:$0xff]   ;;  %765 = vmatprep.subr.bf16.mxu1 %v1142_v1  ;;  %v1146_v4 = vld [vmem:[%s1683_s1 + $0x24] ss:$16 sps:$4 sm:$0xff]   ;;  %v1148_v5 = vld [vmem:[%s1683_s1 + $0x2c] ss:$16 sps:$4 sm:$0xff]  }
   0x3   :  { %664 = vmatpush1.bf16.msra.mxu0 %v1144_v2  ;;  %766 = vmatpush1.bf16.msra.mxu1 %v1145_v3  ;;  %v1150_v6 = vld [vmem:[%s1683_s1 + $0x20] ss:$16 sps:$4 sm:$0xff]   ;;  %v1151_v7 = vld [vmem:[%s1683_s1 + $0x28] ss:$16 sps:$4 sm:$0xff]   ;;  %v1152_v8 = vld [vmem:[%s1683_s1 + $0x44] ss:$16 sps:$4 sm:$0xff]  }
   0x4   :  { %665 = vmatprep.subr.bf16.mxu0 %v1146_v4  ;;  %767 = vmatprep.subr.bf16.mxu1 %v1148_v5  ;;  %v1154_v9 = vld [vmem:[%s1683_s1 + $0x4c] ss:$16 sps:$4 sm:$0xff]   ;;  %v1156_v10 = vld [vmem:[%s1683_s1 + $0x40] ss:$16 sps:$4 sm:$0xff]   ;;  %v1157_v11 = vld [vmem:[%s1683_s1 + $0x48] ss:$16 sps:$4 sm:$0xff]  }
   0x5   :  { %v1158_v12 = vld [vmem:[%s1683_s1 + $0x64] ss:$16 sps:$4 sm:$0xff]   ;;  %v1160_v13 = vld [vmem:[%s1683_s1 + $0x6c] ss:$16 sps:$4 sm:$0xff]   ;;  %v1162_v14 = vld [vmem:[%s1683_s1 + $0x60] ss:$16 sps:$4 sm:$0xff]  }
   0x6   :  { %v1163_v15 = vld [vmem:[%s1683_s1 + $0x68] ss:$16 sps:$4 sm:$0xff]   ;;  %v1164_v16 = vld [vmem:[%s1683_s1 + $0x84] ss:$16 sps:$4 sm:$0xff]   ;;  %v1166_v17 = vld [vmem:[%s1683_s1 + $0x8c] ss:$16 sps:$4 sm:$0xff]  }
   0x7   :  { %666 = vmatpush1.bf16.msra.mxu0 %v1150_v6  ;;  %768 = vmatpush1.bf16.msra.mxu1 %v1151_v7  ;;  %v1168_v18 = vld [vmem:[%s1683_s1 + $0x80] ss:$16 sps:$4 sm:$0xff]   ;;  %v1169_v19 = vld [vmem:[%s1683_s1 + $0x88] ss:$16 sps:$4 sm:$0xff]   ;;  %v1170_v20 = vld [vmem:[%s1683_s1 + $0xa4] ss:$16 sps:$4 sm:$0xff]  }
   0x8   :  { %667 = vmatprep.subr.bf16.mxu0 %v1152_v8  ;;  %769 = vmatprep.subr.bf16.mxu1 %v1154_v9  ;;  %v1172_v21 = vld [vmem:[%s1683_s1 + $0xac] ss:$16 sps:$4 sm:$0xff]   ;;  %v1174_v22 = vld [vmem:[%s1683_s1 + $0xa0] ss:$16 sps:$4 sm:$0xff]   ;;  %v1175_v23 = vld [vmem:[%s1683_s1 + $0xa8] ss:$16 sps:$4 sm:$0xff]  }
   0x9   :  { %v1176_v24 = vld [vmem:[%s1683_s1 + $0xc4] ss:$16 sps:$4 sm:$0xff]   ;;  %v1178_v25 = vld [vmem:[%s1683_s1 + $0xcc] ss:$16 sps:$4 sm:$0xff]   ;;  %v1180_v26 = vld [vmem:[%s1683_s1 + $0xc0] ss:$16 sps:$4 sm:$0xff]  }
   0xa   :  { %v1181_v27 = vld [vmem:[%s1683_s1 + $0xc8] ss:$16 sps:$4 sm:$0xff]   ;;  %v1182_v28 = vld [vmem:[%s1683_s1 + $0xe4] ss:$16 sps:$4 sm:$0xff]   ;;  %v1184_v29 = vld [vmem:[%s1683_s1 + $0xec] ss:$16 sps:$4 sm:$0xff]  }
   0xb   :  { %668 = vmatpush1.bf16.msra.mxu0 %v1156_v10  ;;  %770 = vmatpush1.bf16.msra.mxu1 %v1157_v11  ;;  %v1186_v30 = vld [vmem:[%s1683_s1 + $0xe0] ss:$16 sps:$4 sm:$0xff]   ;;  %v1187_v31 = vld [vmem:[%s1683_s1 + $0xe8] ss:$16 sps:$4 sm:$0xff]   ;;  %v1188_v32 = vld [vmem:[%s1683_s1 + $0x104] ss:$16 sps:$4 sm:$0xff]  }
   0xc   :  { %669 = vmatprep.subr.bf16.mxu0 %v1158_v12  ;;  %771 = vmatprep.subr.bf16.mxu1 %v1160_v13  ;;  %v1190_v33 = vld [vmem:[%s1683_s1 + $0x10c] ss:$16 sps:$4 sm:$0xff]   ;;  %v1192_v34 = vld [vmem:[%s1683_s1 + $0x100] ss:$16 sps:$4 sm:$0xff]   ;;  %v1193_v35 = vld [vmem:[%s1683_s1 + $0x108] ss:$16 sps:$4 sm:$0xff]  }
   0xd   :  { %v1194_v36 = vld [vmem:[%s1683_s1 + $0x124] ss:$16 sps:$4 sm:$0xff]   ;;  %v1196_v37 = vld [vmem:[%s1683_s1 + $0x12c] ss:$16 sps:$4 sm:$0xff]   ;;  %v1198_v38 = vld [vmem:[%s1683_s1 + $0x120] ss:$16 sps:$4 sm:$0xff]  }
   0xe   :  { %v1199_v39 = vld [vmem:[%s1683_s1 + $0x128] ss:$16 sps:$4 sm:$0xff]   ;;  %v1200_v40 = vld [vmem:[%s1683_s1 + $0x144] ss:$16 sps:$4 sm:$0xff]   ;;  %v1202_v41 = vld [vmem:[%s1683_s1 + $0x14c] ss:$16 sps:$4 sm:$0xff]  }
   0xf   :  { %670 = vmatpush1.bf16.msra.mxu0 %v1162_v14  ;;  %772 = vmatpush1.bf16.msra.mxu1 %v1163_v15  ;;  %v1204_v42 = vld [vmem:[%s1683_s1 + $0x140] ss:$16 sps:$4 sm:$0xff]   ;;  %v1205_v43 = vld [vmem:[%s1683_s1 + $0x148] ss:$16 sps:$4 sm:$0xff]   ;;  %v1206_v44 = vld [vmem:[%s1683_s1 + $0x164] ss:$16 sps:$4 sm:$0xff]  }
  0x10   :  { %671 = vmatprep.subr.bf16.mxu0 %v1164_v16  ;;  %773 = vmatprep.subr.bf16.mxu1 %v1166_v17  ;;  %v1208_v45 = vld [vmem:[%s1683_s1 + $0x16c] ss:$16 sps:$4 sm:$0xff]   ;;  %v1210_v46 = vld [vmem:[%s1683_s1 + $0x160] ss:$16 sps:$4 sm:$0xff]   ;;  %v1211_v47 = vld [vmem:[%s1683_s1 + $0x168] ss:$16 sps:$4 sm:$0xff]  }
  0x11   :  { %v1238_v48 = vld [vmem:[%s1684_s0 + $0x4] ss:$16 sps:$4 sm:$0xff]   ;;  %v1214_v50 = vld [vmem:[%s1683_s1 + $0x18c] ss:$16 sps:$4 sm:$0xff]   ;;  %v1216_v51 = vld [vmem:[%s1683_s1 + $0x180] ss:$16 sps:$4 sm:$0xff]  }
  0x12   :  { %v1212_v49 = vld [vmem:[%s1683_s1 + $0x184] ss:$16 sps:$4 sm:$0xff]   ;;  %695 = vmatprep.mubr.bf16.mxu0 %v1238_v48  ;;  %797 = vmatprep.mubr.bf16.mxu1 %v1238_v48  ;;  %v1217_v52 = vld [vmem:[%s1683_s1 + $0x188] ss:$16 sps:$4 sm:$0xff]   ;;  %v1220_v54 = vld [vmem:[%s1683_s1 + $0x1ac] ss:$16 sps:$4 sm:$0xff]  }
  0x13   :  { %672 = vmatpush1.bf16.msra.mxu0 %v1168_v18  ;;  %774 = vmatpush1.bf16.msra.mxu1 %v1169_v19  ;;  %v1218_v53 = vld [vmem:[%s1683_s1 + $0x1a4] ss:$16 sps:$4 sm:$0xff]   ;;  %v1222_v55 = vld [vmem:[%s1683_s1 + $0x1a0] ss:$16 sps:$4 sm:$0xff]   ;;  %v1223_v56 = vld [vmem:[%s1683_s1 + $0x1a8] ss:$16 sps:$4 sm:$0xff]  }
  0x14   :  { %673 = vmatprep.subr.bf16.mxu0 %v1170_v20  ;;  %775 = vmatprep.subr.bf16.mxu1 %v1172_v21  ;;  %v1224_v57 = vld [vmem:[%s1683_s1 + $0x1c4] ss:$16 sps:$4 sm:$0xff]   ;;  %v1226_v58 = vld [vmem:[%s1683_s1 + $0x1cc] ss:$16 sps:$4 sm:$0xff]   ;;  %v1228_v59 = vld [vmem:[%s1683_s1 + $0x1c0] ss:$16 sps:$4 sm:$0xff]  }
  0x15   :  { %v1229_v60 = vld [vmem:[%s1683_s1 + $0x1c8] ss:$16 sps:$4 sm:$0xff]   ;;  %v1230_v61 = vld [vmem:[%s1683_s1 + $0x1e4] ss:$16 sps:$4 sm:$0xff]   ;;  %v1232_v62 = vld [vmem:[%s1683_s1 + $0x1ec] ss:$16 sps:$4 sm:$0xff]  }
  0x16   :  { %v1234_v63 = vld [vmem:[%s1683_s1 + $0x1e0] ss:$16 sps:$4 sm:$0xff]   ;;  %v1235_v0 = vld [vmem:[%s1683_s1 + $0x1e8] ss:$16 sps:$4 sm:$0xff]   ;;  %v1241_v1 = vld [vmem:[%s1683_s1 + $0x204] ss:$16 sps:$4 sm:$0xff]  }
  0x17   :  { %674 = vmatpush1.bf16.msra.mxu0 %v1174_v22  ;;  %776 = vmatpush1.bf16.msra.mxu1 %v1175_v23  ;;  %v1244_v2 = vld [vmem:[%s1683_s1 + $0x20c] ss:$16 sps:$4 sm:$0xff]   ;;  %v1236_v3 = vld [vmem:[%s1684_s0] ss:$16 sps:$4 sm:$0xff]   ;;  %v1242_v6 = vld [vmem:[%s1683_s1 + $0x208] ss:$16 sps:$4 sm:$0xff]  }
  0x18   :  { %675 = vmatprep.subr.bf16.mxu0 %v1176_v24  ;;  %777 = vmatprep.subr.bf16.mxu1 %v1178_v25  ;;  %v1239_v4 = vld [vmem:[%s1683_s1 + $0x200] ss:$16 sps:$4 sm:$0xff]   ;;  %v1247_v7 = vld [vmem:[%s1683_s1 + $0x224] ss:$16 sps:$4 sm:$0xff]   ;;  %v1250_v8 = vld [vmem:[%s1683_s1 + $0x22c] ss:$16 sps:$4 sm:$0xff]  }
  0x19   :  { %v22_v5 = vld [vmem:[%s1684_s0 + $0x20] sm:$0xff]  ;;  %v1248_v11 = vld [vmem:[%s1683_s1 + $0x228] ss:$16 sps:$4 sm:$0xff]   ;;  %v1256_v13 = vld [vmem:[%s1683_s1 + $0x24c] ss:$16 sps:$4 sm:$0xff]  }
  0x1a   :  { %v1005_v9 = vcombine.high %v22_v5, %v22_v5  ;;  %v1245_v10 = vld [vmem:[%s1683_s1 + $0x220] ss:$16 sps:$4 sm:$0xff]   ;;  %v1253_v12 = vld [vmem:[%s1683_s1 + $0x244] ss:$16 sps:$4 sm:$0xff]   ;;  %v1004_v14 = vcombine.low %v22_v5, %v22_v5  ;;  %v1254_v16 = vld [vmem:[%s1683_s1 + $0x248] ss:$16 sps:$4 sm:$0xff]  }
  0x1b   :  { %676 = vmatpush1.bf16.msra.mxu0 %v1180_v26  ;;  %778 = vmatpush1.bf16.msra.mxu1 %v1181_v27  ;;  %v1251_v15 = vld [vmem:[%s1683_s1 + $0x240] ss:$16 sps:$4 sm:$0xff]   ;;  %v1259_v17 = vld [vmem:[%s1683_s1 + $0x264] ss:$16 sps:$4 sm:$0xff]   ;;  %v1262_v18 = vld [vmem:[%s1683_s1 + $0x26c] ss:$16 sps:$4 sm:$0xff]  }
  0x1c   :  { %677 = vmatprep.subr.bf16.mxu0 %v1182_v28  ;;  %779 = vmatprep.subr.bf16.mxu1 %v1184_v29  ;;  %v1297_v19 = vld [vmem:[%s1684_s0 + $0xc] ss:$16 sps:$4 sm:$0xff]   ;;  %v1257_v20 = vld [vmem:[%s1683_s1 + $0x260] ss:$16 sps:$4 sm:$0xff]   ;;  %v1260_v21 = vld [vmem:[%s1683_s1 + $0x268] ss:$16 sps:$4 sm:$0xff]  }
  0x1d   :  { %v1265_v22 = vld [vmem:[%s1683_s1 + $0x284] ss:$16 sps:$4 sm:$0xff]   ;;  %v1268_v23 = vld [vmem:[%s1683_s1 + $0x28c] ss:$16 sps:$4 sm:$0xff]   ;;  %v1263_v24 = vld [vmem:[%s1683_s1 + $0x280] ss:$16 sps:$4 sm:$0xff]  }
  0x1e   :  { %v1266_v25 = vld [vmem:[%s1683_s1 + $0x288] ss:$16 sps:$4 sm:$0xff]   ;;  %v1271_v26 = vld [vmem:[%s1683_s1 + $0x2a4] ss:$16 sps:$4 sm:$0xff]   ;;  %v1274_v27 = vld [vmem:[%s1683_s1 + $0x2ac] ss:$16 sps:$4 sm:$0xff]  }
  0x1f   :  { %678 = vmatpush1.bf16.msra.mxu0 %v1186_v30  ;;  %780 = vmatpush1.bf16.msra.mxu1 %v1187_v31  ;;  %v1269_v28 = vld [vmem:[%s1683_s1 + $0x2a0] ss:$16 sps:$4 sm:$0xff]   ;;  %v1272_v29 = vld [vmem:[%s1683_s1 + $0x2a8] ss:$16 sps:$4 sm:$0xff]   ;;  %v1277_v30 = vld [vmem:[%s1683_s1 + $0x2c4] ss:$16 sps:$4 sm:$0xff]  }
  0x20   :  { %679 = vmatprep.subr.bf16.mxu0 %v1188_v32  ;;  %781 = vmatprep.subr.bf16.mxu1 %v1190_v33  ;;  %v1280_v31 = vld [vmem:[%s1683_s1 + $0x2cc] ss:$16 sps:$4 sm:$0xff]   ;;  %v1275_v32 = vld [vmem:[%s1683_s1 + $0x2c0] ss:$16 sps:$4 sm:$0xff]   ;;  %v1278_v33 = vld [vmem:[%s1683_s1 + $0x2c8] ss:$16 sps:$4 sm:$0xff]  }
  0x21   :  { %vm1655_vm3 = vmor %vm989_vm2, %vm988_vm1 }
  0x23   :  { %680 = vmatpush1.bf16.msra.mxu0 %v1192_v34  ;;  %782 = vmatpush1.bf16.msra.mxu1 %v1193_v35  ;;  %v1285_v34 = vld [vmem:[%s1683_s1 + $0x2e4] ss:$16 sps:$4 sm:$0xff]   ;;  %v1288_v35 = vld [vmem:[%s1683_s1 + $0x2ec] ss:$16 sps:$4 sm:$0xff]  }
  0x24   :  { %681 = vmatprep.subr.bf16.mxu0 %v1194_v36  ;;  %783 = vmatprep.subr.bf16.mxu1 %v1196_v37  ;;  %v1283_v36 = vld [vmem:[%s1683_s1 + $0x2e0] ss:$16 sps:$4 sm:$0xff]   ;;  %v1286_v37 = vld [vmem:[%s1683_s1 + $0x2e8] ss:$16 sps:$4 sm:$0xff]  }
  0x27   :  { %682 = vmatpush1.bf16.msra.mxu0 %v1198_v38  ;;  %784 = vmatpush1.bf16.msra.mxu1 %v1199_v39  ;;  %v1291_v38 = vld [vmem:[%s1683_s1 + $0x304] ss:$16 sps:$4 sm:$0xff]   ;;  %v1294_v39 = vld [vmem:[%s1683_s1 + $0x30c] ss:$16 sps:$4 sm:$0xff]  }
  0x28   :  { %683 = vmatprep.subr.bf16.mxu0 %v1200_v40  ;;  %785 = vmatprep.subr.bf16.mxu1 %v1202_v41  ;;  %v1289_v40 = vld [vmem:[%s1683_s1 + $0x300] ss:$16 sps:$4 sm:$0xff]   ;;  %v1292_v41 = vld [vmem:[%s1683_s1 + $0x308] ss:$16 sps:$4 sm:$0xff]  }
  0x2b   :  { %684 = vmatpush1.bf16.msra.mxu0 %v1204_v42  ;;  %786 = vmatpush1.bf16.msra.mxu1 %v1205_v43  ;;  %v23_v42 = vld [vmem:[%s1684_s0 + $0x28] sm:$0xff] }
  0x2c   :  { %685 = vmatprep.subr.bf16.mxu0 %v1206_v44  ;;  %787 = vmatprep.subr.bf16.mxu1 %v1208_v45  ;;  %v1295_v43 = vld [vmem:[%s1684_s0 + $0x8] ss:$16 sps:$4 sm:$0xff]   ;;  %v1007_v44 = vcombine.high %v23_v42, %v23_v42  ;;  %v1006_v45 = vcombine.low %v23_v42, %v23_v42 }
  0x2f   :  { %686 = vmatpush1.bf16.msra.mxu0 %v1210_v46  ;;  %788 = vmatpush1.bf16.msra.mxu1 %v1211_v47  ;;  %v869_v46 = vlaneseq }
  0x30   :  { %687 = vmatprep.subr.bf16.mxu0 %v1212_v49  ;;  %789 = vmatprep.subr.bf16.mxu1 %v1214_v50  ;;  %v867_v50 = vld [vmem:[%s1685_s2] sm:$0xf] }
  0x31   :  { %v870_v47 = vshrl.u32 %v869_v46, 7 }
  0x33   :  { %688 = vmatpush1.bf16.msra.mxu0 %v1216_v51  ;;  %790 = vmatpush1.bf16.msra.mxu1 %v1217_v52  ;;  %v871_v48 = vsub.s32 0, %v870_v47  ;;  %v879_v49 = vsub.s32 2, %v870_v47  ;;  %v875_v51 = vsub.s32 1, %v870_v47  ;;  %v883_v52 = vsub.s32 3, %v870_v47 }
  0x34   :  { %689 = vmatprep.subr.bf16.mxu0 %v1218_v53  ;;  %791 = vmatprep.subr.bf16.mxu1 %v1220_v54  ;;  %v901_v53 = vld [vmem:[%s1686_s3] sm:$0xf] }
  0x35   :  { %v872_v54 = vrot.slane %v867_v50, %v871_v48 }
  0x37   :  { %690 = vmatpush1.bf16.msra.mxu0 %v1222_v55  ;;  %792 = vmatpush1.bf16.msra.mxu1 %v1223_v56  ;;  %v880_v55 = vrot.slane %v867_v50, %v879_v49  ;;  %v876_v56 = vrot.slane %v867_v50, %v875_v51 }
  0x38   :  { %691 = vmatprep.subr.bf16.mxu0 %v1224_v57  ;;  %793 = vmatprep.subr.bf16.mxu1 %v1226_v58  ;;  %v884_v57 = vrot.slane %v867_v50, %v883_v52  ;;  %v906_v58 = vrot.slane %v901_v53, %v871_v48 }
  0x3b   :  { %692 = vmatpush1.bf16.msra.mxu0 %v1228_v59  ;;  %794 = vmatpush1.bf16.msra.mxu1 %v1229_v60  ;;  %v914_v59 = vrot.slane %v901_v53, %v879_v49 }
  0x3c   :  { %693 = vmatprep.subr.bf16.mxu0 %v1230_v61  ;;  %795 = vmatprep.subr.bf16.mxu1 %v1232_v62  ;;  %v910_v62 = vrot.slane %v901_v53, %v875_v51 }
  0x3f   :  { %694 = vmatpush1.bf16.msra.mxu0 %v1234_v63  ;;  %796 = vmatpush1.bf16.msra.mxu1 %v1235_v0  ;;  %v918_v63 = vrot.slane %v901_v53, %v883_v52 }
  0x40   :  { %714 = vmatprep.subr.bf16.mxu0 %v1241_v1  ;;  %816 = vmatprep.subr.bf16.mxu1 %v1244_v2 }
  0x42   :  { %696 = vmatmul.mubr.bf16.vlgmr.msra.gmra.mrb[0].mxu0 %v1236_v3  ;;  %798 = vmatmul.mubr.bf16.vlgmr.msra.gmra.mrb[0].mxu1 %v1236_v3 }
  0x43   :  { %715 = vmatpush1.bf16.msra.mxu0 %v1239_v4  ;;  %817 = vmatpush1.bf16.msra.mxu1 %v1242_v6 }
  0x44   :  { %716 = vmatprep.subr.bf16.mxu0 %v1247_v7  ;;  %818 = vmatprep.subr.bf16.mxu1 %v1250_v8 }
  0x45   :  { %705 = vmatprep.mubr.bf16.mxu0 %v1005_v9  ;;  %807 = vmatprep.mubr.bf16.mxu1 %v1005_v9 }
  0x47   :  { %717 = vmatpush1.bf16.msra.mxu0 %v1245_v10  ;;  %819 = vmatpush1.bf16.msra.mxu1 %v1248_v11 }
  0x48   :  { %718 = vmatprep.subr.bf16.mxu0 %v1253_v12  ;;  %820 = vmatprep.subr.bf16.mxu1 %v1256_v13 }
  0x4a   :  { %706 = vmatmul.mubr.bf16.gmra.mrb[4].mxu0 %v1004_v14  ;;  %808 = vmatmul.mubr.bf16.gmra.mrb[4].mxu1 %v1004_v14 }
  0x4b   :  { %719 = vmatpush1.bf16.msra.mxu0 %v1251_v15  ;;  %821 = vmatpush1.bf16.msra.mxu1 %v1254_v16 }
  0x4c   :  { %720 = vmatprep.subr.bf16.mxu0 %v1259_v17  ;;  %822 = vmatprep.subr.bf16.mxu1 %v1262_v18 }
  0x4d   :  { %1108 = vmatprep.mubr.msk.bf16.mxu0 %vm656_vm0, %v1297_v19  ;;  %1110 = vmatprep.mubr.msk.bf16.mxu1 %vm656_vm0, %v1297_v19 }
  0x4f   :  { %721 = vmatpush1.bf16.msra.mxu0 %v1257_v20  ;;  %823 = vmatpush1.bf16.msra.mxu1 %v1260_v21 }
  0x50   :  { %722 = vmatprep.subr.bf16.mxu0 %v1265_v22  ;;  %824 = vmatprep.subr.bf16.mxu1 %v1268_v23 }
  0x53   :  { %723 = vmatpush1.bf16.msra.mxu0 %v1263_v24  ;;  %825 = vmatpush1.bf16.msra.mxu1 %v1266_v25 }
  0x54   :  { %724 = vmatprep.subr.bf16.mxu0 %v1271_v26  ;;  %826 = vmatprep.subr.bf16.mxu1 %v1274_v27 }
  0x57   :  { %725 = vmatpush1.bf16.msra.mxu0 %v1269_v28  ;;  %827 = vmatpush1.bf16.msra.mxu1 %v1272_v29 }
  0x58   :  { %726 = vmatprep.subr.bf16.mxu0 %v1277_v30  ;;  %828 = vmatprep.subr.bf16.mxu1 %v1280_v31 }
  0x5b   :  { %727 = vmatpush1.bf16.msra.mxu0 %v1275_v32  ;;  %829 = vmatpush1.bf16.msra.mxu1 %v1278_v33 }
  0x5c   :  { %728 = vmatprep.subr.bf16.mxu0 %v1285_v34  ;;  %830 = vmatprep.subr.bf16.mxu1 %v1288_v35 }
  0x5f   :  { %729 = vmatpush1.bf16.msra.mxu0 %v1283_v36  ;;  %831 = vmatpush1.bf16.msra.mxu1 %v1286_v37 }
  0x60   :  { %730 = vmatprep.subr.bf16.mxu0 %v1291_v38  ;;  %832 = vmatprep.subr.bf16.mxu1 %v1294_v39 }
  0x63   :  { %731 = vmatpush1.bf16.msra.mxu0 %v1289_v40  ;;  %833 = vmatpush1.bf16.msra.mxu1 %v1292_v41 }
  0x66   :  { %747 = vmatmul.mubr.bf16.vlgmr.msra.gmra.mrb[0].mxu0 %v1295_v43  ;;  %849 = vmatmul.mubr.bf16.vlgmr.msra.gmra.mrb[0].mxu1 %v1295_v43 }
  0x67   :  { %1109 = vmatprep.mubr.msk.bf16.mxu0 %vm656_vm0, %v1007_v44  ;;  %1111 = vmatprep.mubr.msk.bf16.mxu1 %vm656_vm0, %v1007_v44 }
  0x6e   :  { %757 = vmatmul.mubr.bf16.gmra.mrb[4].mxu0 %v1006_v45  ;;  %859 = vmatmul.mubr.bf16.gmra.mrb[4].mxu1 %v1006_v45 }
 0x139   :  { %v748_v60 = vpop.f32.mrb[0].mxu0  ;;  %v850_v61 = vpop.f32.mrb[0].mxu1 }
 0x13a   :  { %v889_v0 = vmul.f32 %v872_v54, %v748_v60  ;;  %v891_v1 = vmul.f32 %v880_v55, %v850_v61  ;;  %v750_v2 = vpop.f32.mrb[1].mxu0  ;;  %v852_v3 = vpop.f32.mrb[1].mxu1 }
 0x13b   :  { %v890_v4 = vmul.f32 %v876_v56, %v750_v2  ;;  %v892_v5 = vmul.f32 %v884_v57, %v852_v3  ;;  %v752_v6 = vpop.f32.mrb[2].mxu0  ;;  %v854_v7 = vpop.f32.mrb[2].mxu1 }
 0x13c   :  { %v923_v8 = vadd.f32 %v906_v58, %v889_v0  ;;  %v925_v9 = vadd.f32 %v914_v59, %v891_v1  ;;  %v893_v10 = vmul.f32 %v872_v54, %v752_v6  ;;  %v895_v11 = vmul.f32 %v880_v55, %v854_v7  ;;  %v754_v12 = vpop.f32.mrb[3].mxu0  ;;  %v856_v13 = vpop.f32.mrb[3].mxu1 }
 0x13d   :  { %v924_v14 = vadd.f32 %v910_v62, %v890_v4  ;;  %v926_v15 = vadd.f32 %v918_v63, %v892_v5  ;;  %v894_v16 = vmul.f32 %v876_v56, %v754_v12  ;;  %v896_v17 = vmul.f32 %v884_v57, %v856_v13 }
 0x13e   :  { %v935_v18 = vmax.f32 %v923_v8, 0.0  ;;  %v937_v19 = vmax.f32 %v925_v9, 0.0  ;;  %v927_v20 = vadd.f32 %v906_v58, %v893_v10  ;;  %v929_v21 = vadd.f32 %v914_v59, %v895_v11 }
 0x13f   :  { %v936_v22 = vmax.f32 %v924_v14, 0.0  ;;  %v938_v23 = vmax.f32 %v926_v15, 0.0  ;;  %v928_v24 = vadd.f32 %v910_v62, %v894_v16  ;;  %v930_v25 = vadd.f32 %v918_v63, %v896_v17 }
 0x140   :  { %v939_v27 = vmax.f32 %v927_v20, 0.0  ;;  %v941_v28 = vmax.f32 %v929_v21, 0.0 }
 0x141   :  { %v1118_v29 = vpack.c.bf16 %v936_v22, %v935_v18  ;;  %v1119_v30 = vpack.c.bf16 %v938_v23, %v937_v19  ;;  %v940_v31 = vmax.f32 %v928_v24, 0.0  ;;  %v942_v32 = vmax.f32 %v930_v25, 0.0  ;;  %v758_v33 = vpop.f32.mrb[4].mxu0  ;;  %v860_v34 = vpop.f32.mrb[4].mxu1 }
 0x142   :  { %v897_v35 = vmul.f32 %v872_v54, %v758_v33  ;;  %v899_v36 = vmul.f32 %v880_v55, %v860_v34  ;;  %v760_v37 = vpop.f32.mrb[5].mxu0  ;;  %v862_v38 = vpop.f32.mrb[5].mxu1 }
 0x143   :  { %987 = vst [vmem:[%s1687_s4] sm:$0xff] %v1118_v29  ;;  %991 = vst.msk [vmem:[%s1687_s4 + $0x8] sm:$0xff] %vm1655_vm3, %v1119_v30  ;;  %v1120_v39 = vpack.c.bf16 %v940_v31, %v939_v27  ;;  %v1121_v40 = vpack.c.bf16 %v942_v32, %v941_v28  ;;  %v898_v41 = vmul.f32 %v876_v56, %v760_v37  ;;  %v762_v43 = vpop.f32.mrb[6].mxu0  ;;  %v864_v44 = vpop.f32.mrb[6].mxu1 }
 0x144   :  { %v900_v42 = vmul.f32 %v884_v57, %v862_v38  ;;  %v931_v45 = vadd.f32 %v906_v58, %v897_v35  ;;  %v933_v46 = vadd.f32 %v914_v59, %v899_v36  ;;  %v763_v47 = vpop.f32.mrb[7].mxu0  ;;  %v865_v48 = vpop.f32.mrb[7].mxu1 }
 0x145   :  { %992 = vst [vmem:[%s1687_s4 + $0x10] sm:$0xff] %v1120_v39  ;;  %993 = vst.msk [vmem:[%s1687_s4 + $0x18] sm:$0xff] %vm1655_vm3, %v1121_v40  ;;  %v932_v49 = vadd.f32 %v910_v62, %v898_v41 }
 0x146   :  { %v934_v50 = vadd.f32 %v918_v63, %v900_v42  ;;  %v943_v51 = vmax.f32 %v931_v45, 0.0  ;;  %v945_v52 = vmax.f32 %v933_v46, 0.0 }
 0x147   :  { %v944_v53 = vmax.f32 %v932_v49, 0.0 }
 0x148   :  { %v946_v54 = vmax.f32 %v934_v50, 0.0 }
 0x149   :  { %v1122_v55 = vpack.c.bf16 %v944_v53, %v943_v51 }
 0x14a   :  { %v1123_v56 = vpack.c.bf16 %v946_v54, %v945_v52 }
 0x14b   :  { %994 = vst [vmem:[%s1687_s4 + $0x20] sm:$0xff] %v1122_v55 }
 0x14c   :  { %995 = vst.msk [vmem:[%s1687_s4 + $0x28] sm:$0xff] %vm1655_vm3, %v1123_v56 }

// kernel: _lambda_.101
= control target key start
LH: loop header
LB: loop body
LE: loop exit
PB: predicated region body
PF: predicated region fallthrough
CT: control target
= control target key end

     0   :  { %vm636_vm0 = vcmask 130048   ;;  %vm887_vm1 = vcmask 1043456   ;;  %vm888_vm2 = vcmask 130052   ;;  %s1527_s1 = inlined_call_operand.vmem [shape: bf16[400,400], index: 1, kind: input, shape index: {}]   ;;  %s1528_s0 = inlined_call_operand.vmem [shape: bf16[8,400], index: 0, kind: input, shape index: {}]   ;;  %s1529_s2 = inlined_call_operand.vmem [shape: f32[1,400], index: 2, kind: input, shape index: {}]   ;;  %s1530_s3 = inlined_call_operand.vmem [shape: f32[1,400], index: 3, kind: input, shape index: {}]   ;;  %s1531_s4 = inlined_call_operand.vmem [shape: bf16[8,400], index: 4, kind: input, shape index: {}]   ;;  %s1532_s5 = inlined_call_operand.vmem [shape: bf16[8,400], index: 5, kind: output, shape index: {}]  }
   0x1   :  { %v1013_v0 = vld [vmem:[%s1527_s1 + $0x4] ss:$16 sps:$4 sm:$0xff]   ;;  %v1015_v1 = vld [vmem:[%s1527_s1 + $0xc] ss:$16 sps:$4 sm:$0xff]   ;;  %v1017_v2 = vld [vmem:[%s1527_s1] ss:$16 sps:$4 sm:$0xff]  }
   0x2   :  { %640 = vmatprep.subr.bf16.mxu0 %v1013_v0  ;;  %v1018_v3 = vld [vmem:[%s1527_s1 + $0x8] ss:$16 sps:$4 sm:$0xff]   ;;  %722 = vmatprep.subr.bf16.mxu1 %v1015_v1  ;;  %v1019_v4 = vld [vmem:[%s1527_s1 + $0x24] ss:$16 sps:$4 sm:$0xff]   ;;  %v1021_v5 = vld [vmem:[%s1527_s1 + $0x2c] ss:$16 sps:$4 sm:$0xff]  }
   0x3   :  { %641 = vmatpush1.bf16.msra.mxu0 %v1017_v2  ;;  %723 = vmatpush1.bf16.msra.mxu1 %v1018_v3  ;;  %v1023_v6 = vld [vmem:[%s1527_s1 + $0x20] ss:$16 sps:$4 sm:$0xff]   ;;  %v1024_v7 = vld [vmem:[%s1527_s1 + $0x28] ss:$16 sps:$4 sm:$0xff]   ;;  %v1025_v8 = vld [vmem:[%s1527_s1 + $0x44] ss:$16 sps:$4 sm:$0xff]  }
   0x4   :  { %642 = vmatprep.subr.bf16.mxu0 %v1019_v4  ;;  %724 = vmatprep.subr.bf16.mxu1 %v1021_v5  ;;  %v1027_v9 = vld [vmem:[%s1527_s1 + $0x4c] ss:$16 sps:$4 sm:$0xff]   ;;  %v1029_v10 = vld [vmem:[%s1527_s1 + $0x40] ss:$16 sps:$4 sm:$0xff]   ;;  %v1030_v11 = vld [vmem:[%s1527_s1 + $0x48] ss:$16 sps:$4 sm:$0xff]  }
   0x5   :  { %v1031_v12 = vld [vmem:[%s1527_s1 + $0x64] ss:$16 sps:$4 sm:$0xff]   ;;  %v1033_v13 = vld [vmem:[%s1527_s1 + $0x6c] ss:$16 sps:$4 sm:$0xff]   ;;  %v1035_v14 = vld [vmem:[%s1527_s1 + $0x60] ss:$16 sps:$4 sm:$0xff]  }
   0x6   :  { %v1036_v15 = vld [vmem:[%s1527_s1 + $0x68] ss:$16 sps:$4 sm:$0xff]   ;;  %v1037_v16 = vld [vmem:[%s1527_s1 + $0x84] ss:$16 sps:$4 sm:$0xff]   ;;  %v1039_v17 = vld [vmem:[%s1527_s1 + $0x8c] ss:$16 sps:$4 sm:$0xff]  }
   0x7   :  { %643 = vmatpush1.bf16.msra.mxu0 %v1023_v6  ;;  %725 = vmatpush1.bf16.msra.mxu1 %v1024_v7  ;;  %v1041_v18 = vld [vmem:[%s1527_s1 + $0x80] ss:$16 sps:$4 sm:$0xff]   ;;  %v1042_v19 = vld [vmem:[%s1527_s1 + $0x88] ss:$16 sps:$4 sm:$0xff]   ;;  %v1043_v20 = vld [vmem:[%s1527_s1 + $0xa4] ss:$16 sps:$4 sm:$0xff]  }
   0x8   :  { %644 = vmatprep.subr.bf16.mxu0 %v1025_v8  ;;  %726 = vmatprep.subr.bf16.mxu1 %v1027_v9  ;;  %v1045_v21 = vld [vmem:[%s1527_s1 + $0xac] ss:$16 sps:$4 sm:$0xff]   ;;  %v1047_v22 = vld [vmem:[%s1527_s1 + $0xa0] ss:$16 sps:$4 sm:$0xff]   ;;  %v1048_v23 = vld [vmem:[%s1527_s1 + $0xa8] ss:$16 sps:$4 sm:$0xff]  }
   0x9   :  { %v1049_v24 = vld [vmem:[%s1527_s1 + $0xc4] ss:$16 sps:$4 sm:$0xff]   ;;  %v1051_v25 = vld [vmem:[%s1527_s1 + $0xcc] ss:$16 sps:$4 sm:$0xff]   ;;  %v1053_v26 = vld [vmem:[%s1527_s1 + $0xc0] ss:$16 sps:$4 sm:$0xff]  }
   0xa   :  { %v1054_v27 = vld [vmem:[%s1527_s1 + $0xc8] ss:$16 sps:$4 sm:$0xff]   ;;  %v1055_v28 = vld [vmem:[%s1527_s1 + $0xe4] ss:$16 sps:$4 sm:$0xff]   ;;  %v1057_v29 = vld [vmem:[%s1527_s1 + $0xec] ss:$16 sps:$4 sm:$0xff]  }
   0xb   :  { %645 = vmatpush1.bf16.msra.mxu0 %v1029_v10  ;;  %727 = vmatpush1.bf16.msra.mxu1 %v1030_v11  ;;  %v1059_v30 = vld [vmem:[%s1527_s1 + $0xe0] ss:$16 sps:$4 sm:$0xff]   ;;  %v1060_v31 = vld [vmem:[%s1527_s1 + $0xe8] ss:$16 sps:$4 sm:$0xff]   ;;  %v1061_v32 = vld [vmem:[%s1527_s1 + $0x104] ss:$16 sps:$4 sm:$0xff]  }
   0xc   :  { %646 = vmatprep.subr.bf16.mxu0 %v1031_v12  ;;  %728 = vmatprep.subr.bf16.mxu1 %v1033_v13  ;;  %v1063_v33 = vld [vmem:[%s1527_s1 + $0x10c] ss:$16 sps:$4 sm:$0xff]   ;;  %v1065_v34 = vld [vmem:[%s1527_s1 + $0x100] ss:$16 sps:$4 sm:$0xff]   ;;  %v1066_v35 = vld [vmem:[%s1527_s1 + $0x108] ss:$16 sps:$4 sm:$0xff]  }
   0xd   :  { %v1067_v36 = vld [vmem:[%s1527_s1 + $0x124] ss:$16 sps:$4 sm:$0xff]   ;;  %v1069_v37 = vld [vmem:[%s1527_s1 + $0x12c] ss:$16 sps:$4 sm:$0xff]   ;;  %v1071_v38 = vld [vmem:[%s1527_s1 + $0x120] ss:$16 sps:$4 sm:$0xff]  }
   0xe   :  { %v1072_v39 = vld [vmem:[%s1527_s1 + $0x128] ss:$16 sps:$4 sm:$0xff]   ;;  %v1073_v40 = vld [vmem:[%s1527_s1 + $0x144] ss:$16 sps:$4 sm:$0xff]   ;;  %v1075_v41 = vld [vmem:[%s1527_s1 + $0x14c] ss:$16 sps:$4 sm:$0xff]  }
   0xf   :  { %647 = vmatpush1.bf16.msra.mxu0 %v1035_v14  ;;  %729 = vmatpush1.bf16.msra.mxu1 %v1036_v15  ;;  %v1077_v42 = vld [vmem:[%s1527_s1 + $0x140] ss:$16 sps:$4 sm:$0xff]   ;;  %v1078_v43 = vld [vmem:[%s1527_s1 + $0x148] ss:$16 sps:$4 sm:$0xff]   ;;  %v1079_v44 = vld [vmem:[%s1527_s1 + $0x164] ss:$16 sps:$4 sm:$0xff]  }
  0x10   :  { %648 = vmatprep.subr.bf16.mxu0 %v1037_v16  ;;  %730 = vmatprep.subr.bf16.mxu1 %v1039_v17  ;;  %v1081_v45 = vld [vmem:[%s1527_s1 + $0x16c] ss:$16 sps:$4 sm:$0xff]   ;;  %v21_v46 = vld [vmem:[%s1528_s0] sm:$0xff]  ;;  %v1084_v49 = vld [vmem:[%s1527_s1 + $0x168] ss:$16 sps:$4 sm:$0xff]  }
  0x11   :  { %v896_v47 = vcombine.high %v21_v46, %v21_v46  ;;  %v1083_v48 = vld [vmem:[%s1527_s1 + $0x160] ss:$16 sps:$4 sm:$0xff]   ;;  %v1085_v50 = vld [vmem:[%s1527_s1 + $0x184] ss:$16 sps:$4 sm:$0xff]   ;;  %v1087_v51 = vld [vmem:[%s1527_s1 + $0x18c] ss:$16 sps:$4 sm:$0xff]   ;;  %v895_v5 = vcombine.low %v21_v46, %v21_v46 }
  0x12   :  { %v1089_v52 = vld [vmem:[%s1527_s1 + $0x180] ss:$16 sps:$4 sm:$0xff]   ;;  %v1090_v53 = vld [vmem:[%s1527_s1 + $0x188] ss:$16 sps:$4 sm:$0xff]   ;;  %v1091_v54 = vld [vmem:[%s1527_s1 + $0x1a4] ss:$16 sps:$4 sm:$0xff]  }
  0x13   :  { %649 = vmatpush1.bf16.msra.mxu0 %v1041_v18  ;;  %731 = vmatpush1.bf16.msra.mxu1 %v1042_v19  ;;  %v1093_v55 = vld [vmem:[%s1527_s1 + $0x1ac] ss:$16 sps:$4 sm:$0xff]   ;;  %v1095_v56 = vld [vmem:[%s1527_s1 + $0x1a0] ss:$16 sps:$4 sm:$0xff]   ;;  %v1096_v57 = vld [vmem:[%s1527_s1 + $0x1a8] ss:$16 sps:$4 sm:$0xff]  }
  0x14   :  { %650 = vmatprep.subr.bf16.mxu0 %v1043_v20  ;;  %732 = vmatprep.subr.bf16.mxu1 %v1045_v21  ;;  %v1097_v58 = vld [vmem:[%s1527_s1 + $0x1c4] ss:$16 sps:$4 sm:$0xff]   ;;  %v1099_v59 = vld [vmem:[%s1527_s1 + $0x1cc] ss:$16 sps:$4 sm:$0xff]   ;;  %v1101_v60 = vld [vmem:[%s1527_s1 + $0x1c0] ss:$16 sps:$4 sm:$0xff]  }
  0x15   :  { %672 = vmatprep.mubr.bf16.mxu0 %v896_v47  ;;  %754 = vmatprep.mubr.bf16.mxu1 %v896_v47  ;;  %v1102_v61 = vld [vmem:[%s1527_s1 + $0x1c8] ss:$16 sps:$4 sm:$0xff]   ;;  %v1103_v62 = vld [vmem:[%s1527_s1 + $0x1e4] ss:$16 sps:$4 sm:$0xff]   ;;  %v1105_v63 = vld [vmem:[%s1527_s1 + $0x1ec] ss:$16 sps:$4 sm:$0xff]  }
  0x16   :  { %v1107_v0 = vld [vmem:[%s1527_s1 + $0x1e0] ss:$16 sps:$4 sm:$0xff]   ;;  %v1108_v1 = vld [vmem:[%s1527_s1 + $0x1e8] ss:$16 sps:$4 sm:$0xff]   ;;  %v1115_v2 = vld [vmem:[%s1527_s1 + $0x204] ss:$16 sps:$4 sm:$0xff]  }
  0x17   :  { %651 = vmatpush1.bf16.msra.mxu0 %v1047_v22  ;;  %733 = vmatpush1.bf16.msra.mxu1 %v1048_v23  ;;  %v1118_v3 = vld [vmem:[%s1527_s1 + $0x20c] ss:$16 sps:$4 sm:$0xff]   ;;  %v1113_v6 = vld [vmem:[%s1527_s1 + $0x200] ss:$16 sps:$4 sm:$0xff]   ;;  %v1116_v7 = vld [vmem:[%s1527_s1 + $0x208] ss:$16 sps:$4 sm:$0xff]  }
  0x18   :  { %652 = vmatprep.subr.bf16.mxu0 %v1049_v24  ;;  %734 = vmatprep.subr.bf16.mxu1 %v1051_v25  ;;  %v1401_v4 = vld [vmem:[%s1528_s0 + $0x8] sm:$0xff]  ;;  %v1121_v8 = vld [vmem:[%s1527_s1 + $0x224] ss:$16 sps:$4 sm:$0xff]   ;;  %v1119_v11 = vld [vmem:[%s1527_s1 + $0x220] ss:$16 sps:$4 sm:$0xff]  }
  0x19   :  { %v1124_v9 = vld [vmem:[%s1527_s1 + $0x22c] ss:$16 sps:$4 sm:$0xff]   ;;  %v898_v10 = vcombine.high %v1401_v4, %v1401_v4  ;;  %v1122_v12 = vld [vmem:[%s1527_s1 + $0x228] ss:$16 sps:$4 sm:$0xff]   ;;  %v1127_v13 = vld [vmem:[%s1527_s1 + $0x244] ss:$16 sps:$4 sm:$0xff]  }
  0x1a   :  { %v1130_v14 = vld [vmem:[%s1527_s1 + $0x24c] ss:$16 sps:$4 sm:$0xff]   ;;  %v1125_v15 = vld [vmem:[%s1527_s1 + $0x240] ss:$16 sps:$4 sm:$0xff]   ;;  %v1128_v16 = vld [vmem:[%s1527_s1 + $0x248] ss:$16 sps:$4 sm:$0xff]  }
  0x1b   :  { %653 = vmatpush1.bf16.msra.mxu0 %v1053_v26  ;;  %735 = vmatpush1.bf16.msra.mxu1 %v1054_v27  ;;  %v1133_v17 = vld [vmem:[%s1527_s1 + $0x264] ss:$16 sps:$4 sm:$0xff]   ;;  %v1136_v18 = vld [vmem:[%s1527_s1 + $0x26c] ss:$16 sps:$4 sm:$0xff]   ;;  %v1131_v19 = vld [vmem:[%s1527_s1 + $0x260] ss:$16 sps:$4 sm:$0xff]  }
  0x1c   :  { %654 = vmatprep.subr.bf16.mxu0 %v1055_v28  ;;  %736 = vmatprep.subr.bf16.mxu1 %v1057_v29  ;;  %v1134_v20 = vld [vmem:[%s1527_s1 + $0x268] ss:$16 sps:$4 sm:$0xff]   ;;  %v1139_v21 = vld [vmem:[%s1527_s1 + $0x284] ss:$16 sps:$4 sm:$0xff]   ;;  %v1142_v22 = vld [vmem:[%s1527_s1 + $0x28c] ss:$16 sps:$4 sm:$0xff]  }
  0x1d   :  { %v1137_v23 = vld [vmem:[%s1527_s1 + $0x280] ss:$16 sps:$4 sm:$0xff]   ;;  %v1140_v24 = vld [vmem:[%s1527_s1 + $0x288] ss:$16 sps:$4 sm:$0xff]   ;;  %v1145_v25 = vld [vmem:[%s1527_s1 + $0x2a4] ss:$16 sps:$4 sm:$0xff]  }
  0x1e   :  { %v1148_v26 = vld [vmem:[%s1527_s1 + $0x2ac] ss:$16 sps:$4 sm:$0xff]   ;;  %v1143_v27 = vld [vmem:[%s1527_s1 + $0x2a0] ss:$16 sps:$4 sm:$0xff]   ;;  %v1146_v28 = vld [vmem:[%s1527_s1 + $0x2a8] ss:$16 sps:$4 sm:$0xff]  }
  0x1f   :  { %655 = vmatpush1.bf16.msra.mxu0 %v1059_v30  ;;  %737 = vmatpush1.bf16.msra.mxu1 %v1060_v31  ;;  %v1151_v29 = vld [vmem:[%s1527_s1 + $0x2c4] ss:$16 sps:$4 sm:$0xff]   ;;  %v1154_v30 = vld [vmem:[%s1527_s1 + $0x2cc] ss:$16 sps:$4 sm:$0xff]   ;;  %v1149_v31 = vld [vmem:[%s1527_s1 + $0x2c0] ss:$16 sps:$4 sm:$0xff]  }
  0x20   :  { %656 = vmatprep.subr.bf16.mxu0 %v1061_v32  ;;  %738 = vmatprep.subr.bf16.mxu1 %v1063_v33  ;;  %v1152_v32 = vld [vmem:[%s1527_s1 + $0x2c8] ss:$16 sps:$4 sm:$0xff]   ;;  %v1157_v33 = vld [vmem:[%s1527_s1 + $0x2e4] ss:$16 sps:$4 sm:$0xff]   ;;  %v804_v46 = vld [vmem:[%s1529_s2] sm:$0xf] }
  0x21   :  { %vm889_vm3 = vmor %vm888_vm2, %vm887_vm1 }
  0x23   :  { %657 = vmatpush1.bf16.msra.mxu0 %v1065_v34  ;;  %739 = vmatpush1.bf16.msra.mxu1 %v1066_v35  ;;  %v1160_v34 = vld [vmem:[%s1527_s1 + $0x2ec] ss:$16 sps:$4 sm:$0xff]   ;;  %v1155_v35 = vld [vmem:[%s1527_s1 + $0x2e0] ss:$16 sps:$4 sm:$0xff]  }
  0x24   :  { %658 = vmatprep.subr.bf16.mxu0 %v1067_v36  ;;  %740 = vmatprep.subr.bf16.mxu1 %v1069_v37  ;;  %v1158_v36 = vld [vmem:[%s1527_s1 + $0x2e8] ss:$16 sps:$4 sm:$0xff]   ;;  %v1163_v37 = vld [vmem:[%s1527_s1 + $0x304] ss:$16 sps:$4 sm:$0xff]  }
  0x27   :  { %659 = vmatpush1.bf16.msra.mxu0 %v1071_v38  ;;  %741 = vmatpush1.bf16.msra.mxu1 %v1072_v39  ;;  %v1166_v38 = vld [vmem:[%s1527_s1 + $0x30c] ss:$16 sps:$4 sm:$0xff]   ;;  %v1161_v39 = vld [vmem:[%s1527_s1 + $0x300] ss:$16 sps:$4 sm:$0xff]  }
  0x28   :  { %660 = vmatprep.subr.bf16.mxu0 %v1073_v40  ;;  %742 = vmatprep.subr.bf16.mxu1 %v1075_v41  ;;  %v1164_v40 = vld [vmem:[%s1527_s1 + $0x308] ss:$16 sps:$4 sm:$0xff]   ;;  %v897_v41 = vcombine.low %v1401_v4, %v1401_v4 }
  0x2b   :  { %661 = vmatpush1.bf16.msra.mxu0 %v1077_v42  ;;  %743 = vmatpush1.bf16.msra.mxu1 %v1078_v43  ;;  %v806_v42 = vlaneseq }
  0x2c   :  { %662 = vmatprep.subr.bf16.mxu0 %v1079_v44  ;;  %744 = vmatprep.subr.bf16.mxu1 %v1081_v45 }
  0x2d   :  { %v807_v43 = vshrl.u32 %v806_v42, 7 }
  0x2f   :  { %663 = vmatpush1.bf16.msra.mxu0 %v1083_v48  ;;  %745 = vmatpush1.bf16.msra.mxu1 %v1084_v49  ;;  %v808_v44 = vsub.s32 0, %v807_v43  ;;  %v816_v45 = vsub.s32 2, %v807_v43  ;;  %v812_v47 = vsub.s32 1, %v807_v43  ;;  %v820_v48 = vsub.s32 3, %v807_v43  ;;  %v830_v49 = vld [vmem:[%s1530_s3] sm:$0xf] }
  0x30   :  { %664 = vmatprep.subr.bf16.mxu0 %v1085_v50  ;;  %746 = vmatprep.subr.bf16.mxu1 %v1087_v51 }
  0x31   :  { %v809_v50 = vrot.slane %v804_v46, %v808_v44  ;;  %v817_v51 = vrot.slane %v804_v46, %v816_v45 }
  0x33   :  { %665 = vmatpush1.bf16.msra.mxu0 %v1089_v52  ;;  %747 = vmatpush1.bf16.msra.mxu1 %v1090_v53  ;;  %v856_v52 = vld [vmem:[%s1531_s4] sm:$0xff]  ;;  %v857_v53 = vld [vmem:[%s1531_s4 + $0x8] sm:$0xff] }
  0x34   :  { %666 = vmatprep.subr.bf16.mxu0 %v1091_v54  ;;  %748 = vmatprep.subr.bf16.mxu1 %v1093_v55  ;;  %v813_v54 = vrot.slane %v804_v46, %v812_v47  ;;  %v821_v55 = vrot.slane %v804_v46, %v820_v48 }
  0x37   :  { %667 = vmatpush1.bf16.msra.mxu0 %v1095_v56  ;;  %749 = vmatpush1.bf16.msra.mxu1 %v1096_v57  ;;  %v835_v56 = vrot.slane %v830_v49, %v808_v44  ;;  %v843_v57 = vrot.slane %v830_v49, %v816_v45 }
  0x38   :  { %668 = vmatprep.subr.bf16.mxu0 %v1097_v58  ;;  %750 = vmatprep.subr.bf16.mxu1 %v1099_v59 }
  0x3b   :  { %669 = vmatpush1.bf16.msra.mxu0 %v1101_v60  ;;  %751 = vmatpush1.bf16.msra.mxu1 %v1102_v61  ;;  %v839_v60 = vrot.slane %v830_v49, %v812_v47  ;;  %v847_v61 = vrot.slane %v830_v49, %v820_v48 }
  0x3c   :  { %670 = vmatprep.subr.bf16.mxu0 %v1103_v62  ;;  %752 = vmatprep.subr.bf16.mxu1 %v1105_v63  ;;  %v858_v63 = vunpack.c.l.bf16 %v856_v52 }
  0x3f   :  { %671 = vmatpush1.bf16.msra.mxu0 %v1107_v0  ;;  %753 = vmatpush1.bf16.msra.mxu1 %v1108_v1  ;;  %v860_v1 = vunpack.c.l.bf16 %v857_v53 }
  0x40   :  { %681 = vmatprep.subr.bf16.mxu0 %v1115_v2  ;;  %763 = vmatprep.subr.bf16.mxu1 %v1118_v3 }
  0x42   :  { %673 = vmatmul.mubr.bf16.vlgmr.msra.gmra.mrb[0].mxu0 %v895_v5  ;;  %755 = vmatmul.mubr.bf16.vlgmr.msra.gmra.mrb[0].mxu1 %v895_v5  ;;  %v859_v5 = vunpack.c.h.bf16 %v856_v52 }
  0x43   :  { %682 = vmatpush1.bf16.msra.mxu0 %v1113_v6  ;;  %764 = vmatpush1.bf16.msra.mxu1 %v1116_v7  ;;  %v861_v7 = vunpack.c.h.bf16 %v857_v53 }
  0x44   :  { %683 = vmatprep.subr.bf16.mxu0 %v1121_v8  ;;  %765 = vmatprep.subr.bf16.mxu1 %v1124_v9 }
  0x45   :  { %999 = vmatprep.mubr.msk.bf16.mxu0 %vm636_vm0, %v898_v10  ;;  %1000 = vmatprep.mubr.msk.bf16.mxu1 %vm636_vm0, %v898_v10 }
  0x47   :  { %684 = vmatpush1.bf16.msra.mxu0 %v1119_v11  ;;  %766 = vmatpush1.bf16.msra.mxu1 %v1122_v12 }
  0x48   :  { %685 = vmatprep.subr.bf16.mxu0 %v1127_v13  ;;  %767 = vmatprep.subr.bf16.mxu1 %v1130_v14 }
  0x4b   :  { %686 = vmatpush1.bf16.msra.mxu0 %v1125_v15  ;;  %768 = vmatpush1.bf16.msra.mxu1 %v1128_v16 }
  0x4c   :  { %687 = vmatprep.subr.bf16.mxu0 %v1133_v17  ;;  %769 = vmatprep.subr.bf16.mxu1 %v1136_v18 }
  0x4f   :  { %688 = vmatpush1.bf16.msra.mxu0 %v1131_v19  ;;  %770 = vmatpush1.bf16.msra.mxu1 %v1134_v20 }
  0x50   :  { %689 = vmatprep.subr.bf16.mxu0 %v1139_v21  ;;  %771 = vmatprep.subr.bf16.mxu1 %v1142_v22 }
  0x53   :  { %690 = vmatpush1.bf16.msra.mxu0 %v1137_v23  ;;  %772 = vmatpush1.bf16.msra.mxu1 %v1140_v24 }
  0x54   :  { %691 = vmatprep.subr.bf16.mxu0 %v1145_v25  ;;  %773 = vmatprep.subr.bf16.mxu1 %v1148_v26 }
  0x57   :  { %692 = vmatpush1.bf16.msra.mxu0 %v1143_v27  ;;  %774 = vmatpush1.bf16.msra.mxu1 %v1146_v28 }
  0x58   :  { %693 = vmatprep.subr.bf16.mxu0 %v1151_v29  ;;  %775 = vmatprep.subr.bf16.mxu1 %v1154_v30 }
  0x5b   :  { %694 = vmatpush1.bf16.msra.mxu0 %v1149_v31  ;;  %776 = vmatpush1.bf16.msra.mxu1 %v1152_v32 }
  0x5c   :  { %695 = vmatprep.subr.bf16.mxu0 %v1157_v33  ;;  %777 = vmatprep.subr.bf16.mxu1 %v1160_v34 }
  0x5f   :  { %696 = vmatpush1.bf16.msra.mxu0 %v1155_v35  ;;  %778 = vmatpush1.bf16.msra.mxu1 %v1158_v36 }
  0x60   :  { %697 = vmatprep.subr.bf16.mxu0 %v1163_v37  ;;  %779 = vmatprep.subr.bf16.mxu1 %v1166_v38 }
  0x63   :  { %698 = vmatpush1.bf16.msra.mxu0 %v1161_v39  ;;  %780 = vmatpush1.bf16.msra.mxu1 %v1164_v40 }
  0x66   :  { %714 = vmatmul.mubr.bf16.vlgmr.msra.gmra.mrb[0].mxu0 %v897_v41  ;;  %796 = vmatmul.mubr.bf16.vlgmr.msra.gmra.mrb[0].mxu1 %v897_v41 }
 0x139   :  { %v715_v58 = vpop.f32.mrb[0].mxu0  ;;  %v797_v59 = vpop.f32.mrb[0].mxu1 }
 0x13a   :  { %v826_v62 = vmul.f32 %v809_v50, %v715_v58  ;;  %v828_v0 = vmul.f32 %v817_v51, %v797_v59  ;;  %v717_v2 = vpop.f32.mrb[1].mxu0  ;;  %v799_v3 = vpop.f32.mrb[1].mxu1 }
 0x13b   :  { %v827_v4 = vmul.f32 %v813_v54, %v717_v2  ;;  %v829_v6 = vmul.f32 %v821_v55, %v799_v3  ;;  %v719_v8 = vpop.f32.mrb[2].mxu0  ;;  %v801_v9 = vpop.f32.mrb[2].mxu1 }
 0x13c   :  { %v852_v10 = vadd.f32 %v835_v56, %v826_v62  ;;  %v854_v11 = vadd.f32 %v843_v57, %v828_v0  ;;  %v720_v12 = vpop.f32.mrb[3].mxu0  ;;  %v802_v13 = vpop.f32.mrb[3].mxu1 }
 0x13d   :  { %v853_v14 = vadd.f32 %v839_v60, %v827_v4  ;;  %v855_v15 = vadd.f32 %v847_v61, %v829_v6 }
 0x13e   :  { %v862_v16 = vadd.f32 %v858_v63, %v852_v10  ;;  %v864_v17 = vadd.f32 %v860_v1, %v854_v11 }
 0x13f   :  { %v863_v18 = vadd.f32 %v859_v5, %v853_v14  ;;  %v865_v19 = vadd.f32 %v861_v7, %v855_v15 }
 0x140   :  { %v866_v20 = vmax.f32 %v862_v16, 0.0  ;;  %v868_v21 = vmax.f32 %v864_v17, 0.0 }
 0x141   :  { %v867_v22 = vmax.f32 %v863_v18, 0.0  ;;  %v869_v23 = vmax.f32 %v865_v19, 0.0 }
 0x143   :  { %v1003_v24 = vpack.c.bf16 %v867_v22, %v866_v20  ;;  %v1004_v25 = vpack.c.bf16 %v869_v23, %v868_v21 }
 0x145   :  { %886 = vst [vmem:[%s1532_s5] sm:$0xff] %v1003_v24  ;;  %890 = vst.msk [vmem:[%s1532_s5 + $0x8] sm:$0xff] %vm889_vm3, %v1004_v25 }

// kernel: _lambda_.109
= control target key start
LH: loop header
LB: loop body
LE: loop exit
PB: predicated region body
PF: predicated region fallthrough
CT: control target
= control target key end

     0   :  { %v422_v0 = vmov 0   ;;  %vm233_vm0 = vcmask 130048   ;;  %s547_s1 = inlined_call_operand.vmem [shape: bf16[400,128], index: 1, kind: input, shape index: {}]   ;;  %s548_s0 = inlined_call_operand.vmem [shape: bf16[8,400], index: 0, kind: input, shape index: {}]   ;;  %s549_s2 = inlined_call_operand.vmem [shape: f32[1,128], index: 2, kind: input, shape index: {}]   ;;  %s550_s3 = inlined_call_operand.vmem [shape: f32[1,128], index: 3, kind: input, shape index: {}]   ;;  %s551_s4 = inlined_call_operand.vmem [shape: f32[8,128], index: 4, kind: output, shape index: {}]  }
   0x1   :  { %277 = vmatprep.subr.bf16.mxu1 %v422_v0  ;;  %v393_v1 = vld [vmem:[%s547_s1 + $0x40] sm:$0xff]   ;;  %v396_v4 = vld [vmem:[%s547_s1 + $0x48] sm:$0xff]   ;;  %v399_v7 = vld [vmem:[%s547_s1 + $0x50] sm:$0xff]  }
   0x2   :  { %v394_v2 = vld [vmem:[%s547_s1 + $0x80] sm:$0xff]   ;;  %370 = vmatprep.subr.bf16.mxu0 %v393_v1  ;;  %v397_v5 = vld [vmem:[%s547_s1 + $0x88] sm:$0xff]   ;;  %v400_v8 = vld [vmem:[%s547_s1 + $0x90] sm:$0xff]  }
   0x3   :  { %v395_v3 = vld [vmem:[%s547_s1] sm:$0xff]   ;;  %278 = vmatpush1.bf16.msra.mxu1 %v394_v2  ;;  %v398_v6 = vld [vmem:[%s547_s1 + $0x8] sm:$0xff]   ;;  %v401_v9 = vld [vmem:[%s547_s1 + $0x10] sm:$0xff]  }
   0x4   :  { %371 = vmatpush3.bf16.msra.mxu0 %v395_v3  ;;  %279 = vmatprep.subr.bf16.mxu1 %v422_v0  ;;  %v402_v10 = vld [vmem:[%s547_s1 + $0x58] sm:$0xff]   ;;  %v405_v13 = vld [vmem:[%s547_s1 + $0x60] sm:$0xff]   ;;  %v408_v16 = vld [vmem:[%s547_s1 + $0x68] sm:$0xff]  }
   0x5   :  { %372 = vmatprep.subr.bf16.mxu0 %v396_v4  ;;  %v403_v11 = vld [vmem:[%s547_s1 + $0x98] sm:$0xff]   ;;  %v406_v14 = vld [vmem:[%s547_s1 + $0xa0] sm:$0xff]   ;;  %v409_v17 = vld [vmem:[%s547_s1 + $0xa8] sm:$0xff]  }
   0x6   :  { %v404_v12 = vld [vmem:[%s547_s1 + $0x18] sm:$0xff]   ;;  %v407_v15 = vld [vmem:[%s547_s1 + $0x20] sm:$0xff]   ;;  %v410_v18 = vld [vmem:[%s547_s1 + $0x28] sm:$0xff]  }
   0x7   :  { %280 = vmatpush1.bf16.msra.mxu1 %v397_v5  ;;  %v411_v19 = vld [vmem:[%s547_s1 + $0x70] sm:$0xff]   ;;  %v18_v22 = vld [vmem:[%s548_s0] sm:$0xff]  ;;  %v414_v23 = vld [vmem:[%s547_s1 + $0x78] sm:$0xff]  }
   0x8   :  { %373 = vmatpush3.bf16.msra.mxu0 %v398_v6  ;;  %281 = vmatprep.subr.bf16.mxu1 %v422_v0  ;;  %v412_v20 = vld [vmem:[%s547_s1 + $0xb0] sm:$0xff]   ;;  %v339_v24 = vcombine.high %v18_v22, %v18_v22  ;;  %v19_v25 = vld [vmem:[%s548_s0 + $0x8] sm:$0xff]  ;;  %v415_v27 = vld [vmem:[%s547_s1 + $0xb8] sm:$0xff]   ;;  %v338_v29 = vcombine.low %v18_v22, %v18_v22 }
   0x9   :  { %374 = vmatprep.subr.bf16.mxu0 %v399_v7  ;;  %v413_v21 = vld [vmem:[%s547_s1 + $0x30] sm:$0xff]   ;;  %v341_v26 = vcombine.high %v19_v25, %v19_v25  ;;  %v416_v28 = vld [vmem:[%s547_s1 + $0x38] sm:$0xff]   ;;  %v419_v30 = vld [vmem:[%s547_s1 + $0xc0] sm:$0xff]   ;;  %v340_v31 = vcombine.low %v19_v25, %v19_v25 }
   0xa   :  { %269 = vmatprep.mubr.bf16.mxu0 %v339_v24  ;;  %v368_v38 = vld [vmem:[%s549_s2] ss:$0 sm:$0xff] }
   0xb   :  { %282 = vmatpush1.bf16.msra.mxu1 %v400_v8  ;;  %367 = vmatprep.mubr.msk.bf16.mxu1 %vm233_vm0, %v341_v26  ;;  %v369_v41 = vld [vmem:[%s550_s3] ss:$0 sm:$0xff] }
   0xc   :  { %375 = vmatpush3.bf16.msra.mxu0 %v401_v9  ;;  %283 = vmatprep.subr.bf16.mxu1 %v422_v0 }
   0xd   :  { %376 = vmatprep.subr.bf16.mxu0 %v402_v10 }
   0xf   :  { %284 = vmatpush1.bf16.msra.mxu1 %v403_v11 }
  0x10   :  { %377 = vmatpush3.bf16.msra.mxu0 %v404_v12  ;;  %285 = vmatprep.subr.bf16.mxu1 %v422_v0 }
  0x11   :  { %378 = vmatprep.subr.bf16.mxu0 %v405_v13 }
  0x13   :  { %286 = vmatpush1.bf16.msra.mxu1 %v406_v14 }
  0x14   :  { %379 = vmatpush3.bf16.msra.mxu0 %v407_v15  ;;  %287 = vmatprep.subr.bf16.mxu1 %v422_v0 }
  0x15   :  { %380 = vmatprep.subr.bf16.mxu0 %v408_v16 }
  0x17   :  { %288 = vmatpush1.bf16.msra.mxu1 %v409_v17 }
  0x18   :  { %381 = vmatpush3.bf16.msra.mxu0 %v410_v18  ;;  %289 = vmatprep.subr.bf16.mxu1 %v422_v0 }
  0x19   :  { %382 = vmatprep.subr.bf16.mxu0 %v411_v19 }
  0x1b   :  { %290 = vmatpush1.bf16.msra.mxu1 %v412_v20 }
  0x1c   :  { %383 = vmatpush3.bf16.msra.mxu0 %v413_v21  ;;  %291 = vmatprep.subr.bf16.mxu1 %v422_v0 }
  0x1d   :  { %384 = vmatprep.subr.bf16.mxu0 %v414_v23 }
  0x1f   :  { %292 = vmatpush1.bf16.msra.mxu1 %v415_v27 }
  0x20   :  { %385 = vmatpush3.bf16.msra.mxu0 %v416_v28  ;;  %293 = vmatprep.subr.bf16.mxu1 %v422_v0 }
  0x23   :  { %270 = vmatmul.mubr.bf16.vlgmr.msra.gmra.mrb[0].mxu0 %v338_v29  ;;  %294 = vmatpush1.bf16.msra.mxu1 %v419_v30 }
  0x26   :  { %310 = vmatmul.mubr.bf16.vlgmr.msra.gmra.mrb[0].mxu1 %v340_v31 }
  0xf6   :  { %v386_v32 = vpop.f32.mrb[0].mxu0 }
  0xf7   :  { %v387_v33 = vpop.f32.mrb[1].mxu0 }
  0xf8   :  { %v388_v34 = vadd.f32 %v387_v33, %v386_v32  ;;  %v389_v35 = vpop.f32.mrb[2].mxu0 }
  0xf9   :  { %v390_v36 = vpop.f32.mrb[3].mxu0  ;;  %v311_v37 = vpop.f32.mrb[0].mxu1 }
  0xfa   :  { %v312_v39 = vadd.f32 %v388_v34, %v311_v37  ;;  %v313_v40 = vpop.f32.mrb[1].mxu1 }
  0xfb   :  { %v314_v42 = vpop.f32.mrb[2].mxu1 }
  0xfc   :  { %v324_v43 = vmul.f32 %v368_v38, %v312_v39  ;;  %v315_v44 = vpop.f32.mrb[3].mxu1 }
  0xfe   :  { %v332_v45 = vadd.f32 %v369_v41, %v324_v43 }
 0x100   :  { %333 = vst [vmem:[%s551_s4] sm:$0xff] %v332_v45 }

</bundles_post_ra>
